<compile_context>
chip_gen: v6e
topology: v6e:2x2x1
jax: 0.10.0
libtpu: 0.0.40
codegen_flags: <defaults>
</compile_context>

<pallas_src>
import functools

import jax
import jax.numpy as jnp
from jax.experimental import pallas as pl
from jax.experimental.pallas import tpu as pltpu


def _round_up(x, m):
    return (x + m - 1) // m * m


def _pick_tiles():
    """MXU-shaped tiles: 256 for v6e/v7x (2x256x256 MXU), 128 for v5e."""
    try:
        kind = jax.devices()[0].device_kind.lower()
    except Exception:  # pragma: no cover - defensive
        kind = ""
    if "v5 lite" in kind or "v5e" in kind or "v5litepod" in kind:
        return 128, 128, 512
    return 256, 256, 512


# --------------------------------------------------------------------------- #
# Tiled matmul kernel (bf16 operands, f32 accumulator) with optional fused
# bias add and activation in the last-k epilogue.
# --------------------------------------------------------------------------- #
def _matmul_kernel(*refs, has_bias, act):
    if has_bias:
        a_ref, b_ref, bias_ref, o_ref, acc_ref = refs
    else:
        a_ref, b_ref, o_ref, acc_ref = refs
        bias_ref = None

    @pl.when(pl.program_id(2) == 0)
    def _():
        acc_ref[...] = jnp.zeros_like(acc_ref)

    acc_ref[...] += jnp.dot(a_ref[...], b_ref[...],
                            preferred_element_type=jnp.float32)

    @pl.when(pl.program_id(2) == pl.num_programs(2) - 1)
    def _():
        out = acc_ref[...]
        if has_bias:
            out = out + bias_ref[...]
        if act == "relu":
            out = jnp.maximum(out, 0.0)
        elif act == "tanh":
            out = jnp.tanh(out)
        o_ref[...] = out.astype(o_ref.dtype)


def pallas_matmul(a, b, bias=None, act="none", out_dtype=jnp.float32):
    """C = act(A @ B + bias).  A, B are cast to bf16; accumulation is f32."""
    M, K = a.shape
    K2, N = b.shape
    assert K == K2, (K, K2)
    tm_max, tn_max, tk_max = _pick_tiles()
    tm = min(tm_max, _round_up(M, 16))          # 16: bf16 sublane packing
    tn = min(tn_max, _round_up(N, 128))
    tk = min(tk_max, _round_up(K, 128))
    Mp, Np, Kp = _round_up(M, tm), _round_up(N, tn), _round_up(K, tk)

    a_p = jnp.pad(a.astype(jnp.bfloat16), ((0, Mp - M), (0, Kp - K)))
    b_p = jnp.pad(b.astype(jnp.bfloat16), ((0, Kp - K), (0, Np - N)))

    in_specs = [pl.BlockSpec((tm, tk), lambda i, j, k: (i, k)),
                pl.BlockSpec((tk, tn), lambda i, j, k: (k, j))]
    operands = [a_p, b_p]
    if bias is not None:
        bias_p = jnp.pad(bias.astype(jnp.float32).reshape(1, N),
                         ((0, 0), (0, Np - N)))
        in_specs.append(pl.BlockSpec((1, tn), lambda i, j, k: (0, j)))
        operands.append(bias_p)

    kernel = functools.partial(_matmul_kernel, has_bias=bias is not None,
                               act=act)
    out = pl.pallas_call(
        kernel,
        out_shape=jax.ShapeDtypeStruct((Mp, Np), out_dtype),
        grid_spec=pltpu.PrefetchScalarGridSpec(
            num_scalar_prefetch=0,
            grid=(Mp // tm, Np // tn, Kp // tk),
            in_specs=in_specs,
            out_specs=pl.BlockSpec((tm, tn), lambda i, j, k: (i, j)),
            scratch_shapes=[pltpu.VMEM((tm, tn), jnp.float32)]),
        compiler_params=pltpu.CompilerParams(
            dimension_semantics=("parallel", "parallel", "arbitrary")),
    )(*operands)
    return out[:M, :N]


# --------------------------------------------------------------------------- #
# BatchNorm (training-mode batch stats) + ReLU, as two tiled Pallas passes:
#   (1) gridded per-channel sum / sum-sq reduction over M (accumulator
#       resident across the "arbitrary" reduction axis),
#   (2) gridded scale/shift + activation apply pass.
# --------------------------------------------------------------------------- #
def _bn_stats_kernel(x_ref, s_ref, ss_ref):
    @pl.when(pl.program_id(0) == 0)
    def _():
        s_ref[...] = jnp.zeros_like(s_ref)
        ss_ref[...] = jnp.zeros_like(ss_ref)

    x = x_ref[...].astype(jnp.float32)
    s_ref[...] += jnp.sum(x, axis=0, keepdims=True)
    ss_ref[...] += jnp.sum(x * x, axis=0, keepdims=True)


def _bn_apply_kernel(x_ref, scale_ref, shift_ref, o_ref, *, act):
    x = x_ref[...].astype(jnp.float32)
    y = x * scale_ref[...] + shift_ref[...]
    if act == "relu":
        y = jnp.maximum(y, 0.0)
    elif act == "tanh":
        y = jnp.tanh(y)
    o_ref[...] = y.astype(o_ref.dtype)


def bn_act(x, gamma, beta, *, act="relu", eps=1e-5, out_dtype=jnp.bfloat16):
    M, C = x.shape
    x = x.astype(jnp.float32)
    tm = min(512, _round_up(M, 16))
    Mp = _round_up(M, tm)
    x_p = jnp.pad(x, ((0, Mp - M), (0, 0)))   # zero rows don't corrupt sums

    s, ss = pl.pallas_call(
        _bn_stats_kernel,
        out_shape=(jax.ShapeDtypeStruct((1, C), jnp.float32),
                   jax.ShapeDtypeStruct((1, C), jnp.float32)),
        grid_spec=pltpu.PrefetchScalarGridSpec(
            num_scalar_prefetch=0,
            grid=(Mp // tm,),
            in_specs=[pl.BlockSpec((tm, C), lambda i: (i, 0))],
            out_specs=[pl.BlockSpec((1, C), lambda i: (0, 0)),
                       pl.BlockSpec((1, C), lambda i: (0, 0))]),
        compiler_params=pltpu.CompilerParams(
            dimension_semantics=("arbitrary",)),
    )(x_p)

    mean = s / M                                           # (1, C)
    var = jnp.maximum(ss / M - mean * mean, 0.0)           # biased variance
    scale = gamma.astype(jnp.float32).reshape(1, C) * jax.lax.rsqrt(var + eps)
    shift = beta.astype(jnp.float32).reshape(1, C) - mean * scale

    kernel = functools.partial(_bn_apply_kernel, act=act)
    out = pl.pallas_call(
        kernel,
        out_shape=jax.ShapeDtypeStruct((Mp, C), out_dtype),
        grid_spec=pltpu.PrefetchScalarGridSpec(
            num_scalar_prefetch=0,
            grid=(Mp // tm,),
            in_specs=[pl.BlockSpec((tm, C), lambda i: (i, 0)),
                      pl.BlockSpec((1, C), lambda i: (0, 0)),
                      pl.BlockSpec((1, C), lambda i: (0, 0))],
            out_specs=pl.BlockSpec((tm, C), lambda i: (i, 0))),
        compiler_params=pltpu.CompilerParams(
            dimension_semantics=("parallel",)),
    )(x_p, scale, shift)
    return out[:M]


# --------------------------------------------------------------------------- #
# ConvTranspose2d(k=4, s=2, p=1, bias=False) via 4-output-phase decomposition.
# For output row oy = 2m+py (and analogously columns), only 2 kernel rows
# contribute:
#   py=0: (ky=1, input m),   (ky=3, input m-1)
#   py=1: (ky=0, input m+1), (ky=2, input m)
# With a 1-pixel zero pad of the input, each tap is just a shifted HxW window.
# x: (B, H, W, Cin)   w: (Cin, Cout, 4, 4)  (PyTorch ConvTranspose2d layout)
# --------------------------------------------------------------------------- #
_PHASE_TAPS = {
    0: ((1, 1), (3, 0)),   # (kernel index k, window offset d in padded input)
    1: ((0, 2), (2, 1)),
}


def conv_transpose_4x4(x_nhwc, w, *, act="none", out_dtype=jnp.float32):
    B, H, W_sp, Cin = x_nhwc.shape
    Cout = w.shape[1]
    xp = jnp.pad(x_nhwc.astype(jnp.bfloat16), ((0, 0), (1, 1), (1, 1), (0, 0)))
    wf = w.astype(jnp.float32)

    phase_rows = []
    for py in (0, 1):
        row_phases = []
        for px in (0, 1):
            cols, wrows = [], []
            for (ky, dy) in _PHASE_TAPS[py]:
                for (kx, dx) in _PHASE_TAPS[px]:
                    cols.append(xp[:, dy:dy + H, dx:dx + W_sp, :])
                    wrows.append(wf[:, :, ky, kx])          # (Cin, Cout)
            A = jnp.concatenate(cols, axis=-1).reshape(B * H * W_sp, 4 * Cin)
            Wm = jnp.concatenate(wrows, axis=0)             # (4*Cin, Cout)
            y = pallas_matmul(A, Wm, act=act, out_dtype=out_dtype)
            row_phases.append(y.reshape(B, H, W_sp, Cout))
        phase_rows.append(jnp.stack(row_phases, axis=3))    # (B,H,W,2,Cout)
    y = jnp.stack(phase_rows, axis=2)                       # (B,H,2,W,2,Cout)
    return y.reshape(B, 2 * H, 2 * W_sp, Cout)


# --------------------------------------------------------------------------- #
# Parameters + forward pass of the Generator.
# --------------------------------------------------------------------------- #
_CHANS = [64 * 16, 64 * 8, 64 * 4, 64 * 2, 64, 1]   # 1024,512,256,128,64,1


def init_params(key, w, h):
    nf = (w * h) // (32 * 32)
    keys = jax.random.split(key, 2 + 5)
    p = {}
    p["lin_w"] = 0.05 * jax.random.normal(keys[0], (nf, 100), jnp.float32)
    p["lin_b"] = jnp.zeros((nf,), jnp.float32)
    p["bn0_g"] = jnp.ones((nf,), jnp.float32)
    p["bn0_b"] = jnp.zeros((nf,), jnp.float32)
    p["ct0_w"] = 0.05 * jax.random.normal(keys[1], (1, _CHANS[0], 1, 1),
                                          jnp.float32)
    p["bn1_g"] = jnp.ones((_CHANS[0],), jnp.float32)
    p["bn1_b"] = jnp.zeros((_CHANS[0],), jnp.float32)
    for li in range(5):
        cin, cout = _CHANS[li], _CHANS[li + 1]
        p[f"ct{li + 1}_w"] = 0.05 * jax.random.normal(
            keys[2 + li], (cin, cout, 4, 4), jnp.float32)
        if li < 4:
            p[f"bn{li + 2}_g"] = jnp.ones((cout,), jnp.float32)
            p[f"bn{li + 2}_b"] = jnp.zeros((cout,), jnp.float32)
    return p


def generator_forward(params, inputs, w, h):
    B = inputs.shape[0]
    h32, w32 = h // 32, w // 32

    # Linear(100 -> w*h/1024) with bias fused in the matmul epilogue,
    # then BatchNorm1d + ReLU.
    x = pallas_matmul(inputs, params["lin_w"].T, bias=params["lin_b"])
    x = bn_act(x, params["bn0_g"], params["bn0_b"], act="relu",
               out_dtype=jnp.bfloat16)

    # view(-1, 1, h/32, w/32) -> NHWC with C=1
    x = x.reshape(B, h32, w32, 1)

    # ConvTranspose2d 1x1 (1 -> 1024, no bias) + BatchNorm2d + ReLU
    M = B * h32 * w32
    x = pallas_matmul(x.reshape(M, 1), params["ct0_w"].reshape(1, _CHANS[0]))
    x = bn_act(x, params["bn1_g"], params["bn1_b"], act="relu",
               out_dtype=jnp.bfloat16)
    x = x.reshape(B, h32, w32, _CHANS[0])

    # main: 4x [ConvTranspose2d 4x4 s2 p1 + BN + ReLU]
    for li in range(4):
        x = conv_transpose_4x4(x, params[f"ct{li + 1}_w"], act="none",
                               out_dtype=jnp.float32)
        Bc, Hc, Wc, Cc = x.shape
        flat = bn_act(x.reshape(Bc * Hc * Wc, Cc),
                      params[f"bn{li + 2}_g"], params[f"bn{li + 2}_b"],
                      act="relu", out_dtype=jnp.bfloat16)
        x = flat.reshape(Bc, Hc, Wc, Cc)

    # final ConvTranspose2d (64 -> 1) with Tanh fused in the GEMM epilogue.
    x = conv_transpose_4x4(x, params["ct5_w"], act="tanh",
                           out_dtype=jnp.float32)

    # back to NCHW to match the PyTorch output: (B, 1, h, w)
    return jnp.transpose(x, (0, 3, 1, 2))


if __name__ == "__main__":
    W_IMG = H_IMG = 32     # smallest size consistent with the module (w*h/1024 >= 1)
    BATCH = 2

    key = jax.random.PRNGKey(0)
    kp, kx = jax.random.split(key)
    params = init_params(kp, W_IMG, H_IMG)
    inputs = jax.random.normal(kx, (BATCH, 100), jnp.float32)

    fwd = jax.jit(functools.partial(generator_forward, w=W_IMG, h=H_IMG))
    out = jax.block_until_ready(fwd(params, inputs))
    assert out.shape == (BATCH, 1, H_IMG, W_IMG), out.shape
    assert bool(jnp.all(jnp.isfinite(out)))
    print("KERNEL_OK")
</pallas_src>

<mosaic_0001>
module attributes {stable_mosaic.version = 11 : i64} {
  func.func @_matmul_kernel(%arg0: i32, %arg1: i32, %arg2: i32, %arg3: memref<16x128xbf16, #tpu.memory_space<vmem>>, %arg4: memref<128x128xbf16, #tpu.memory_space<vmem>>, %arg5: memref<1x128xf32, #tpu.memory_space<vmem>>, %arg6: memref<16x128xf32, #tpu.memory_space<vmem>>, %arg7: memref<16x128xf32, #tpu.memory_space<vmem>>) attributes {dimension_semantics = [#tpu.dimension_semantics<parallel>, #tpu.dimension_semantics<parallel>, #tpu.dimension_semantics<arbitrary>], iteration_bounds = array<i64: 1, 1, 1>, scalar_prefetch = 0 : i64, scratch_operands = 1 : i64, tpu.core_type = #tpu.core_type<tc>, window_params = [{transform_indices = @transform_0, window_bounds = array<i64: 16, 128>}, {transform_indices = @transform_1, window_bounds = array<i64: 128, 128>}, {transform_indices = @transform_2, window_bounds = array<i64: 1, 128>}, {transform_indices = @transform_3, window_bounds = array<i64: 16, 128>}]} {
    %c0_i32 = arith.constant 0 : i32
    %0 = arith.cmpi eq, %arg2, %c0_i32 : i32
    %1 = arith.extui %0 : i1 to i32
    %c0_i32_0 = arith.constant 0 : i32
    %2 = arith.cmpi ne, %1, %c0_i32_0 : i32
    scf.if %2 {
      %cst_10 = arith.constant 0.000000e+00 : f32
      %12 = vector.broadcast %cst_10 : f32 to vector<16x128xf32>
      %c0_11 = arith.constant 0 : index
      %c0_12 = arith.constant 0 : index
      %13 = vector.load %arg7[%c0_11, %c0_12] : memref<16x128xf32, #tpu.memory_space<vmem>>, vector<16x128xf32>
      tpu.vector_store %arg7[%c0_11, %c0_12], %12 {strides = array<i32>} : memref<16x128xf32, #tpu.memory_space<vmem>>, vector<16x128xf32>,
    } else {
    }
    %c0 = arith.constant 0 : index
    %c0_1 = arith.constant 0 : index
    %3 = vector.load %arg7[%c0, %c0_1] : memref<16x128xf32, #tpu.memory_space<vmem>>, vector<16x128xf32>
    %c0_2 = arith.constant 0 : index
    %c0_3 = arith.constant 0 : index
    %4 = vector.load %arg3[%c0_2, %c0_3] : memref<16x128xbf16, #tpu.memory_space<vmem>>, vector<16x128xbf16>
    %c0_4 = arith.constant 0 : index
    %c0_5 = arith.constant 0 : index
    %5 = vector.load %arg4[%c0_4, %c0_5] : memref<128x128xbf16, #tpu.memory_space<vmem>>, vector<128x128xbf16>
    %cst = arith.constant dense<0.000000e+00> : vector<16x128xf32>
    %6 = tpu.matmul %4, %5, %cst {dimension_numbers = #tpu.dot_dimension_numbers<[1], [0], [0], [1], [0, 0, 1, 1], [], []>} : vector<16x128xbf16>, vector<128x128xbf16>, vector<16x128xf32> -> vector<16x128xf32>
    %7 = arith.addf %3, %6 : vector<16x128xf32>
    %c0_6 = arith.constant 0 : index
    %c0_7 = arith.constant 0 : index
    %8 = vector.load %arg7[%c0_6, %c0_7] : memref<16x128xf32, #tpu.memory_space<vmem>>, vector<16x128xf32>
    tpu.vector_store %arg7[%c0_6, %c0_7], %7 {strides = array<i32>} : memref<16x128xf32, #tpu.memory_space<vmem>>, vector<16x128xf32>,
    %c0_i32_8 = arith.constant 0 : i32
    %9 = arith.cmpi eq, %arg2, %c0_i32_8 : i32
    %10 = arith.extui %9 : i1 to i32
    %c0_i32_9 = arith.constant 0 : i32
    %11 = arith.cmpi ne, %10, %c0_i32_9 : i32
    scf.if %11 {
      %c0_10 = arith.constant 0 : index
      %c0_11 = arith.constant 0 : index
      %12 = vector.load %arg7[%c0_10, %c0_11] : memref<16x128xf32, #tpu.memory_space<vmem>>, vector<16x128xf32>
      %c0_12 = arith.constant 0 : index
      %c0_13 = arith.constant 0 : index
      %13 = vector.load %arg5[%c0_12, %c0_13] : memref<1x128xf32, #tpu.memory_space<vmem>>, vector<1x128xf32>
      %14 = vector.broadcast %13 : vector<1x128xf32> to vector<16x128xf32>
      %15 = arith.addf %12, %14 : vector<16x128xf32>
      %c0_14 = arith.constant 0 : index
      %c0_15 = arith.constant 0 : index
      %16 = vector.load %arg6[%c0_14, %c0_15] : memref<16x128xf32, #tpu.memory_space<vmem>>, vector<16x128xf32>
      tpu.vector_store %arg6[%c0_14, %c0_15], %15 {strides = array<i32>} : memref<16x128xf32, #tpu.memory_space<vmem>>, vector<16x128xf32>,
    } else {
    }
    return
  }
  func.func @transform_0(%arg0: i32, %arg1: i32, %arg2: i32) -> (i32, i32) {
    %c0_i32 = arith.constant 0 : i32
    return %arg0, %arg2 : i32, i32
  }
  func.func @transform_1(%arg0: i32, %arg1: i32, %arg2: i32) -> (i32, i32) {
    %c0_i32 = arith.constant 0 : i32
    return %arg2, %arg1 : i32, i32
  }
  func.func @transform_2(%arg0: i32, %arg1: i32, %arg2: i32) -> (i32, i32) {
    %c0_i32 = arith.constant 0 : i32
    %c0_i32_0 = arith.constant 0 : i32
    return %c0_i32, %arg1 : i32, i32
  }
  func.func @transform_3(%arg0: i32, %arg1: i32, %arg2: i32) -> (i32, i32) {
    %c0_i32 = arith.constant 0 : i32
    return %arg0, %arg1 : i32, i32
  }
}

module attributes {stable_mosaic.version = 11 : i64} {
  func.func @_bn_stats_kernel(%arg0: i32, %arg1: memref<16x1xf32, #tpu.memory_space<vmem>>, %arg2: memref<1x1xf32, #tpu.memory_space<vmem>>, %arg3: memref<1x1xf32, #tpu.memory_space<vmem>>) attributes {dimension_semantics = [#tpu.dimension_semantics<arbitrary>], iteration_bounds = array<i64: 1>, scalar_prefetch = 0 : i64, scratch_operands = 0 : i64, tpu.core_type = #tpu.core_type<tc>, window_params = [{transform_indices = @transform_0, window_bounds = array<i64: 16, 1>}, {pipeline_mode = #tpu.pipeline_mode<synchronous>, transform_indices = @transform_1, window_bounds = array<i64: 1, 1>}, {pipeline_mode = #tpu.pipeline_mode<synchronous>, transform_indices = @transform_2, window_bounds = array<i64: 1, 1>}]} {
    %c0_i32 = arith.constant 0 : i32
    %0 = arith.cmpi eq, %arg0, %c0_i32 : i32
    %1 = arith.extui %0 : i1 to i32
    %c0_i32_0 = arith.constant 0 : i32
    %2 = arith.cmpi ne, %1, %c0_i32_0 : i32
    scf.if %2 {
      %cst_11 = arith.constant 0.000000e+00 : f32
      %15 = vector.broadcast %cst_11 : f32 to vector<1x1xf32>
      %c0_12 = arith.constant 0 : index
      %c0_13 = arith.constant 0 : index
      %16 = vector.load %arg2[%c0_12, %c0_13] : memref<1x1xf32, #tpu.memory_space<vmem>>, vector<1x1xf32>
      tpu.vector_store %arg2[%c0_12, %c0_13], %15 {strides = array<i32>} : memref<1x1xf32, #tpu.memory_space<vmem>>, vector<1x1xf32>,
      %cst_14 = arith.constant 0.000000e+00 : f32
      %17 = vector.broadcast %cst_14 : f32 to vector<1x1xf32>
      %c0_15 = arith.constant 0 : index
      %c0_16 = arith.constant 0 : index
      %18 = vector.load %arg3[%c0_15, %c0_16] : memref<1x1xf32, #tpu.memory_space<vmem>>, vector<1x1xf32>
      tpu.vector_store %arg3[%c0_15, %c0_16], %17 {strides = array<i32>} : memref<1x1xf32, #tpu.memory_space<vmem>>, vector<1x1xf32>,
    } else {
    }
    %c0 = arith.constant 0 : index
    %c0_1 = arith.constant 0 : index
    %3 = vector.load %arg1[%c0, %c0_1] : memref<16x1xf32, #tpu.memory_space<vmem>>, vector<16x1xf32>
    %c0_2 = arith.constant 0 : index
    %c0_3 = arith.constant 0 : index
    %4 = vector.load %arg2[%c0_2, %c0_3] : memref<1x1xf32, #tpu.memory_space<vmem>>, vector<1x1xf32>
    %cst = arith.constant dense<0.000000e+00> : vector<1xf32>
    %5 = vector.multi_reduction <add>, %3, %cst [0] : vector<16x1xf32> to vector<1xf32>
    %6 = vector.shape_cast %5 : vector<1xf32> to vector<1x1xf32>
    %7 = arith.addf %4, %6 : vector<1x1xf32>
    %c0_4 = arith.constant 0 : index
    %c0_5 = arith.constant 0 : index
    %8 = vector.load %arg2[%c0_4, %c0_5] : memref<1x1xf32, #tpu.memory_space<vmem>>, vector<1x1xf32>
    tpu.vector_store %arg2[%c0_4, %c0_5], %7 {strides = array<i32>} : memref<1x1xf32, #tpu.memory_space<vmem>>, vector<1x1xf32>,
    %c0_6 = arith.constant 0 : index
    %c0_7 = arith.constant 0 : index
    %9 = vector.load %arg3[%c0_6, %c0_7] : memref<1x1xf32, #tpu.memory_space<vmem>>, vector<1x1xf32>
    %10 = arith.mulf %3, %3 : vector<16x1xf32>
    %cst_8 = arith.constant dense<0.000000e+00> : vector<1xf32>
    %11 = vector.multi_reduction <add>, %10, %cst_8 [0] : vector<16x1xf32> to vector<1xf32>
    %12 = vector.shape_cast %11 : vector<1xf32> to vector<1x1xf32>
    %13 = arith.addf %9, %12 : vector<1x1xf32>
    %c0_9 = arith.constant 0 : index
    %c0_10 = arith.constant 0 : index
    %14 = vector.load %arg3[%c0_9, %c0_10] : memref<1x1xf32, #tpu.memory_space<vmem>>, vector<1x1xf32>
    tpu.vector_store %arg3[%c0_9, %c0_10], %13 {strides = array<i32>} : memref<1x1xf32, #tpu.memory_space<vmem>>, vector<1x1xf32>,
    return
  }
  func.func @transform_0(%arg0: i32) -> (i32, i32) {
    %c0_i32 = arith.constant 0 : i32
    %c0_i32_0 = arith.constant 0 : i32
    return %arg0, %c0_i32 : i32, i32
  }
  func.func @transform_1(%arg0: i32) -> (i32, i32) {
    %c0_i32 = arith.constant 0 : i32
    %c0_i32_0 = arith.constant 0 : i32
    %c0_i32_1 = arith.constant 0 : i32
    return %c0_i32, %c0_i32_0 : i32, i32
  }
  func.func @transform_2(%arg0: i32) -> (i32, i32) {
    %c0_i32 = arith.constant 0 : i32
    %c0_i32_0 = arith.constant 0 : i32
    %c0_i32_1 = arith.constant 0 : i32
    return %c0_i32, %c0_i32_0 : i32, i32
  }
}

module attributes {stable_mosaic.version = 11 : i64} {
  func.func @_bn_apply_kernel(%arg0: i32, %arg1: memref<16x1xf32, #tpu.memory_space<vmem>>, %arg2: memref<1x1xf32, #tpu.memory_space<vmem>>, %arg3: memref<1x1xf32, #tpu.memory_space<vmem>>, %arg4: memref<16x1xbf16, #tpu.memory_space<vmem>>) attributes {dimension_semantics = [#tpu.dimension_semantics<parallel>], iteration_bounds = array<i64: 1>, scalar_prefetch = 0 : i64, scratch_operands = 0 : i64, tpu.core_type = #tpu.core_type<tc>, window_params = [{transform_indices = @transform_0, window_bounds = array<i64: 16, 1>}, {pipeline_mode = #tpu.pipeline_mode<synchronous>, transform_indices = @transform_1, window_bounds = array<i64: 1, 1>}, {pipeline_mode = #tpu.pipeline_mode<synchronous>, transform_indices = @transform_2, window_bounds = array<i64: 1, 1>}, {transform_indices = @transform_3, window_bounds = array<i64: 16, 1>}]} {
    %c0 = arith.constant 0 : index
    %c0_0 = arith.constant 0 : index
    %0 = vector.load %arg1[%c0, %c0_0] : memref<16x1xf32, #tpu.memory_space<vmem>>, vector<16x1xf32>
    %c0_1 = arith.constant 0 : index
    %c0_2 = arith.constant 0 : index
    %1 = vector.load %arg2[%c0_1, %c0_2] : memref<1x1xf32, #tpu.memory_space<vmem>>, vector<1x1xf32>
    %2 = vector.broadcast %1 : vector<1x1xf32> to vector<16x1xf32>
    %3 = arith.mulf %0, %2 : vector<16x1xf32>
    %c0_3 = arith.constant 0 : index
    %c0_4 = arith.constant 0 : index
    %4 = vector.load %arg3[%c0_3, %c0_4] : memref<1x1xf32, #tpu.memory_space<vmem>>, vector<1x1xf32>
    %5 = vector.broadcast %4 : vector<1x1xf32> to vector<16x1xf32>
    %6 = arith.addf %3, %5 : vector<16x1xf32>
    %cst = arith.constant 0.000000e+00 : f32
    %7 = vector.broadcast %cst : f32 to vector<16x1xf32>
    %8 = arith.maximumf %6, %7 : vector<16x1xf32>
    %9 = arith.truncf %8 : vector<16x1xf32> to vector<16x1xbf16>
    %c0_5 = arith.constant 0 : index
    %c0_6 = arith.constant 0 : index
    %10 = vector.load %arg4[%c0_5, %c0_6] : memref<16x1xbf16, #tpu.memory_space<vmem>>, vector<16x1xbf16>
    tpu.vector_store %arg4[%c0_5, %c0_6], %9 {strides = array<i32>} : memref<16x1xbf16, #tpu.memory_space<vmem>>, vector<16x1xbf16>,
    return
  }
  func.func @transform_0(%arg0: i32) -> (i32, i32) {
    %c0_i32 = arith.constant 0 : i32
    %c0_i32_0 = arith.constant 0 : i32
    return %arg0, %c0_i32 : i32, i32
  }
  func.func @transform_1(%arg0: i32) -> (i32, i32) {
    %c0_i32 = arith.constant 0 : i32
    %c0_i32_0 = arith.constant 0 : i32
    %c0_i32_1 = arith.constant 0 : i32
    return %c0_i32, %c0_i32_0 : i32, i32
  }
  func.func @transform_2(%arg0: i32) -> (i32, i32) {
    %c0_i32 = arith.constant 0 : i32
    %c0_i32_0 = arith.constant 0 : i32
    %c0_i32_1 = arith.constant 0 : i32
    return %c0_i32, %c0_i32_0 : i32, i32
  }
  func.func @transform_3(%arg0: i32) -> (i32, i32) {
    %c0_i32 = arith.constant 0 : i32
    %c0_i32_0 = arith.constant 0 : i32
    return %arg0, %c0_i32 : i32, i32
  }
}

module attributes {stable_mosaic.version = 11 : i64} {
  func.func @_matmul_kernel(%arg0: i32, %arg1: i32, %arg2: i32, %arg3: memref<16x128xbf16, #tpu.memory_space<vmem>>, %arg4: memref<128x256xbf16, #tpu.memory_space<vmem>>, %arg5: memref<16x256xf32, #tpu.memory_space<vmem>>, %arg6: memref<16x256xf32, #tpu.memory_space<vmem>>) attributes {dimension_semantics = [#tpu.dimension_semantics<parallel>, #tpu.dimension_semantics<parallel>, #tpu.dimension_semantics<arbitrary>], iteration_bounds = array<i64: 1, 4, 1>, scalar_prefetch = 0 : i64, scratch_operands = 1 : i64, tpu.core_type = #tpu.core_type<tc>, window_params = [{transform_indices = @transform_0, window_bounds = array<i64: 16, 128>}, {transform_indices = @transform_1, window_bounds = array<i64: 128, 256>}, {transform_indices = @transform_2, window_bounds = array<i64: 16, 256>}]} {
    %c0_i32 = arith.constant 0 : i32
    %0 = arith.cmpi eq, %arg2, %c0_i32 : i32
    %1 = arith.extui %0 : i1 to i32
    %c0_i32_0 = arith.constant 0 : i32
    %2 = arith.cmpi ne, %1, %c0_i32_0 : i32
    scf.if %2 {
      %cst_10 = arith.constant 0.000000e+00 : f32
      %12 = vector.broadcast %cst_10 : f32 to vector<16x256xf32>
      %c0_11 = arith.constant 0 : index
      %c0_12 = arith.constant 0 : index
      %13 = vector.load %arg6[%c0_11, %c0_12] : memref<16x256xf32, #tpu.memory_space<vmem>>, vector<16x256xf32>
      tpu.vector_store %arg6[%c0_11, %c0_12], %12 {strides = array<i32>} : memref<16x256xf32, #tpu.memory_space<vmem>>, vector<16x256xf32>,
    } else {
    }
    %c0 = arith.constant 0 : index
    %c0_1 = arith.constant 0 : index
    %3 = vector.load %arg6[%c0, %c0_1] : memref<16x256xf32, #tpu.memory_space<vmem>>, vector<16x256xf32>
    %c0_2 = arith.constant 0 : index
    %c0_3 = arith.constant 0 : index
    %4 = vector.load %arg3[%c0_2, %c0_3] : memref<16x128xbf16, #tpu.memory_space<vmem>>, vector<16x128xbf16>
    %c0_4 = arith.constant 0 : index
    %c0_5 = arith.constant 0 : index
    %5 = vector.load %arg4[%c0_4, %c0_5] : memref<128x256xbf16, #tpu.memory_space<vmem>>, vector<128x256xbf16>
    %cst = arith.constant dense<0.000000e+00> : vector<16x256xf32>
    %6 = tpu.matmul %4, %5, %cst {dimension_numbers = #tpu.dot_dimension_numbers<[1], [0], [0], [1], [0, 0, 1, 1], [], []>} : vector<16x128xbf16>, vector<128x256xbf16>, vector<16x256xf32> -> vector<16x256xf32>
    %7 = arith.addf %3, %6 : vector<16x256xf32>
    %c0_6 = arith.constant 0 : index
    %c0_7 = arith.constant 0 : index
    %8 = vector.load %arg6[%c0_6, %c0_7] : memref<16x256xf32, #tpu.memory_space<vmem>>, vector<16x256xf32>
    tpu.vector_store %arg6[%c0_6, %c0_7], %7 {strides = array<i32>} : memref<16x256xf32, #tpu.memory_space<vmem>>, vector<16x256xf32>,
    %c0_i32_8 = arith.constant 0 : i32
    %9 = arith.cmpi eq, %arg2, %c0_i32_8 : i32
    %10 = arith.extui %9 : i1 to i32
    %c0_i32_9 = arith.constant 0 : i32
    %11 = arith.cmpi ne, %10, %c0_i32_9 : i32
    scf.if %11 {
      %c0_10 = arith.constant 0 : index
      %c0_11 = arith.constant 0 : index
      %12 = vector.load %arg6[%c0_10, %c0_11] : memref<16x256xf32, #tpu.memory_space<vmem>>, vector<16x256xf32>
      %c0_12 = arith.constant 0 : index
      %c0_13 = arith.constant 0 : index
      %13 = vector.load %arg5[%c0_12, %c0_13] : memref<16x256xf32, #tpu.memory_space<vmem>>, vector<16x256xf32>
      tpu.vector_store %arg5[%c0_12, %c0_13], %12 {strides = array<i32>} : memref<16x256xf32, #tpu.memory_space<vmem>>, vector<16x256xf32>,
    } else {
    }
    return
  }
  func.func @transform_0(%arg0: i32, %arg1: i32, %arg2: i32) -> (i32, i32) {
    %c0_i32 = arith.constant 0 : i32
    return %arg0, %arg2 : i32, i32
  }
  func.func @transform_1(%arg0: i32, %arg1: i32, %arg2: i32) -> (i32, i32) {
    %c0_i32 = arith.constant 0 : i32
    return %arg2, %arg1 : i32, i32
  }
  func.func @transform_2(%arg0: i32, %arg1: i32, %arg2: i32) -> (i32, i32) {
    %c0_i32 = arith.constant 0 : i32
    return %arg0, %arg1 : i32, i32
  }
}

module attributes {stable_mosaic.version = 11 : i64} {
  func.func @_bn_apply_kernel(%arg0: i32, %arg1: memref<16x1024xf32, #tpu.memory_space<vmem>>, %arg2: memref<1x1024xf32, #tpu.memory_space<vmem>>, %arg3: memref<1x1024xf32, #tpu.memory_space<vmem>>, %arg4: memref<16x1024xbf16, #tpu.memory_space<vmem>>) attributes {dimension_semantics = [#tpu.dimension_semantics<parallel>], iteration_bounds = array<i64: 1>, scalar_prefetch = 0 : i64, scratch_operands = 0 : i64, tpu.core_type = #tpu.core_type<tc>, window_params = [{transform_indices = @transform_0, window_bounds = array<i64: 16, 1024>}, {pipeline_mode = #tpu.pipeline_mode<synchronous>, transform_indices = @transform_1, window_bounds = array<i64: 1, 1024>}, {pipeline_mode = #tpu.pipeline_mode<synchronous>, transform_indices = @transform_2, window_bounds = array<i64: 1, 1024>}, {transform_indices = @transform_3, window_bounds = array<i64: 16, 1024>}]} {
    %c0 = arith.constant 0 : index
    %c0_0 = arith.constant 0 : index
    %0 = vector.load %arg1[%c0, %c0_0] : memref<16x1024xf32, #tpu.memory_space<vmem>>, vector<16x1024xf32>
    %c0_1 = arith.constant 0 : index
    %c0_2 = arith.constant 0 : index
    %1 = vector.load %arg2[%c0_1, %c0_2] : memref<1x1024xf32, #tpu.memory_space<vmem>>, vector<1x1024xf32>
    %2 = vector.broadcast %1 : vector<1x1024xf32> to vector<16x1024xf32>
    %3 = arith.mulf %0, %2 : vector<16x1024xf32>
    %c0_3 = arith.constant 0 : index
    %c0_4 = arith.constant 0 : index
    %4 = vector.load %arg3[%c0_3, %c0_4] : memref<1x1024xf32, #tpu.memory_space<vmem>>, vector<1x1024xf32>
    %5 = vector.broadcast %4 : vector<1x1024xf32> to vector<16x1024xf32>
    %6 = arith.addf %3, %5 : vector<16x1024xf32>
    %cst = arith.constant 0.000000e+00 : f32
    %7 = vector.broadcast %cst : f32 to vector<16x1024xf32>
    %8 = arith.maximumf %6, %7 : vector<16x1024xf32>
    %9 = arith.truncf %8 : vector<16x1024xf32> to vector<16x1024xbf16>
    %c0_5 = arith.constant 0 : index
    %c0_6 = arith.constant 0 : index
    %10 = vector.load %arg4[%c0_5, %c0_6] : memref<16x1024xbf16, #tpu.memory_space<vmem>>, vector<16x1024xbf16>
    tpu.vector_store %arg4[%c0_5, %c0_6], %9 {strides = array<i32>} : memref<16x1024xbf16, #tpu.memory_space<vmem>>, vector<16x1024xbf16>,
    return
  }
  func.func @transform_0(%arg0: i32) -> (i32, i32) {
    %c0_i32 = arith.constant 0 : i32
    %c0_i32_0 = arith.constant 0 : i32
    return %arg0, %c0_i32 : i32, i32
  }
  func.func @transform_1(%arg0: i32) -> (i32, i32) {
    %c0_i32 = arith.constant 0 : i32
    %c0_i32_0 = arith.constant 0 : i32
    %c0_i32_1 = arith.constant 0 : i32
    return %c0_i32, %c0_i32_0 : i32, i32
  }
  func.func @transform_2(%arg0: i32) -> (i32, i32) {
    %c0_i32 = arith.constant 0 : i32
    %c0_i32_0 = arith.constant 0 : i32
    %c0_i32_1 = arith.constant 0 : i32
    return %c0_i32, %c0_i32_0 : i32, i32
  }
  func.func @transform_3(%arg0: i32) -> (i32, i32) {
    %c0_i32 = arith.constant 0 : i32
    %c0_i32_0 = arith.constant 0 : i32
    return %arg0, %c0_i32 : i32, i32
  }
}

module attributes {stable_mosaic.version = 11 : i64} {
  func.func @_bn_stats_kernel(%arg0: i32, %arg1: memref<16x1024xf32, #tpu.memory_space<vmem>>, %arg2: memref<1x1024xf32, #tpu.memory_space<vmem>>, %arg3: memref<1x1024xf32, #tpu.memory_space<vmem>>) attributes {dimension_semantics = [#tpu.dimension_semantics<arbitrary>], iteration_bounds = array<i64: 1>, scalar_prefetch = 0 : i64, scratch_operands = 0 : i64, tpu.core_type = #tpu.core_type<tc>, window_params = [{transform_indices = @transform_0, window_bounds = array<i64: 16, 1024>}, {pipeline_mode = #tpu.pipeline_mode<synchronous>, transform_indices = @transform_1, window_bounds = array<i64: 1, 1024>}, {pipeline_mode = #tpu.pipeline_mode<synchronous>, transform_indices = @transform_2, window_bounds = array<i64: 1, 1024>}]} {
    %c0_i32 = arith.constant 0 : i32
    %0 = arith.cmpi eq, %arg0, %c0_i32 : i32
    %1 = arith.extui %0 : i1 to i32
    %c0_i32_0 = arith.constant 0 : i32
    %2 = arith.cmpi ne, %1, %c0_i32_0 : i32
    scf.if %2 {
      %cst_11 = arith.constant 0.000000e+00 : f32
      %15 = vector.broadcast %cst_11 : f32 to vector<1x1024xf32>
      %c0_12 = arith.constant 0 : index
      %c0_13 = arith.constant 0 : index
      %16 = vector.load %arg2[%c0_12, %c0_13] : memref<1x1024xf32, #tpu.memory_space<vmem>>, vector<1x1024xf32>
      tpu.vector_store %arg2[%c0_12, %c0_13], %15 {strides = array<i32>} : memref<1x1024xf32, #tpu.memory_space<vmem>>, vector<1x1024xf32>,
      %cst_14 = arith.constant 0.000000e+00 : f32
      %17 = vector.broadcast %cst_14 : f32 to vector<1x1024xf32>
      %c0_15 = arith.constant 0 : index
      %c0_16 = arith.constant 0 : index
      %18 = vector.load %arg3[%c0_15, %c0_16] : memref<1x1024xf32, #tpu.memory_space<vmem>>, vector<1x1024xf32>
      tpu.vector_store %arg3[%c0_15, %c0_16], %17 {strides = array<i32>} : memref<1x1024xf32, #tpu.memory_space<vmem>>, vector<1x1024xf32>,
    } else {
    }
    %c0 = arith.constant 0 : index
    %c0_1 = arith.constant 0 : index
    %3 = vector.load %arg1[%c0, %c0_1] : memref<16x1024xf32, #tpu.memory_space<vmem>>, vector<16x1024xf32>
    %c0_2 = arith.constant 0 : index
    %c0_3 = arith.constant 0 : index
    %4 = vector.load %arg2[%c0_2, %c0_3] : memref<1x1024xf32, #tpu.memory_space<vmem>>, vector<1x1024xf32>
    %cst = arith.constant dense<0.000000e+00> : vector<1024xf32>
    %5 = vector.multi_reduction <add>, %3, %cst [0] : vector<16x1024xf32> to vector<1024xf32>
    %6 = vector.shape_cast %5 : vector<1024xf32> to vector<1x1024xf32>
    %7 = arith.addf %4, %6 : vector<1x1024xf32>
    %c0_4 = arith.constant 0 : index
    %c0_5 = arith.constant 0 : index
    %8 = vector.load %arg2[%c0_4, %c0_5] : memref<1x1024xf32, #tpu.memory_space<vmem>>, vector<1x1024xf32>
    tpu.vector_store %arg2[%c0_4, %c0_5], %7 {strides = array<i32>} : memref<1x1024xf32, #tpu.memory_space<vmem>>, vector<1x1024xf32>,
    %c0_6 = arith.constant 0 : index
    %c0_7 = arith.constant 0 : index
    %9 = vector.load %arg3[%c0_6, %c0_7] : memref<1x1024xf32, #tpu.memory_space<vmem>>, vector<1x1024xf32>
    %10 = arith.mulf %3, %3 : vector<16x1024xf32>
    %cst_8 = arith.constant dense<0.000000e+00> : vector<1024xf32>
    %11 = vector.multi_reduction <add>, %10, %cst_8 [0] : vector<16x1024xf32> to vector<1024xf32>
    %12 = vector.shape_cast %11 : vector<1024xf32> to vector<1x1024xf32>
    %13 = arith.addf %9, %12 : vector<1x1024xf32>
    %c0_9 = arith.constant 0 : index
    %c0_10 = arith.constant 0 : index
    %14 = vector.load %arg3[%c0_9, %c0_10] : memref<1x1024xf32, #tpu.memory_space<vmem>>, vector<1x1024xf32>
    tpu.vector_store %arg3[%c0_9, %c0_10], %13 {strides = array<i32>} : memref<1x1024xf32, #tpu.memory_space<vmem>>, vector<1x1024xf32>,
    return
  }
  func.func @transform_0(%arg0: i32) -> (i32, i32) {
    %c0_i32 = arith.constant 0 : i32
    %c0_i32_0 = arith.constant 0 : i32
    return %arg0, %c0_i32 : i32, i32
  }
  func.func @transform_1(%arg0: i32) -> (i32, i32) {
    %c0_i32 = arith.constant 0 : i32
    %c0_i32_0 = arith.constant 0 : i32
    %c0_i32_1 = arith.constant 0 : i32
    return %c0_i32, %c0_i32_0 : i32, i32
  }
  func.func @transform_2(%arg0: i32) -> (i32, i32) {
    %c0_i32 = arith.constant 0 : i32
    %c0_i32_0 = arith.constant 0 : i32
    %c0_i32_1 = arith.constant 0 : i32
    return %c0_i32, %c0_i32_0 : i32, i32
  }
}

module attributes {stable_mosaic.version = 11 : i64} {
  func.func @_matmul_kernel(%arg0: i32, %arg1: i32, %arg2: i32, %arg3: memref<16x512xbf16, #tpu.memory_space<vmem>>, %arg4: memref<512x256xbf16, #tpu.memory_space<vmem>>, %arg5: memref<16x256xf32, #tpu.memory_space<vmem>>, %arg6: memref<16x256xf32, #tpu.memory_space<vmem>>) attributes {dimension_semantics = [#tpu.dimension_semantics<parallel>, #tpu.dimension_semantics<parallel>, #tpu.dimension_semantics<arbitrary>], iteration_bounds = array<i64: 1, 2, 8>, scalar_prefetch = 0 : i64, scratch_operands = 1 : i64, tpu.core_type = #tpu.core_type<tc>, window_params = [{transform_indices = @transform_0, window_bounds = array<i64: 16, 512>}, {transform_indices = @transform_1, window_bounds = array<i64: 512, 256>}, {transform_indices = @transform_2, window_bounds = array<i64: 16, 256>}]} {
    %c0_i32 = arith.constant 0 : i32
    %0 = arith.cmpi eq, %arg2, %c0_i32 : i32
    %1 = arith.extui %0 : i1 to i32
    %c0_i32_0 = arith.constant 0 : i32
    %2 = arith.cmpi ne, %1, %c0_i32_0 : i32
    scf.if %2 {
      %cst_9 = arith.constant 0.000000e+00 : f32
      %12 = vector.broadcast %cst_9 : f32 to vector<16x256xf32>
      %c0_10 = arith.constant 0 : index
      %c0_11 = arith.constant 0 : index
      %13 = vector.load %arg6[%c0_10, %c0_11] : memref<16x256xf32, #tpu.memory_space<vmem>>, vector<16x256xf32>
      tpu.vector_store %arg6[%c0_10, %c0_11], %12 {strides = array<i32>} : memref<16x256xf32, #tpu.memory_space<vmem>>, vector<16x256xf32>,
    } else {
    }
    %c0 = arith.constant 0 : index
    %c0_1 = arith.constant 0 : index
    %3 = vector.load %arg6[%c0, %c0_1] : memref<16x256xf32, #tpu.memory_space<vmem>>, vector<16x256xf32>
    %c0_2 = arith.constant 0 : index
    %c0_3 = arith.constant 0 : index
    %4 = vector.load %arg3[%c0_2, %c0_3] : memref<16x512xbf16, #tpu.memory_space<vmem>>, vector<16x512xbf16>
    %c0_4 = arith.constant 0 : index
    %c0_5 = arith.constant 0 : index
    %5 = vector.load %arg4[%c0_4, %c0_5] : memref<512x256xbf16, #tpu.memory_space<vmem>>, vector<512x256xbf16>
    %cst = arith.constant dense<0.000000e+00> : vector<16x256xf32>
    %6 = tpu.matmul %4, %5, %cst {dimension_numbers = #tpu.dot_dimension_numbers<[1], [0], [0], [1], [0, 0, 1, 1], [], []>} : vector<16x512xbf16>, vector<512x256xbf16>, vector<16x256xf32> -> vector<16x256xf32>
    %7 = arith.addf %3, %6 : vector<16x256xf32>
    %c0_6 = arith.constant 0 : index
    %c0_7 = arith.constant 0 : index
    %8 = vector.load %arg6[%c0_6, %c0_7] : memref<16x256xf32, #tpu.memory_space<vmem>>, vector<16x256xf32>
    tpu.vector_store %arg6[%c0_6, %c0_7], %7 {strides = array<i32>} : memref<16x256xf32, #tpu.memory_space<vmem>>, vector<16x256xf32>,
    %c7_i32 = arith.constant 7 : i32
    %9 = arith.cmpi eq, %arg2, %c7_i32 : i32
    %10 = arith.extui %9 : i1 to i32
    %c0_i32_8 = arith.constant 0 : i32
    %11 = arith.cmpi ne, %10, %c0_i32_8 : i32
    scf.if %11 {
      %c0_9 = arith.constant 0 : index
      %c0_10 = arith.constant 0 : index
      %12 = vector.load %arg6[%c0_9, %c0_10] : memref<16x256xf32, #tpu.memory_space<vmem>>, vector<16x256xf32>
      %c0_11 = arith.constant 0 : index
      %c0_12 = arith.constant 0 : index
      %13 = vector.load %arg5[%c0_11, %c0_12] : memref<16x256xf32, #tpu.memory_space<vmem>>, vector<16x256xf32>
      tpu.vector_store %arg5[%c0_11, %c0_12], %12 {strides = array<i32>} : memref<16x256xf32, #tpu.memory_space<vmem>>, vector<16x256xf32>,
    } else {
    }
    return
  }
  func.func @transform_0(%arg0: i32, %arg1: i32, %arg2: i32) -> (i32, i32) {
    %c0_i32 = arith.constant 0 : i32
    return %arg0, %arg2 : i32, i32
  }
  func.func @transform_1(%arg0: i32, %arg1: i32, %arg2: i32) -> (i32, i32) {
    %c0_i32 = arith.constant 0 : i32
    return %arg2, %arg1 : i32, i32
  }
  func.func @transform_2(%arg0: i32, %arg1: i32, %arg2: i32) -> (i32, i32) {
    %c0_i32 = arith.constant 0 : i32
    return %arg0, %arg1 : i32, i32
  }
}

module attributes {stable_mosaic.version = 11 : i64} {
  func.func @_bn_stats_kernel(%arg0: i32, %arg1: memref<16x512xf32, #tpu.memory_space<vmem>>, %arg2: memref<1x512xf32, #tpu.memory_space<vmem>>, %arg3: memref<1x512xf32, #tpu.memory_space<vmem>>) attributes {dimension_semantics = [#tpu.dimension_semantics<arbitrary>], iteration_bounds = array<i64: 1>, scalar_prefetch = 0 : i64, scratch_operands = 0 : i64, tpu.core_type = #tpu.core_type<tc>, window_params = [{transform_indices = @transform_0, window_bounds = array<i64: 16, 512>}, {pipeline_mode = #tpu.pipeline_mode<synchronous>, transform_indices = @transform_1, window_bounds = array<i64: 1, 512>}, {pipeline_mode = #tpu.pipeline_mode<synchronous>, transform_indices = @transform_2, window_bounds = array<i64: 1, 512>}]} {
    %c0_i32 = arith.constant 0 : i32
    %0 = arith.cmpi eq, %arg0, %c0_i32 : i32
    %1 = arith.extui %0 : i1 to i32
    %c0_i32_0 = arith.constant 0 : i32
    %2 = arith.cmpi ne, %1, %c0_i32_0 : i32
    scf.if %2 {
      %cst_11 = arith.constant 0.000000e+00 : f32
      %15 = vector.broadcast %cst_11 : f32 to vector<1x512xf32>
      %c0_12 = arith.constant 0 : index
      %c0_13 = arith.constant 0 : index
      %16 = vector.load %arg2[%c0_12, %c0_13] : memref<1x512xf32, #tpu.memory_space<vmem>>, vector<1x512xf32>
      tpu.vector_store %arg2[%c0_12, %c0_13], %15 {strides = array<i32>} : memref<1x512xf32, #tpu.memory_space<vmem>>, vector<1x512xf32>,
      %cst_14 = arith.constant 0.000000e+00 : f32
      %17 = vector.broadcast %cst_14 : f32 to vector<1x512xf32>
      %c0_15 = arith.constant 0 : index
      %c0_16 = arith.constant 0 : index
      %18 = vector.load %arg3[%c0_15, %c0_16] : memref<1x512xf32, #tpu.memory_space<vmem>>, vector<1x512xf32>
      tpu.vector_store %arg3[%c0_15, %c0_16], %17 {strides = array<i32>} : memref<1x512xf32, #tpu.memory_space<vmem>>, vector<1x512xf32>,
    } else {
    }
    %c0 = arith.constant 0 : index
    %c0_1 = arith.constant 0 : index
    %3 = vector.load %arg1[%c0, %c0_1] : memref<16x512xf32, #tpu.memory_space<vmem>>, vector<16x512xf32>
    %c0_2 = arith.constant 0 : index
    %c0_3 = arith.constant 0 : index
    %4 = vector.load %arg2[%c0_2, %c0_3] : memref<1x512xf32, #tpu.memory_space<vmem>>, vector<1x512xf32>
    %cst = arith.constant dense<0.000000e+00> : vector<512xf32>
    %5 = vector.multi_reduction <add>, %3, %cst [0] : vector<16x512xf32> to vector<512xf32>
    %6 = vector.shape_cast %5 : vector<512xf32> to vector<1x512xf32>
    %7 = arith.addf %4, %6 : vector<1x512xf32>
    %c0_4 = arith.constant 0 : index
    %c0_5 = arith.constant 0 : index
    %8 = vector.load %arg2[%c0_4, %c0_5] : memref<1x512xf32, #tpu.memory_space<vmem>>, vector<1x512xf32>
    tpu.vector_store %arg2[%c0_4, %c0_5], %7 {strides = array<i32>} : memref<1x512xf32, #tpu.memory_space<vmem>>, vector<1x512xf32>,
    %c0_6 = arith.constant 0 : index
    %c0_7 = arith.constant 0 : index
    %9 = vector.load %arg3[%c0_6, %c0_7] : memref<1x512xf32, #tpu.memory_space<vmem>>, vector<1x512xf32>
    %10 = arith.mulf %3, %3 : vector<16x512xf32>
    %cst_8 = arith.constant dense<0.000000e+00> : vector<512xf32>
    %11 = vector.multi_reduction <add>, %10, %cst_8 [0] : vector<16x512xf32> to vector<512xf32>
    %12 = vector.shape_cast %11 : vector<512xf32> to vector<1x512xf32>
    %13 = arith.addf %9, %12 : vector<1x512xf32>
    %c0_9 = arith.constant 0 : index
    %c0_10 = arith.constant 0 : index
    %14 = vector.load %arg3[%c0_9, %c0_10] : memref<1x512xf32, #tpu.memory_space<vmem>>, vector<1x512xf32>
    tpu.vector_store %arg3[%c0_9, %c0_10], %13 {strides = array<i32>} : memref<1x512xf32, #tpu.memory_space<vmem>>, vector<1x512xf32>,
    return
  }
  func.func @transform_0(%arg0: i32) -> (i32, i32) {
    %c0_i32 = arith.constant 0 : i32
    %c0_i32_0 = arith.constant 0 : i32
    return %arg0, %c0_i32 : i32, i32
  }
  func.func @transform_1(%arg0: i32) -> (i32, i32) {
    %c0_i32 = arith.constant 0 : i32
    %c0_i32_0 = arith.constant 0 : i32
    %c0_i32_1 = arith.constant 0 : i32
    return %c0_i32, %c0_i32_0 : i32, i32
  }
  func.func @transform_2(%arg0: i32) -> (i32, i32) {
    %c0_i32 = arith.constant 0 : i32
    %c0_i32_0 = arith.constant 0 : i32
    %c0_i32_1 = arith.constant 0 : i32
    return %c0_i32, %c0_i32_0 : i32, i32
  }
}

module attributes {stable_mosaic.version = 11 : i64} {
  func.func @_bn_apply_kernel(%arg0: i32, %arg1: memref<16x512xf32, #tpu.memory_space<vmem>>, %arg2: memref<1x512xf32, #tpu.memory_space<vmem>>, %arg3: memref<1x512xf32, #tpu.memory_space<vmem>>, %arg4: memref<16x512xbf16, #tpu.memory_space<vmem>>) attributes {dimension_semantics = [#tpu.dimension_semantics<parallel>], iteration_bounds = array<i64: 1>, scalar_prefetch = 0 : i64, scratch_operands = 0 : i64, tpu.core_type = #tpu.core_type<tc>, window_params = [{transform_indices = @transform_0, window_bounds = array<i64: 16, 512>}, {pipeline_mode = #tpu.pipeline_mode<synchronous>, transform_indices = @transform_1, window_bounds = array<i64: 1, 512>}, {pipeline_mode = #tpu.pipeline_mode<synchronous>, transform_indices = @transform_2, window_bounds = array<i64: 1, 512>}, {transform_indices = @transform_3, window_bounds = array<i64: 16, 512>}]} {
    %c0 = arith.constant 0 : index
    %c0_0 = arith.constant 0 : index
    %0 = vector.load %arg1[%c0, %c0_0] : memref<16x512xf32, #tpu.memory_space<vmem>>, vector<16x512xf32>
    %c0_1 = arith.constant 0 : index
    %c0_2 = arith.constant 0 : index
    %1 = vector.load %arg2[%c0_1, %c0_2] : memref<1x512xf32, #tpu.memory_space<vmem>>, vector<1x512xf32>
    %2 = vector.broadcast %1 : vector<1x512xf32> to vector<16x512xf32>
    %3 = arith.mulf %0, %2 : vector<16x512xf32>
    %c0_3 = arith.constant 0 : index
    %c0_4 = arith.constant 0 : index
    %4 = vector.load %arg3[%c0_3, %c0_4] : memref<1x512xf32, #tpu.memory_space<vmem>>, vector<1x512xf32>
    %5 = vector.broadcast %4 : vector<1x512xf32> to vector<16x512xf32>
    %6 = arith.addf %3, %5 : vector<16x512xf32>
    %cst = arith.constant 0.000000e+00 : f32
    %7 = vector.broadcast %cst : f32 to vector<16x512xf32>
    %8 = arith.maximumf %6, %7 : vector<16x512xf32>
    %9 = arith.truncf %8 : vector<16x512xf32> to vector<16x512xbf16>
    %c0_5 = arith.constant 0 : index
    %c0_6 = arith.constant 0 : index
    %10 = vector.load %arg4[%c0_5, %c0_6] : memref<16x512xbf16, #tpu.memory_space<vmem>>, vector<16x512xbf16>
    tpu.vector_store %arg4[%c0_5, %c0_6], %9 {strides = array<i32>} : memref<16x512xbf16, #tpu.memory_space<vmem>>, vector<16x512xbf16>,
    return
  }
  func.func @transform_0(%arg0: i32) -> (i32, i32) {
    %c0_i32 = arith.constant 0 : i32
    %c0_i32_0 = arith.constant 0 : i32
    return %arg0, %c0_i32 : i32, i32
  }
  func.func @transform_1(%arg0: i32) -> (i32, i32) {
    %c0_i32 = arith.constant 0 : i32
    %c0_i32_0 = arith.constant 0 : i32
    %c0_i32_1 = arith.constant 0 : i32
    return %c0_i32, %c0_i32_0 : i32, i32
  }
  func.func @transform_2(%arg0: i32) -> (i32, i32) {
    %c0_i32 = arith.constant 0 : i32
    %c0_i32_0 = arith.constant 0 : i32
    %c0_i32_1 = arith.constant 0 : i32
    return %c0_i32, %c0_i32_0 : i32, i32
  }
  func.func @transform_3(%arg0: i32) -> (i32, i32) {
    %c0_i32 = arith.constant 0 : i32
    %c0_i32_0 = arith.constant 0 : i32
    return %arg0, %c0_i32 : i32, i32
  }
}

module attributes {stable_mosaic.version = 11 : i64} {
  func.func @_matmul_kernel(%arg0: i32, %arg1: i32, %arg2: i32, %arg3: memref<16x512xbf16, #tpu.memory_space<vmem>>, %arg4: memref<512x256xbf16, #tpu.memory_space<vmem>>, %arg5: memref<16x256xf32, #tpu.memory_space<vmem>>, %arg6: memref<16x256xf32, #tpu.memory_space<vmem>>) attributes {dimension_semantics = [#tpu.dimension_semantics<parallel>, #tpu.dimension_semantics<parallel>, #tpu.dimension_semantics<arbitrary>], iteration_bounds = array<i64: 1, 1, 4>, scalar_prefetch = 0 : i64, scratch_operands = 1 : i64, tpu.core_type = #tpu.core_type<tc>, window_params = [{transform_indices = @transform_0, window_bounds = array<i64: 16, 512>}, {transform_indices = @transform_1, window_bounds = array<i64: 512, 256>}, {transform_indices = @transform_2, window_bounds = array<i64: 16, 256>}]} {
    %c0_i32 = arith.constant 0 : i32
    %0 = arith.cmpi eq, %arg2, %c0_i32 : i32
    %1 = arith.extui %0 : i1 to i32
    %c0_i32_0 = arith.constant 0 : i32
    %2 = arith.cmpi ne, %1, %c0_i32_0 : i32
    scf.if %2 {
      %cst_9 = arith.constant 0.000000e+00 : f32
      %12 = vector.broadcast %cst_9 : f32 to vector<16x256xf32>
      %c0_10 = arith.constant 0 : index
      %c0_11 = arith.constant 0 : index
      %13 = vector.load %arg6[%c0_10, %c0_11] : memref<16x256xf32, #tpu.memory_space<vmem>>, vector<16x256xf32>
      tpu.vector_store %arg6[%c0_10, %c0_11], %12 {strides = array<i32>} : memref<16x256xf32, #tpu.memory_space<vmem>>, vector<16x256xf32>,
    } else {
    }
    %c0 = arith.constant 0 : index
    %c0_1 = arith.constant 0 : index
    %3 = vector.load %arg6[%c0, %c0_1] : memref<16x256xf32, #tpu.memory_space<vmem>>, vector<16x256xf32>
    %c0_2 = arith.constant 0 : index
    %c0_3 = arith.constant 0 : index
    %4 = vector.load %arg3[%c0_2, %c0_3] : memref<16x512xbf16, #tpu.memory_space<vmem>>, vector<16x512xbf16>
    %c0_4 = arith.constant 0 : index
    %c0_5 = arith.constant 0 : index
    %5 = vector.load %arg4[%c0_4, %c0_5] : memref<512x256xbf16, #tpu.memory_space<vmem>>, vector<512x256xbf16>
    %cst = arith.constant dense<0.000000e+00> : vector<16x256xf32>
    %6 = tpu.matmul %4, %5, %cst {dimension_numbers = #tpu.dot_dimension_numbers<[1], [0], [0], [1], [0, 0, 1, 1], [], []>} : vector<16x512xbf16>, vector<512x256xbf16>, vector<16x256xf32> -> vector<16x256xf32>
    %7 = arith.addf %3, %6 : vector<16x256xf32>
    %c0_6 = arith.constant 0 : index
    %c0_7 = arith.constant 0 : index
    %8 = vector.load %arg6[%c0_6, %c0_7] : memref<16x256xf32, #tpu.memory_space<vmem>>, vector<16x256xf32>
    tpu.vector_store %arg6[%c0_6, %c0_7], %7 {strides = array<i32>} : memref<16x256xf32, #tpu.memory_space<vmem>>, vector<16x256xf32>,
    %c3_i32 = arith.constant 3 : i32
    %9 = arith.cmpi eq, %arg2, %c3_i32 : i32
    %10 = arith.extui %9 : i1 to i32
    %c0_i32_8 = arith.constant 0 : i32
    %11 = arith.cmpi ne, %10, %c0_i32_8 : i32
    scf.if %11 {
      %c0_9 = arith.constant 0 : index
      %c0_10 = arith.constant 0 : index
      %12 = vector.load %arg6[%c0_9, %c0_10] : memref<16x256xf32, #tpu.memory_space<vmem>>, vector<16x256xf32>
      %c0_11 = arith.constant 0 : index
      %c0_12 = arith.constant 0 : index
      %13 = vector.load %arg5[%c0_11, %c0_12] : memref<16x256xf32, #tpu.memory_space<vmem>>, vector<16x256xf32>
      tpu.vector_store %arg5[%c0_11, %c0_12], %12 {strides = array<i32>} : memref<16x256xf32, #tpu.memory_space<vmem>>, vector<16x256xf32>,
    } else {
    }
    return
  }
  func.func @transform_0(%arg0: i32, %arg1: i32, %arg2: i32) -> (i32, i32) {
    %c0_i32 = arith.constant 0 : i32
    return %arg0, %arg2 : i32, i32
  }
  func.func @transform_1(%arg0: i32, %arg1: i32, %arg2: i32) -> (i32, i32) {
    %c0_i32 = arith.constant 0 : i32
    return %arg2, %arg1 : i32, i32
  }
  func.func @transform_2(%arg0: i32, %arg1: i32, %arg2: i32) -> (i32, i32) {
    %c0_i32 = arith.constant 0 : i32
    return %arg0, %arg1 : i32, i32
  }
}

module attributes {stable_mosaic.version = 11 : i64} {
  func.func @_bn_stats_kernel(%arg0: i32, %arg1: memref<32x256xf32, #tpu.memory_space<vmem>>, %arg2: memref<1x256xf32, #tpu.memory_space<vmem>>, %arg3: memref<1x256xf32, #tpu.memory_space<vmem>>) attributes {dimension_semantics = [#tpu.dimension_semantics<arbitrary>], iteration_bounds = array<i64: 1>, scalar_prefetch = 0 : i64, scratch_operands = 0 : i64, tpu.core_type = #tpu.core_type<tc>, window_params = [{transform_indices = @transform_0, window_bounds = array<i64: 32, 256>}, {pipeline_mode = #tpu.pipeline_mode<synchronous>, transform_indices = @transform_1, window_bounds = array<i64: 1, 256>}, {pipeline_mode = #tpu.pipeline_mode<synchronous>, transform_indices = @transform_2, window_bounds = array<i64: 1, 256>}]} {
    %c0_i32 = arith.constant 0 : i32
    %0 = arith.cmpi eq, %arg0, %c0_i32 : i32
    %1 = arith.extui %0 : i1 to i32
    %c0_i32_0 = arith.constant 0 : i32
    %2 = arith.cmpi ne, %1, %c0_i32_0 : i32
    scf.if %2 {
      %cst_11 = arith.constant 0.000000e+00 : f32
      %15 = vector.broadcast %cst_11 : f32 to vector<1x256xf32>
      %c0_12 = arith.constant 0 : index
      %c0_13 = arith.constant 0 : index
      %16 = vector.load %arg2[%c0_12, %c0_13] : memref<1x256xf32, #tpu.memory_space<vmem>>, vector<1x256xf32>
      tpu.vector_store %arg2[%c0_12, %c0_13], %15 {strides = array<i32>} : memref<1x256xf32, #tpu.memory_space<vmem>>, vector<1x256xf32>,
      %cst_14 = arith.constant 0.000000e+00 : f32
      %17 = vector.broadcast %cst_14 : f32 to vector<1x256xf32>
      %c0_15 = arith.constant 0 : index
      %c0_16 = arith.constant 0 : index
      %18 = vector.load %arg3[%c0_15, %c0_16] : memref<1x256xf32, #tpu.memory_space<vmem>>, vector<1x256xf32>
      tpu.vector_store %arg3[%c0_15, %c0_16], %17 {strides = array<i32>} : memref<1x256xf32, #tpu.memory_space<vmem>>, vector<1x256xf32>,
    } else {
    }
    %c0 = arith.constant 0 : index
    %c0_1 = arith.constant 0 : index
    %3 = vector.load %arg1[%c0, %c0_1] : memref<32x256xf32, #tpu.memory_space<vmem>>, vector<32x256xf32>
    %c0_2 = arith.constant 0 : index
    %c0_3 = arith.constant 0 : index
    %4 = vector.load %arg2[%c0_2, %c0_3] : memref<1x256xf32, #tpu.memory_space<vmem>>, vector<1x256xf32>
    %cst = arith.constant dense<0.000000e+00> : vector<256xf32>
    %5 = vector.multi_reduction <add>, %3, %cst [0] : vector<32x256xf32> to vector<256xf32>
    %6 = vector.shape_cast %5 : vector<256xf32> to vector<1x256xf32>
    %7 = arith.addf %4, %6 : vector<1x256xf32>
    %c0_4 = arith.constant 0 : index
    %c0_5 = arith.constant 0 : index
    %8 = vector.load %arg2[%c0_4, %c0_5] : memref<1x256xf32, #tpu.memory_space<vmem>>, vector<1x256xf32>
    tpu.vector_store %arg2[%c0_4, %c0_5], %7 {strides = array<i32>} : memref<1x256xf32, #tpu.memory_space<vmem>>, vector<1x256xf32>,
    %c0_6 = arith.constant 0 : index
    %c0_7 = arith.constant 0 : index
    %9 = vector.load %arg3[%c0_6, %c0_7] : memref<1x256xf32, #tpu.memory_space<vmem>>, vector<1x256xf32>
    %10 = arith.mulf %3, %3 : vector<32x256xf32>
    %cst_8 = arith.constant dense<0.000000e+00> : vector<256xf32>
    %11 = vector.multi_reduction <add>, %10, %cst_8 [0] : vector<32x256xf32> to vector<256xf32>
    %12 = vector.shape_cast %11 : vector<256xf32> to vector<1x256xf32>
    %13 = arith.addf %9, %12 : vector<1x256xf32>
    %c0_9 = arith.constant 0 : index
    %c0_10 = arith.constant 0 : index
    %14 = vector.load %arg3[%c0_9, %c0_10] : memref<1x256xf32, #tpu.memory_space<vmem>>, vector<1x256xf32>
    tpu.vector_store %arg3[%c0_9, %c0_10], %13 {strides = array<i32>} : memref<1x256xf32, #tpu.memory_space<vmem>>, vector<1x256xf32>,
    return
  }
  func.func @transform_0(%arg0: i32) -> (i32, i32) {
    %c0_i32 = arith.constant 0 : i32
    %c0_i32_0 = arith.constant 0 : i32
    return %arg0, %c0_i32 : i32, i32
  }
  func.func @transform_1(%arg0: i32) -> (i32, i32) {
    %c0_i32 = arith.constant 0 : i32
    %c0_i32_0 = arith.constant 0 : i32
    %c0_i32_1 = arith.constant 0 : i32
    return %c0_i32, %c0_i32_0 : i32, i32
  }
  func.func @transform_2(%arg0: i32) -> (i32, i32) {
    %c0_i32 = arith.constant 0 : i32
    %c0_i32_0 = arith.constant 0 : i32
    %c0_i32_1 = arith.constant 0 : i32
    return %c0_i32, %c0_i32_0 : i32, i32
  }
}

module attributes {stable_mosaic.version = 11 : i64} {
  func.func @_bn_apply_kernel(%arg0: i32, %arg1: memref<32x256xf32, #tpu.memory_space<vmem>>, %arg2: memref<1x256xf32, #tpu.memory_space<vmem>>, %arg3: memref<1x256xf32, #tpu.memory_space<vmem>>, %arg4: memref<32x256xbf16, #tpu.memory_space<vmem>>) attributes {dimension_semantics = [#tpu.dimension_semantics<parallel>], iteration_bounds = array<i64: 1>, scalar_prefetch = 0 : i64, scratch_operands = 0 : i64, tpu.core_type = #tpu.core_type<tc>, window_params = [{transform_indices = @transform_0, window_bounds = array<i64: 32, 256>}, {pipeline_mode = #tpu.pipeline_mode<synchronous>, transform_indices = @transform_1, window_bounds = array<i64: 1, 256>}, {pipeline_mode = #tpu.pipeline_mode<synchronous>, transform_indices = @transform_2, window_bounds = array<i64: 1, 256>}, {transform_indices = @transform_3, window_bounds = array<i64: 32, 256>}]} {
    %c0 = arith.constant 0 : index
    %c0_0 = arith.constant 0 : index
    %0 = vector.load %arg1[%c0, %c0_0] : memref<32x256xf32, #tpu.memory_space<vmem>>, vector<32x256xf32>
    %c0_1 = arith.constant 0 : index
    %c0_2 = arith.constant 0 : index
    %1 = vector.load %arg2[%c0_1, %c0_2] : memref<1x256xf32, #tpu.memory_space<vmem>>, vector<1x256xf32>
    %2 = vector.broadcast %1 : vector<1x256xf32> to vector<32x256xf32>
    %3 = arith.mulf %0, %2 : vector<32x256xf32>
    %c0_3 = arith.constant 0 : index
    %c0_4 = arith.constant 0 : index
    %4 = vector.load %arg3[%c0_3, %c0_4] : memref<1x256xf32, #tpu.memory_space<vmem>>, vector<1x256xf32>
    %5 = vector.broadcast %4 : vector<1x256xf32> to vector<32x256xf32>
    %6 = arith.addf %3, %5 : vector<32x256xf32>
    %cst = arith.constant 0.000000e+00 : f32
    %7 = vector.broadcast %cst : f32 to vector<32x256xf32>
    %8 = arith.maximumf %6, %7 : vector<32x256xf32>
    %9 = arith.truncf %8 : vector<32x256xf32> to vector<32x256xbf16>
    %c0_5 = arith.constant 0 : index
    %c0_6 = arith.constant 0 : index
    %10 = vector.load %arg4[%c0_5, %c0_6] : memref<32x256xbf16, #tpu.memory_space<vmem>>, vector<32x256xbf16>
    tpu.vector_store %arg4[%c0_5, %c0_6], %9 {strides = array<i32>} : memref<32x256xbf16, #tpu.memory_space<vmem>>, vector<32x256xbf16>,
    return
  }
  func.func @transform_0(%arg0: i32) -> (i32, i32) {
    %c0_i32 = arith.constant 0 : i32
    %c0_i32_0 = arith.constant 0 : i32
    return %arg0, %c0_i32 : i32, i32
  }
  func.func @transform_1(%arg0: i32) -> (i32, i32) {
    %c0_i32 = arith.constant 0 : i32
    %c0_i32_0 = arith.constant 0 : i32
    %c0_i32_1 = arith.constant 0 : i32
    return %c0_i32, %c0_i32_0 : i32, i32
  }
  func.func @transform_2(%arg0: i32) -> (i32, i32) {
    %c0_i32 = arith.constant 0 : i32
    %c0_i32_0 = arith.constant 0 : i32
    %c0_i32_1 = arith.constant 0 : i32
    return %c0_i32, %c0_i32_0 : i32, i32
  }
  func.func @transform_3(%arg0: i32) -> (i32, i32) {
    %c0_i32 = arith.constant 0 : i32
    %c0_i32_0 = arith.constant 0 : i32
    return %arg0, %c0_i32 : i32, i32
  }
}

module attributes {stable_mosaic.version = 11 : i64} {
  func.func @_matmul_kernel(%arg0: i32, %arg1: i32, %arg2: i32, %arg3: memref<32x512xbf16, #tpu.memory_space<vmem>>, %arg4: memref<512x128xbf16, #tpu.memory_space<vmem>>, %arg5: memref<32x128xf32, #tpu.memory_space<vmem>>, %arg6: memref<32x128xf32, #tpu.memory_space<vmem>>) attributes {dimension_semantics = [#tpu.dimension_semantics<parallel>, #tpu.dimension_semantics<parallel>, #tpu.dimension_semantics<arbitrary>], iteration_bounds = array<i64: 1, 1, 2>, scalar_prefetch = 0 : i64, scratch_operands = 1 : i64, tpu.core_type = #tpu.core_type<tc>, window_params = [{transform_indices = @transform_0, window_bounds = array<i64: 32, 512>}, {transform_indices = @transform_1, window_bounds = array<i64: 512, 128>}, {transform_indices = @transform_2, window_bounds = array<i64: 32, 128>}]} {
    %c0_i32 = arith.constant 0 : i32
    %0 = arith.cmpi eq, %arg2, %c0_i32 : i32
    %1 = arith.extui %0 : i1 to i32
    %c0_i32_0 = arith.constant 0 : i32
    %2 = arith.cmpi ne, %1, %c0_i32_0 : i32
    scf.if %2 {
      %cst_9 = arith.constant 0.000000e+00 : f32
      %12 = vector.broadcast %cst_9 : f32 to vector<32x128xf32>
      %c0_10 = arith.constant 0 : index
      %c0_11 = arith.constant 0 : index
      %13 = vector.load %arg6[%c0_10, %c0_11] : memref<32x128xf32, #tpu.memory_space<vmem>>, vector<32x128xf32>
      tpu.vector_store %arg6[%c0_10, %c0_11], %12 {strides = array<i32>} : memref<32x128xf32, #tpu.memory_space<vmem>>, vector<32x128xf32>,
    } else {
    }
    %c0 = arith.constant 0 : index
    %c0_1 = arith.constant 0 : index
    %3 = vector.load %arg6[%c0, %c0_1] : memref<32x128xf32, #tpu.memory_space<vmem>>, vector<32x128xf32>
    %c0_2 = arith.constant 0 : index
    %c0_3 = arith.constant 0 : index
    %4 = vector.load %arg3[%c0_2, %c0_3] : memref<32x512xbf16, #tpu.memory_space<vmem>>, vector<32x512xbf16>
    %c0_4 = arith.constant 0 : index
    %c0_5 = arith.constant 0 : index
    %5 = vector.load %arg4[%c0_4, %c0_5] : memref<512x128xbf16, #tpu.memory_space<vmem>>, vector<512x128xbf16>
    %cst = arith.constant dense<0.000000e+00> : vector<32x128xf32>
    %6 = tpu.matmul %4, %5, %cst {dimension_numbers = #tpu.dot_dimension_numbers<[1], [0], [0], [1], [0, 0, 1, 1], [], []>} : vector<32x512xbf16>, vector<512x128xbf16>, vector<32x128xf32> -> vector<32x128xf32>
    %7 = arith.addf %3, %6 : vector<32x128xf32>
    %c0_6 = arith.constant 0 : index
    %c0_7 = arith.constant 0 : index
    %8 = vector.load %arg6[%c0_6, %c0_7] : memref<32x128xf32, #tpu.memory_space<vmem>>, vector<32x128xf32>
    tpu.vector_store %arg6[%c0_6, %c0_7], %7 {strides = array<i32>} : memref<32x128xf32, #tpu.memory_space<vmem>>, vector<32x128xf32>,
    %c1_i32 = arith.constant 1 : i32
    %9 = arith.cmpi eq, %arg2, %c1_i32 : i32
    %10 = arith.extui %9 : i1 to i32
    %c0_i32_8 = arith.constant 0 : i32
    %11 = arith.cmpi ne, %10, %c0_i32_8 : i32
    scf.if %11 {
      %c0_9 = arith.constant 0 : index
      %c0_10 = arith.constant 0 : index
      %12 = vector.load %arg6[%c0_9, %c0_10] : memref<32x128xf32, #tpu.memory_space<vmem>>, vector<32x128xf32>
      %c0_11 = arith.constant 0 : index
      %c0_12 = arith.constant 0 : index
      %13 = vector.load %arg5[%c0_11, %c0_12] : memref<32x128xf32, #tpu.memory_space<vmem>>, vector<32x128xf32>
      tpu.vector_store %arg5[%c0_11, %c0_12], %12 {strides = array<i32>} : memref<32x128xf32, #tpu.memory_space<vmem>>, vector<32x128xf32>,
    } else {
    }
    return
  }
  func.func @transform_0(%arg0: i32, %arg1: i32, %arg2: i32) -> (i32, i32) {
    %c0_i32 = arith.constant 0 : i32
    return %arg0, %arg2 : i32, i32
  }
  func.func @transform_1(%arg0: i32, %arg1: i32, %arg2: i32) -> (i32, i32) {
    %c0_i32 = arith.constant 0 : i32
    return %arg2, %arg1 : i32, i32
  }
  func.func @transform_2(%arg0: i32, %arg1: i32, %arg2: i32) -> (i32, i32) {
    %c0_i32 = arith.constant 0 : i32
    return %arg0, %arg1 : i32, i32
  }
}

module attributes {stable_mosaic.version = 11 : i64} {
  func.func @_bn_stats_kernel(%arg0: i32, %arg1: memref<128x128xf32, #tpu.memory_space<vmem>>, %arg2: memref<1x128xf32, #tpu.memory_space<vmem>>, %arg3: memref<1x128xf32, #tpu.memory_space<vmem>>) attributes {dimension_semantics = [#tpu.dimension_semantics<arbitrary>], iteration_bounds = array<i64: 1>, scalar_prefetch = 0 : i64, scratch_operands = 0 : i64, tpu.core_type = #tpu.core_type<tc>, window_params = [{transform_indices = @transform_0, window_bounds = array<i64: 128, 128>}, {pipeline_mode = #tpu.pipeline_mode<synchronous>, transform_indices = @transform_1, window_bounds = array<i64: 1, 128>}, {pipeline_mode = #tpu.pipeline_mode<synchronous>, transform_indices = @transform_2, window_bounds = array<i64: 1, 128>}]} {
    %c0_i32 = arith.constant 0 : i32
    %0 = arith.cmpi eq, %arg0, %c0_i32 : i32
    %1 = arith.extui %0 : i1 to i32
    %c0_i32_0 = arith.constant 0 : i32
    %2 = arith.cmpi ne, %1, %c0_i32_0 : i32
    scf.if %2 {
      %cst_11 = arith.constant 0.000000e+00 : f32
      %15 = vector.broadcast %cst_11 : f32 to vector<1x128xf32>
      %c0_12 = arith.constant 0 : index
      %c0_13 = arith.constant 0 : index
      %16 = vector.load %arg2[%c0_12, %c0_13] : memref<1x128xf32, #tpu.memory_space<vmem>>, vector<1x128xf32>
      tpu.vector_store %arg2[%c0_12, %c0_13], %15 {strides = array<i32>} : memref<1x128xf32, #tpu.memory_space<vmem>>, vector<1x128xf32>,
      %cst_14 = arith.constant 0.000000e+00 : f32
      %17 = vector.broadcast %cst_14 : f32 to vector<1x128xf32>
      %c0_15 = arith.constant 0 : index
      %c0_16 = arith.constant 0 : index
      %18 = vector.load %arg3[%c0_15, %c0_16] : memref<1x128xf32, #tpu.memory_space<vmem>>, vector<1x128xf32>
      tpu.vector_store %arg3[%c0_15, %c0_16], %17 {strides = array<i32>} : memref<1x128xf32, #tpu.memory_space<vmem>>, vector<1x128xf32>,
    } else {
    }
    %c0 = arith.constant 0 : index
    %c0_1 = arith.constant 0 : index
    %3 = vector.load %arg1[%c0, %c0_1] : memref<128x128xf32, #tpu.memory_space<vmem>>, vector<128x128xf32>
    %c0_2 = arith.constant 0 : index
    %c0_3 = arith.constant 0 : index
    %4 = vector.load %arg2[%c0_2, %c0_3] : memref<1x128xf32, #tpu.memory_space<vmem>>, vector<1x128xf32>
    %cst = arith.constant dense<0.000000e+00> : vector<128xf32>
    %5 = vector.multi_reduction <add>, %3, %cst [0] : vector<128x128xf32> to vector<128xf32>
    %6 = vector.shape_cast %5 : vector<128xf32> to vector<1x128xf32>
    %7 = arith.addf %4, %6 : vector<1x128xf32>
    %c0_4 = arith.constant 0 : index
    %c0_5 = arith.constant 0 : index
    %8 = vector.load %arg2[%c0_4, %c0_5] : memref<1x128xf32, #tpu.memory_space<vmem>>, vector<1x128xf32>
    tpu.vector_store %arg2[%c0_4, %c0_5], %7 {strides = array<i32>} : memref<1x128xf32, #tpu.memory_space<vmem>>, vector<1x128xf32>,
    %c0_6 = arith.constant 0 : index
    %c0_7 = arith.constant 0 : index
    %9 = vector.load %arg3[%c0_6, %c0_7] : memref<1x128xf32, #tpu.memory_space<vmem>>, vector<1x128xf32>
    %10 = arith.mulf %3, %3 : vector<128x128xf32>
    %cst_8 = arith.constant dense<0.000000e+00> : vector<128xf32>
    %11 = vector.multi_reduction <add>, %10, %cst_8 [0] : vector<128x128xf32> to vector<128xf32>
    %12 = vector.shape_cast %11 : vector<128xf32> to vector<1x128xf32>
    %13 = arith.addf %9, %12 : vector<1x128xf32>
    %c0_9 = arith.constant 0 : index
    %c0_10 = arith.constant 0 : index
    %14 = vector.load %arg3[%c0_9, %c0_10] : memref<1x128xf32, #tpu.memory_space<vmem>>, vector<1x128xf32>
    tpu.vector_store %arg3[%c0_9, %c0_10], %13 {strides = array<i32>} : memref<1x128xf32, #tpu.memory_space<vmem>>, vector<1x128xf32>,
    return
  }
  func.func @transform_0(%arg0: i32) -> (i32, i32) {
    %c0_i32 = arith.constant 0 : i32
    %c0_i32_0 = arith.constant 0 : i32
    return %arg0, %c0_i32 : i32, i32
  }
  func.func @transform_1(%arg0: i32) -> (i32, i32) {
    %c0_i32 = arith.constant 0 : i32
    %c0_i32_0 = arith.constant 0 : i32
    %c0_i32_1 = arith.constant 0 : i32
    return %c0_i32, %c0_i32_0 : i32, i32
  }
  func.func @transform_2(%arg0: i32) -> (i32, i32) {
    %c0_i32 = arith.constant 0 : i32
    %c0_i32_0 = arith.constant 0 : i32
    %c0_i32_1 = arith.constant 0 : i32
    return %c0_i32, %c0_i32_0 : i32, i32
  }
}

module attributes {stable_mosaic.version = 11 : i64} {
  func.func @_bn_apply_kernel(%arg0: i32, %arg1: memref<128x128xf32, #tpu.memory_space<vmem>>, %arg2: memref<1x128xf32, #tpu.memory_space<vmem>>, %arg3: memref<1x128xf32, #tpu.memory_space<vmem>>, %arg4: memref<128x128xbf16, #tpu.memory_space<vmem>>) attributes {dimension_semantics = [#tpu.dimension_semantics<parallel>], iteration_bounds = array<i64: 1>, scalar_prefetch = 0 : i64, scratch_operands = 0 : i64, tpu.core_type = #tpu.core_type<tc>, window_params = [{transform_indices = @transform_0, window_bounds = array<i64: 128, 128>}, {pipeline_mode = #tpu.pipeline_mode<synchronous>, transform_indices = @transform_1, window_bounds = array<i64: 1, 128>}, {pipeline_mode = #tpu.pipeline_mode<synchronous>, transform_indices = @transform_2, window_bounds = array<i64: 1, 128>}, {transform_indices = @transform_3, window_bounds = array<i64: 128, 128>}]} {
    %c0 = arith.constant 0 : index
    %c0_0 = arith.constant 0 : index
    %0 = vector.load %arg1[%c0, %c0_0] : memref<128x128xf32, #tpu.memory_space<vmem>>, vector<128x128xf32>
    %c0_1 = arith.constant 0 : index
    %c0_2 = arith.constant 0 : index
    %1 = vector.load %arg2[%c0_1, %c0_2] : memref<1x128xf32, #tpu.memory_space<vmem>>, vector<1x128xf32>
    %2 = vector.broadcast %1 : vector<1x128xf32> to vector<128x128xf32>
    %3 = arith.mulf %0, %2 : vector<128x128xf32>
    %c0_3 = arith.constant 0 : index
    %c0_4 = arith.constant 0 : index
    %4 = vector.load %arg3[%c0_3, %c0_4] : memref<1x128xf32, #tpu.memory_space<vmem>>, vector<1x128xf32>
    %5 = vector.broadcast %4 : vector<1x128xf32> to vector<128x128xf32>
    %6 = arith.addf %3, %5 : vector<128x128xf32>
    %cst = arith.constant 0.000000e+00 : f32
    %7 = vector.broadcast %cst : f32 to vector<128x128xf32>
    %8 = arith.maximumf %6, %7 : vector<128x128xf32>
    %9 = arith.truncf %8 : vector<128x128xf32> to vector<128x128xbf16>
    %c0_5 = arith.constant 0 : index
    %c0_6 = arith.constant 0 : index
    %10 = vector.load %arg4[%c0_5, %c0_6] : memref<128x128xbf16, #tpu.memory_space<vmem>>, vector<128x128xbf16>
    tpu.vector_store %arg4[%c0_5, %c0_6], %9 {strides = array<i32>} : memref<128x128xbf16, #tpu.memory_space<vmem>>, vector<128x128xbf16>,
    return
  }
  func.func @transform_0(%arg0: i32) -> (i32, i32) {
    %c0_i32 = arith.constant 0 : i32
    %c0_i32_0 = arith.constant 0 : i32
    return %arg0, %c0_i32 : i32, i32
  }
  func.func @transform_1(%arg0: i32) -> (i32, i32) {
    %c0_i32 = arith.constant 0 : i32
    %c0_i32_0 = arith.constant 0 : i32
    %c0_i32_1 = arith.constant 0 : i32
    return %c0_i32, %c0_i32_0 : i32, i32
  }
  func.func @transform_2(%arg0: i32) -> (i32, i32) {
    %c0_i32 = arith.constant 0 : i32
    %c0_i32_0 = arith.constant 0 : i32
    %c0_i32_1 = arith.constant 0 : i32
    return %c0_i32, %c0_i32_0 : i32, i32
  }
  func.func @transform_3(%arg0: i32) -> (i32, i32) {
    %c0_i32 = arith.constant 0 : i32
    %c0_i32_0 = arith.constant 0 : i32
    return %arg0, %c0_i32 : i32, i32
  }
}

module attributes {stable_mosaic.version = 11 : i64} {
  func.func @_matmul_kernel(%arg0: i32, %arg1: i32, %arg2: i32, %arg3: memref<128x512xbf16, #tpu.memory_space<vmem>>, %arg4: memref<512x128xbf16, #tpu.memory_space<vmem>>, %arg5: memref<128x128xf32, #tpu.memory_space<vmem>>, %arg6: memref<128x128xf32, #tpu.memory_space<vmem>>) attributes {dimension_semantics = [#tpu.dimension_semantics<parallel>, #tpu.dimension_semantics<parallel>, #tpu.dimension_semantics<arbitrary>], iteration_bounds = array<i64: 1, 1, 1>, scalar_prefetch = 0 : i64, scratch_operands = 1 : i64, tpu.core_type = #tpu.core_type<tc>, window_params = [{transform_indices = @transform_0, window_bounds = array<i64: 128, 512>}, {transform_indices = @transform_1, window_bounds = array<i64: 512, 128>}, {transform_indices = @transform_2, window_bounds = array<i64: 128, 128>}]} {
    %c0_i32 = arith.constant 0 : i32
    %0 = arith.cmpi eq, %arg2, %c0_i32 : i32
    %1 = arith.extui %0 : i1 to i32
    %c0_i32_0 = arith.constant 0 : i32
    %2 = arith.cmpi ne, %1, %c0_i32_0 : i32
    scf.if %2 {
      %cst_10 = arith.constant 0.000000e+00 : f32
      %12 = vector.broadcast %cst_10 : f32 to vector<128x128xf32>
      %c0_11 = arith.constant 0 : index
      %c0_12 = arith.constant 0 : index
      %13 = vector.load %arg6[%c0_11, %c0_12] : memref<128x128xf32, #tpu.memory_space<vmem>>, vector<128x128xf32>
      tpu.vector_store %arg6[%c0_11, %c0_12], %12 {strides = array<i32>} : memref<128x128xf32, #tpu.memory_space<vmem>>, vector<128x128xf32>,
    } else {
    }
    %c0 = arith.constant 0 : index
    %c0_1 = arith.constant 0 : index
    %3 = vector.load %arg6[%c0, %c0_1] : memref<128x128xf32, #tpu.memory_space<vmem>>, vector<128x128xf32>
    %c0_2 = arith.constant 0 : index
    %c0_3 = arith.constant 0 : index
    %4 = vector.load %arg3[%c0_2, %c0_3] : memref<128x512xbf16, #tpu.memory_space<vmem>>, vector<128x512xbf16>
    %c0_4 = arith.constant 0 : index
    %c0_5 = arith.constant 0 : index
    %5 = vector.load %arg4[%c0_4, %c0_5] : memref<512x128xbf16, #tpu.memory_space<vmem>>, vector<512x128xbf16>
    %cst = arith.constant dense<0.000000e+00> : vector<128x128xf32>
    %6 = tpu.matmul %4, %5, %cst {dimension_numbers = #tpu.dot_dimension_numbers<[1], [0], [0], [1], [0, 0, 1, 1], [], []>} : vector<128x512xbf16>, vector<512x128xbf16>, vector<128x128xf32> -> vector<128x128xf32>
    %7 = arith.addf %3, %6 : vector<128x128xf32>
    %c0_6 = arith.constant 0 : index
    %c0_7 = arith.constant 0 : index
    %8 = vector.load %arg6[%c0_6, %c0_7] : memref<128x128xf32, #tpu.memory_space<vmem>>, vector<128x128xf32>
    tpu.vector_store %arg6[%c0_6, %c0_7], %7 {strides = array<i32>} : memref<128x128xf32, #tpu.memory_space<vmem>>, vector<128x128xf32>,
    %c0_i32_8 = arith.constant 0 : i32
    %9 = arith.cmpi eq, %arg2, %c0_i32_8 : i32
    %10 = arith.extui %9 : i1 to i32
    %c0_i32_9 = arith.constant 0 : i32
    %11 = arith.cmpi ne, %10, %c0_i32_9 : i32
    scf.if %11 {
      %c0_10 = arith.constant 0 : index
      %c0_11 = arith.constant 0 : index
      %12 = vector.load %arg6[%c0_10, %c0_11] : memref<128x128xf32, #tpu.memory_space<vmem>>, vector<128x128xf32>
      %c0_12 = arith.constant 0 : index
      %c0_13 = arith.constant 0 : index
      %13 = vector.load %arg5[%c0_12, %c0_13] : memref<128x128xf32, #tpu.memory_space<vmem>>, vector<128x128xf32>
      tpu.vector_store %arg5[%c0_12, %c0_13], %12 {strides = array<i32>} : memref<128x128xf32, #tpu.memory_space<vmem>>, vector<128x128xf32>,
    } else {
    }
    return
  }
  func.func @transform_0(%arg0: i32, %arg1: i32, %arg2: i32) -> (i32, i32) {
    %c0_i32 = arith.constant 0 : i32
    return %arg0, %arg2 : i32, i32
  }
  func.func @transform_1(%arg0: i32, %arg1: i32, %arg2: i32) -> (i32, i32) {
    %c0_i32 = arith.constant 0 : i32
    return %arg2, %arg1 : i32, i32
  }
  func.func @transform_2(%arg0: i32, %arg1: i32, %arg2: i32) -> (i32, i32) {
    %c0_i32 = arith.constant 0 : i32
    return %arg0, %arg1 : i32, i32
  }
}

module attributes {stable_mosaic.version = 11 : i64} {
  func.func @_bn_stats_kernel(%arg0: i32, %arg1: memref<512x64xf32, #tpu.memory_space<vmem>>, %arg2: memref<1x64xf32, #tpu.memory_space<vmem>>, %arg3: memref<1x64xf32, #tpu.memory_space<vmem>>) attributes {dimension_semantics = [#tpu.dimension_semantics<arbitrary>], iteration_bounds = array<i64: 1>, scalar_prefetch = 0 : i64, scratch_operands = 0 : i64, tpu.core_type = #tpu.core_type<tc>, window_params = [{transform_indices = @transform_0, window_bounds = array<i64: 512, 64>}, {pipeline_mode = #tpu.pipeline_mode<synchronous>, transform_indices = @transform_1, window_bounds = array<i64: 1, 64>}, {pipeline_mode = #tpu.pipeline_mode<synchronous>, transform_indices = @transform_2, window_bounds = array<i64: 1, 64>}]} {
    %c0_i32 = arith.constant 0 : i32
    %0 = arith.cmpi eq, %arg0, %c0_i32 : i32
    %1 = arith.extui %0 : i1 to i32
    %c0_i32_0 = arith.constant 0 : i32
    %2 = arith.cmpi ne, %1, %c0_i32_0 : i32
    scf.if %2 {
      %cst_11 = arith.constant 0.000000e+00 : f32
      %15 = vector.broadcast %cst_11 : f32 to vector<1x64xf32>
      %c0_12 = arith.constant 0 : index
      %c0_13 = arith.constant 0 : index
      %16 = vector.load %arg2[%c0_12, %c0_13] : memref<1x64xf32, #tpu.memory_space<vmem>>, vector<1x64xf32>
      tpu.vector_store %arg2[%c0_12, %c0_13], %15 {strides = array<i32>} : memref<1x64xf32, #tpu.memory_space<vmem>>, vector<1x64xf32>,
      %cst_14 = arith.constant 0.000000e+00 : f32
      %17 = vector.broadcast %cst_14 : f32 to vector<1x64xf32>
      %c0_15 = arith.constant 0 : index
      %c0_16 = arith.constant 0 : index
      %18 = vector.load %arg3[%c0_15, %c0_16] : memref<1x64xf32, #tpu.memory_space<vmem>>, vector<1x64xf32>
      tpu.vector_store %arg3[%c0_15, %c0_16], %17 {strides = array<i32>} : memref<1x64xf32, #tpu.memory_space<vmem>>, vector<1x64xf32>,
    } else {
    }
    %c0 = arith.constant 0 : index
    %c0_1 = arith.constant 0 : index
    %3 = vector.load %arg1[%c0, %c0_1] : memref<512x64xf32, #tpu.memory_space<vmem>>, vector<512x64xf32>
    %c0_2 = arith.constant 0 : index
    %c0_3 = arith.constant 0 : index
    %4 = vector.load %arg2[%c0_2, %c0_3] : memref<1x64xf32, #tpu.memory_space<vmem>>, vector<1x64xf32>
    %cst = arith.constant dense<0.000000e+00> : vector<64xf32>
    %5 = vector.multi_reduction <add>, %3, %cst [0] : vector<512x64xf32> to vector<64xf32>
    %6 = vector.shape_cast %5 : vector<64xf32> to vector<1x64xf32>
    %7 = arith.addf %4, %6 : vector<1x64xf32>
    %c0_4 = arith.constant 0 : index
    %c0_5 = arith.constant 0 : index
    %8 = vector.load %arg2[%c0_4, %c0_5] : memref<1x64xf32, #tpu.memory_space<vmem>>, vector<1x64xf32>
    tpu.vector_store %arg2[%c0_4, %c0_5], %7 {strides = array<i32>} : memref<1x64xf32, #tpu.memory_space<vmem>>, vector<1x64xf32>,
    %c0_6 = arith.constant 0 : index
    %c0_7 = arith.constant 0 : index
    %9 = vector.load %arg3[%c0_6, %c0_7] : memref<1x64xf32, #tpu.memory_space<vmem>>, vector<1x64xf32>
    %10 = arith.mulf %3, %3 : vector<512x64xf32>
    %cst_8 = arith.constant dense<0.000000e+00> : vector<64xf32>
    %11 = vector.multi_reduction <add>, %10, %cst_8 [0] : vector<512x64xf32> to vector<64xf32>
    %12 = vector.shape_cast %11 : vector<64xf32> to vector<1x64xf32>
    %13 = arith.addf %9, %12 : vector<1x64xf32>
    %c0_9 = arith.constant 0 : index
    %c0_10 = arith.constant 0 : index
    %14 = vector.load %arg3[%c0_9, %c0_10] : memref<1x64xf32, #tpu.memory_space<vmem>>, vector<1x64xf32>
    tpu.vector_store %arg3[%c0_9, %c0_10], %13 {strides = array<i32>} : memref<1x64xf32, #tpu.memory_space<vmem>>, vector<1x64xf32>,
    return
  }
  func.func @transform_0(%arg0: i32) -> (i32, i32) {
    %c0_i32 = arith.constant 0 : i32
    %c0_i32_0 = arith.constant 0 : i32
    return %arg0, %c0_i32 : i32, i32
  }
  func.func @transform_1(%arg0: i32) -> (i32, i32) {
    %c0_i32 = arith.constant 0 : i32
    %c0_i32_0 = arith.constant 0 : i32
    %c0_i32_1 = arith.constant 0 : i32
    return %c0_i32, %c0_i32_0 : i32, i32
  }
  func.func @transform_2(%arg0: i32) -> (i32, i32) {
    %c0_i32 = arith.constant 0 : i32
    %c0_i32_0 = arith.constant 0 : i32
    %c0_i32_1 = arith.constant 0 : i32
    return %c0_i32, %c0_i32_0 : i32, i32
  }
}

module attributes {stable_mosaic.version = 11 : i64} {
  func.func @_bn_apply_kernel(%arg0: i32, %arg1: memref<512x64xf32, #tpu.memory_space<vmem>>, %arg2: memref<1x64xf32, #tpu.memory_space<vmem>>, %arg3: memref<1x64xf32, #tpu.memory_space<vmem>>, %arg4: memref<512x64xbf16, #tpu.memory_space<vmem>>) attributes {dimension_semantics = [#tpu.dimension_semantics<parallel>], iteration_bounds = array<i64: 1>, scalar_prefetch = 0 : i64, scratch_operands = 0 : i64, tpu.core_type = #tpu.core_type<tc>, window_params = [{transform_indices = @transform_0, window_bounds = array<i64: 512, 64>}, {pipeline_mode = #tpu.pipeline_mode<synchronous>, transform_indices = @transform_1, window_bounds = array<i64: 1, 64>}, {pipeline_mode = #tpu.pipeline_mode<synchronous>, transform_indices = @transform_2, window_bounds = array<i64: 1, 64>}, {transform_indices = @transform_3, window_bounds = array<i64: 512, 64>}]} {
    %c0 = arith.constant 0 : index
    %c0_0 = arith.constant 0 : index
    %0 = vector.load %arg1[%c0, %c0_0] : memref<512x64xf32, #tpu.memory_space<vmem>>, vector<512x64xf32>
    %c0_1 = arith.constant 0 : index
    %c0_2 = arith.constant 0 : index
    %1 = vector.load %arg2[%c0_1, %c0_2] : memref<1x64xf32, #tpu.memory_space<vmem>>, vector<1x64xf32>
    %2 = vector.broadcast %1 : vector<1x64xf32> to vector<512x64xf32>
    %3 = arith.mulf %0, %2 : vector<512x64xf32>
    %c0_3 = arith.constant 0 : index
    %c0_4 = arith.constant 0 : index
    %4 = vector.load %arg3[%c0_3, %c0_4] : memref<1x64xf32, #tpu.memory_space<vmem>>, vector<1x64xf32>
    %5 = vector.broadcast %4 : vector<1x64xf32> to vector<512x64xf32>
    %6 = arith.addf %3, %5 : vector<512x64xf32>
    %cst = arith.constant 0.000000e+00 : f32
    %7 = vector.broadcast %cst : f32 to vector<512x64xf32>
    %8 = arith.maximumf %6, %7 : vector<512x64xf32>
    %9 = arith.truncf %8 : vector<512x64xf32> to vector<512x64xbf16>
    %c0_5 = arith.constant 0 : index
    %c0_6 = arith.constant 0 : index
    %10 = vector.load %arg4[%c0_5, %c0_6] : memref<512x64xbf16, #tpu.memory_space<vmem>>, vector<512x64xbf16>
    tpu.vector_store %arg4[%c0_5, %c0_6], %9 {strides = array<i32>} : memref<512x64xbf16, #tpu.memory_space<vmem>>, vector<512x64xbf16>,
    return
  }
  func.func @transform_0(%arg0: i32) -> (i32, i32) {
    %c0_i32 = arith.constant 0 : i32
    %c0_i32_0 = arith.constant 0 : i32
    return %arg0, %c0_i32 : i32, i32
  }
  func.func @transform_1(%arg0: i32) -> (i32, i32) {
    %c0_i32 = arith.constant 0 : i32
    %c0_i32_0 = arith.constant 0 : i32
    %c0_i32_1 = arith.constant 0 : i32
    return %c0_i32, %c0_i32_0 : i32, i32
  }
  func.func @transform_2(%arg0: i32) -> (i32, i32) {
    %c0_i32 = arith.constant 0 : i32
    %c0_i32_0 = arith.constant 0 : i32
    %c0_i32_1 = arith.constant 0 : i32
    return %c0_i32, %c0_i32_0 : i32, i32
  }
  func.func @transform_3(%arg0: i32) -> (i32, i32) {
    %c0_i32 = arith.constant 0 : i32
    %c0_i32_0 = arith.constant 0 : i32
    return %arg0, %c0_i32 : i32, i32
  }
}

module attributes {stable_mosaic.version = 11 : i64} {
  func.func @_matmul_kernel(%arg0: i32, %arg1: i32, %arg2: i32, %arg3: memref<256x256xbf16, #tpu.memory_space<vmem>>, %arg4: memref<256x128xbf16, #tpu.memory_space<vmem>>, %arg5: memref<256x128xf32, #tpu.memory_space<vmem>>, %arg6: memref<256x128xf32, #tpu.memory_space<vmem>>) attributes {dimension_semantics = [#tpu.dimension_semantics<parallel>, #tpu.dimension_semantics<parallel>, #tpu.dimension_semantics<arbitrary>], iteration_bounds = array<i64: 2, 1, 1>, scalar_prefetch = 0 : i64, scratch_operands = 1 : i64, tpu.core_type = #tpu.core_type<tc>, window_params = [{transform_indices = @transform_0, window_bounds = array<i64: 256, 256>}, {transform_indices = @transform_1, window_bounds = array<i64: 256, 128>}, {transform_indices = @transform_2, window_bounds = array<i64: 256, 128>}]} {
    %c0_i32 = arith.constant 0 : i32
    %0 = arith.cmpi eq, %arg2, %c0_i32 : i32
    %1 = arith.extui %0 : i1 to i32
    %c0_i32_0 = arith.constant 0 : i32
    %2 = arith.cmpi ne, %1, %c0_i32_0 : i32
    scf.if %2 {
      %cst_10 = arith.constant 0.000000e+00 : f32
      %12 = vector.broadcast %cst_10 : f32 to vector<256x128xf32>
      %c0_11 = arith.constant 0 : index
      %c0_12 = arith.constant 0 : index
      %13 = vector.load %arg6[%c0_11, %c0_12] : memref<256x128xf32, #tpu.memory_space<vmem>>, vector<256x128xf32>
      tpu.vector_store %arg6[%c0_11, %c0_12], %12 {strides = array<i32>} : memref<256x128xf32, #tpu.memory_space<vmem>>, vector<256x128xf32>,
    } else {
    }
    %c0 = arith.constant 0 : index
    %c0_1 = arith.constant 0 : index
    %3 = vector.load %arg6[%c0, %c0_1] : memref<256x128xf32, #tpu.memory_space<vmem>>, vector<256x128xf32>
    %c0_2 = arith.constant 0 : index
    %c0_3 = arith.constant 0 : index
    %4 = vector.load %arg3[%c0_2, %c0_3] : memref<256x256xbf16, #tpu.memory_space<vmem>>, vector<256x256xbf16>
    %c0_4 = arith.constant 0 : index
    %c0_5 = arith.constant 0 : index
    %5 = vector.load %arg4[%c0_4, %c0_5] : memref<256x128xbf16, #tpu.memory_space<vmem>>, vector<256x128xbf16>
    %cst = arith.constant dense<0.000000e+00> : vector<256x128xf32>
    %6 = tpu.matmul %4, %5, %cst {dimension_numbers = #tpu.dot_dimension_numbers<[1], [0], [0], [1], [0, 0, 1, 1], [], []>} : vector<256x256xbf16>, vector<256x128xbf16>, vector<256x128xf32> -> vector<256x128xf32>
    %7 = arith.addf %3, %6 : vector<256x128xf32>
    %c0_6 = arith.constant 0 : index
    %c0_7 = arith.constant 0 : index
    %8 = vector.load %arg6[%c0_6, %c0_7] : memref<256x128xf32, #tpu.memory_space<vmem>>, vector<256x128xf32>
    tpu.vector_store %arg6[%c0_6, %c0_7], %7 {strides = array<i32>} : memref<256x128xf32, #tpu.memory_space<vmem>>, vector<256x128xf32>,
    %c0_i32_8 = arith.constant 0 : i32
    %9 = arith.cmpi eq, %arg2, %c0_i32_8 : i32
    %10 = arith.extui %9 : i1 to i32
    %c0_i32_9 = arith.constant 0 : i32
    %11 = arith.cmpi ne, %10, %c0_i32_9 : i32
    scf.if %11 {
      %c0_10 = arith.constant 0 : index
      %c0_11 = arith.constant 0 : index
      %12 = vector.load %arg6[%c0_10, %c0_11] : memref<256x128xf32, #tpu.memory_space<vmem>>, vector<256x128xf32>
      %13 = math.tanh %12 : vector<256x128xf32>
      %c0_12 = arith.constant 0 : index
      %c0_13 = arith.constant 0 : index
      %14 = vector.load %arg5[%c0_12, %c0_13] : memref<256x128xf32, #tpu.memory_space<vmem>>, vector<256x128xf32>
      tpu.vector_store %arg5[%c0_12, %c0_13], %13 {strides = array<i32>} : memref<256x128xf32, #tpu.memory_space<vmem>>, vector<256x128xf32>,
    } else {
    }
    return
  }
  func.func @transform_0(%arg0: i32, %arg1: i32, %arg2: i32) -> (i32, i32) {
    %c0_i32 = arith.constant 0 : i32
    return %arg0, %arg2 : i32, i32
  }
  func.func @transform_1(%arg0: i32, %arg1: i32, %arg2: i32) -> (i32, i32) {
    %c0_i32 = arith.constant 0 : i32
    return %arg2, %arg1 : i32, i32
  }
  func.func @transform_2(%arg0: i32, %arg1: i32, %arg2: i32) -> (i32, i32) {
    %c0_i32 = arith.constant 0 : i32
    return %arg0, %arg1 : i32, i32
  }
}

</mosaic_0001>

<bundles_post_ra>
// kernel: generator_forward.34
= control target key start
LH: loop header
LB: loop body
LE: loop exit
PB: predicated region body
PF: predicated region fallthrough
CT: control target
= control target key end

     0   :  { %v210_v0 = vmov 0.0   ;;  %vm211_vm0 = vmmov 0   ;;  %s268_s1 = inlined_call_operand.vmem [shape: bf16[128,128], index: 1, kind: input, shape index: {}]   ;;  %s269_s0 = inlined_call_operand.vmem [shape: bf16[16,128], index: 0, kind: input, shape index: {}]   ;;  %s270_s2 = inlined_call_operand.vmem [shape: f32[1,128], index: 2, kind: input, shape index: {}]   ;;  %s271_s3 = inlined_call_operand.vmem [shape: f32[16,128], index: 3, kind: output, shape index: {}]  }
   0x1   :  { %179 = vmatprep.subr.bf16.mxu0 %v210_v0  ;;  %v201_v1 = vld [vmem:[%s268_s1 + $0x38] sm:$0xff]   ;;  %195 = vmatprep.mubr.msk.bf16.mxu0 %vm211_vm0, %v210_v0  ;;  %v202_v2 = vld [vmem:[%s268_s1 + $0x30] sm:$0xff]   ;;  %v203_v3 = vld [vmem:[%s268_s1 + $0x28] sm:$0xff]  }
   0x2   :  { %180 = vmatpush3.bf16.msra.mxu0 %v201_v1  ;;  %v204_v4 = vld [vmem:[%s268_s1 + $0x20] sm:$0xff]   ;;  %v205_v5 = vld [vmem:[%s268_s1 + $0x18] sm:$0xff]   ;;  %v206_v6 = vld [vmem:[%s268_s1 + $0x10] sm:$0xff]  }
   0x3   :  { %181 = vmatprep.subr.bf16.mxu0 %v210_v0  ;;  %v207_v7 = vld [vmem:[%s268_s1 + $0x8] sm:$0xff]   ;;  %v208_v8 = vld [vmem:[%s268_s1] sm:$0xff]  }
   0x4   :  { %v209_v9 = vld [vmem:[%s269_s0] sm:$0xff]  }
   0x5   :  { %v169_v10 = vld [vmem:[%s270_s2] ss:$0 sm:$0xff] }
   0x6   :  { %182 = vmatpush3.bf16.msra.mxu0 %v202_v2 }
   0x7   :  { %183 = vmatprep.subr.bf16.mxu0 %v210_v0 }
   0xa   :  { %184 = vmatpush3.bf16.msra.mxu0 %v203_v3 }
   0xb   :  { %185 = vmatprep.subr.bf16.mxu0 %v210_v0 }
   0xe   :  { %186 = vmatpush3.bf16.msra.mxu0 %v204_v4 }
   0xf   :  { %187 = vmatprep.subr.bf16.mxu0 %v210_v0 }
  0x12   :  { %188 = vmatpush3.bf16.msra.mxu0 %v205_v5 }
  0x13   :  { %189 = vmatprep.subr.bf16.mxu0 %v210_v0 }
  0x16   :  { %190 = vmatpush3.bf16.msra.mxu0 %v206_v6 }
  0x17   :  { %191 = vmatprep.subr.bf16.mxu0 %v210_v0 }
  0x1a   :  { %192 = vmatpush3.bf16.msra.mxu0 %v207_v7 }
  0x1b   :  { %193 = vmatprep.subr.bf16.mxu0 %v210_v0 }
  0x1e   :  { %194 = vmatpush3.bf16.msra.mxu0 %v208_v8 }
  0x21   :  { %196 = vmatmul.mubr.bf16.vlgmr.msra.gmra.mxu0 %v209_v9 }
  0xe1   :  { %v129_v11 = vpop.f32.mrf.mxu0 }
  0xe2   :  { %v152_v12 = vadd.f32 %v169_v10, %v129_v11 }
  0xe3   :  { %v197_v13 = vpop.f32.mrf.mxu0 }
  0xe4   :  { %154 = vst [vmem:[%s271_s3] sm:$0xff] %v152_v12 }
  0xe5   :  { %v132_v14 = vpop.f32.mrf.mxu0 }
  0xe6   :  { %v153_v15 = vadd.f32 %v169_v10, %v132_v14 }
  0xe7   :  { %v198_v16 = vpop.f32.mrf.mxu0 }
  0xe8   :  { %155 = vst [vmem:[%s271_s3 + $0x8] sm:$0xff] %v153_v15 }

// kernel: generator_forward.35
= control target key start
LH: loop header
LB: loop body
LE: loop exit
PB: predicated region body
PF: predicated region fallthrough
CT: control target
= control target key end

     0   :  { %8 = vsyncpa [#allocation3], 0  ;;  %vm16_vm0 = vcmask 0   ;;  %vm22_vm1 = vcmask 7168   ;;  %v124_v2 = vmov 0.0   ;;  %s158_s0 = inlined_call_operand.vmem [shape: f32[16,1], index: 0, kind: input, shape index: {}]   ;;  %s159_s1 = inlined_call_operand.hbm [shape: f32[1,1], index: 1, kind: output, shape index: {0}]   ;;  %s160_s2 = inlined_call_operand.hbm [shape: f32[1,1], index: 2, kind: output, shape index: {1}]  }
   0x1   :  { %v19_v0 = vld [vmem:[%s158_s0] sm:$0xff]  ;;  %v20_v1 = vld [vmem:[%s158_s0 + $0x8] sm:$0xff]  ;;  %17 = vst.msk [vmem:[#allocation2] sm:$0x1] %vm16_vm0, %v124_v2  ;;  %18 = vst.msk [vmem:[#allocation4] sm:$0x1] %vm16_vm0, %v124_v2 }
   0x2   :  { %v23_v3 = vsel %vm22_vm1, %v19_v0, 0.0  ;;  %v24_v4 = vsel %vm22_vm1, %v20_v1, 0.0  ;;  %v36_v5 = vmul.f32 %v19_v0, %v19_v0  ;;  %v37_v6 = vmul.f32 %v20_v1, %v20_v1 }
   0x3   :  { %9 = vsyncpa [#allocation5], 0  ;;  %v25_v7 = vadd.f32 %v24_v4, %v23_v3  ;;  %s125_s0 = smov [#allocation2]   ;;  %s126_s14 = smov [#allocation4]  }
   0x4   :  { %v38_v8 = vsel %vm22_vm1, %v36_v5, 0.0  ;;  %v39_v9 = vsel %vm22_vm1, %v37_v6, 0.0  ;;  %s55_s13 = sshll.u32 %s125_s0, 4  ;;  %s65_s15 = sshll.u32 %s126_s14, 4  ;;  %s56_s13 = int_to_ptr.vmem [resolvable:$true] %s55_s13  ;;  %s66_s15 = int_to_ptr.vmem [resolvable:$true] %s65_s15 }
   0x5   :  { %v26_v10 = vrot.slane %v25_v7, 4  ;;  %v40_v11 = vadd.f32 %v39_v9, %v38_v8  ;;  %s80_s16 = scalar_lea.vmem %s56_s13, 16  ;;  %s84_s17 = scalar_lea.vmem %s56_s13, 32 }
   0x6   :  { %p81_p0 = scmp.ne.s32.totalorder %s56_s13, %s80_s16  ;;  %p85_p1 = scmp.lt.s32.totalorder %s56_s13, %s56_s13 }
   0x7   :  { %v27_v12 = vadd.f32 %v26_v10, %v25_v7  ;;  %v41_v13 = vrot.slane %v40_v11, 4  ;;  %p86_p2 = scmp.lt.s32.totalorder %s84_s17, %s80_s16 }
   0x8   :  { %v21_v20 = vld [vmem:[#allocation2] sm:$0x1]  ;;  %v35_v23 = vld [vmem:[#allocation4] sm:$0x1] }
   0x9   :  { %v28_v14 = vrot.slane %v27_v12, 2  ;;  %v42_v15 = vadd.f32 %v41_v13, %v40_v11  ;;  %p87_p3 = por %p86_p2, %p85_p1 }
   0xb   :  { %v29_v16 = vadd.f32 %v28_v14, %v27_v12  ;;  %v43_v17 = vrot.slane %v42_v15, 2  ;;  %p88_p4 = pnand %p87_p3, %p81_p0 }
   0xd   :  { %v30_v18 = vrot.slane %v29_v16, 1  ;;  %v44_v19 = vadd.f32 %v43_v17, %v42_v15 }
   0xf   :  { %v31_v21 = vadd.f32 %v30_v18, %v29_v16  ;;  %v45_v22 = vrot.slane %v44_v19, 1 }
  0x11   :  { %v32_v24 = vadd.f32 %v31_v21, %v21_v20  ;;  %v46_v25 = vadd.f32 %v45_v22, %v44_v19 }
  0x13   :  { %34 = vst.msk [vmem:[#allocation2] sm:$0x1] %vm16_vm0, %v32_v24  ;;  %v47_v26 = vadd.f32 %v46_v25, %v35_v23 }
  0x14   :  { %91 = shalt.err (!%p88_p4)
}
  0x15   :  { %58 = dma.vmem_to_hbm [thread:$0]  %s56_s13, 16, %s159_s1, [#allocation3]   ;;  %48 = vst.msk [vmem:[#allocation4] sm:$0x1] %vm16_vm0, %v47_v26 }
  0x16   :  { %s100_s20 = scalar_lea.vmem %s66_s15, 16  ;;  %s104_s21 = scalar_lea.vmem %s66_s15, 32 }
  0x17   :  { %p101_p5 = scmp.ne.s32.totalorder %s66_s15, %s100_s20  ;;  %p105_p6 = scmp.lt.s32.totalorder %s66_s15, %s66_s15 }
  0x18   :  { %p106_p7 = scmp.lt.s32.totalorder %s104_s21, %s100_s20 }
  0x1a   :  { %p107_p8 = por %p106_p7, %p105_p6 }
  0x1c   :  { %p108_p9 = pnand %p107_p8, %p101_p5 }
  0x1e   :  { %111 = shalt.err (!%p108_p9)
}
  0x1f   :  { %68 = dma.vmem_to_hbm [thread:$0]  %s66_s15, 16, %s160_s2, [#allocation5]  }
  0x20   :  { %120 = dma.done.wait [#allocation3], 16  }
  0x21   :  { %121 = vsyncadd [#allocation3], 4294967280 }
  0x22   :  { %122 = dma.done.wait [#allocation5], 16  }
  0x23   :  { %123 = vsyncadd [#allocation5], 4294967280 }
  0x24   :  { %75 = vsyncpa [#allocation3], 1 }
  0x25   :  { %76 = vsyncpa [#allocation5], 1 }

// kernel: generator_forward.36
= control target key start
LH: loop header
LB: loop body
LE: loop exit
PB: predicated region body
PF: predicated region fallthrough
CT: control target
= control target key end

     0   :  { %vm48_vm0 = vcmask 3072   ;;  %s99_s1 = inlined_call_operand.<no memory space> [shape: f32[1,1], index: 1, kind: input, shape index: {}]   ;;  %s100_s2 = inlined_call_operand.<no memory space> [shape: f32[1,1], index: 2, kind: input, shape index: {}]   ;;  %s101_s0 = inlined_call_operand.vmem [shape: f32[16,1], index: 0, kind: input, shape index: {}]   ;;  %s102_s3 = inlined_call_operand.vmem [shape: bf16[16,1], index: 3, kind: output, shape index: {}]  }
   0x1   :  { %v8_v0 = vstv %s99_s1  ;;  %v10_v1 = vstv %s100_s2  ;;  %v18_v2 = vld [vmem:[%s101_s0] sm:$0xff]  ;;  %v19_v3 = vld [vmem:[%s101_s0 + $0x8] sm:$0xff] }
   0x2   :  { %9 = vst [vmem:[#allocation2] sm:$0x1] %v8_v0  ;;  %11 = vst [vmem:[#allocation3] sm:$0x1] %v10_v1 }
   0x9   :  { %v55_v4 = vld [vmem:[#allocation2] ss:$0 sm:$0xff]  ;;  %v56_v5 = vld [vmem:[#allocation3] ss:$0 sm:$0xff] }
   0xa   :  { %v27_v6 = vmul.f32 %v55_v4, %v18_v2  ;;  %v28_v7 = vmul.f32 %v55_v4, %v19_v3 }
   0xc   :  { %v36_v8 = vadd.f32 %v56_v5, %v27_v6  ;;  %v37_v9 = vadd.f32 %v56_v5, %v28_v7 }
   0xe   :  { %v38_v10 = vmax.f32 %v36_v8, 0.0  ;;  %v39_v11 = vmax.f32 %v37_v9, 0.0 }
  0x10   :  { %v59_v12 = vpack.c.bf16 %v38_v10, %v38_v10  ;;  %v60_v13 = vpack.c.bf16 %v39_v11, %v39_v11 }
  0x12   :  { %49 = vst.msk [vmem:[%s102_s3] sm:$0xf] %vm48_vm0, %v59_v12  ;;  %50 = vst.msk [vmem:[%s102_s3 + $0x4] sm:$0xf] %vm48_vm0, %v60_v13 }

// kernel: generator_forward.37
= control target key start
LH: loop header
LB: loop body
LE: loop exit
PB: predicated region body
PF: predicated region fallthrough
CT: control target
= control target key end

     0   :  { %s761_s9 = smov 0   ;;  %s763_s10 = smov 0   ;;  %s858_s0 = inlined_call_operand.vmem [shape: bf16[16,128], index: 0, kind: input, shape index: {}]   ;;  %s859_s1 = inlined_call_operand.vmem [shape: bf16[128,1024], index: 1, kind: input, shape index: {}]   ;;  %s860_s2 = inlined_call_operand.vmem [shape: f32[16,1024], index: 2, kind: output, shape index: {}]  }
   0x1   :  { %s765_s11 = smov 0   ;;  %s767_s12 = smov 0  }
   0x2   :  { %s769_s13 = smov 0  }
   0x3 LB: > { %s27_s14 = sadd.s32 1, %s739_s12  ;;  %s604_s15 = sadd.s32 4294967295, %s743_s13   ;;  %s743_s13 = sphi %s769_s13, %s12_s13   ;;  %s739_s12 = sphi %s767_s12, %s865_s12   ;;  %s735_s11 = sphi %s765_s11, %s864_s11   ;;  %s731_s10 = sphi %s763_s10, %s863_s10   ;;  %s727_s9 = sphi %s761_s9, %s862_s9  }
   0x4   : > { %p29_p0 = scmp.ge.s32.totalorder %s27_s14, 4  ;;  %p75_p1 = scmp.ne.s32.totalorder %s731_s10, %s727_s9 }
   0x5   : > { %p76_p2 = scmp.eq.s32.totalorder %s743_s13, 0  ;;  %p107_p4 = scmp.eq.s32.totalorder %s604_s15, 3 }
   0x6   : > { %s867_s14 = smov (%p29_p0, %s27_s14), 0  ;;  %s68_s17 = sadd.s32 1, %s731_s10 }
   0x7   : > { %p77_p3 = por %p76_p2, %p75_p1  ;;  %s64_s16 = ssub.s32 %s739_s12, %s867_s14 }
   0x8   : > { %p66_p5 = scmp.eq.s32.totalorder %s64_s16, 0  ;;  %p796_p6 = por %p107_p4, %p75_p1 }
   0x9   : > { %p608_p7 = scmp.ge.s32.totalorder %s743_s13, 4 }
   0xa   : > { %s801_s19 = scalar_select %p66_p5, %s731_s10, %s68_s17  }
   0xb   : > { %141 = sbr.rel (%p608_p7) target bundleno = 36 (0x24), region = 20 }
  0x10   : > { %144 = sbr.rel (!%p77_p3) target bundleno = 36 (0x24), region = 24  ;;  %s146_s20 = sand.u32 (%p77_p3), 1, %s731_s10  }
  0x11   : > { %s637_s21 = sshll.u32 (%p77_p3), %s739_s12, 3  ;;  %s609_s22 = sshll.u32 (%p77_p3), %s146_s20, 7 }
  0x12   : > { %s809_s25 = scalar_lea.vmem (%p77_p3), %s859_s1, %s637_s21  ;;  %s148_s26 = scalar_lea.vmem (%p77_p3), [#allocation3], %s609_s22 }
  0x13   : > { %v213_v0 = vld [vmem:[%s809_s25] sm:$0xff] (%p77_p3) }
  0x14   : > { %v215_v1 = vld [vmem:[%s809_s25 + $0x20] sm:$0xff] (%p77_p3)  ;;  %214 = vst [vmem:[%s148_s26] sm:$0xff] (%p77_p3), %v213_v0 }
  0x15   : > { %v217_v2 = vld [vmem:[%s809_s25 + $0x40] sm:$0xff]  ;;  %216 = vst [vmem:[%s148_s26 + $0x8] sm:$0xff] %v215_v1 }
  0x16   : > { %218 = vst [vmem:[%s148_s26 + $0x10] sm:$0xff] %v217_v2  ;;  %v219_v3 = vld [vmem:[%s809_s25 + $0x60] sm:$0xff] }
  0x17   : > { %v221_v4 = vld [vmem:[%s809_s25 + $0x80] sm:$0xff]  ;;  %220 = vst [vmem:[%s148_s26 + $0x18] sm:$0xff] %v219_v3 }
  0x18   : > { %v223_v5 = vld [vmem:[%s809_s25 + $0xa0] sm:$0xff]  ;;  %222 = vst [vmem:[%s148_s26 + $0x20] sm:$0xff] %v221_v4 }
  0x19   : > { %224 = vst [vmem:[%s148_s26 + $0x28] sm:$0xff] %v223_v5  ;;  %v225_v6 = vld [vmem:[%s809_s25 + $0xc0] sm:$0xff] }
  0x1a   : > { %v227_v7 = vld [vmem:[%s809_s25 + $0xe0] sm:$0xff]  ;;  %226 = vst [vmem:[%s148_s26 + $0x30] sm:$0xff] %v225_v6 }
  0x1b   : > { %v229_v8 = vld [vmem:[%s809_s25 + $0x100] sm:$0xff]  ;;  %228 = vst [vmem:[%s148_s26 + $0x38] sm:$0xff] %v227_v7 }
  0x1c   : > { %230 = vst [vmem:[%s148_s26 + $0x40] sm:$0xff] %v229_v8  ;;  %v231_v9 = vld [vmem:[%s809_s25 + $0x120] sm:$0xff] }
  0x1d   : > { %v233_v10 = vld [vmem:[%s809_s25 + $0x140] sm:$0xff]  ;;  %232 = vst [vmem:[%s148_s26 + $0x48] sm:$0xff] %v231_v9 }
  0x1e   : > { %v235_v11 = vld [vmem:[%s809_s25 + $0x160] sm:$0xff]  ;;  %234 = vst [vmem:[%s148_s26 + $0x50] sm:$0xff] %v233_v10 }
  0x1f   : > { %236 = vst [vmem:[%s148_s26 + $0x58] sm:$0xff] %v235_v11  ;;  %v237_v12 = vld [vmem:[%s809_s25 + $0x180] sm:$0xff] }
  0x20   : > { %v239_v13 = vld [vmem:[%s809_s25 + $0x1a0] sm:$0xff]  ;;  %238 = vst [vmem:[%s148_s26 + $0x60] sm:$0xff] %v237_v12 }
  0x21   : > { %v241_v14 = vld [vmem:[%s809_s25 + $0x1c0] sm:$0xff]  ;;  %240 = vst [vmem:[%s148_s26 + $0x68] sm:$0xff] %v239_v13 }
  0x22   : > { %242 = vst [vmem:[%s148_s26 + $0x70] sm:$0xff] %v241_v14  ;;  %v243_v15 = vld [vmem:[%s809_s25 + $0x1e0] sm:$0xff] }
  0x23   : > { %244 = vst [vmem:[%s148_s26 + $0x78] sm:$0xff] %v243_v15 }
  0x24 PF: > { %p612_p8 = scmp.ge.s32.totalorder %s743_s13, 1  ;;  %p249_p9 = scmp.lt.s32.totalorder %s743_s13, 5 }
  0x26   : > { %p250_p10 = pnand %p612_p8, %p249_p9 }
  0x27   : > { %s256_s27 = sand.u32 (!%p250_p10), 1, %s727_s9  }
  0x28   : > { %253 = sbr.rel (%p250_p10) target bundleno = 286 (0x11e), region = 62  ;;  %s613_s28 = sshll.u32 (!%p250_p10), %s256_s27, 7 }
  0x29   : > { %s258_s29 = scalar_lea.vmem (!%p250_p10), [#allocation3], %s613_s28  ;;  %s614_s4 = sshll.u32 (!%p250_p10), %s256_s27, 5 }
  0x2a   : > { %s283_s5 = scalar_lea.vmem (!%p250_p10), [#allocation4], %s614_s4 }
  0x2d   : > { %v745_v16 = vmov 0   ;;  %v680_v17 = vld [vmem:[%s258_s29 + $0x74] ss:$8 sps:$4 sm:$0xff]   ;;  %v682_v18 = vld [vmem:[%s258_s29 + $0x70] ss:$8 sps:$4 sm:$0xff]   ;;  %v704_v33 = vld [vmem:[%s858_s0] sm:$0xff]  }
  0x2e   : > { %446 = vmatprep.mubr.bf16.mxu0 %v745_v16  ;;  %414 = vmatprep.subr.bf16.mxu0 %v680_v17  ;;  %v683_v19 = vld [vmem:[%s258_s29 + $0x64] ss:$8 sps:$4 sm:$0xff]   ;;  %v685_v20 = vld [vmem:[%s258_s29 + $0x60] ss:$8 sps:$4 sm:$0xff]   ;;  %v686_v21 = vld [vmem:[%s258_s29 + $0x54] ss:$8 sps:$4 sm:$0xff]  }
  0x2f   : > { %415 = vmatpush1.bf16.msra.mxu0 %v682_v18  ;;  %v688_v22 = vld [vmem:[%s258_s29 + $0x50] ss:$8 sps:$4 sm:$0xff]   ;;  %v689_v23 = vld [vmem:[%s258_s29 + $0x44] ss:$8 sps:$4 sm:$0xff]   ;;  %v691_v24 = vld [vmem:[%s258_s29 + $0x40] ss:$8 sps:$4 sm:$0xff]  }
  0x30   : > { %416 = vmatprep.subr.bf16.mxu0 %v683_v19  ;;  %v692_v25 = vld [vmem:[%s258_s29 + $0x34] ss:$8 sps:$4 sm:$0xff]   ;;  %v694_v26 = vld [vmem:[%s258_s29 + $0x30] ss:$8 sps:$4 sm:$0xff]   ;;  %v695_v27 = vld [vmem:[%s258_s29 + $0x24] ss:$8 sps:$4 sm:$0xff]  }
  0x31   : > { %v697_v28 = vld [vmem:[%s258_s29 + $0x20] ss:$8 sps:$4 sm:$0xff]   ;;  %v698_v29 = vld [vmem:[%s258_s29 + $0x14] ss:$8 sps:$4 sm:$0xff]   ;;  %v700_v30 = vld [vmem:[%s258_s29 + $0x10] ss:$8 sps:$4 sm:$0xff]  }
  0x32   : > { %v701_v31 = vld [vmem:[%s258_s29 + $0x4] ss:$8 sps:$4 sm:$0xff]   ;;  %v703_v32 = vld [vmem:[%s258_s29] ss:$8 sps:$4 sm:$0xff]   ;;  %s638_s6 = sshll.u32 (%p796_p6), %s735_s11, 4 }
  0x33   : > { %417 = vmatpush1.bf16.msra.mxu0 %v685_v20  ;;  %s488_s9 = scalar_lea.vmem (%p796_p6), %s860_s2, %s638_s6 }
  0x34   : > { %418 = vmatprep.subr.bf16.mxu0 %v686_v21 }
  0x37   : > { %419 = vmatpush1.bf16.msra.mxu0 %v688_v22 }
  0x38   : > { %420 = vmatprep.subr.bf16.mxu0 %v689_v23 }
  0x3b   : > { %421 = vmatpush1.bf16.msra.mxu0 %v691_v24 }
  0x3c   : > { %422 = vmatprep.subr.bf16.mxu0 %v692_v25 }
  0x3f   : > { %423 = vmatpush1.bf16.msra.mxu0 %v694_v26 }
  0x40   : > { %424 = vmatprep.subr.bf16.mxu0 %v695_v27 }
  0x43   : > { %425 = vmatpush1.bf16.msra.mxu0 %v697_v28 }
  0x44   : > { %426 = vmatprep.subr.bf16.mxu0 %v698_v29 }
  0x47   : > { %427 = vmatpush1.bf16.msra.mxu0 %v700_v30 }
  0x48   : > { %428 = vmatprep.subr.bf16.mxu0 %v701_v31 }
  0x4b   : > { %429 = vmatpush1.bf16.msra.mxu0 %v703_v32 }
  0x4e   : > { %447 = vmatmul.mubr.bf16.vlgmr.msra.gmra.mxu0 %v704_v33 }
 0x10e   : > { %v448_v34 = vpop.f32.mrf.mxu0 }
 0x10f   : > { %472 = vst [vmem:[%s283_s5] sm:$0xff] %v448_v34 }
 0x110   : > { %v450_v35 = vpop.f32.mrf.mxu0 }
 0x111   : > { %473 = vst [vmem:[%s283_s5 + $0x8] sm:$0xff] %v450_v35  ;;  %482 = sbr.rel (!%p796_p6) target bundleno = 286 (0x11e), region = 78 }
 0x112   : > { %v452_v36 = vpop.f32.mrf.mxu0 }
 0x113   : > { %474 = vst [vmem:[%s283_s5 + $0x10] sm:$0xff] %v452_v36 }
 0x114   : > { %v454_v37 = vpop.f32.mrf.mxu0 }
 0x115   : > { %475 = vst [vmem:[%s283_s5 + $0x18] sm:$0xff] %v454_v37 }
 0x116   : > { %v501_v38 = vld [vmem:[%s283_s5] sm:$0xff] }
 0x117   : > { %502 = vst [vmem:[%s488_s9] sm:$0xff] %v501_v38 }
 0x118   : > { %v503_v39 = vld [vmem:[%s283_s5 + $0x8] sm:$0xff] }
 0x119   : > { %504 = vst [vmem:[%s488_s9 + $0x8] sm:$0xff] %v503_v39 }
 0x11a   : > { %v505_v40 = vld [vmem:[%s283_s5 + $0x10] sm:$0xff] }
 0x11b   : > { %506 = vst [vmem:[%s488_s9 + $0x40] sm:$0xff] %v505_v40 }
 0x11c   : > { %v507_v41 = vld [vmem:[%s283_s5 + $0x18] sm:$0xff] }
 0x11d   : > { %508 = vst [vmem:[%s488_s9 + $0x48] sm:$0xff] %v507_v41 }
 0x11e PF: > { %s12_s13 = sadd.s32 1, %s743_s13   ;;  %s862_s9 = smov %s731_s10 }
 0x11f   : > { %p9_p11 = scmp.ge.s32.totalorder %s12_s13, 6   ;;  %s863_s10 = smov %s801_s19 }
 0x120   : > { %s864_s11 = smov %s739_s12  ;;  %s865_s12 = smov %s867_s14 }
 0x121   :  { %11 = sbr.rel (!%p9_p11) target bundleno = 3 (0x3), region = 135 }

// kernel: generator_forward.39
= control target key start
LH: loop header
LB: loop body
LE: loop exit
PB: predicated region body
PF: predicated region fallthrough
CT: control target
= control target key end

     0   :  { %v32_v0 = vlaneseq  ;;  %s346_s1 = inlined_call_operand.vmem [shape: f32[1,1024], index: 1, kind: input, shape index: {}]   ;;  %s347_s2 = inlined_call_operand.vmem [shape: f32[1,1024], index: 2, kind: input, shape index: {}]   ;;  %s348_s0 = inlined_call_operand.vmem [shape: f32[16,1024], index: 0, kind: input, shape index: {}]   ;;  %s349_s3 = inlined_call_operand.vmem [shape: bf16[16,1024], index: 3, kind: output, shape index: {}]  }
   0x1   :  { %v30_v2 = vld [vmem:[%s346_s1] sm:$0xff]  ;;  %v15_v9 = vld [vmem:[%s348_s0 + $0x8] sm:$0xff]  ;;  %v16_v18 = vld [vmem:[%s348_s0 + $0x10] sm:$0xff] }
   0x2   :  { %v258_v1 = vshrl.u32 %v32_v0, 7  ;;  %v88_v3 = vld [vmem:[%s347_s2] sm:$0xff]  ;;  %v17_v19 = vld [vmem:[%s348_s0 + $0x18] sm:$0xff]  ;;  %v19_v25 = vld [vmem:[%s348_s0 + $0x28] sm:$0xff] }
   0x3   :  { %v14_v8 = vld [vmem:[%s348_s0] sm:$0xff]  ;;  %v20_v38 = vld [vmem:[%s348_s0 + $0x30] sm:$0xff]  ;;  %v21_v39 = vld [vmem:[%s348_s0 + $0x38] sm:$0xff] }
   0x4   :  { %v34_v4 = vsub.s32 0, %v258_v1  ;;  %v38_v5 = vsub.s32 1, %v258_v1  ;;  %v42_v6 = vsub.s32 2, %v258_v1  ;;  %v46_v7 = vsub.s32 3, %v258_v1  ;;  %v18_v24 = vld [vmem:[%s348_s0 + $0x20] sm:$0xff]  ;;  %v23_v49 = vld [vmem:[%s348_s0 + $0x48] sm:$0xff] }
   0x5   :  { %v50_v10 = vsub.s32 4, %v258_v1  ;;  %v54_v11 = vsub.s32 5, %v258_v1  ;;  %v58_v12 = vsub.s32 6, %v258_v1  ;;  %v62_v13 = vsub.s32 7, %v258_v1  ;;  %v22_v48 = vld [vmem:[%s348_s0 + $0x40] sm:$0xff]  ;;  %v24_v54 = vld [vmem:[%s348_s0 + $0x50] sm:$0xff] }
   0x6   :  { %v35_v14 = vrot.slane %v30_v2, %v34_v4  ;;  %v39_v15 = vrot.slane %v30_v2, %v38_v5  ;;  %v93_v16 = vrot.slane %v88_v3, %v34_v4  ;;  %v97_v17 = vrot.slane %v88_v3, %v38_v5  ;;  %v25_v55 = vld [vmem:[%s348_s0 + $0x58] sm:$0xff]  ;;  %v26_v60 = vld [vmem:[%s348_s0 + $0x60] sm:$0xff]  ;;  %v27_v1 = vld [vmem:[%s348_s0 + $0x68] sm:$0xff] }
   0x7   :  { %v43_v20 = vrot.slane %v30_v2, %v42_v6  ;;  %v47_v21 = vrot.slane %v30_v2, %v46_v7  ;;  %v101_v22 = vrot.slane %v88_v3, %v42_v6  ;;  %v105_v23 = vrot.slane %v88_v3, %v46_v7 }
   0x8   :  { %v72_v26 = vmul.f32 %v35_v14, %v14_v8  ;;  %v73_v27 = vmul.f32 %v39_v15, %v15_v9  ;;  %v51_v28 = vrot.slane %v30_v2, %v50_v10  ;;  %v55_v29 = vrot.slane %v30_v2, %v54_v11 }
   0x9   :  { %v74_v30 = vmul.f32 %v43_v20, %v16_v18  ;;  %v75_v31 = vmul.f32 %v47_v21, %v17_v19  ;;  %v109_v32 = vrot.slane %v88_v3, %v50_v10  ;;  %v113_v33 = vrot.slane %v88_v3, %v54_v11  ;;  %v28_v10 = vld [vmem:[%s348_s0 + $0x70] sm:$0xff] }
   0xa   :  { %v130_v34 = vadd.f32 %v93_v16, %v72_v26  ;;  %v131_v35 = vadd.f32 %v97_v17, %v73_v27  ;;  %v76_v36 = vmul.f32 %v51_v28, %v18_v24  ;;  %v77_v37 = vmul.f32 %v55_v29, %v19_v25 }
   0xb   :  { %v132_v40 = vadd.f32 %v101_v22, %v74_v30  ;;  %v133_v41 = vadd.f32 %v105_v23, %v75_v31  ;;  %v59_v42 = vrot.slane %v30_v2, %v58_v12  ;;  %v63_v43 = vrot.slane %v30_v2, %v62_v13 }
   0xc   :  { %v146_v44 = vmax.f32 %v130_v34, 0.0  ;;  %v147_v45 = vmax.f32 %v131_v35, 0.0  ;;  %v134_v46 = vadd.f32 %v109_v32, %v76_v36  ;;  %v135_v47 = vadd.f32 %v113_v33, %v77_v37 }
   0xd   :  { %v148_v50 = vmax.f32 %v132_v40, 0.0  ;;  %v149_v51 = vmax.f32 %v133_v41, 0.0  ;;  %v78_v52 = vmul.f32 %v59_v42, %v20_v38  ;;  %v79_v53 = vmul.f32 %v63_v43, %v21_v39 }
   0xe   :  { %v230_v56 = vpack.c.bf16 %v147_v45, %v146_v44  ;;  %v150_v57 = vmax.f32 %v134_v46, 0.0  ;;  %v151_v58 = vmax.f32 %v135_v47, 0.0  ;;  %v117_v59 = vrot.slane %v88_v3, %v58_v12 }
   0xf   :  { %v231_v61 = vpack.c.bf16 %v149_v51, %v148_v50  ;;  %v121_v62 = vrot.slane %v88_v3, %v62_v13  ;;  %v80_v63 = vmul.f32 %v35_v14, %v22_v48  ;;  %v81_v0 = vmul.f32 %v39_v15, %v23_v49  ;;  %v29_v15 = vld [vmem:[%s348_s0 + $0x78] sm:$0xff] }
  0x10   :  { %210 = vst [vmem:[%s349_s3] sm:$0xff] %v230_v56  ;;  %v232_v2 = vpack.c.bf16 %v151_v58, %v150_v57  ;;  %v136_v4 = vadd.f32 %v117_v59, %v78_v52  ;;  %v82_v5 = vmul.f32 %v43_v20, %v24_v54  ;;  %v83_v6 = vmul.f32 %v47_v21, %v25_v55 }
  0x11   :  { %211 = vst [vmem:[%s349_s3 + $0x8] sm:$0xff] %v231_v61  ;;  %v137_v7 = vadd.f32 %v121_v62, %v79_v53  ;;  %v138_v3 = vadd.f32 %v93_v16, %v80_v63  ;;  %v139_v8 = vadd.f32 %v97_v17, %v81_v0  ;;  %v84_v9 = vmul.f32 %v51_v28, %v26_v60 }
  0x12   :  { %212 = vst [vmem:[%s349_s3 + $0x10] sm:$0xff] %v232_v2  ;;  %v152_v11 = vmax.f32 %v136_v4, 0.0  ;;  %v140_v12 = vadd.f32 %v101_v22, %v82_v5  ;;  %v141_v13 = vadd.f32 %v105_v23, %v83_v6  ;;  %v85_v14 = vmul.f32 %v55_v29, %v27_v1 }
  0x13   :  { %v153_v18 = vmax.f32 %v137_v7, 0.0  ;;  %v154_v16 = vmax.f32 %v138_v3, 0.0  ;;  %v155_v17 = vmax.f32 %v139_v8, 0.0  ;;  %v142_v19 = vadd.f32 %v109_v32, %v84_v9 }
  0x14   :  { %v156_v20 = vmax.f32 %v140_v12, 0.0  ;;  %v157_v21 = vmax.f32 %v141_v13, 0.0  ;;  %v143_v24 = vadd.f32 %v113_v33, %v85_v14  ;;  %v86_v25 = vmul.f32 %v59_v42, %v28_v10 }
  0x15   :  { %v233_v26 = vpack.c.bf16 %v153_v18, %v152_v11  ;;  %v234_v27 = vpack.c.bf16 %v155_v17, %v154_v16  ;;  %v158_v28 = vmax.f32 %v142_v19, 0.0  ;;  %v87_v30 = vmul.f32 %v63_v43, %v29_v15 }
  0x16   :  { %v235_v31 = vpack.c.bf16 %v157_v21, %v156_v20  ;;  %v159_v22 = vmax.f32 %v143_v24, 0.0  ;;  %v144_v23 = vadd.f32 %v117_v59, %v86_v25 }
  0x17   :  { %213 = vst [vmem:[%s349_s3 + $0x18] sm:$0xff] %v233_v26  ;;  %214 = vst [vmem:[%s349_s3 + $0x20] sm:$0xff] %v234_v27  ;;  %v145_v29 = vadd.f32 %v121_v62, %v87_v30 }
  0x18   :  { %215 = vst [vmem:[%s349_s3 + $0x28] sm:$0xff] %v235_v31  ;;  %v236_v32 = vpack.c.bf16 %v159_v22, %v158_v28  ;;  %v160_v33 = vmax.f32 %v144_v23, 0.0 }
  0x19   :  { %v161_v34 = vmax.f32 %v145_v29, 0.0 }
  0x1a   :  { %216 = vst [vmem:[%s349_s3 + $0x30] sm:$0xff] %v236_v32 }
  0x1b   :  { %v237_v35 = vpack.c.bf16 %v161_v34, %v160_v33 }
  0x1d   :  { %217 = vst [vmem:[%s349_s3 + $0x38] sm:$0xff] %v237_v35 }

// kernel: generator_forward.38
= control target key start
LH: loop header
LB: loop body
LE: loop exit
PB: predicated region body
PF: predicated region fallthrough
CT: control target
= control target key end

     0   :  { %v104_v0 = vlaneseq  ;;  %v292_v4 = vmov 1966171168   ;;  %s438_s0 = inlined_call_operand.vmem [shape: f32[16,1024], index: 0, kind: input, shape index: {}]   ;;  %s439_s1 = inlined_call_operand.vmem [shape: f32[1,1024], index: 1, kind: output, shape index: {0}]   ;;  %s440_s2 = inlined_call_operand.vmem [shape: f32[1,1024], index: 2, kind: output, shape index: {1}]  }
   0x1   :  { %v16_v1 = vld [vmem:[%s438_s0] sm:$0xff]  ;;  %v17_v2 = vld [vmem:[%s438_s0 + $0x8] sm:$0xff]  ;;  %v18_v3 = vld [vmem:[%s438_s0 + $0x10] sm:$0xff]  ;;  %v102_v5 = vunpack.c.l.s4 %v292_v4 }
   0x2   :  { %v19_v6 = vld [vmem:[%s438_s0 + $0x18] sm:$0xff]  ;;  %v20_v7 = vld [vmem:[%s438_s0 + $0x20] sm:$0xff]  ;;  %v21_v8 = vld [vmem:[%s438_s0 + $0x28] sm:$0xff]  ;;  %v105_v9 = vshrl.u32 %v104_v0, 7  ;;  %v326_v10 = vmul.f32 %v16_v1, %v16_v1  ;;  %v328_v11 = vmul.f32 %v17_v2, %v17_v2  ;;  %v330_v12 = vmul.f32 %v18_v3, %v18_v3 }
   0x3   :  { %v22_v13 = vld [vmem:[%s438_s0 + $0x30] sm:$0xff]  ;;  %v23_v14 = vld [vmem:[%s438_s0 + $0x38] sm:$0xff]  ;;  %v24_v15 = vld [vmem:[%s438_s0 + $0x40] sm:$0xff]  ;;  %v103_v16 = vunpack.c.0.s8 %v102_v5  ;;  %v341_v17 = vmul.f32 %v19_v6, %v19_v6  ;;  %v343_v18 = vmul.f32 %v20_v7, %v20_v7  ;;  %v345_v19 = vmul.f32 %v21_v8, %v21_v8 }
   0x4   :  { %v350_v20 = vld [vmem:[%s438_s0 + $0x48] sm:$0xff]  ;;  %v355_v21 = vld [vmem:[%s438_s0 + $0x50] sm:$0xff]  ;;  %v360_v22 = vld [vmem:[%s438_s0 + $0x58] sm:$0xff]  ;;  %v33_v23 = vadd.f32 %v24_v15, %v16_v1  ;;  %v362_v24 = vmul.f32 %v22_v13, %v22_v13  ;;  %v364_v25 = vmul.f32 %v23_v14, %v23_v14  ;;  %v366_v26 = vmul.f32 %v24_v15, %v24_v15 }
   0x5   :  { %v371_v27 = vld [vmem:[%s438_s0 + $0x60] sm:$0xff]  ;;  %v376_v28 = vld [vmem:[%s438_s0 + $0x68] sm:$0xff]  ;;  %v381_v29 = vld [vmem:[%s438_s0 + $0x70] sm:$0xff]  ;;  %v40_v30 = vadd.f32 %v350_v20, %v17_v2  ;;  %v47_v31 = vadd.f32 %v355_v21, %v18_v3  ;;  %v54_v32 = vadd.f32 %v360_v22, %v19_v6  ;;  %v386_v33 = vsub.s32 %v103_v16, %v105_v9 }
   0x6   :  { %v391_v34 = vld [vmem:[%s438_s0 + $0x78] sm:$0xff]  ;;  %v34_v35 = vrot.slane %v33_v23, 4  ;;  %v61_v36 = vadd.f32 %v371_v27, %v20_v7  ;;  %v68_v37 = vadd.f32 %v376_v28, %v21_v8  ;;  %v75_v38 = vadd.f32 %v381_v29, %v22_v13 }
   0x7   :  { %v41_v39 = vrot.slane %v40_v30, 4  ;;  %v48_v40 = vrot.slane %v47_v31, 4  ;;  %v55_v41 = vrot.slane %v54_v32, 4  ;;  %v82_v42 = vadd.f32 %v391_v34, %v23_v14 }
   0x8   :  { %v35_v43 = vadd.f32 %v34_v35, %v33_v23  ;;  %v62_v44 = vrot.slane %v61_v36, 4  ;;  %v69_v45 = vrot.slane %v68_v37, 4  ;;  %v76_v46 = vrot.slane %v75_v38, 4 }
   0x9   :  { %v42_v47 = vadd.f32 %v41_v39, %v40_v30  ;;  %v49_v48 = vadd.f32 %v48_v40, %v47_v31  ;;  %v56_v49 = vadd.f32 %v55_v41, %v54_v32  ;;  %v83_v50 = vrot.slane %v82_v42, 4 }
   0xa   :  { %v36_v51 = vrot.slane %v35_v43, 2  ;;  %v63_v52 = vadd.f32 %v62_v44, %v61_v36  ;;  %v70_v53 = vadd.f32 %v69_v45, %v68_v37  ;;  %v77_v54 = vadd.f32 %v76_v46, %v75_v38 }
   0xb   :  { %v43_v55 = vrot.slane %v42_v47, 2  ;;  %v50_v56 = vrot.slane %v49_v48, 2  ;;  %v57_v57 = vrot.slane %v56_v49, 2  ;;  %v84_v58 = vadd.f32 %v83_v50, %v82_v42 }
   0xc   :  { %v37_v59 = vadd.f32 %v36_v51, %v35_v43  ;;  %v64_v60 = vrot.slane %v63_v52, 2  ;;  %v71_v61 = vrot.slane %v70_v53, 2  ;;  %v78_v62 = vrot.slane %v77_v54, 2 }
   0xd   :  { %v44_v63 = vadd.f32 %v43_v55, %v42_v47  ;;  %v51_v0 = vadd.f32 %v50_v56, %v49_v48  ;;  %v58_v1 = vadd.f32 %v57_v57, %v56_v49  ;;  %v85_v2 = vrot.slane %v84_v58, 2 }
   0xe   :  { %v38_v3 = vrot.slane %v37_v59, 1  ;;  %v65_v4 = vadd.f32 %v64_v60, %v63_v52  ;;  %v72_v5 = vadd.f32 %v71_v61, %v70_v53  ;;  %v79_v6 = vadd.f32 %v78_v62, %v77_v54 }
   0xf   :  { %v45_v7 = vrot.slane %v44_v63, 1  ;;  %v52_v8 = vrot.slane %v51_v0, 1  ;;  %v59_v9 = vrot.slane %v58_v1, 1  ;;  %v86_v13 = vadd.f32 %v85_v2, %v84_v58 }
  0x10   :  { %v39_v14 = vadd.f32 %v38_v3, %v37_v59  ;;  %v66_v15 = vrot.slane %v65_v4, 1  ;;  %v73_v16 = vrot.slane %v72_v5, 1  ;;  %v80_v23 = vrot.slane %v79_v6, 1 }
  0x11   :  { %v46_v30 = vadd.f32 %v45_v7, %v44_v63  ;;  %v53_v31 = vadd.f32 %v52_v8, %v51_v0  ;;  %v60_v32 = vadd.f32 %v59_v9, %v58_v1  ;;  %v87_v35 = vrot.slane %v86_v13, 1 }
  0x12   :  { %v67_v36 = vadd.f32 %v66_v15, %v65_v4  ;;  %v74_v37 = vadd.f32 %v73_v16, %v72_v5  ;;  %v81_v38 = vadd.f32 %v80_v23, %v79_v6  ;;  %v159_v39 = vmul.f32 %v350_v20, %v350_v20 }
  0x13   :  { %v88_v40 = vadd.f32 %v87_v35, %v86_v13  ;;  %v97_v41 = vcombine.low %v39_v14, %v46_v30  ;;  %v98_v42 = vcombine.low %v53_v31, %v60_v32  ;;  %v160_v43 = vmul.f32 %v355_v21, %v355_v21 }
  0x14   :  { %v99_v44 = vcombine.low %v67_v36, %v74_v37  ;;  %v161_v45 = vmul.f32 %v360_v22, %v360_v22  ;;  %v162_v46 = vmul.f32 %v371_v27, %v371_v27  ;;  %v163_v47 = vmul.f32 %v376_v28, %v376_v28 }
  0x15   :  { %v100_v48 = vcombine.low %v81_v38, %v88_v40  ;;  %v107_v49 = vrot.slane %v97_v41, %v386_v33  ;;  %v114_v20 = vrot.slane %v98_v42, %v386_v33  ;;  %v164_v50 = vmul.f32 %v381_v29, %v381_v29 }
  0x16   :  { %v121_v21 = vrot.slane %v99_v44, %v386_v33  ;;  %v165_v51 = vmul.f32 %v391_v34, %v391_v34  ;;  %v166_v22 = vadd.f32 %v366_v26, %v326_v10  ;;  %v173_v27 = vadd.f32 %v159_v39, %v328_v11 }
  0x17   :  { %v128_v28 = vrot.slane %v100_v48, %v386_v33  ;;  %v129_v52 = vcombine.low %v107_v49, %v114_v20  ;;  %v180_v53 = vadd.f32 %v160_v43, %v330_v12  ;;  %v187_v54 = vadd.f32 %v161_v45, %v341_v17 }
  0x18   :  { %v167_v55 = vrot.slane %v166_v22, 4  ;;  %v174_v56 = vrot.slane %v173_v27, 4  ;;  %v194_v29 = vadd.f32 %v162_v46, %v343_v18  ;;  %v201_v57 = vadd.f32 %v163_v47, %v345_v19 }
  0x19   :  { %v130_v58 = vcombine.low %v121_v21, %v128_v28  ;;  %v137_v34 = vrot.slane %v129_v52, %v386_v33  ;;  %v181_v59 = vrot.slane %v180_v53, 4  ;;  %v188_v10 = vrot.slane %v187_v54, 4 }
  0x1a   :  { %v168_v26 = vadd.f32 %v167_v55, %v166_v22  ;;  %v175_v11 = vadd.f32 %v174_v56, %v173_v27  ;;  %v195_v60 = vrot.slane %v194_v29, 4  ;;  %v202_v61 = vrot.slane %v201_v57, 4 }
  0x1b   :  { %v144_v62 = vrot.slane %v130_v58, %v386_v33  ;;  %v182_v12 = vadd.f32 %v181_v59, %v180_v53  ;;  %v189_v63 = vadd.f32 %v188_v10, %v187_v54  ;;  %v208_v17 = vadd.f32 %v164_v50, %v362_v24 }
  0x1c   :  { %v169_v0 = vrot.slane %v168_v26, 2  ;;  %v176_v1 = vrot.slane %v175_v11, 2  ;;  %v196_v18 = vadd.f32 %v195_v60, %v194_v29  ;;  %v203_v2 = vadd.f32 %v202_v61, %v201_v57 }
  0x1d   :  { %v145_v19 = vcombine.low %v137_v34, %v144_v62  ;;  %v183_v3 = vrot.slane %v182_v12, 2  ;;  %v190_v4 = vrot.slane %v189_v63, 2  ;;  %v209_v5 = vrot.slane %v208_v17, 4 }
  0x1e   :  { %v170_v6 = vadd.f32 %v169_v0, %v168_v26  ;;  %v177_v7 = vadd.f32 %v176_v1, %v175_v11  ;;  %v197_v8 = vrot.slane %v196_v18, 2  ;;  %v204_v9 = vrot.slane %v203_v2, 2 }
  0x1f   :  { %v184_v13 = vadd.f32 %v183_v3, %v182_v12  ;;  %v191_v14 = vadd.f32 %v190_v4, %v189_v63  ;;  %v210_v15 = vadd.f32 %v209_v5, %v208_v17  ;;  %148 = vst [vmem:[%s439_s1] sm:$0xff] %v145_v19  ;;  %v215_v36 = vadd.f32 %v165_v51, %v364_v25 }
  0x20   :  { %v171_v16 = vrot.slane %v170_v6, 1  ;;  %v178_v23 = vrot.slane %v177_v7, 1  ;;  %v198_v30 = vadd.f32 %v197_v8, %v196_v18  ;;  %v205_v31 = vadd.f32 %v204_v9, %v203_v2 }
  0x21   :  { %v185_v24 = vrot.slane %v184_v13, 1  ;;  %v192_v32 = vrot.slane %v191_v14, 1  ;;  %v211_v35 = vrot.slane %v210_v15, 2  ;;  %v216_v44 = vrot.slane %v215_v36, 4 }
  0x22   :  { %v172_v37 = vadd.f32 %v171_v16, %v170_v6  ;;  %v179_v38 = vadd.f32 %v178_v23, %v177_v7  ;;  %v199_v39 = vrot.slane %v198_v30, 1  ;;  %v206_v40 = vrot.slane %v205_v31, 1 }
  0x23   :  { %v186_v41 = vadd.f32 %v185_v24, %v184_v13  ;;  %v193_v42 = vadd.f32 %v192_v32, %v191_v14  ;;  %v212_v43 = vadd.f32 %v211_v35, %v210_v15  ;;  %v217_v45 = vadd.f32 %v216_v44, %v215_v36 }
  0x24   :  { %v200_v46 = vadd.f32 %v199_v39, %v198_v30  ;;  %v207_v47 = vadd.f32 %v206_v40, %v205_v31  ;;  %v230_v20 = vcombine.low %v172_v37, %v179_v38 }
  0x25   :  { %v213_v48 = vrot.slane %v212_v43, 1  ;;  %v218_v49 = vrot.slane %v217_v45, 2  ;;  %v231_v50 = vcombine.low %v186_v41, %v193_v42 }
  0x26   :  { %v232_v22 = vcombine.low %v200_v46, %v207_v47  ;;  %v240_v25 = vrot.slane %v230_v20, %v386_v33 }
  0x27   :  { %v219_v21 = vadd.f32 %v218_v49, %v217_v45  ;;  %v214_v27 = vadd.f32 %v213_v48, %v212_v43  ;;  %v247_v51 = vrot.slane %v231_v50, %v386_v33 }
  0x28   :  { %v254_v54 = vrot.slane %v232_v22, %v386_v33 }
  0x29   :  { %v220_v28 = vrot.slane %v219_v21, 1  ;;  %v262_v55 = vcombine.low %v240_v25, %v247_v51 }
  0x2b   :  { %v221_v52 = vadd.f32 %v220_v28, %v219_v21  ;;  %v270_v57 = vrot.slane %v262_v55, %v386_v33 }
  0x2d   :  { %v233_v53 = vcombine.low %v214_v27, %v221_v52 }
  0x2f   :  { %v261_v56 = vrot.slane %v233_v53, %v386_v33 }
  0x31   :  { %v263_v29 = vcombine.low %v254_v54, %v261_v56 }
  0x33   :  { %v277_v58 = vrot.slane %v263_v29, %v386_v33 }
  0x35   :  { %v278_v34 = vcombine.low %v270_v57, %v277_v58 }
  0x37   :  { %281 = vst [vmem:[%s440_s2] sm:$0xff] %v278_v34 }

// kernel: generator_forward.40
= control target key start
LH: loop header
LB: loop body
LE: loop exit
PB: predicated region body
PF: predicated region fallthrough
CT: control target
= control target key end

     0   :  { %s1932_s0 = inlined_call_operand.vmem [shape: bf16[16,4096], index: 0, kind: input, shape index: {}]   ;;  %s1933_s1 = inlined_call_operand.vmem [shape: bf16[4096,512], index: 1, kind: input, shape index: {}]   ;;  %s1934_s2 = inlined_call_operand.vmem [shape: f32[16,512], index: 2, kind: output, shape index: {}]  }
   0x1   :  { %1935 = sst [smem:[#allocation6_spill]] %s1932_s0 }
   0x2   :  { %s1558_s9 = smov 0   ;;  %s1560_s10 = smov 0  }
   0x3   :  { %s1562_s11 = smov 0   ;;  %s1564_s12 = smov 0  }
   0x4   :  { %s1566_s13 = smov 0   ;;  %s1568_s14 = smov 0  }
   0x5   :  { %s1570_s15 = smov 0   ;;  %s1572_s16 = smov 0  }
   0x6   :  { %s1574_s17 = smov 0   ;;  %s1576_s18 = smov 0  }
   0x7   :  { %s1578_s19 = smov 0  }
   0x8 LB: > { %s1169_s20 = sadd.s32 4294967295, %s1540_s19   ;;  %s24_s21 = sadd.s32 1, %s1532_s17  ;;  %s1540_s19 = sphi %s1578_s19, %s12_s19   ;;  %s1536_s18 = sphi %s1576_s18, %s1949_s18   ;;  %s1532_s17 = sphi %s1574_s17, %s1948_s17   ;;  %s1528_s16 = sphi %s1572_s16, %s1947_s16   ;;  %s1524_s15 = sphi %s1570_s15, %s1946_s15   ;;  %s1520_s14 = sphi %s1568_s14, %s1945_s14   ;;  %s1516_s13 = sphi %s1566_s13, %s1944_s13   ;;  %s1512_s12 = sphi %s1564_s12, %s1943_s12   ;;  %s1508_s11 = sphi %s1562_s11, %s1942_s11   ;;  %s1504_s10 = sphi %s1560_s10, %s1941_s10   ;;  %s1500_s9 = sphi %s1558_s9, %s1940_s9  }
   0x9   : > { %p25_p0 = scmp.ge.s32.totalorder %s24_s21, 8  ;;  %s27_s22 = sadd.s32 1, %s1536_s18 }
   0xa   : > { %s40_s23 = sadd.s32 1, %s1520_s14  ;;  %p47_p1 = scmp.ne.s32.totalorder %s1520_s14, %s1516_s13 }
   0xb   : > { %s1951_s21 = smov (%p25_p0, %s24_s21), 0  ;;  %s1953_s22 = smov (!%p25_p0, %s27_s22), %s1536_s18 }
   0xc   : > { %s36_s24 = ssub.s32 %s1532_s17, %s1951_s21  ;;  %p48_p2 = scmp.eq.s32.totalorder %s1540_s19, 0 }
   0xd   : > { %p29_p3 = scmp.ge.s32.totalorder %s1953_s22, 2  ;;  %p38_p4 = scmp.eq.s32.totalorder %s36_s24, 0 }
   0xe   : > { %p1625_p5 = por %p48_p2, %p47_p1  ;;  %s68_s26 = sadd.s32 1, %s1512_s12 }
   0xf   : > { %s1955_s22 = smov (%p29_p3, %s1953_s22), 0  ;;  %p75_p6 = scmp.ne.s32.totalorder %s1512_s12, %s1508_s11 }
  0x10   : > { %s1633_s27 = scalar_select %p38_p4, %s1520_s14, %s40_s23  }
  0x11   : > { %s64_s28 = ssub.s32 %s1536_s18, %s1955_s22  ;;  %p1639_p9 = por %p75_p6, %p48_p2 }
  0x12   : > { %s65_s29 = sor.u32 %s64_s28, %s36_s24  ;;  %p94_p7 = scmp.eq.s32.totalorder %s64_s28, 0 }
  0x13   : > { %p66_p8 = scmp.eq.s32.totalorder %s65_s29, 0  ;;  %s96_s3 = sadd.s32 1, %s1504_s10 }
  0x14   : > { %p106_p10 = scmp.ne.s32.totalorder %s1504_s10, %s1500_s9  ;;  %p107_p11 = scmp.eq.s32.totalorder %s1169_s20, 15 }
  0x15   : > { %s1647_s4 = scalar_select %p66_p8, %s1512_s12, %s68_s26  }
  0x16   : > { %s1650_s5 = scalar_select %p94_p7, %s1504_s10, %s96_s3  }
  0x17   : > { %p1652_p12 = por %p107_p11, %p106_p10  ;;  %p1172_p13 = scmp.ge.s32.totalorder %s1540_s19, 16 }
  0x19   : > { %129 = sbr.rel (%p1172_p13) target bundleno = 81 (0x51), region = 16 }
  0x1e   : > { %132 = sbr.rel (!%p1625_p5) target bundleno = 42 (0x2a), region = 20  ;;  %s134_s7 = sand.u32 (%p1625_p5), 1, %s1520_s14  }
  0x1f   : > { %s1260_s8 = sshll.u32 (%p1625_p5), %s1532_s17, 4  ;;  %s1173_s23 = sshll.u32 (%p1625_p5), %s134_s7, 5 }
  0x20   : > { %s1939_s0 = sld [smem:[#allocation6_spill]] (%p1625_p5)  ;;  %s136_s20 = scalar_lea.vmem (%p1625_p5), [#allocation3], %s1173_s23 }
  0x26   : > { %s142_s28 = scalar_lea.vmem %s1939_s0, %s1260_s8 }
  0x27   : > { %v155_v0 = vld [vmem:[%s142_s28] sm:$0xff]  ;;  %v157_v1 = vld [vmem:[%s142_s28 + $0x8] sm:$0xff] }
  0x28   : > { %v159_v2 = vld [vmem:[%s142_s28 + $0x80] sm:$0xff]  ;;  %156 = vst [vmem:[%s136_s20] sm:$0xff] %v155_v0  ;;  %158 = vst [vmem:[%s136_s20 + $0x8] sm:$0xff] %v157_v1  ;;  %v161_v3 = vld [vmem:[%s142_s28 + $0x88] sm:$0xff] }
  0x29   : > { %160 = vst [vmem:[%s136_s20 + $0x10] sm:$0xff] %v159_v2  ;;  %162 = vst [vmem:[%s136_s20 + $0x18] sm:$0xff] %v161_v3 }
  0x2a PF: > { %168 = sbr.rel (!%p1639_p9) target bundleno = 81 (0x51), region = 43  ;;  %s170_s25 = sand.u32 (%p1639_p9), 1, %s1512_s12  }
  0x2b   : > { %s1178_s29 = sshll.u32 (%p1639_p9), %s1536_s18, 1  ;;  %s1176_s3 = sshll.u32 (%p1639_p9), %s170_s25, 9 }
  0x2c   : > { %s1261_s7 = sshll.u32 (%p1639_p9), %s1532_s17, 8  ;;  %s1677_s30 = scalar_lea.vmem (%p1639_p9), [#allocation4], %s1176_s3 }
  0x2d   : > { %s176_s8 = sadd.s32 (%p1639_p9), %s1261_s7, %s1178_s29 }
  0x2e   : > { %s1180_s24 = sshll.u32 (%p1639_p9), %s176_s8, 2 }
  0x2f   : > { %s1672_s0 = scalar_lea.vmem %s1933_s1, %s1180_s24 }
  0x30   : > { %v333_v4 = vld [vmem:[%s1672_s0] sm:$0xff]  ;;  %v335_v5 = vld [vmem:[%s1672_s0 + $0x10] sm:$0xff] }
  0x31   : > { %v337_v6 = vld [vmem:[%s1672_s0 + $0x20] sm:$0xff]  ;;  %334 = vst [vmem:[%s1677_s30] sm:$0xff] %v333_v4  ;;  %336 = vst [vmem:[%s1677_s30 + $0x8] sm:$0xff] %v335_v5  ;;  %v339_v7 = vld [vmem:[%s1672_s0 + $0x30] sm:$0xff] }
  0x32   : > { %338 = vst [vmem:[%s1677_s30 + $0x10] sm:$0xff] %v337_v6  ;;  %v341_v8 = vld [vmem:[%s1672_s0 + $0x40] sm:$0xff]  ;;  %v343_v9 = vld [vmem:[%s1672_s0 + $0x50] sm:$0xff]  ;;  %340 = vst [vmem:[%s1677_s30 + $0x18] sm:$0xff] %v339_v7 }
  0x33   : > { %342 = vst [vmem:[%s1677_s30 + $0x20] sm:$0xff] %v341_v8  ;;  %344 = vst [vmem:[%s1677_s30 + $0x28] sm:$0xff] %v343_v9  ;;  %v345_v10 = vld [vmem:[%s1672_s0 + $0x60] sm:$0xff]  ;;  %v347_v11 = vld [vmem:[%s1672_s0 + $0x70] sm:$0xff] }
  0x34   : > { %v349_v12 = vld [vmem:[%s1672_s0 + $0x80] sm:$0xff]  ;;  %346 = vst [vmem:[%s1677_s30 + $0x30] sm:$0xff] %v345_v10  ;;  %348 = vst [vmem:[%s1677_s30 + $0x38] sm:$0xff] %v347_v11  ;;  %v351_v13 = vld [vmem:[%s1672_s0 + $0x90] sm:$0xff] }
  0x35   : > { %350 = vst [vmem:[%s1677_s30 + $0x40] sm:$0xff] %v349_v12  ;;  %v353_v14 = vld [vmem:[%s1672_s0 + $0xa0] sm:$0xff]  ;;  %v355_v15 = vld [vmem:[%s1672_s0 + $0xb0] sm:$0xff]  ;;  %352 = vst [vmem:[%s1677_s30 + $0x48] sm:$0xff] %v351_v13 }
  0x36   : > { %354 = vst [vmem:[%s1677_s30 + $0x50] sm:$0xff] %v353_v14  ;;  %356 = vst [vmem:[%s1677_s30 + $0x58] sm:$0xff] %v355_v15  ;;  %v357_v16 = vld [vmem:[%s1672_s0 + $0xc0] sm:$0xff]  ;;  %v359_v17 = vld [vmem:[%s1672_s0 + $0xd0] sm:$0xff] }
  0x37   : > { %v361_v18 = vld [vmem:[%s1672_s0 + $0xe0] sm:$0xff]  ;;  %358 = vst [vmem:[%s1677_s30 + $0x60] sm:$0xff] %v357_v16  ;;  %360 = vst [vmem:[%s1677_s30 + $0x68] sm:$0xff] %v359_v17  ;;  %v363_v19 = vld [vmem:[%s1672_s0 + $0xf0] sm:$0xff] }
  0x38   : > { %362 = vst [vmem:[%s1677_s30 + $0x70] sm:$0xff] %v361_v18  ;;  %v365_v20 = vld [vmem:[%s1672_s0 + $0x100] sm:$0xff]  ;;  %v367_v21 = vld [vmem:[%s1672_s0 + $0x110] sm:$0xff]  ;;  %364 = vst [vmem:[%s1677_s30 + $0x78] sm:$0xff] %v363_v19 }
  0x39   : > { %366 = vst [vmem:[%s1677_s30 + $0x80] sm:$0xff] %v365_v20  ;;  %368 = vst [vmem:[%s1677_s30 + $0x88] sm:$0xff] %v367_v21  ;;  %v369_v22 = vld [vmem:[%s1672_s0 + $0x120] sm:$0xff]  ;;  %v371_v23 = vld [vmem:[%s1672_s0 + $0x130] sm:$0xff] }
  0x3a   : > { %v373_v24 = vld [vmem:[%s1672_s0 + $0x140] sm:$0xff]  ;;  %370 = vst [vmem:[%s1677_s30 + $0x90] sm:$0xff] %v369_v22  ;;  %372 = vst [vmem:[%s1677_s30 + $0x98] sm:$0xff] %v371_v23  ;;  %v375_v25 = vld [vmem:[%s1672_s0 + $0x150] sm:$0xff] }
  0x3b   : > { %374 = vst [vmem:[%s1677_s30 + $0xa0] sm:$0xff] %v373_v24  ;;  %v377_v26 = vld [vmem:[%s1672_s0 + $0x160] sm:$0xff]  ;;  %v379_v27 = vld [vmem:[%s1672_s0 + $0x170] sm:$0xff]  ;;  %376 = vst [vmem:[%s1677_s30 + $0xa8] sm:$0xff] %v375_v25 }
  0x3c   : > { %378 = vst [vmem:[%s1677_s30 + $0xb0] sm:$0xff] %v377_v26  ;;  %380 = vst [vmem:[%s1677_s30 + $0xb8] sm:$0xff] %v379_v27  ;;  %v381_v28 = vld [vmem:[%s1672_s0 + $0x180] sm:$0xff]  ;;  %v383_v29 = vld [vmem:[%s1672_s0 + $0x190] sm:$0xff] }
  0x3d   : > { %v385_v30 = vld [vmem:[%s1672_s0 + $0x1a0] sm:$0xff]  ;;  %382 = vst [vmem:[%s1677_s30 + $0xc0] sm:$0xff] %v381_v28  ;;  %384 = vst [vmem:[%s1677_s30 + $0xc8] sm:$0xff] %v383_v29  ;;  %v387_v31 = vld [vmem:[%s1672_s0 + $0x1b0] sm:$0xff] }
  0x3e   : > { %386 = vst [vmem:[%s1677_s30 + $0xd0] sm:$0xff] %v385_v30  ;;  %v389_v32 = vld [vmem:[%s1672_s0 + $0x1c0] sm:$0xff]  ;;  %v391_v33 = vld [vmem:[%s1672_s0 + $0x1d0] sm:$0xff]  ;;  %388 = vst [vmem:[%s1677_s30 + $0xd8] sm:$0xff] %v387_v31 }
  0x3f   : > { %390 = vst [vmem:[%s1677_s30 + $0xe0] sm:$0xff] %v389_v32  ;;  %392 = vst [vmem:[%s1677_s30 + $0xe8] sm:$0xff] %v391_v33  ;;  %v393_v34 = vld [vmem:[%s1672_s0 + $0x1e0] sm:$0xff]  ;;  %v395_v35 = vld [vmem:[%s1672_s0 + $0x1f0] sm:$0xff] }
  0x40   : > { %v397_v36 = vld [vmem:[%s1672_s0 + $0x200] sm:$0xff]  ;;  %394 = vst [vmem:[%s1677_s30 + $0xf0] sm:$0xff] %v393_v34  ;;  %396 = vst [vmem:[%s1677_s30 + $0xf8] sm:$0xff] %v395_v35  ;;  %v399_v37 = vld [vmem:[%s1672_s0 + $0x210] sm:$0xff] }
  0x41   : > { %398 = vst [vmem:[%s1677_s30 + $0x100] sm:$0xff] %v397_v36  ;;  %v401_v38 = vld [vmem:[%s1672_s0 + $0x220] sm:$0xff]  ;;  %v403_v39 = vld [vmem:[%s1672_s0 + $0x230] sm:$0xff]  ;;  %400 = vst [vmem:[%s1677_s30 + $0x108] sm:$0xff] %v399_v37 }
  0x42   : > { %402 = vst [vmem:[%s1677_s30 + $0x110] sm:$0xff] %v401_v38  ;;  %404 = vst [vmem:[%s1677_s30 + $0x118] sm:$0xff] %v403_v39  ;;  %v405_v40 = vld [vmem:[%s1672_s0 + $0x240] sm:$0xff]  ;;  %v407_v41 = vld [vmem:[%s1672_s0 + $0x250] sm:$0xff] }
  0x43   : > { %v409_v42 = vld [vmem:[%s1672_s0 + $0x260] sm:$0xff]  ;;  %406 = vst [vmem:[%s1677_s30 + $0x120] sm:$0xff] %v405_v40  ;;  %408 = vst [vmem:[%s1677_s30 + $0x128] sm:$0xff] %v407_v41  ;;  %v411_v43 = vld [vmem:[%s1672_s0 + $0x270] sm:$0xff] }
  0x44   : > { %410 = vst [vmem:[%s1677_s30 + $0x130] sm:$0xff] %v409_v42  ;;  %v413_v44 = vld [vmem:[%s1672_s0 + $0x280] sm:$0xff]  ;;  %v415_v45 = vld [vmem:[%s1672_s0 + $0x290] sm:$0xff]  ;;  %412 = vst [vmem:[%s1677_s30 + $0x138] sm:$0xff] %v411_v43 }
  0x45   : > { %414 = vst [vmem:[%s1677_s30 + $0x140] sm:$0xff] %v413_v44  ;;  %416 = vst [vmem:[%s1677_s30 + $0x148] sm:$0xff] %v415_v45  ;;  %v417_v46 = vld [vmem:[%s1672_s0 + $0x2a0] sm:$0xff]  ;;  %v419_v47 = vld [vmem:[%s1672_s0 + $0x2b0] sm:$0xff] }
  0x46   : > { %v421_v48 = vld [vmem:[%s1672_s0 + $0x2c0] sm:$0xff]  ;;  %418 = vst [vmem:[%s1677_s30 + $0x150] sm:$0xff] %v417_v46  ;;  %420 = vst [vmem:[%s1677_s30 + $0x158] sm:$0xff] %v419_v47  ;;  %v423_v49 = vld [vmem:[%s1672_s0 + $0x2d0] sm:$0xff] }
  0x47   : > { %422 = vst [vmem:[%s1677_s30 + $0x160] sm:$0xff] %v421_v48  ;;  %v425_v50 = vld [vmem:[%s1672_s0 + $0x2e0] sm:$0xff]  ;;  %v427_v51 = vld [vmem:[%s1672_s0 + $0x2f0] sm:$0xff]  ;;  %424 = vst [vmem:[%s1677_s30 + $0x168] sm:$0xff] %v423_v49 }
  0x48   : > { %426 = vst [vmem:[%s1677_s30 + $0x170] sm:$0xff] %v425_v50  ;;  %428 = vst [vmem:[%s1677_s30 + $0x178] sm:$0xff] %v427_v51  ;;  %v429_v52 = vld [vmem:[%s1672_s0 + $0x300] sm:$0xff]  ;;  %v431_v53 = vld [vmem:[%s1672_s0 + $0x310] sm:$0xff] }
  0x49   : > { %v433_v54 = vld [vmem:[%s1672_s0 + $0x320] sm:$0xff]  ;;  %430 = vst [vmem:[%s1677_s30 + $0x180] sm:$0xff] %v429_v52  ;;  %432 = vst [vmem:[%s1677_s30 + $0x188] sm:$0xff] %v431_v53  ;;  %v435_v55 = vld [vmem:[%s1672_s0 + $0x330] sm:$0xff] }
  0x4a   : > { %434 = vst [vmem:[%s1677_s30 + $0x190] sm:$0xff] %v433_v54  ;;  %v437_v56 = vld [vmem:[%s1672_s0 + $0x340] sm:$0xff]  ;;  %v439_v57 = vld [vmem:[%s1672_s0 + $0x350] sm:$0xff]  ;;  %436 = vst [vmem:[%s1677_s30 + $0x198] sm:$0xff] %v435_v55 }
  0x4b   : > { %438 = vst [vmem:[%s1677_s30 + $0x1a0] sm:$0xff] %v437_v56  ;;  %440 = vst [vmem:[%s1677_s30 + $0x1a8] sm:$0xff] %v439_v57  ;;  %v441_v58 = vld [vmem:[%s1672_s0 + $0x360] sm:$0xff]  ;;  %v443_v59 = vld [vmem:[%s1672_s0 + $0x370] sm:$0xff] }
  0x4c   : > { %v445_v60 = vld [vmem:[%s1672_s0 + $0x380] sm:$0xff]  ;;  %442 = vst [vmem:[%s1677_s30 + $0x1b0] sm:$0xff] %v441_v58  ;;  %444 = vst [vmem:[%s1677_s30 + $0x1b8] sm:$0xff] %v443_v59  ;;  %v447_v61 = vld [vmem:[%s1672_s0 + $0x390] sm:$0xff] }
  0x4d   : > { %446 = vst [vmem:[%s1677_s30 + $0x1c0] sm:$0xff] %v445_v60  ;;  %v449_v62 = vld [vmem:[%s1672_s0 + $0x3a0] sm:$0xff]  ;;  %v451_v63 = vld [vmem:[%s1672_s0 + $0x3b0] sm:$0xff]  ;;  %448 = vst [vmem:[%s1677_s30 + $0x1c8] sm:$0xff] %v447_v61 }
  0x4e   : > { %450 = vst [vmem:[%s1677_s30 + $0x1d0] sm:$0xff] %v449_v62  ;;  %452 = vst [vmem:[%s1677_s30 + $0x1d8] sm:$0xff] %v451_v63  ;;  %v453_v0 = vld [vmem:[%s1672_s0 + $0x3c0] sm:$0xff]  ;;  %v455_v1 = vld [vmem:[%s1672_s0 + $0x3d0] sm:$0xff] }
  0x4f   : > { %v457_v2 = vld [vmem:[%s1672_s0 + $0x3e0] sm:$0xff]  ;;  %454 = vst [vmem:[%s1677_s30 + $0x1e0] sm:$0xff] %v453_v0  ;;  %456 = vst [vmem:[%s1677_s30 + $0x1e8] sm:$0xff] %v455_v1  ;;  %v459_v3 = vld [vmem:[%s1672_s0 + $0x3f0] sm:$0xff] }
  0x50   : > { %458 = vst [vmem:[%s1677_s30 + $0x1f0] sm:$0xff] %v457_v2  ;;  %460 = vst [vmem:[%s1677_s30 + $0x1f8] sm:$0xff] %v459_v3 }
  0x51 PF: > { %p1181_p0 = scmp.ge.s32.totalorder %s1540_s19, 1  ;;  %p465_p1 = scmp.lt.s32.totalorder %s1540_s19, 17 }
  0x53   : > { %p466_p2 = pnand %p1181_p0, %p465_p1 }
  0x54   : > { %s472_s28 = sand.u32 (!%p466_p2), 1, %s1516_s13   ;;  %s479_s20 = sand.u32 (!%p466_p2), 1, %s1508_s11  }
  0x55   : > { %469 = sbr.rel (%p466_p2) target bundleno = 385 (0x181), region = 81  ;;  %s1182_s25 = sshll.u32 (!%p466_p2), %s472_s28, 5 }
  0x56   : > { %s1183_s29 = sshll.u32 (!%p466_p2), %s479_s20, 9  ;;  %s500_s3 = sand.u32 (!%p466_p2), 1, %s1500_s9  }
  0x57   : > { %s1184_s7 = sshll.u32 (!%p466_p2), %s500_s3, 5  ;;  %s1809_s8 = scalar_lea.vmem (!%p466_p2), [#allocation3], %s1182_s25 }
  0x58   : > { %s1811_s0 = scalar_lea.vmem (!%p466_p2), [#allocation4], %s1183_s29  ;;  %s1813_s24 = scalar_lea.vmem (!%p466_p2), [#allocation5], %s1184_s7 }
  0x59   : > { %p1185_p3 = scmp.ne.s32.totalorder (!%p466_p2), %s1524_s15, 0 }
  0x5b   : > { %512 = sbr.rel (%p1185_p3) target bundleno = 99 (0x63), region = 93 }
  0x60   : > { %v1542_v4 = vmov 0.0  }
  0x61   : > { %513 = vst [vmem:[#allocation2 + $0x10] sm:$0xff] %v1542_v4  ;;  %514 = vst [vmem:[#allocation2] sm:$0xff] %v1542_v4 }
  0x62   : > { %515 = vst [vmem:[#allocation2 + $0x18] sm:$0xff] %v1542_v4  ;;  %516 = vst [vmem:[#allocation2 + $0x8] sm:$0xff] %v1542_v4 }
  0x63 PF: > { %v1352_v5 = vld [vmem:[%s1811_s0 + $0x74] ss:$8 sps:$4 sm:$0xff]   ;;  %v1356_v7 = vld [vmem:[%s1811_s0 + $0x70] ss:$8 sps:$4 sm:$0xff]   ;;  %v1358_v9 = vld [vmem:[%s1811_s0 + $0x64] ss:$8 sps:$4 sm:$0xff]  }
  0x64   : > { %v1354_v6 = vld [vmem:[%s1811_s0 + $0x174] ss:$8 sps:$4 sm:$0xff]   ;;  %929 = vmatprep.subr.bf16.mxu0 %v1352_v5  ;;  %v1357_v8 = vld [vmem:[%s1811_s0 + $0x170] ss:$8 sps:$4 sm:$0xff]   ;;  %v1360_v10 = vld [vmem:[%s1811_s0 + $0x164] ss:$8 sps:$4 sm:$0xff]  }
  0x65   : > { %972 = vmatprep.subr.bf16.mxu1 %v1354_v6  ;;  %930 = vmatpush1.bf16.msra.mxu0 %v1356_v7  ;;  %v1362_v11 = vld [vmem:[%s1811_s0 + $0x60] ss:$8 sps:$4 sm:$0xff]   ;;  %v1364_v13 = vld [vmem:[%s1811_s0 + $0x54] ss:$8 sps:$4 sm:$0xff]   ;;  %v1368_v15 = vld [vmem:[%s1811_s0 + $0x50] ss:$8 sps:$4 sm:$0xff]  }
  0x66   : > { %973 = vmatpush1.bf16.msra.mxu1 %v1357_v8  ;;  %931 = vmatprep.subr.bf16.mxu0 %v1358_v9  ;;  %v1363_v12 = vld [vmem:[%s1811_s0 + $0x160] ss:$8 sps:$4 sm:$0xff]   ;;  %v1366_v14 = vld [vmem:[%s1811_s0 + $0x154] ss:$8 sps:$4 sm:$0xff]   ;;  %v1369_v16 = vld [vmem:[%s1811_s0 + $0x150] ss:$8 sps:$4 sm:$0xff]  }
  0x67   : > { %974 = vmatprep.subr.bf16.mxu1 %v1360_v10  ;;  %v1370_v17 = vld [vmem:[%s1811_s0 + $0x44] ss:$8 sps:$4 sm:$0xff]   ;;  %v1374_v19 = vld [vmem:[%s1811_s0 + $0x40] ss:$8 sps:$4 sm:$0xff]   ;;  %v1376_v21 = vld [vmem:[%s1811_s0 + $0x34] ss:$8 sps:$4 sm:$0xff]  }
  0x68   : > { %v1372_v18 = vld [vmem:[%s1811_s0 + $0x144] ss:$8 sps:$4 sm:$0xff]   ;;  %v1375_v20 = vld [vmem:[%s1811_s0 + $0x140] ss:$8 sps:$4 sm:$0xff]   ;;  %v1378_v22 = vld [vmem:[%s1811_s0 + $0x134] ss:$8 sps:$4 sm:$0xff]  }
  0x69   : > { %932 = vmatpush1.bf16.msra.mxu0 %v1362_v11  ;;  %v1380_v23 = vld [vmem:[%s1811_s0 + $0x30] ss:$8 sps:$4 sm:$0xff]   ;;  %v1382_v25 = vld [vmem:[%s1811_s0 + $0x24] ss:$8 sps:$4 sm:$0xff]   ;;  %v1386_v27 = vld [vmem:[%s1811_s0 + $0x20] ss:$8 sps:$4 sm:$0xff]  }
  0x6a   : > { %975 = vmatpush1.bf16.msra.mxu1 %v1363_v12  ;;  %933 = vmatprep.subr.bf16.mxu0 %v1364_v13  ;;  %v1381_v24 = vld [vmem:[%s1811_s0 + $0x130] ss:$8 sps:$4 sm:$0xff]   ;;  %v1384_v26 = vld [vmem:[%s1811_s0 + $0x124] ss:$8 sps:$4 sm:$0xff]   ;;  %v1387_v28 = vld [vmem:[%s1811_s0 + $0x120] ss:$8 sps:$4 sm:$0xff]  }
  0x6b   : > { %976 = vmatprep.subr.bf16.mxu1 %v1366_v14  ;;  %v1388_v29 = vld [vmem:[%s1811_s0 + $0x14] ss:$8 sps:$4 sm:$0xff]   ;;  %v1392_v31 = vld [vmem:[%s1811_s0 + $0x10] ss:$8 sps:$4 sm:$0xff]   ;;  %v1394_v33 = vld [vmem:[%s1811_s0 + $0x4] ss:$8 sps:$4 sm:$0xff]  }
  0x6c   : > { %v1390_v30 = vld [vmem:[%s1811_s0 + $0x114] ss:$8 sps:$4 sm:$0xff]   ;;  %v1393_v32 = vld [vmem:[%s1811_s0 + $0x110] ss:$8 sps:$4 sm:$0xff]   ;;  %v1396_v34 = vld [vmem:[%s1811_s0 + $0x104] ss:$8 sps:$4 sm:$0xff]  }
  0x6d   : > { %934 = vmatpush1.bf16.msra.mxu0 %v1368_v15  ;;  %v1398_v35 = vld [vmem:[%s1811_s0] ss:$8 sps:$4 sm:$0xff]   ;;  %v1400_v37 = vld [vmem:[%s1811_s0 + $0xf4] ss:$8 sps:$4 sm:$0xff]   ;;  %v1404_v39 = vld [vmem:[%s1811_s0 + $0xf0] ss:$8 sps:$4 sm:$0xff]  }
  0x6e   : > { %977 = vmatpush1.bf16.msra.mxu1 %v1369_v16  ;;  %935 = vmatprep.subr.bf16.mxu0 %v1370_v17  ;;  %v1399_v36 = vld [vmem:[%s1811_s0 + $0x100] ss:$8 sps:$4 sm:$0xff]   ;;  %v1402_v38 = vld [vmem:[%s1811_s0 + $0x1f4] ss:$8 sps:$4 sm:$0xff]   ;;  %v1405_v40 = vld [vmem:[%s1811_s0 + $0x1f0] ss:$8 sps:$4 sm:$0xff]  }
  0x6f   : > { %978 = vmatprep.subr.bf16.mxu1 %v1372_v18  ;;  %v1406_v41 = vld [vmem:[%s1811_s0 + $0xe4] ss:$8 sps:$4 sm:$0xff]   ;;  %v1410_v43 = vld [vmem:[%s1811_s0 + $0xe0] ss:$8 sps:$4 sm:$0xff]   ;;  %v1412_v45 = vld [vmem:[%s1811_s0 + $0xd4] ss:$8 sps:$4 sm:$0xff]  }
  0x70   : > { %v1408_v42 = vld [vmem:[%s1811_s0 + $0x1e4] ss:$8 sps:$4 sm:$0xff]   ;;  %v1411_v44 = vld [vmem:[%s1811_s0 + $0x1e0] ss:$8 sps:$4 sm:$0xff]   ;;  %v1414_v46 = vld [vmem:[%s1811_s0 + $0x1d4] ss:$8 sps:$4 sm:$0xff]  }
  0x71   : > { %936 = vmatpush1.bf16.msra.mxu0 %v1374_v19  ;;  %v1416_v47 = vld [vmem:[%s1811_s0 + $0xd0] ss:$8 sps:$4 sm:$0xff]   ;;  %v1418_v49 = vld [vmem:[%s1811_s0 + $0xc4] ss:$8 sps:$4 sm:$0xff]   ;;  %v1422_v51 = vld [vmem:[%s1811_s0 + $0xc0] ss:$8 sps:$4 sm:$0xff]  }
  0x72   : > { %979 = vmatpush1.bf16.msra.mxu1 %v1375_v20  ;;  %937 = vmatprep.subr.bf16.mxu0 %v1376_v21  ;;  %v1417_v48 = vld [vmem:[%s1811_s0 + $0x1d0] ss:$8 sps:$4 sm:$0xff]   ;;  %v1420_v50 = vld [vmem:[%s1811_s0 + $0x1c4] ss:$8 sps:$4 sm:$0xff]   ;;  %v1423_v53 = vld [vmem:[%s1811_s0 + $0x1c0] ss:$8 sps:$4 sm:$0xff]  }
  0x73   : > { %980 = vmatprep.subr.bf16.mxu1 %v1378_v22  ;;  %v1450_v52 = vld [vmem:[%s1809_s8 + $0x4] ss:$16 sps:$4 sm:$0xff]   ;;  %v1453_v56 = vld [vmem:[%s1809_s8 + $0xc] ss:$16 sps:$4 sm:$0xff]   ;;  %v1428_v57 = vld [vmem:[%s1811_s0 + $0xb0] ss:$8 sps:$4 sm:$0xff]  }
  0x74   : > { %v1424_v54 = vld [vmem:[%s1811_s0 + $0xb4] ss:$8 sps:$4 sm:$0xff]   ;;  %961 = vmatprep.mubr.bf16.mxu0 %v1450_v52  ;;  %1004 = vmatprep.mubr.bf16.mxu1 %v1453_v56  ;;  %v1429_v58 = vld [vmem:[%s1811_s0 + $0x1b0] ss:$8 sps:$4 sm:$0xff]   ;;  %v1430_v59 = vld [vmem:[%s1811_s0 + $0xa4] ss:$8 sps:$4 sm:$0xff]  }
  0x75   : > { %938 = vmatpush1.bf16.msra.mxu0 %v1380_v23  ;;  %v1426_v55 = vld [vmem:[%s1811_s0 + $0x1b4] ss:$8 sps:$4 sm:$0xff]   ;;  %v1432_v60 = vld [vmem:[%s1811_s0 + $0x1a4] ss:$8 sps:$4 sm:$0xff]   ;;  %v1434_v61 = vld [vmem:[%s1811_s0 + $0xa0] ss:$8 sps:$4 sm:$0xff]  }
  0x76   : > { %981 = vmatpush1.bf16.msra.mxu1 %v1381_v24  ;;  %939 = vmatprep.subr.bf16.mxu0 %v1382_v25  ;;  %v1435_v62 = vld [vmem:[%s1811_s0 + $0x1a0] ss:$8 sps:$4 sm:$0xff]   ;;  %v1436_v63 = vld [vmem:[%s1811_s0 + $0x94] ss:$8 sps:$4 sm:$0xff]   ;;  %v1440_v1 = vld [vmem:[%s1811_s0 + $0x90] ss:$8 sps:$4 sm:$0xff]  }
  0x77   : > { %982 = vmatprep.subr.bf16.mxu1 %v1384_v26  ;;  %v1438_v0 = vld [vmem:[%s1811_s0 + $0x194] ss:$8 sps:$4 sm:$0xff]   ;;  %v1441_v2 = vld [vmem:[%s1811_s0 + $0x190] ss:$8 sps:$4 sm:$0xff]   ;;  %v1442_v3 = vld [vmem:[%s1811_s0 + $0x84] ss:$8 sps:$4 sm:$0xff]  }
  0x78   : > { %v1444_v4 = vld [vmem:[%s1811_s0 + $0x184] ss:$8 sps:$4 sm:$0xff]   ;;  %v1446_v5 = vld [vmem:[%s1811_s0 + $0x80] ss:$8 sps:$4 sm:$0xff]   ;;  %v517_v10 = vld [vmem:[#allocation2 + $0x10] sm:$0xff]  ;;  %p1254_p4 = scmp.ne.s32.totalorder %s1524_s15, 7 }
  0x79   : > { %940 = vmatpush1.bf16.msra.mxu0 %v1386_v27  ;;  %v1447_v6 = vld [vmem:[%s1811_s0 + $0x180] ss:$8 sps:$4 sm:$0xff]   ;;  %v519_v19 = vld [vmem:[#allocation2 + $0x18] sm:$0xff] }
  0x7a   : > { %983 = vmatpush1.bf16.msra.mxu1 %v1387_v28  ;;  %941 = vmatprep.subr.bf16.mxu0 %v1388_v29  ;;  %v1448_v7 = vld [vmem:[%s1809_s8] ss:$16 sps:$4 sm:$0xff]   ;;  %v1451_v8 = vld [vmem:[%s1809_s8 + $0x8] ss:$16 sps:$4 sm:$0xff]  }
  0x7b   : > { %984 = vmatprep.subr.bf16.mxu1 %v1390_v30  ;;  %v518_v14 = vld [vmem:[#allocation2] sm:$0xff]  ;;  %v520_v24 = vld [vmem:[#allocation2 + $0x8] sm:$0xff] }
  0x7d   : > { %942 = vmatpush1.bf16.msra.mxu0 %v1392_v31 }
  0x7e   : > { %985 = vmatpush1.bf16.msra.mxu1 %v1393_v32  ;;  %943 = vmatprep.subr.bf16.mxu0 %v1394_v33 }
  0x7f   : > { %986 = vmatprep.subr.bf16.mxu1 %v1396_v34 }
  0x81   : > { %944 = vmatpush1.bf16.msra.mxu0 %v1398_v35 }
  0x82   : > { %987 = vmatpush1.bf16.msra.mxu1 %v1399_v36  ;;  %945 = vmatprep.subr.bf16.mxu0 %v1400_v37 }
  0x83   : > { %988 = vmatprep.subr.bf16.mxu1 %v1402_v38 }
  0x85   : > { %946 = vmatpush2.bf16.msra.mxu0 %v1404_v39 }
  0x86   : > { %989 = vmatpush2.bf16.msra.mxu1 %v1405_v40  ;;  %947 = vmatprep.subr.bf16.mxu0 %v1406_v41 }
  0x87   : > { %990 = vmatprep.subr.bf16.mxu1 %v1408_v42 }
  0x89   : > { %948 = vmatpush2.bf16.msra.mxu0 %v1410_v43 }
  0x8a   : > { %991 = vmatpush2.bf16.msra.mxu1 %v1411_v44  ;;  %949 = vmatprep.subr.bf16.mxu0 %v1412_v45 }
  0x8b   : > { %992 = vmatprep.subr.bf16.mxu1 %v1414_v46 }
  0x8d   : > { %950 = vmatpush2.bf16.msra.mxu0 %v1416_v47 }
  0x8e   : > { %993 = vmatpush2.bf16.msra.mxu1 %v1417_v48  ;;  %951 = vmatprep.subr.bf16.mxu0 %v1418_v49 }
  0x8f   : > { %994 = vmatprep.subr.bf16.mxu1 %v1420_v50 }
  0x91   : > { %952 = vmatpush2.bf16.msra.mxu0 %v1422_v51 }
  0x92   : > { %995 = vmatpush2.bf16.msra.mxu1 %v1423_v53  ;;  %953 = vmatprep.subr.bf16.mxu0 %v1424_v54 }
  0x93   : > { %996 = vmatprep.subr.bf16.mxu1 %v1426_v55 }
  0x95   : > { %954 = vmatpush2.bf16.msra.mxu0 %v1428_v57 }
  0x96   : > { %997 = vmatpush2.bf16.msra.mxu1 %v1429_v58  ;;  %955 = vmatprep.subr.bf16.mxu0 %v1430_v59 }
  0x97   : > { %998 = vmatprep.subr.bf16.mxu1 %v1432_v60 }
  0x99   : > { %956 = vmatpush2.bf16.msra.mxu0 %v1434_v61 }
  0x9a   : > { %999 = vmatpush2.bf16.msra.mxu1 %v1435_v62  ;;  %957 = vmatprep.subr.bf16.mxu0 %v1436_v63 }
  0x9b   : > { %1000 = vmatprep.subr.bf16.mxu1 %v1438_v0 }
  0x9d   : > { %958 = vmatpush2.bf16.msra.mxu0 %v1440_v1 }
  0x9e   : > { %1001 = vmatpush2.bf16.msra.mxu1 %v1441_v2  ;;  %959 = vmatprep.subr.bf16.mxu0 %v1442_v3 }
  0x9f   : > { %1002 = vmatprep.subr.bf16.mxu1 %v1444_v4 }
  0xa1   : > { %960 = vmatpush2.bf16.msra.mxu0 %v1446_v5 }
  0xa2   : > { %1003 = vmatpush2.bf16.msra.mxu1 %v1447_v6 }
  0xa4   : > { %962 = vmatmul.mubr.bf16.vlgmr.msra.gmra.mxu0 %v1448_v7 }
  0xa5   : > { %1005 = vmatmul.mubr.bf16.vlgmr.msra.gmra.mxu1 %v1451_v8 }
 0x164   : > { %v963_v9 = vpop.f32.mrf.mxu0 }
 0x165   : > { %v1006_v11 = vpop.f32.mrf.mxu1 }
 0x166   : > { %v1007_v12 = vadd.f32 %v1006_v11, %v963_v9  ;;  %v965_v13 = vpop.f32.mrf.mxu0 }
 0x167   : > { %v1008_v15 = vpop.f32.mrf.mxu1 }
 0x168   : > { %v1015_v16 = vadd.f32 %v1007_v12, %v517_v10  ;;  %v1009_v17 = vadd.f32 %v1008_v15, %v965_v13  ;;  %v967_v18 = vpop.f32.mrf.mxu0 }
 0x169   : > { %v1010_v20 = vpop.f32.mrf.mxu1 }
 0x16a   : > { %1019 = vst [vmem:[#allocation2 + $0x10] sm:$0xff] %v1015_v16  ;;  %v1016_v21 = vadd.f32 %v1009_v17, %v518_v14  ;;  %v1011_v22 = vadd.f32 %v1010_v20, %v967_v18  ;;  %v969_v23 = vpop.f32.mrf.mxu0 }
 0x16b   : > { %v1012_v25 = vpop.f32.mrf.mxu1 }
 0x16c   : > { %1020 = vst [vmem:[#allocation2] sm:$0xff] %v1016_v21  ;;  %v1017_v26 = vadd.f32 %v1011_v22, %v519_v19  ;;  %v1013_v27 = vadd.f32 %v1012_v25, %v969_v23  ;;  %1026 = sbr.rel (%p1254_p4) target bundleno = 377 (0x179), region = 97 }
 0x16e   : > { %1021 = vst [vmem:[#allocation2 + $0x18] sm:$0xff] %v1017_v26  ;;  %v1018_v28 = vadd.f32 %v1013_v27, %v520_v24 }
 0x170   : > { %1022 = vst [vmem:[#allocation2 + $0x8] sm:$0xff] %v1018_v28 }
 0x171   : > { %v1027_v29 = vld [vmem:[#allocation2 + $0x10] sm:$0xff] }
 0x172   : > { %1031 = vst [vmem:[%s1813_s24] sm:$0xff] %v1027_v29 }
 0x173   : > { %v1028_v30 = vld [vmem:[#allocation2] sm:$0xff] }
 0x174   : > { %1032 = vst [vmem:[%s1813_s24 + $0x8] sm:$0xff] %v1028_v30 }
 0x175   : > { %v1029_v31 = vld [vmem:[#allocation2 + $0x18] sm:$0xff] }
 0x176   : > { %1033 = vst [vmem:[%s1813_s24 + $0x10] sm:$0xff] %v1029_v31 }
 0x177   : > { %v1030_v32 = vld [vmem:[#allocation2 + $0x8] sm:$0xff] }
 0x178   : > { %1034 = vst [vmem:[%s1813_s24 + $0x18] sm:$0xff] %v1030_v32 }
 0x179 PF: > { %1041 = sbr.rel (!%p1652_p12) target bundleno = 385 (0x181), region = 101  ;;  %s1262_s9 = sshll.u32 (%p1652_p12), %s1528_s16, 4  ;;  %v1060_v33 = vld [vmem:[%s1813_s24] sm:$0xff] (%p1652_p12) }
 0x17a   : > { %s1047_s15 = scalar_lea.vmem (%p1652_p12), %s1934_s2, %s1262_s9 }
 0x17b   : > { %v1062_v34 = vld [vmem:[%s1813_s24 + $0x8] sm:$0xff] (%p1652_p12)  ;;  %1061 = vst [vmem:[%s1047_s15] sm:$0xff] (%p1652_p12), %v1060_v33 }
 0x17c   : > { %1063 = vst [vmem:[%s1047_s15 + $0x8] sm:$0xff] (%p1652_p12), %v1062_v34 }
 0x17d   : > { %v1064_v35 = vld [vmem:[%s1813_s24 + $0x10] sm:$0xff] (%p1652_p12) }
 0x17e   : > { %1065 = vst [vmem:[%s1047_s15 + $0x20] sm:$0xff] %v1064_v35 }
 0x17f   : > { %v1066_v36 = vld [vmem:[%s1813_s24 + $0x18] sm:$0xff] }
 0x180   : > { %1067 = vst [vmem:[%s1047_s15 + $0x28] sm:$0xff] %v1066_v36 }
 0x181 PF: > { %s12_s19 = sadd.s32 1, %s1540_s19   ;;  %s1940_s9 = smov %s1504_s10 }
 0x182   : > { %p9_p5 = scmp.ge.s32.totalorder %s12_s19, 18   ;;  %s1941_s10 = smov %s1650_s5 }
 0x183   : > { %s1942_s11 = smov %s1512_s12  ;;  %s1943_s12 = smov %s1647_s4 }
 0x184   : > { %s1944_s13 = smov %s1520_s14  ;;  %s1945_s14 = smov %s1633_s27 }
 0x185   : > { %s1946_s15 = smov %s1532_s17  ;;  %s1947_s16 = smov %s1536_s18 }
 0x186   : > { %s1948_s17 = smov %s1951_s21  ;;  %s1949_s18 = smov %s1955_s22 }
 0x187   :  { %11 = sbr.rel (!%p9_p5) target bundleno = 8 (0x8), region = 163 }

// kernel: generator_forward.44
= control target key start
LH: loop header
LB: loop body
LE: loop exit
PB: predicated region body
PF: predicated region fallthrough
CT: control target
= control target key end

     0   :  { %v14_v0 = vlaneseq  ;;  %v170_v4 = vmov 1966171168   ;;  %v171_v12 = vmov 0.0   ;;  %s241_s0 = inlined_call_operand.vmem [shape: f32[16,512], index: 0, kind: input, shape index: {}]   ;;  %s242_s1 = inlined_call_operand.vmem [shape: f32[1,512], index: 1, kind: output, shape index: {0}]   ;;  %s243_s2 = inlined_call_operand.vmem [shape: f32[1,512], index: 2, kind: output, shape index: {1}]  }
   0x1   :  { %v20_v1 = vld [vmem:[%s241_s0] sm:$0xff]  ;;  %v21_v2 = vld [vmem:[%s241_s0 + $0x8] sm:$0xff]  ;;  %v22_v3 = vld [vmem:[%s241_s0 + $0x10] sm:$0xff]  ;;  %v64_v5 = vunpack.c.l.s4 %v170_v4 }
   0x2   :  { %vm196_vm0 = vcmp.lt.s32.totalorder %v14_v0, 512  ;;  %v23_v7 = vld [vmem:[%s241_s0 + $0x18] sm:$0xff]  ;;  %v24_v8 = vld [vmem:[%s241_s0 + $0x20] sm:$0xff]  ;;  %v25_v9 = vld [vmem:[%s241_s0 + $0x28] sm:$0xff]  ;;  %v67_v10 = vshrl.u32 %v14_v0, 7  ;;  %v93_v11 = vmul.f32 %v20_v1, %v20_v1  ;;  %v94_v17 = vmul.f32 %v21_v2, %v21_v2 }
   0x3   :  { %18 = vst.msk [vmem:[%s242_s1] sm:$0xf] %vm196_vm0, %v171_v12  ;;  %v26_v13 = vld [vmem:[%s241_s0 + $0x30] sm:$0xff]  ;;  %v27_v14 = vld [vmem:[%s241_s0 + $0x38] sm:$0xff]  ;;  %v29_v15 = vadd.f32 %v24_v8, %v20_v1  ;;  %v36_v16 = vadd.f32 %v25_v9, %v21_v2  ;;  %19 = vst.msk [vmem:[%s243_s2] sm:$0xf] %vm196_vm0, %v171_v12  ;;  %v95_v18 = vmul.f32 %v22_v3, %v22_v3  ;;  %v65_v25 = vunpack.c.0.s8 %v64_v5 }
   0x4   :  { %v43_v19 = vadd.f32 %v26_v13, %v22_v3  ;;  %v50_v20 = vadd.f32 %v27_v14, %v23_v7  ;;  %v96_v21 = vmul.f32 %v23_v7, %v23_v7  ;;  %v97_v22 = vmul.f32 %v24_v8, %v24_v8 }
   0x5   :  { %v30_v23 = vrot.slane %v29_v15, 4  ;;  %v37_v24 = vrot.slane %v36_v16, 4  ;;  %v98_v26 = vmul.f32 %v25_v9, %v25_v9  ;;  %v99_v29 = vmul.f32 %v26_v13, %v26_v13 }
   0x6   :  { %v44_v27 = vrot.slane %v43_v19, 4  ;;  %v51_v28 = vrot.slane %v50_v20, 4  ;;  %v100_v30 = vmul.f32 %v27_v14, %v27_v14  ;;  %v101_v33 = vadd.f32 %v97_v22, %v93_v11 }
   0x7   :  { %v31_v31 = vadd.f32 %v30_v23, %v29_v15  ;;  %v38_v32 = vadd.f32 %v37_v24, %v36_v16  ;;  %v108_v34 = vadd.f32 %v98_v26, %v94_v17  ;;  %v115_v37 = vadd.f32 %v99_v29, %v95_v18 }
   0x8   :  { %v45_v35 = vadd.f32 %v44_v27, %v43_v19  ;;  %v52_v36 = vadd.f32 %v51_v28, %v50_v20  ;;  %v122_v38 = vadd.f32 %v100_v30, %v96_v21  ;;  %v102_v41 = vrot.slane %v101_v33, 4 }
   0x9   :  { %v32_v39 = vrot.slane %v31_v31, 2  ;;  %v39_v40 = vrot.slane %v38_v32, 2  ;;  %v109_v42 = vrot.slane %v108_v34, 4  ;;  %v68_v45 = vsub.s32 %v65_v25, %v67_v10 }
   0xa   :  { %v46_v43 = vrot.slane %v45_v35, 2  ;;  %v53_v44 = vrot.slane %v52_v36, 2  ;;  %v103_v48 = vadd.f32 %v102_v41, %v101_v33  ;;  %v116_v52 = vrot.slane %v115_v37, 4  ;;  %v28_v23 = vld [vmem:[%s242_s1] sm:$0xf] }
   0xb   :  { %v33_v46 = vadd.f32 %v32_v39, %v31_v31  ;;  %v40_v47 = vadd.f32 %v39_v40, %v38_v32  ;;  %v110_v49 = vadd.f32 %v109_v42, %v108_v34  ;;  %v123_v53 = vrot.slane %v122_v38, 4  ;;  %v92_v30 = vld [vmem:[%s243_s2] sm:$0xf] }
   0xc   :  { %v47_v50 = vadd.f32 %v46_v43, %v45_v35  ;;  %v54_v51 = vadd.f32 %v53_v44, %v52_v36  ;;  %v104_v56 = vrot.slane %v103_v48, 2  ;;  %v117_v60 = vadd.f32 %v116_v52, %v115_v37 }
   0xd   :  { %v34_v54 = vrot.slane %v33_v46, 1  ;;  %v41_v55 = vrot.slane %v40_v47, 1  ;;  %v111_v57 = vrot.slane %v110_v49, 2  ;;  %v124_v61 = vadd.f32 %v123_v53, %v122_v38 }
   0xe   :  { %v48_v58 = vrot.slane %v47_v50, 1  ;;  %v55_v59 = vrot.slane %v54_v51, 1  ;;  %v105_v0 = vadd.f32 %v104_v56, %v103_v48  ;;  %v118_v4 = vrot.slane %v117_v60, 2 }
   0xf   :  { %v35_v62 = vadd.f32 %v34_v54, %v33_v46  ;;  %v42_v63 = vadd.f32 %v41_v55, %v40_v47  ;;  %v112_v1 = vadd.f32 %v111_v57, %v110_v49  ;;  %v125_v5 = vrot.slane %v124_v61, 2 }
  0x10   :  { %v49_v2 = vadd.f32 %v48_v58, %v47_v50  ;;  %v56_v3 = vadd.f32 %v55_v59, %v54_v51  ;;  %v106_v8 = vrot.slane %v105_v0, 1  ;;  %v119_v11 = vadd.f32 %v118_v4, %v117_v60 }
  0x11   :  { %v61_v7 = vcombine.low %v35_v62, %v42_v63  ;;  %v113_v9 = vrot.slane %v112_v1, 1  ;;  %v126_v12 = vadd.f32 %v125_v5, %v124_v61 }
  0x12   :  { %v62_v10 = vcombine.low %v49_v2, %v56_v3  ;;  %v107_v14 = vadd.f32 %v106_v8, %v105_v0  ;;  %v120_v17 = vrot.slane %v119_v11, 1 }
  0x13   :  { %v69_v13 = vrot.slane %v61_v7, %v68_v45  ;;  %v114_v15 = vadd.f32 %v113_v9, %v112_v1  ;;  %v127_v18 = vrot.slane %v126_v12, 1 }
  0x14   :  { %v76_v16 = vrot.slane %v62_v10, %v68_v45  ;;  %v121_v21 = vadd.f32 %v120_v17, %v119_v11 }
  0x15   :  { %v133_v19 = vcombine.low %v107_v14, %v114_v15  ;;  %v128_v22 = vadd.f32 %v127_v18, %v126_v12 }
  0x16   :  { %v77_v20 = vcombine.low %v69_v13, %v76_v16 }
  0x17   :  { %v134_v25 = vcombine.low %v121_v21, %v128_v22  ;;  %v141_v26 = vrot.slane %v133_v19, %v68_v45 }
  0x18   :  { %v84_v24 = vrot.slane %v77_v20, %v68_v45 }
  0x19   :  { %v148_v28 = vrot.slane %v134_v25, %v68_v45 }
  0x1a   :  { %v86_v27 = vadd.f32 %v84_v24, %v28_v23 }
  0x1b   :  { %v149_v29 = vcombine.low %v141_v26, %v148_v28 }
  0x1c   :  { %91 = vst.msk [vmem:[%s242_s1] sm:$0xf] %vm196_vm0, %v86_v27 }
  0x1d   :  { %v156_v31 = vrot.slane %v149_v29, %v68_v45 }
  0x1f   :  { %v158_v32 = vadd.f32 %v156_v31, %v92_v30 }
  0x21   :  { %159 = vst.msk [vmem:[%s243_s2] sm:$0xf] %vm196_vm0, %v158_v32 }

// kernel: generator_forward.45
= control target key start
LH: loop header
LB: loop body
LE: loop exit
PB: predicated region body
PF: predicated region fallthrough
CT: control target
= control target key end

     0   :  { %v24_v0 = vlaneseq  ;;  %s192_s1 = inlined_call_operand.vmem [shape: f32[1,512], index: 1, kind: input, shape index: {}]   ;;  %s193_s2 = inlined_call_operand.vmem [shape: f32[1,512], index: 2, kind: input, shape index: {}]   ;;  %s194_s0 = inlined_call_operand.vmem [shape: f32[16,512], index: 0, kind: input, shape index: {}]   ;;  %s195_s3 = inlined_call_operand.vmem [shape: bf16[16,512], index: 3, kind: output, shape index: {}]  }
   0x1   :  { %v22_v2 = vld [vmem:[%s192_s1] sm:$0xf]  ;;  %v15_v5 = vld [vmem:[%s194_s0 + $0x8] sm:$0xff]  ;;  %v16_v10 = vld [vmem:[%s194_s0 + $0x10] sm:$0xff] }
   0x2   :  { %v25_v1 = vshrl.u32 %v24_v0, 7  ;;  %v52_v3 = vld [vmem:[%s193_s2] sm:$0xf]  ;;  %v19_v12 = vld [vmem:[%s194_s0 + $0x28] sm:$0xff]  ;;  %v17_v17 = vld [vmem:[%s194_s0 + $0x18] sm:$0xff] }
   0x3   :  { %v14_v4 = vld [vmem:[%s194_s0] sm:$0xff]  ;;  %v20_v18 = vld [vmem:[%s194_s0 + $0x30] sm:$0xff]  ;;  %v21_v19 = vld [vmem:[%s194_s0 + $0x38] sm:$0xff] }
   0x4   :  { %v26_v6 = vsub.s32 0, %v25_v1  ;;  %v30_v7 = vsub.s32 1, %v25_v1  ;;  %v34_v8 = vsub.s32 2, %v25_v1  ;;  %v38_v9 = vsub.s32 3, %v25_v1  ;;  %v18_v11 = vld [vmem:[%s194_s0 + $0x20] sm:$0xff] }
   0x6   :  { %v27_v13 = vrot.slane %v22_v2, %v26_v6  ;;  %v31_v14 = vrot.slane %v22_v2, %v30_v7  ;;  %v57_v15 = vrot.slane %v52_v3, %v26_v6  ;;  %v61_v16 = vrot.slane %v52_v3, %v30_v7 }
   0x7   :  { %v35_v20 = vrot.slane %v22_v2, %v34_v8  ;;  %v39_v21 = vrot.slane %v22_v2, %v38_v9  ;;  %v65_v22 = vrot.slane %v52_v3, %v34_v8  ;;  %v69_v23 = vrot.slane %v52_v3, %v38_v9 }
   0x8   :  { %v44_v24 = vmul.f32 %v27_v13, %v14_v4  ;;  %v45_v25 = vmul.f32 %v31_v14, %v15_v5  ;;  %v48_v26 = vmul.f32 %v27_v13, %v18_v11  ;;  %v49_v27 = vmul.f32 %v31_v14, %v19_v12 }
   0x9   :  { %v46_v28 = vmul.f32 %v35_v20, %v16_v10  ;;  %v47_v29 = vmul.f32 %v39_v21, %v17_v17  ;;  %v50_v30 = vmul.f32 %v35_v20, %v20_v18  ;;  %v51_v31 = vmul.f32 %v39_v21, %v21_v19 }
   0xa   :  { %v74_v32 = vadd.f32 %v57_v15, %v44_v24  ;;  %v75_v33 = vadd.f32 %v61_v16, %v45_v25  ;;  %v78_v34 = vadd.f32 %v57_v15, %v48_v26  ;;  %v79_v35 = vadd.f32 %v61_v16, %v49_v27 }
   0xb   :  { %v76_v36 = vadd.f32 %v65_v22, %v46_v28  ;;  %v77_v37 = vadd.f32 %v69_v23, %v47_v29  ;;  %v80_v38 = vadd.f32 %v65_v22, %v50_v30  ;;  %v81_v39 = vadd.f32 %v69_v23, %v51_v31 }
   0xc   :  { %v82_v40 = vmax.f32 %v74_v32, 0.0  ;;  %v83_v41 = vmax.f32 %v75_v33, 0.0  ;;  %v86_v42 = vmax.f32 %v78_v34, 0.0  ;;  %v87_v43 = vmax.f32 %v79_v35, 0.0 }
   0xd   :  { %v84_v44 = vmax.f32 %v76_v36, 0.0  ;;  %v85_v45 = vmax.f32 %v77_v37, 0.0  ;;  %v88_v46 = vmax.f32 %v80_v38, 0.0  ;;  %v89_v47 = vmax.f32 %v81_v39, 0.0 }
   0xe   :  { %v126_v48 = vpack.c.bf16 %v83_v41, %v82_v40  ;;  %v128_v49 = vpack.c.bf16 %v87_v43, %v86_v42 }
   0xf   :  { %v127_v50 = vpack.c.bf16 %v85_v45, %v84_v44  ;;  %v129_v51 = vpack.c.bf16 %v89_v47, %v88_v46 }
  0x10   :  { %114 = vst [vmem:[%s195_s3] sm:$0xff] %v126_v48  ;;  %116 = vst [vmem:[%s195_s3 + $0x10] sm:$0xff] %v128_v49 }
  0x11   :  { %115 = vst [vmem:[%s195_s3 + $0x8] sm:$0xff] %v127_v50  ;;  %117 = vst [vmem:[%s195_s3 + $0x18] sm:$0xff] %v129_v51 }

// kernel: generator_forward.46
= control target key start
LH: loop header
LB: loop body
LE: loop exit
PB: predicated region body
PF: predicated region fallthrough
CT: control target
= control target key end

     0   :  { %s1174_s9 = smov 0   ;;  %s1176_s10 = smov 0   ;;  %s1325_s0 = inlined_call_operand.vmem [shape: bf16[16,2048], index: 0, kind: input, shape index: {}]   ;;  %s1326_s1 = inlined_call_operand.vmem [shape: bf16[2048,256], index: 1, kind: input, shape index: {}]   ;;  %s1327_s2 = inlined_call_operand.vmem [shape: f32[16,256], index: 2, kind: output, shape index: {}]  }
   0x1   :  { %s1178_s11 = smov 0   ;;  %s1180_s12 = smov 0  }
   0x2   :  { %s1182_s13 = smov 0  }
   0x3 LB: > { %s24_s14 = sadd.s32 1, %s1152_s12  ;;  %p47_p1 = scmp.ne.s32.totalorder %s1144_s10, %s1140_s9  ;;  %s1156_s13 = sphi %s1182_s13, %s12_s13   ;;  %s1152_s12 = sphi %s1180_s12, %s1331_s12   ;;  %s1148_s11 = sphi %s1178_s11, %s1330_s11   ;;  %s1144_s10 = sphi %s1176_s10, %s1329_s10   ;;  %s1140_s9 = sphi %s1174_s9, %s1328_s9  }
   0x4   : > { %p25_p0 = scmp.ge.s32.totalorder %s24_s14, 4  ;;  %p48_p2 = scmp.eq.s32.totalorder %s1156_s13, 0 }
   0x5   : > { %s40_s16 = sadd.s32 1, %s1144_s10  ;;  %p890_p5 = scmp.ge.s32.totalorder %s1156_s13, 4 }
   0x6   : > { %s1333_s14 = smov (%p25_p0, %s24_s14), 0  ;;  %p49_p3 = por %p48_p2, %p47_p1 }
   0x7   : > { %s36_s15 = ssub.s32 %s1152_s12, %s1333_s14  ;;  %129 = sbr.rel (%p890_p5) target bundleno = 18 (0x12), region = 16 }
   0x8   : > { %p38_p4 = scmp.eq.s32.totalorder %s36_s15, 0 }
   0xa   : > { %s1209_s17 = scalar_select %p38_p4, %s1144_s10, %s40_s16  }
   0xc   : > { %132 = sbr.rel (!%p49_p3) target bundleno = 18 (0x12), region = 20  ;;  %s134_s18 = sand.u32 (%p49_p3), 1, %s1144_s10  }
   0xd   : > { %s973_s19 = sshll.u32 (%p49_p3), %s1152_s12, 4  ;;  %s891_s20 = sshll.u32 (%p49_p3), %s134_s18, 5 }
   0xe   : > { %s142_s23 = scalar_lea.vmem (%p49_p3), %s1325_s0, %s973_s19  ;;  %s136_s24 = scalar_lea.vmem (%p49_p3), [#allocation3], %s891_s20 }
   0xf   : > { %v155_v0 = vld [vmem:[%s142_s23] sm:$0xff] (%p49_p3)  ;;  %v157_v1 = vld [vmem:[%s142_s23 + $0x8] sm:$0xff] (%p49_p3) }
  0x10   : > { %v159_v2 = vld [vmem:[%s142_s23 + $0x40] sm:$0xff] (%p49_p3)  ;;  %156 = vst [vmem:[%s136_s24] sm:$0xff] (%p49_p3), %v155_v0  ;;  %158 = vst [vmem:[%s136_s24 + $0x8] sm:$0xff] (%p49_p3), %v157_v1  ;;  %v161_v3 = vld [vmem:[%s142_s23 + $0x48] sm:$0xff] (%p49_p3) }
  0x11   : > { %160 = vst [vmem:[%s136_s24 + $0x10] sm:$0xff] %v159_v2  ;;  %162 = vst [vmem:[%s136_s24 + $0x18] sm:$0xff] %v161_v3 }
  0x12 PF: > { %p894_p6 = scmp.ge.s32.totalorder %s1156_s13, 1  ;;  %p182_p7 = scmp.lt.s32.totalorder %s1156_s13, 5 }
  0x14   : > { %p183_p8 = pnand %p894_p6, %p182_p7 }
  0x15   : > { %s189_s25 = sand.u32 (!%p183_p8), 1, %s1140_s9   ;;  %s896_s26 = sshll.u32 (!%p183_p8), %s1148_s11, 6 }
  0x16   : > { %186 = sbr.rel (%p183_p8) target bundleno = 313 (0x139), region = 47  ;;  %s895_s27 = sshll.u32 (!%p183_p8), %s189_s25, 5 }
  0x17   : > { %p229_p9 = scmp.lt.s32.totalorder (!%p183_p8), %s896_s26, 255  ;;  %s1226_s4 = scalar_lea.vmem (!%p183_p8), [#allocation3], %s895_s27 }
  0x18   : > { %p899_p10 = scmp.ne.s32.totalorder (!%p183_p8), %s1148_s11, 0 }
  0x1b   : > { %s1335_s26 = smov (!%p229_p9, %s896_s26), 255  ;;  %254 = sbr.rel (%p899_p10) target bundleno = 35 (0x23), region = 55 }
  0x1c   : > { %s974_s28 = sshll.u32 %s1335_s26, 3 }
  0x1d   : > { %s1224_s3 = scalar_lea.vmem %s1326_s1, %s974_s28 }
  0x20   : > { %v1158_v4 = vmov 0.0  }
  0x21   : > { %255 = vst [vmem:[#allocation2 + $0x10] sm:$0xff] %v1158_v4  ;;  %256 = vst [vmem:[#allocation2] sm:$0xff] %v1158_v4 }
  0x22   : > { %257 = vst [vmem:[#allocation2 + $0x18] sm:$0xff] %v1158_v4  ;;  %258 = vst [vmem:[#allocation2 + $0x8] sm:$0xff] %v1158_v4 }
  0x23 PF: > { %v1016_v5 = vld [vmem:[%s1224_s3 + $0x74] ss:$8 sps:$4 sm:$0xff]   ;;  %v1020_v7 = vld [vmem:[%s1224_s3 + $0x70] ss:$8 sps:$4 sm:$0xff]   ;;  %v1022_v9 = vld [vmem:[%s1224_s3 + $0x64] ss:$8 sps:$4 sm:$0xff]  }
  0x24   : > { %v1018_v6 = vld [vmem:[%s1224_s3 + $0x174] ss:$8 sps:$4 sm:$0xff]   ;;  %671 = vmatprep.subr.bf16.mxu0 %v1016_v5  ;;  %v1021_v8 = vld [vmem:[%s1224_s3 + $0x170] ss:$8 sps:$4 sm:$0xff]   ;;  %v1024_v10 = vld [vmem:[%s1224_s3 + $0x164] ss:$8 sps:$4 sm:$0xff]  }
  0x25   : > { %714 = vmatprep.subr.bf16.mxu1 %v1018_v6  ;;  %672 = vmatpush1.bf16.msra.mxu0 %v1020_v7  ;;  %v1026_v11 = vld [vmem:[%s1224_s3 + $0x60] ss:$8 sps:$4 sm:$0xff]   ;;  %v1028_v13 = vld [vmem:[%s1224_s3 + $0x54] ss:$8 sps:$4 sm:$0xff]   ;;  %v1032_v15 = vld [vmem:[%s1224_s3 + $0x50] ss:$8 sps:$4 sm:$0xff]  }
  0x26   : > { %715 = vmatpush1.bf16.msra.mxu1 %v1021_v8  ;;  %673 = vmatprep.subr.bf16.mxu0 %v1022_v9  ;;  %v1027_v12 = vld [vmem:[%s1224_s3 + $0x160] ss:$8 sps:$4 sm:$0xff]   ;;  %v1030_v14 = vld [vmem:[%s1224_s3 + $0x154] ss:$8 sps:$4 sm:$0xff]   ;;  %v1033_v16 = vld [vmem:[%s1224_s3 + $0x150] ss:$8 sps:$4 sm:$0xff]  }
  0x27   : > { %716 = vmatprep.subr.bf16.mxu1 %v1024_v10  ;;  %v1034_v17 = vld [vmem:[%s1224_s3 + $0x44] ss:$8 sps:$4 sm:$0xff]   ;;  %v1038_v19 = vld [vmem:[%s1224_s3 + $0x40] ss:$8 sps:$4 sm:$0xff]   ;;  %v1040_v21 = vld [vmem:[%s1224_s3 + $0x34] ss:$8 sps:$4 sm:$0xff]  }
  0x28   : > { %v1036_v18 = vld [vmem:[%s1224_s3 + $0x144] ss:$8 sps:$4 sm:$0xff]   ;;  %v1039_v20 = vld [vmem:[%s1224_s3 + $0x140] ss:$8 sps:$4 sm:$0xff]   ;;  %v1042_v22 = vld [vmem:[%s1224_s3 + $0x134] ss:$8 sps:$4 sm:$0xff]  }
  0x29   : > { %674 = vmatpush1.bf16.msra.mxu0 %v1026_v11  ;;  %v1044_v23 = vld [vmem:[%s1224_s3 + $0x30] ss:$8 sps:$4 sm:$0xff]   ;;  %v1046_v25 = vld [vmem:[%s1224_s3 + $0x24] ss:$8 sps:$4 sm:$0xff]   ;;  %v1050_v27 = vld [vmem:[%s1224_s3 + $0x20] ss:$8 sps:$4 sm:$0xff]  }
  0x2a   : > { %717 = vmatpush1.bf16.msra.mxu1 %v1027_v12  ;;  %675 = vmatprep.subr.bf16.mxu0 %v1028_v13  ;;  %v1045_v24 = vld [vmem:[%s1224_s3 + $0x130] ss:$8 sps:$4 sm:$0xff]   ;;  %v1048_v26 = vld [vmem:[%s1224_s3 + $0x124] ss:$8 sps:$4 sm:$0xff]   ;;  %v1051_v28 = vld [vmem:[%s1224_s3 + $0x120] ss:$8 sps:$4 sm:$0xff]  }
  0x2b   : > { %718 = vmatprep.subr.bf16.mxu1 %v1030_v14  ;;  %v1052_v29 = vld [vmem:[%s1224_s3 + $0x14] ss:$8 sps:$4 sm:$0xff]   ;;  %v1056_v31 = vld [vmem:[%s1224_s3 + $0x10] ss:$8 sps:$4 sm:$0xff]   ;;  %v1058_v33 = vld [vmem:[%s1224_s3 + $0x4] ss:$8 sps:$4 sm:$0xff]  }
  0x2c   : > { %v1054_v30 = vld [vmem:[%s1224_s3 + $0x114] ss:$8 sps:$4 sm:$0xff]   ;;  %v1057_v32 = vld [vmem:[%s1224_s3 + $0x110] ss:$8 sps:$4 sm:$0xff]   ;;  %v1060_v34 = vld [vmem:[%s1224_s3 + $0x104] ss:$8 sps:$4 sm:$0xff]  }
  0x2d   : > { %676 = vmatpush1.bf16.msra.mxu0 %v1032_v15  ;;  %v1062_v35 = vld [vmem:[%s1224_s3] ss:$8 sps:$4 sm:$0xff]   ;;  %v1064_v37 = vld [vmem:[%s1224_s3 + $0xf4] ss:$8 sps:$4 sm:$0xff]   ;;  %v1068_v39 = vld [vmem:[%s1224_s3 + $0xf0] ss:$8 sps:$4 sm:$0xff]  }
  0x2e   : > { %719 = vmatpush1.bf16.msra.mxu1 %v1033_v16  ;;  %677 = vmatprep.subr.bf16.mxu0 %v1034_v17  ;;  %v1063_v36 = vld [vmem:[%s1224_s3 + $0x100] ss:$8 sps:$4 sm:$0xff]   ;;  %v1066_v38 = vld [vmem:[%s1224_s3 + $0x1f4] ss:$8 sps:$4 sm:$0xff]   ;;  %v1069_v40 = vld [vmem:[%s1224_s3 + $0x1f0] ss:$8 sps:$4 sm:$0xff]  }
  0x2f   : > { %720 = vmatprep.subr.bf16.mxu1 %v1036_v18  ;;  %v1070_v41 = vld [vmem:[%s1224_s3 + $0xe4] ss:$8 sps:$4 sm:$0xff]   ;;  %v1074_v43 = vld [vmem:[%s1224_s3 + $0xe0] ss:$8 sps:$4 sm:$0xff]   ;;  %v1076_v45 = vld [vmem:[%s1224_s3 + $0xd4] ss:$8 sps:$4 sm:$0xff]  }
  0x30   : > { %v1072_v42 = vld [vmem:[%s1224_s3 + $0x1e4] ss:$8 sps:$4 sm:$0xff]   ;;  %v1075_v44 = vld [vmem:[%s1224_s3 + $0x1e0] ss:$8 sps:$4 sm:$0xff]   ;;  %v1078_v46 = vld [vmem:[%s1224_s3 + $0x1d4] ss:$8 sps:$4 sm:$0xff]  }
  0x31   : > { %678 = vmatpush1.bf16.msra.mxu0 %v1038_v19  ;;  %v1080_v47 = vld [vmem:[%s1224_s3 + $0xd0] ss:$8 sps:$4 sm:$0xff]   ;;  %v1082_v49 = vld [vmem:[%s1224_s3 + $0xc4] ss:$8 sps:$4 sm:$0xff]   ;;  %v1086_v51 = vld [vmem:[%s1224_s3 + $0xc0] ss:$8 sps:$4 sm:$0xff]  }
  0x32   : > { %721 = vmatpush1.bf16.msra.mxu1 %v1039_v20  ;;  %679 = vmatprep.subr.bf16.mxu0 %v1040_v21  ;;  %v1081_v48 = vld [vmem:[%s1224_s3 + $0x1d0] ss:$8 sps:$4 sm:$0xff]   ;;  %v1084_v50 = vld [vmem:[%s1224_s3 + $0x1c4] ss:$8 sps:$4 sm:$0xff]   ;;  %v1087_v53 = vld [vmem:[%s1224_s3 + $0x1c0] ss:$8 sps:$4 sm:$0xff]  }
  0x33   : > { %722 = vmatprep.subr.bf16.mxu1 %v1042_v22  ;;  %v1114_v52 = vld [vmem:[%s1226_s4 + $0x4] ss:$16 sps:$4 sm:$0xff]   ;;  %v1117_v56 = vld [vmem:[%s1226_s4 + $0xc] ss:$16 sps:$4 sm:$0xff]   ;;  %v1092_v57 = vld [vmem:[%s1224_s3 + $0xb0] ss:$8 sps:$4 sm:$0xff]  }
  0x34   : > { %v1088_v54 = vld [vmem:[%s1224_s3 + $0xb4] ss:$8 sps:$4 sm:$0xff]   ;;  %703 = vmatprep.mubr.bf16.mxu0 %v1114_v52  ;;  %746 = vmatprep.mubr.bf16.mxu1 %v1117_v56  ;;  %v1093_v58 = vld [vmem:[%s1224_s3 + $0x1b0] ss:$8 sps:$4 sm:$0xff]   ;;  %v1094_v59 = vld [vmem:[%s1224_s3 + $0xa4] ss:$8 sps:$4 sm:$0xff]  }
  0x35   : > { %680 = vmatpush1.bf16.msra.mxu0 %v1044_v23  ;;  %v1090_v55 = vld [vmem:[%s1224_s3 + $0x1b4] ss:$8 sps:$4 sm:$0xff]   ;;  %v1096_v60 = vld [vmem:[%s1224_s3 + $0x1a4] ss:$8 sps:$4 sm:$0xff]   ;;  %v1098_v61 = vld [vmem:[%s1224_s3 + $0xa0] ss:$8 sps:$4 sm:$0xff]  }
  0x36   : > { %723 = vmatpush1.bf16.msra.mxu1 %v1045_v24  ;;  %681 = vmatprep.subr.bf16.mxu0 %v1046_v25  ;;  %v1099_v62 = vld [vmem:[%s1224_s3 + $0x1a0] ss:$8 sps:$4 sm:$0xff]   ;;  %v1100_v63 = vld [vmem:[%s1224_s3 + $0x94] ss:$8 sps:$4 sm:$0xff]   ;;  %v1104_v1 = vld [vmem:[%s1224_s3 + $0x90] ss:$8 sps:$4 sm:$0xff]  }
  0x37   : > { %724 = vmatprep.subr.bf16.mxu1 %v1048_v26  ;;  %v1102_v0 = vld [vmem:[%s1224_s3 + $0x194] ss:$8 sps:$4 sm:$0xff]   ;;  %v1105_v2 = vld [vmem:[%s1224_s3 + $0x190] ss:$8 sps:$4 sm:$0xff]   ;;  %v1106_v3 = vld [vmem:[%s1224_s3 + $0x84] ss:$8 sps:$4 sm:$0xff]  }
  0x38   : > { %v1108_v4 = vld [vmem:[%s1224_s3 + $0x184] ss:$8 sps:$4 sm:$0xff]   ;;  %v1110_v5 = vld [vmem:[%s1224_s3 + $0x80] ss:$8 sps:$4 sm:$0xff]   ;;  %v259_v10 = vld [vmem:[#allocation2 + $0x10] sm:$0xff]  ;;  %p968_p11 = scmp.ne.s32.totalorder %s1148_s11, 3 }
  0x39   : > { %682 = vmatpush1.bf16.msra.mxu0 %v1050_v27  ;;  %v1111_v6 = vld [vmem:[%s1224_s3 + $0x180] ss:$8 sps:$4 sm:$0xff]   ;;  %v261_v19 = vld [vmem:[#allocation2 + $0x18] sm:$0xff] }
  0x3a   : > { %725 = vmatpush1.bf16.msra.mxu1 %v1051_v28  ;;  %683 = vmatprep.subr.bf16.mxu0 %v1052_v29  ;;  %v1112_v7 = vld [vmem:[%s1226_s4] ss:$16 sps:$4 sm:$0xff]   ;;  %v1115_v8 = vld [vmem:[%s1226_s4 + $0x8] ss:$16 sps:$4 sm:$0xff]  }
  0x3b   : > { %726 = vmatprep.subr.bf16.mxu1 %v1054_v30  ;;  %v260_v14 = vld [vmem:[#allocation2] sm:$0xff]  ;;  %v262_v24 = vld [vmem:[#allocation2 + $0x8] sm:$0xff] }
  0x3d   : > { %684 = vmatpush1.bf16.msra.mxu0 %v1056_v31 }
  0x3e   : > { %727 = vmatpush1.bf16.msra.mxu1 %v1057_v32  ;;  %685 = vmatprep.subr.bf16.mxu0 %v1058_v33 }
  0x3f   : > { %728 = vmatprep.subr.bf16.mxu1 %v1060_v34 }
  0x41   : > { %686 = vmatpush1.bf16.msra.mxu0 %v1062_v35 }
  0x42   : > { %729 = vmatpush1.bf16.msra.mxu1 %v1063_v36  ;;  %687 = vmatprep.subr.bf16.mxu0 %v1064_v37 }
  0x43   : > { %730 = vmatprep.subr.bf16.mxu1 %v1066_v38 }
  0x45   : > { %688 = vmatpush2.bf16.msra.mxu0 %v1068_v39 }
  0x46   : > { %731 = vmatpush2.bf16.msra.mxu1 %v1069_v40  ;;  %689 = vmatprep.subr.bf16.mxu0 %v1070_v41 }
  0x47   : > { %732 = vmatprep.subr.bf16.mxu1 %v1072_v42 }
  0x49   : > { %690 = vmatpush2.bf16.msra.mxu0 %v1074_v43 }
  0x4a   : > { %733 = vmatpush2.bf16.msra.mxu1 %v1075_v44  ;;  %691 = vmatprep.subr.bf16.mxu0 %v1076_v45 }
  0x4b   : > { %734 = vmatprep.subr.bf16.mxu1 %v1078_v46 }
  0x4d   : > { %692 = vmatpush2.bf16.msra.mxu0 %v1080_v47 }
  0x4e   : > { %735 = vmatpush2.bf16.msra.mxu1 %v1081_v48  ;;  %693 = vmatprep.subr.bf16.mxu0 %v1082_v49 }
  0x4f   : > { %736 = vmatprep.subr.bf16.mxu1 %v1084_v50 }
  0x51   : > { %694 = vmatpush2.bf16.msra.mxu0 %v1086_v51 }
  0x52   : > { %737 = vmatpush2.bf16.msra.mxu1 %v1087_v53  ;;  %695 = vmatprep.subr.bf16.mxu0 %v1088_v54 }
  0x53   : > { %738 = vmatprep.subr.bf16.mxu1 %v1090_v55 }
  0x55   : > { %696 = vmatpush2.bf16.msra.mxu0 %v1092_v57 }
  0x56   : > { %739 = vmatpush2.bf16.msra.mxu1 %v1093_v58  ;;  %697 = vmatprep.subr.bf16.mxu0 %v1094_v59 }
  0x57   : > { %740 = vmatprep.subr.bf16.mxu1 %v1096_v60 }
  0x59   : > { %698 = vmatpush2.bf16.msra.mxu0 %v1098_v61 }
  0x5a   : > { %741 = vmatpush2.bf16.msra.mxu1 %v1099_v62  ;;  %699 = vmatprep.subr.bf16.mxu0 %v1100_v63 }
  0x5b   : > { %742 = vmatprep.subr.bf16.mxu1 %v1102_v0 }
  0x5d   : > { %700 = vmatpush2.bf16.msra.mxu0 %v1104_v1 }
  0x5e   : > { %743 = vmatpush2.bf16.msra.mxu1 %v1105_v2  ;;  %701 = vmatprep.subr.bf16.mxu0 %v1106_v3 }
  0x5f   : > { %744 = vmatprep.subr.bf16.mxu1 %v1108_v4 }
  0x61   : > { %702 = vmatpush2.bf16.msra.mxu0 %v1110_v5 }
  0x62   : > { %745 = vmatpush2.bf16.msra.mxu1 %v1111_v6 }
  0x64   : > { %704 = vmatmul.mubr.bf16.vlgmr.msra.gmra.mxu0 %v1112_v7 }
  0x65   : > { %747 = vmatmul.mubr.bf16.vlgmr.msra.gmra.mxu1 %v1115_v8 }
 0x124   : > { %v705_v9 = vpop.f32.mrf.mxu0 }
 0x125   : > { %v748_v11 = vpop.f32.mrf.mxu1 }
 0x126   : > { %v749_v12 = vadd.f32 %v748_v11, %v705_v9  ;;  %v707_v13 = vpop.f32.mrf.mxu0 }
 0x127   : > { %v750_v15 = vpop.f32.mrf.mxu1 }
 0x128   : > { %v757_v16 = vadd.f32 %v749_v12, %v259_v10  ;;  %v751_v17 = vadd.f32 %v750_v15, %v707_v13  ;;  %v709_v18 = vpop.f32.mrf.mxu0 }
 0x129   : > { %v752_v20 = vpop.f32.mrf.mxu1 }
 0x12a   : > { %761 = vst [vmem:[#allocation2 + $0x10] sm:$0xff] %v757_v16  ;;  %v758_v21 = vadd.f32 %v751_v17, %v260_v14  ;;  %v753_v22 = vadd.f32 %v752_v20, %v709_v18  ;;  %v711_v23 = vpop.f32.mrf.mxu0 }
 0x12b   : > { %v754_v25 = vpop.f32.mrf.mxu1 }
 0x12c   : > { %762 = vst [vmem:[#allocation2] sm:$0xff] %v758_v21  ;;  %v759_v26 = vadd.f32 %v753_v22, %v261_v19  ;;  %v755_v27 = vadd.f32 %v754_v25, %v711_v23  ;;  %768 = sbr.rel (%p968_p11) target bundleno = 313 (0x139), region = 59 }
 0x12e   : > { %763 = vst [vmem:[#allocation2 + $0x18] sm:$0xff] %v759_v26  ;;  %v760_v28 = vadd.f32 %v755_v27, %v262_v24 }
 0x130   : > { %764 = vst [vmem:[#allocation2 + $0x8] sm:$0xff] %v760_v28 }
 0x131   : > { %v769_v29 = vld [vmem:[#allocation2 + $0x10] sm:$0xff] }
 0x132   : > { %773 = vst [vmem:[%s1327_s2] sm:$0xff] %v769_v29 }
 0x133   : > { %v770_v30 = vld [vmem:[#allocation2] sm:$0xff] }
 0x134   : > { %774 = vst [vmem:[%s1327_s2 + $0x8] sm:$0xff] %v770_v30 }
 0x135   : > { %v771_v31 = vld [vmem:[#allocation2 + $0x18] sm:$0xff] }
 0x136   : > { %775 = vst [vmem:[%s1327_s2 + $0x10] sm:$0xff] %v771_v31 }
 0x137   : > { %v772_v32 = vld [vmem:[#allocation2 + $0x8] sm:$0xff] }
 0x138   : > { %776 = vst [vmem:[%s1327_s2 + $0x18] sm:$0xff] %v772_v32 }
 0x139 PF: > { %s12_s13 = sadd.s32 1, %s1156_s13   ;;  %s1328_s9 = smov %s1144_s10 }
 0x13a   : > { %p9_p12 = scmp.ge.s32.totalorder %s12_s13, 6   ;;  %s1329_s10 = smov %s1209_s17 }
 0x13b   : > { %s1330_s11 = smov %s1152_s12  ;;  %s1331_s12 = smov %s1333_s14 }
 0x13c   :  { %11 = sbr.rel (!%p9_p12) target bundleno = 3 (0x3), region = 97 }

// kernel: generator_forward.50
= control target key start
LH: loop header
LB: loop body
LE: loop exit
PB: predicated region body
PF: predicated region fallthrough
CT: control target
= control target key end

     0   :  { %v14_v0 = vlaneseq  ;;  %v128_v10 = vmov 0.0   ;;  %v129_v35 = vmov 1966171168   ;;  %s199_s0 = inlined_call_operand.vmem [shape: f32[32,256], index: 0, kind: input, shape index: {}]   ;;  %s200_s1 = inlined_call_operand.vmem [shape: f32[1,256], index: 1, kind: output, shape index: {0}]   ;;  %s201_s2 = inlined_call_operand.vmem [shape: f32[1,256], index: 2, kind: output, shape index: {1}]  }
   0x1   :  { %v20_v1 = vld [vmem:[%s199_s0] sm:$0xff]  ;;  %v21_v2 = vld [vmem:[%s199_s0 + $0x8] sm:$0xff]  ;;  %v22_v3 = vld [vmem:[%s199_s0 + $0x10] sm:$0xff]  ;;  %v51_v36 = vunpack.c.l.s4 %v129_v35 }
   0x2   :  { %vm154_vm0 = vcmp.lt.s32.totalorder %v14_v0, 256  ;;  %v23_v5 = vld [vmem:[%s199_s0 + $0x18] sm:$0xff]  ;;  %v24_v6 = vld [vmem:[%s199_s0 + $0x20] sm:$0xff]  ;;  %v25_v7 = vld [vmem:[%s199_s0 + $0x28] sm:$0xff]  ;;  %v29_v8 = vadd.f32 %v22_v3, %v20_v1  ;;  %v72_v9 = vmul.f32 %v20_v1, %v20_v1  ;;  %v73_v14 = vmul.f32 %v21_v2, %v21_v2 }
   0x3   :  { %18 = vst.msk [vmem:[%s200_s1] sm:$0x3] %vm154_vm0, %v128_v10  ;;  %v26_v11 = vld [vmem:[%s199_s0 + $0x30] sm:$0xff]  ;;  %v27_v12 = vld [vmem:[%s199_s0 + $0x38] sm:$0xff]  ;;  %v38_v13 = vadd.f32 %v23_v5, %v21_v2  ;;  %19 = vst.msk [vmem:[%s201_s2] sm:$0x3] %vm154_vm0, %v128_v10  ;;  %v74_v15 = vmul.f32 %v22_v3, %v22_v3  ;;  %v75_v17 = vmul.f32 %v23_v5, %v23_v5  ;;  %v52_v45 = vunpack.c.0.s8 %v51_v36 }
   0x4   :  { %v30_v16 = vadd.f32 %v29_v8, %v24_v6  ;;  %v76_v18 = vmul.f32 %v24_v6, %v24_v6  ;;  %v77_v19 = vmul.f32 %v25_v7, %v25_v7  ;;  %v78_v21 = vmul.f32 %v26_v11, %v26_v11 }
   0x5   :  { %v39_v20 = vadd.f32 %v38_v13, %v25_v7  ;;  %v79_v23 = vmul.f32 %v27_v12, %v27_v12  ;;  %v80_v24 = vadd.f32 %v74_v15, %v72_v9  ;;  %v89_v25 = vadd.f32 %v75_v17, %v73_v14 }
   0x6   :  { %v31_v22 = vadd.f32 %v30_v16, %v26_v11  ;;  %v54_v46 = vshrl.u32 %v14_v0, 7 }
   0x7   :  { %v40_v26 = vadd.f32 %v39_v20, %v27_v12  ;;  %v81_v28 = vadd.f32 %v80_v24, %v76_v18  ;;  %v90_v29 = vadd.f32 %v89_v25, %v77_v19 }
   0x8   :  { %v32_v27 = vrot.slane %v31_v22, 4  ;;  %v55_v55 = vsub.s32 %v52_v45, %v54_v46 }
   0x9   :  { %v41_v30 = vrot.slane %v40_v26, 4  ;;  %v82_v32 = vadd.f32 %v81_v28, %v78_v21  ;;  %v91_v33 = vadd.f32 %v90_v29, %v79_v23 }
   0xa   :  { %v33_v31 = vadd.f32 %v32_v27, %v31_v22  ;;  %v28_v62 = vld [vmem:[%s200_s1] sm:$0x3] }
   0xb   :  { %v42_v34 = vadd.f32 %v41_v30, %v40_v26  ;;  %v83_v38 = vrot.slane %v82_v32, 4  ;;  %v92_v39 = vrot.slane %v91_v33, 4  ;;  %v71_v3 = vld [vmem:[%s201_s2] sm:$0x3] }
   0xc   :  { %v34_v37 = vrot.slane %v33_v31, 2 }
   0xd   :  { %v43_v40 = vrot.slane %v42_v34, 2  ;;  %v84_v42 = vadd.f32 %v83_v38, %v82_v32  ;;  %v93_v43 = vadd.f32 %v92_v39, %v91_v33 }
   0xe   :  { %v35_v41 = vadd.f32 %v34_v37, %v33_v31 }
   0xf   :  { %v44_v44 = vadd.f32 %v43_v40, %v42_v34  ;;  %v85_v48 = vrot.slane %v84_v42, 2  ;;  %v94_v49 = vrot.slane %v93_v43, 2 }
  0x10   :  { %v36_v47 = vrot.slane %v35_v41, 1 }
  0x11   :  { %v45_v50 = vrot.slane %v44_v44, 1  ;;  %v86_v52 = vadd.f32 %v85_v48, %v84_v42  ;;  %v95_v53 = vadd.f32 %v94_v49, %v93_v43 }
  0x12   :  { %v37_v51 = vadd.f32 %v36_v47, %v35_v41 }
  0x13   :  { %v46_v54 = vadd.f32 %v45_v50, %v44_v44  ;;  %v87_v56 = vrot.slane %v86_v52, 1  ;;  %v96_v57 = vrot.slane %v95_v53, 1 }
  0x15   :  { %v49_v58 = vcombine.low %v37_v51, %v46_v54  ;;  %v88_v59 = vadd.f32 %v87_v56, %v86_v52  ;;  %v97_v60 = vadd.f32 %v96_v57, %v95_v53 }
  0x17   :  { %v56_v61 = vrot.slane %v49_v58, %v55_v55  ;;  %v100_v63 = vcombine.low %v88_v59, %v97_v60 }
  0x19   :  { %v63_v0 = vrot.slane %v56_v61, %v55_v55  ;;  %v107_v1 = vrot.slane %v100_v63, %v55_v55 }
  0x1b   :  { %v65_v2 = vadd.f32 %v63_v0, %v28_v62  ;;  %v114_v5 = vrot.slane %v107_v1, %v55_v55 }
  0x1d   :  { %70 = vst.msk [vmem:[%s200_s1] sm:$0x3] %vm154_vm0, %v65_v2  ;;  %v116_v6 = vadd.f32 %v114_v5, %v71_v3 }
  0x1f   :  { %117 = vst.msk [vmem:[%s201_s2] sm:$0x3] %vm154_vm0, %v116_v6 }

// kernel: generator_forward.51
= control target key start
LH: loop header
LB: loop body
LE: loop exit
PB: predicated region body
PF: predicated region fallthrough
CT: control target
= control target key end

     0   :  { %v24_v0 = vlaneseq  ;;  %s172_s1 = inlined_call_operand.vmem [shape: f32[1,256], index: 1, kind: input, shape index: {}]   ;;  %s173_s2 = inlined_call_operand.vmem [shape: f32[1,256], index: 2, kind: input, shape index: {}]   ;;  %s174_s0 = inlined_call_operand.vmem [shape: f32[32,256], index: 0, kind: input, shape index: {}]   ;;  %s175_s3 = inlined_call_operand.vmem [shape: bf16[32,256], index: 3, kind: output, shape index: {}]  }
   0x1   :  { %v22_v2 = vld [vmem:[%s172_s1] sm:$0x3]  ;;  %v15_v5 = vld [vmem:[%s174_s0 + $0x8] sm:$0xff]  ;;  %v16_v8 = vld [vmem:[%s174_s0 + $0x10] sm:$0xff] }
   0x2   :  { %v25_v1 = vshrl.u32 %v24_v0, 7  ;;  %v42_v3 = vld [vmem:[%s173_s2] sm:$0x3]  ;;  %v17_v9 = vld [vmem:[%s174_s0 + $0x18] sm:$0xff]  ;;  %v19_v15 = vld [vmem:[%s174_s0 + $0x28] sm:$0xff] }
   0x3   :  { %v14_v4 = vld [vmem:[%s174_s0] sm:$0xff]  ;;  %v20_v16 = vld [vmem:[%s174_s0 + $0x30] sm:$0xff]  ;;  %v21_v17 = vld [vmem:[%s174_s0 + $0x38] sm:$0xff] }
   0x4   :  { %v26_v6 = vsub.s32 0, %v25_v1  ;;  %v30_v7 = vsub.s32 1, %v25_v1  ;;  %v18_v10 = vld [vmem:[%s174_s0 + $0x20] sm:$0xff] }
   0x6   :  { %v27_v11 = vrot.slane %v22_v2, %v26_v6  ;;  %v31_v12 = vrot.slane %v22_v2, %v30_v7  ;;  %v47_v13 = vrot.slane %v42_v3, %v26_v6  ;;  %v51_v14 = vrot.slane %v42_v3, %v30_v7 }
   0x8   :  { %v34_v18 = vmul.f32 %v27_v11, %v14_v4  ;;  %v35_v19 = vmul.f32 %v31_v12, %v15_v5  ;;  %v36_v20 = vmul.f32 %v27_v11, %v16_v8  ;;  %v37_v21 = vmul.f32 %v31_v12, %v17_v9 }
   0x9   :  { %v38_v22 = vmul.f32 %v27_v11, %v18_v10  ;;  %v39_v23 = vmul.f32 %v31_v12, %v19_v15  ;;  %v40_v24 = vmul.f32 %v27_v11, %v20_v16  ;;  %v41_v25 = vmul.f32 %v31_v12, %v21_v17 }
   0xa   :  { %v54_v26 = vadd.f32 %v47_v13, %v34_v18  ;;  %v55_v27 = vadd.f32 %v51_v14, %v35_v19  ;;  %v56_v28 = vadd.f32 %v47_v13, %v36_v20  ;;  %v57_v29 = vadd.f32 %v51_v14, %v37_v21 }
   0xb   :  { %v58_v30 = vadd.f32 %v47_v13, %v38_v22  ;;  %v59_v31 = vadd.f32 %v51_v14, %v39_v23  ;;  %v60_v32 = vadd.f32 %v47_v13, %v40_v24  ;;  %v61_v33 = vadd.f32 %v51_v14, %v41_v25 }
   0xc   :  { %v62_v34 = vmax.f32 %v54_v26, 0.0  ;;  %v63_v35 = vmax.f32 %v55_v27, 0.0  ;;  %v64_v36 = vmax.f32 %v56_v28, 0.0  ;;  %v65_v37 = vmax.f32 %v57_v29, 0.0 }
   0xd   :  { %v66_v38 = vmax.f32 %v58_v30, 0.0  ;;  %v67_v39 = vmax.f32 %v59_v31, 0.0  ;;  %v68_v40 = vmax.f32 %v60_v32, 0.0  ;;  %v69_v41 = vmax.f32 %v61_v33, 0.0 }
   0xe   :  { %v106_v42 = vpack.c.bf16 %v63_v35, %v62_v34  ;;  %v107_v43 = vpack.c.bf16 %v65_v37, %v64_v36 }
   0xf   :  { %v108_v44 = vpack.c.bf16 %v67_v39, %v66_v38  ;;  %v109_v45 = vpack.c.bf16 %v69_v41, %v68_v40 }
  0x10   :  { %94 = vst [vmem:[%s175_s3] sm:$0xff] %v106_v42  ;;  %95 = vst [vmem:[%s175_s3 + $0x8] sm:$0xff] %v107_v43 }
  0x11   :  { %96 = vst [vmem:[%s175_s3 + $0x10] sm:$0xff] %v108_v44  ;;  %97 = vst [vmem:[%s175_s3 + $0x18] sm:$0xff] %v109_v45 }

// kernel: generator_forward.52
= control target key start
LH: loop header
LB: loop body
LE: loop exit
PB: predicated region body
PF: predicated region fallthrough
CT: control target
= control target key end

     0   :  { %s1034_s9 = smov 0   ;;  %s1036_s10 = smov 0   ;;  %s1157_s0 = inlined_call_operand.vmem [shape: bf16[32,1024], index: 0, kind: input, shape index: {}]   ;;  %s1158_s1 = inlined_call_operand.vmem [shape: bf16[1024,128], index: 1, kind: input, shape index: {}]   ;;  %s1159_s2 = inlined_call_operand.vmem [shape: f32[32,128], index: 2, kind: output, shape index: {}]  }
   0x1   :  { %s1038_s11 = smov 0   ;;  %s1040_s12 = smov 0  }
   0x2   :  { %s1042_s13 = smov 0  }
   0x3 LB: > { %s24_s14 = sadd.s32 1, %s1012_s12  ;;  %p47_p1 = scmp.ne.s32.totalorder %s1004_s10, %s1000_s9  ;;  %s1016_s13 = sphi %s1042_s13, %s12_s13   ;;  %s1012_s12 = sphi %s1040_s12, %s1163_s12   ;;  %s1008_s11 = sphi %s1038_s11, %s1162_s11   ;;  %s1004_s10 = sphi %s1036_s10, %s1161_s10   ;;  %s1000_s9 = sphi %s1034_s9, %s1160_s9  }
   0x4   : > { %p25_p0 = scmp.ge.s32.totalorder %s24_s14, 2  ;;  %p48_p2 = scmp.eq.s32.totalorder %s1016_s13, 0 }
   0x5   : > { %s40_s16 = sadd.s32 1, %s1004_s10  ;;  %p782_p5 = scmp.ge.s32.totalorder %s1016_s13, 2 }
   0x6   : > { %s1165_s14 = smov (%p25_p0, %s24_s14), 0  ;;  %p49_p3 = por %p48_p2, %p47_p1 }
   0x7   : > { %s36_s15 = ssub.s32 %s1012_s12, %s1165_s14  ;;  %129 = sbr.rel (%p782_p5) target bundleno = 20 (0x14), region = 16 }
   0x8   : > { %p38_p4 = scmp.eq.s32.totalorder %s36_s15, 0 }
   0xa   : > { %s1069_s17 = scalar_select %p38_p4, %s1004_s10, %s40_s16  }
   0xc   : > { %132 = sbr.rel (!%p49_p3) target bundleno = 20 (0x14), region = 20  ;;  %s134_s18 = sand.u32 (%p49_p3), 1, %s1004_s10  }
   0xd   : > { %s836_s19 = sshll.u32 (%p49_p3), %s1012_s12, 4  ;;  %s783_s20 = sshll.u32 (%p49_p3), %s134_s18, 6 }
   0xe   : > { %s142_s23 = scalar_lea.vmem (%p49_p3), %s1157_s0, %s836_s19  ;;  %s136_s24 = scalar_lea.vmem (%p49_p3), [#allocation3], %s783_s20 }
   0xf   : > { %v155_v0 = vld [vmem:[%s142_s23] sm:$0xff] (%p49_p3)  ;;  %v157_v1 = vld [vmem:[%s142_s23 + $0x8] sm:$0xff] (%p49_p3) }
  0x10   : > { %v159_v2 = vld [vmem:[%s142_s23 + $0x20] sm:$0xff] (%p49_p3)  ;;  %156 = vst [vmem:[%s136_s24] sm:$0xff] (%p49_p3), %v155_v0  ;;  %158 = vst [vmem:[%s136_s24 + $0x8] sm:$0xff] (%p49_p3), %v157_v1  ;;  %v161_v3 = vld [vmem:[%s142_s23 + $0x28] sm:$0xff] (%p49_p3) }
  0x11   : > { %160 = vst [vmem:[%s136_s24 + $0x10] sm:$0xff] %v159_v2  ;;  %v163_v4 = vld [vmem:[%s142_s23 + $0x40] sm:$0xff]  ;;  %v165_v5 = vld [vmem:[%s142_s23 + $0x48] sm:$0xff]  ;;  %162 = vst [vmem:[%s136_s24 + $0x18] sm:$0xff] %v161_v3 }
  0x12   : > { %164 = vst [vmem:[%s136_s24 + $0x20] sm:$0xff] %v163_v4  ;;  %166 = vst [vmem:[%s136_s24 + $0x28] sm:$0xff] %v165_v5  ;;  %v167_v6 = vld [vmem:[%s142_s23 + $0x60] sm:$0xff]  ;;  %v169_v7 = vld [vmem:[%s142_s23 + $0x68] sm:$0xff] }
  0x13   : > { %168 = vst [vmem:[%s136_s24 + $0x30] sm:$0xff] %v167_v6  ;;  %170 = vst [vmem:[%s136_s24 + $0x38] sm:$0xff] %v169_v7 }
  0x14 PF: > { %p786_p6 = scmp.ge.s32.totalorder %s1016_s13, 1  ;;  %p187_p7 = scmp.lt.s32.totalorder %s1016_s13, 3 }
  0x16   : > { %p188_p8 = pnand %p786_p6, %p187_p7 }
  0x17   : > { %s194_s25 = sand.u32 (!%p188_p8), 1, %s1000_s9   ;;  %s788_s26 = sshll.u32 (!%p188_p8), %s1008_s11, 6 }
  0x18   : > { %191 = sbr.rel (%p188_p8) target bundleno = 294 (0x126), region = 47  ;;  %s787_s27 = sshll.u32 (!%p188_p8), %s194_s25, 6 }
  0x19   : > { %p229_p9 = scmp.lt.s32.totalorder (!%p188_p8), %s788_s26, 127  ;;  %s1086_s4 = scalar_lea.vmem (!%p188_p8), [#allocation3], %s787_s27 }
  0x1a   : > { %p790_p10 = scmp.ne.s32.totalorder (!%p188_p8), %s1008_s11, 0 }
  0x1d   : > { %s1167_s26 = smov (!%p229_p9, %s788_s26), 127  ;;  %250 = sbr.rel (%p790_p10) target bundleno = 37 (0x25), region = 55 }
  0x1e   : > { %s789_s28 = sshll.u32 %s1167_s26, 2 }
  0x1f   : > { %s1084_s3 = scalar_lea.vmem %s1158_s1, %s789_s28 }
  0x22   : > { %v1018_v8 = vmov 0.0  }
  0x23   : > { %251 = vst [vmem:[#allocation2 + $0x10] sm:$0xff] %v1018_v8  ;;  %252 = vst [vmem:[#allocation2] sm:$0xff] %v1018_v8 }
  0x24   : > { %253 = vst [vmem:[#allocation2 + $0x18] sm:$0xff] %v1018_v8  ;;  %254 = vst [vmem:[#allocation2 + $0x8] sm:$0xff] %v1018_v8 }
  0x25 PF: > { %v934_v9 = vld [vmem:[%s1084_s3 + $0x78] sm:$0xff]   ;;  %v938_v13 = vld [vmem:[%s1084_s3 + $0x70] sm:$0xff]   ;;  %v942_v17 = vld [vmem:[%s1084_s3 + $0x68] sm:$0xff]   ;;  %p831_p11 = scmp.ne.s32.totalorder %s1008_s11, 1 }
  0x26   : > { %v935_v10 = vld [vmem:[%s1084_s3 + $0xf8] sm:$0xff]   ;;  %837 = vmatprep.subr.bf16.mxu0 %v934_v9  ;;  %v939_v14 = vld [vmem:[%s1084_s3 + $0xf0] sm:$0xff]   ;;  %v943_v18 = vld [vmem:[%s1084_s3 + $0xe8] sm:$0xff]  }
  0x27   : > { %v936_v11 = vld [vmem:[%s1084_s3 + $0x38] sm:$0xff]   ;;  %865 = vmatprep.subr.bf16.mxu1 %v935_v10  ;;  %v940_v15 = vld [vmem:[%s1084_s3 + $0x30] sm:$0xff]   ;;  %v944_v19 = vld [vmem:[%s1084_s3 + $0x28] sm:$0xff]  }
  0x28   : > { %v937_v12 = vld [vmem:[%s1084_s3 + $0xb8] sm:$0xff]   ;;  %838 = vmatpush3.bf16.msra.mxu0 %v936_v11  ;;  %v941_v16 = vld [vmem:[%s1084_s3 + $0xb0] sm:$0xff]   ;;  %v945_v20 = vld [vmem:[%s1084_s3 + $0xa8] sm:$0xff]  }
  0x29   : > { %866 = vmatpush3.bf16.msra.mxu1 %v937_v12  ;;  %839 = vmatprep.subr.bf16.mxu0 %v938_v13  ;;  %v946_v21 = vld [vmem:[%s1084_s3 + $0x60] sm:$0xff]   ;;  %v950_v25 = vld [vmem:[%s1084_s3 + $0x58] sm:$0xff]   ;;  %v954_v29 = vld [vmem:[%s1084_s3 + $0x50] sm:$0xff]  }
  0x2a   : > { %867 = vmatprep.subr.bf16.mxu1 %v939_v14  ;;  %v947_v22 = vld [vmem:[%s1084_s3 + $0xe0] sm:$0xff]   ;;  %v951_v26 = vld [vmem:[%s1084_s3 + $0xd8] sm:$0xff]   ;;  %v955_v30 = vld [vmem:[%s1084_s3 + $0xd0] sm:$0xff]  }
  0x2b   : > { %v948_v23 = vld [vmem:[%s1084_s3 + $0x20] sm:$0xff]   ;;  %v952_v27 = vld [vmem:[%s1084_s3 + $0x18] sm:$0xff]   ;;  %v956_v31 = vld [vmem:[%s1084_s3 + $0x10] sm:$0xff]  }
  0x2c   : > { %840 = vmatpush3.bf16.msra.mxu0 %v940_v15  ;;  %v949_v24 = vld [vmem:[%s1084_s3 + $0xa0] sm:$0xff]   ;;  %v953_v28 = vld [vmem:[%s1084_s3 + $0x98] sm:$0xff]   ;;  %v957_v32 = vld [vmem:[%s1084_s3 + $0x90] sm:$0xff]  }
  0x2d   : > { %868 = vmatpush3.bf16.msra.mxu1 %v941_v16  ;;  %841 = vmatprep.subr.bf16.mxu0 %v942_v17  ;;  %v958_v33 = vld [vmem:[%s1084_s3 + $0x48] sm:$0xff]   ;;  %v962_v37 = vld [vmem:[%s1084_s3 + $0x40] sm:$0xff]   ;;  %v255_v56 = vld [vmem:[#allocation2 + $0x10] sm:$0xff] }
  0x2e   : > { %869 = vmatprep.subr.bf16.mxu1 %v943_v18  ;;  %v959_v34 = vld [vmem:[%s1084_s3 + $0xc8] sm:$0xff]   ;;  %v963_v38 = vld [vmem:[%s1084_s3 + $0xc0] sm:$0xff]   ;;  %v257_v10 = vld [vmem:[#allocation2 + $0x18] sm:$0xff] }
  0x2f   : > { %v960_v35 = vld [vmem:[%s1084_s3 + $0x8] sm:$0xff]   ;;  %v964_v39 = vld [vmem:[%s1084_s3] sm:$0xff]  }
  0x30   : > { %842 = vmatpush3.bf16.msra.mxu0 %v944_v19  ;;  %v961_v36 = vld [vmem:[%s1084_s3 + $0x88] sm:$0xff]   ;;  %v965_v40 = vld [vmem:[%s1084_s3 + $0x80] sm:$0xff]  }
  0x31   : > { %870 = vmatpush3.bf16.msra.mxu1 %v945_v20  ;;  %843 = vmatprep.subr.bf16.mxu0 %v946_v21  ;;  %v966_v41 = vld [vmem:[%s1086_s4] ss:$16 sps:$4 sm:$0xff]   ;;  %v968_v42 = vld [vmem:[%s1086_s4 + $0x4] ss:$16 sps:$4 sm:$0xff]   ;;  %v969_v43 = vld [vmem:[%s1086_s4 + $0x8] ss:$16 sps:$4 sm:$0xff]  }
  0x32   : > { %871 = vmatprep.subr.bf16.mxu1 %v947_v22  ;;  %v971_v44 = vld [vmem:[%s1086_s4 + $0xc] ss:$16 sps:$4 sm:$0xff]   ;;  %595 = vmatprep.mubr.bf16.mxu0 %v968_v42  ;;  %v972_v45 = vld [vmem:[%s1086_s4 + $0x24] ss:$16 sps:$4 sm:$0xff]   ;;  %v976_v47 = vld [vmem:[%s1086_s4 + $0x20] ss:$16 sps:$4 sm:$0xff]  }
  0x33   : > { %644 = vmatprep.mubr.bf16.mxu1 %v971_v44  ;;  %v974_v46 = vld [vmem:[%s1086_s4 + $0x2c] ss:$16 sps:$4 sm:$0xff]   ;;  %v977_v48 = vld [vmem:[%s1086_s4 + $0x28] ss:$16 sps:$4 sm:$0xff]   ;;  %v256_v1 = vld [vmem:[#allocation2] sm:$0xff] }
  0x34   : > { %844 = vmatpush3.bf16.msra.mxu0 %v948_v23  ;;  %v258_v18 = vld [vmem:[#allocation2 + $0x8] sm:$0xff] }
  0x35   : > { %872 = vmatpush3.bf16.msra.mxu1 %v949_v24  ;;  %845 = vmatprep.subr.bf16.mxu0 %v950_v25 }
  0x36   : > { %873 = vmatprep.subr.bf16.mxu1 %v951_v26 }
  0x38   : > { %846 = vmatpush3.bf16.msra.mxu0 %v952_v27 }
  0x39   : > { %874 = vmatpush3.bf16.msra.mxu1 %v953_v28  ;;  %847 = vmatprep.subr.bf16.mxu0 %v954_v29 }
  0x3a   : > { %875 = vmatprep.subr.bf16.mxu1 %v955_v30 }
  0x3c   : > { %848 = vmatpush3.bf16.msra.mxu0 %v956_v31 }
  0x3d   : > { %876 = vmatpush3.bf16.msra.mxu1 %v957_v32  ;;  %849 = vmatprep.subr.bf16.mxu0 %v958_v33 }
  0x3e   : > { %877 = vmatprep.subr.bf16.mxu1 %v959_v34 }
  0x40   : > { %850 = vmatpush3.bf16.msra.mxu0 %v960_v35 }
  0x41   : > { %878 = vmatpush3.bf16.msra.mxu1 %v961_v36  ;;  %851 = vmatprep.subr.bf16.mxu0 %v962_v37 }
  0x42   : > { %879 = vmatprep.subr.bf16.mxu1 %v963_v38 }
  0x44   : > { %852 = vmatpush3.bf16.msra.mxu0 %v964_v39 }
  0x45   : > { %880 = vmatpush3.bf16.msra.mxu1 %v965_v40 }
  0x47   : > { %596 = vmatmul.mubr.bf16.vlgmr.msra.gmra.mxu0 %v966_v41 }
  0x48   : > { %645 = vmatmul.mubr.bf16.vlgmr.msra.gmra.mxu1 %v969_v43  ;;  %603 = vmatprep.mubr.bf16.mxu0 %v972_v45 }
  0x49   : > { %652 = vmatprep.mubr.bf16.mxu1 %v974_v46 }
  0x4f   : > { %604 = vmatmul.mubr.bf16.gmra.mxu0 %v976_v47 }
  0x50   : > { %653 = vmatmul.mubr.bf16.gmra.mxu1 %v977_v48 }
 0x107   : > { %v853_v49 = vpop.f32.mrf.mxu0 }
 0x108   : > { %v881_v50 = vpop.f32.mrf.mxu1 }
 0x109   : > { %v854_v51 = vpop.f32.mrf.mxu0 }
 0x10a   : > { %v855_v52 = vadd.f32 %v854_v51, %v853_v49  ;;  %v882_v53 = vpop.f32.mrf.mxu1 }
 0x10b   : > { %v883_v54 = vadd.f32 %v882_v53, %v881_v50  ;;  %v856_v55 = vpop.f32.mrf.mxu0 }
 0x10c   : > { %v884_v57 = vpop.f32.mrf.mxu1 }
 0x10d   : > { %v647_v58 = vadd.f32 %v883_v54, %v855_v52  ;;  %v857_v59 = vpop.f32.mrf.mxu0 }
 0x10e   : > { %v858_v60 = vadd.f32 %v857_v59, %v856_v55  ;;  %v885_v61 = vpop.f32.mrf.mxu1 }
 0x10f   : > { %v661_v62 = vadd.f32 %v647_v58, %v255_v56  ;;  %v886_v63 = vadd.f32 %v885_v61, %v884_v57  ;;  %v859_v0 = vpop.f32.mrf.mxu0 }
 0x110   : > { %v887_v2 = vpop.f32.mrf.mxu1 }
 0x111   : > { %665 = vst [vmem:[#allocation2 + $0x10] sm:$0xff] %v661_v62  ;;  %v650_v3 = vadd.f32 %v886_v63, %v858_v60  ;;  %v860_v4 = vpop.f32.mrf.mxu0 }
 0x112   : > { %v861_v5 = vadd.f32 %v860_v4, %v859_v0  ;;  %v888_v6 = vpop.f32.mrf.mxu1 }
 0x113   : > { %v662_v7 = vadd.f32 %v650_v3, %v256_v1  ;;  %v889_v8 = vadd.f32 %v888_v6, %v887_v2  ;;  %v862_v9 = vpop.f32.mrf.mxu0 }
 0x114   : > { %v890_v11 = vpop.f32.mrf.mxu1 }
 0x115   : > { %666 = vst [vmem:[#allocation2] sm:$0xff] %v662_v7  ;;  %v655_v12 = vadd.f32 %v889_v8, %v861_v5  ;;  %v863_v13 = vpop.f32.mrf.mxu0 }
 0x116   : > { %v864_v14 = vadd.f32 %v863_v13, %v862_v9  ;;  %v891_v15 = vpop.f32.mrf.mxu1 }
 0x117   : > { %v663_v16 = vadd.f32 %v655_v12, %v257_v10  ;;  %v892_v17 = vadd.f32 %v891_v15, %v890_v11 }
 0x119   : > { %667 = vst [vmem:[#allocation2 + $0x18] sm:$0xff] %v663_v16  ;;  %v658_v19 = vadd.f32 %v892_v17, %v864_v14  ;;  %672 = sbr.rel (%p831_p11) target bundleno = 294 (0x126), region = 59 }
 0x11b   : > { %v664_v20 = vadd.f32 %v658_v19, %v258_v18 }
 0x11d   : > { %668 = vst [vmem:[#allocation2 + $0x8] sm:$0xff] %v664_v20 }
 0x11e   : > { %v673_v21 = vld [vmem:[#allocation2 + $0x10] sm:$0xff]  ;;  %v674_v22 = vld [vmem:[#allocation2] sm:$0xff] }
 0x11f   : > { %677 = vst [vmem:[%s1159_s2] sm:$0xff] %v673_v21  ;;  %678 = vst [vmem:[%s1159_s2 + $0x8] sm:$0xff] %v674_v22 }
 0x120   : > { %v675_v23 = vld [vmem:[#allocation2 + $0x18] sm:$0xff] }
 0x121   : > { %679 = vst [vmem:[%s1159_s2 + $0x10] sm:$0xff] %v675_v23 }
 0x124   : > { %v676_v24 = vld [vmem:[#allocation2 + $0x8] sm:$0xff] }
 0x125   : > { %680 = vst [vmem:[%s1159_s2 + $0x18] sm:$0xff] %v676_v24 }
 0x126 PF: > { %s12_s13 = sadd.s32 1, %s1016_s13   ;;  %s1160_s9 = smov %s1004_s10 }
 0x127   : > { %p9_p12 = scmp.ge.s32.totalorder %s12_s13, 4   ;;  %s1161_s10 = smov %s1069_s17 }
 0x128   : > { %s1162_s11 = smov %s1012_s12  ;;  %s1163_s12 = smov %s1165_s14 }
 0x129   :  { %11 = sbr.rel (!%p9_p12) target bundleno = 3 (0x3), region = 97 }

// kernel: generator_forward.56
= control target key start
LH: loop header
LB: loop body
LE: loop exit
PB: predicated region body
PF: predicated region fallthrough
CT: control target
= control target key end

     0   :  { %v105_v0 = vmov 0.0   ;;  %s187_s1 = inlined_call_operand.vmem [shape: f32[1,128], index: 1, kind: output, shape index: {0}]   ;;  %s188_s2 = inlined_call_operand.vmem [shape: f32[1,128], index: 2, kind: output, shape index: {1}]   ;;  %s189_s0 = inlined_call_operand.vmem [shape: f32[128,128], index: 0, kind: input, shape index: {}]  }
   0x1   :  { %14 = vst [vmem:[%s187_s1] sm:$0x1] %v105_v0  ;;  %15 = vst [vmem:[%s188_s2] sm:$0x1] %v105_v0  ;;  %v16_v1 = vld [vmem:[%s189_s0] sm:$0xff]  ;;  %v17_v2 = vld [vmem:[%s189_s0 + $0x8] sm:$0xff] }
   0x2   :  { %v18_v3 = vld [vmem:[%s189_s0 + $0x10] sm:$0xff]  ;;  %v19_v4 = vld [vmem:[%s189_s0 + $0x18] sm:$0xff]  ;;  %v33_v5 = vadd.f32 %v17_v2, %v16_v1  ;;  %v57_v6 = vmul.f32 %v16_v1, %v16_v1  ;;  %v58_v7 = vmul.f32 %v17_v2, %v17_v2  ;;  %v20_v9 = vld [vmem:[%s189_s0 + $0x20] sm:$0xff] }
   0x3   :  { %v59_v8 = vmul.f32 %v18_v3, %v18_v3  ;;  %v60_v11 = vmul.f32 %v19_v4, %v19_v4  ;;  %v21_v13 = vld [vmem:[%s189_s0 + $0x28] sm:$0xff]  ;;  %v61_v15 = vmul.f32 %v20_v9, %v20_v9  ;;  %v22_v17 = vld [vmem:[%s189_s0 + $0x30] sm:$0xff]  ;;  %v23_v21 = vld [vmem:[%s189_s0 + $0x38] sm:$0xff] }
   0x4   :  { %v34_v10 = vadd.f32 %v33_v5, %v18_v3  ;;  %v73_v12 = vadd.f32 %v58_v7, %v57_v6  ;;  %v62_v19 = vmul.f32 %v21_v13, %v21_v13  ;;  %v63_v23 = vmul.f32 %v22_v17, %v22_v17  ;;  %v24_v25 = vld [vmem:[%s189_s0 + $0x40] sm:$0xff]  ;;  %v25_v29 = vld [vmem:[%s189_s0 + $0x48] sm:$0xff]  ;;  %v26_v33 = vld [vmem:[%s189_s0 + $0x50] sm:$0xff] }
   0x5   :  { %v64_v27 = vmul.f32 %v23_v21, %v23_v21  ;;  %v65_v31 = vmul.f32 %v24_v25, %v24_v25  ;;  %v66_v35 = vmul.f32 %v25_v29, %v25_v29  ;;  %v27_v37 = vld [vmem:[%s189_s0 + $0x58] sm:$0xff]  ;;  %v67_v39 = vmul.f32 %v26_v33, %v26_v33  ;;  %v28_v41 = vld [vmem:[%s189_s0 + $0x60] sm:$0xff]  ;;  %v29_v45 = vld [vmem:[%s189_s0 + $0x68] sm:$0xff] }
   0x6   :  { %v35_v14 = vadd.f32 %v34_v10, %v19_v4  ;;  %v74_v16 = vadd.f32 %v73_v12, %v59_v8  ;;  %v68_v43 = vmul.f32 %v27_v37, %v27_v37  ;;  %v69_v47 = vmul.f32 %v28_v41, %v28_v41  ;;  %v30_v49 = vld [vmem:[%s189_s0 + $0x70] sm:$0xff]  ;;  %v31_v53 = vld [vmem:[%s189_s0 + $0x78] sm:$0xff] }
   0x7   :  { %v70_v51 = vmul.f32 %v29_v45, %v29_v45  ;;  %v71_v55 = vmul.f32 %v30_v49, %v30_v49  ;;  %v72_v58 = vmul.f32 %v31_v53, %v31_v53 }
   0x8   :  { %v36_v18 = vadd.f32 %v35_v14, %v20_v9  ;;  %v75_v20 = vadd.f32 %v74_v16, %v60_v11  ;;  %v32_v7 = vld [vmem:[%s187_s1] sm:$0x1] }
   0x9   :  { %v56_v12 = vld [vmem:[%s188_s2] sm:$0x1] }
   0xa   :  { %v37_v22 = vadd.f32 %v36_v18, %v21_v13  ;;  %v76_v24 = vadd.f32 %v75_v20, %v61_v15 }
   0xc   :  { %v38_v26 = vadd.f32 %v37_v22, %v22_v17  ;;  %v77_v28 = vadd.f32 %v76_v24, %v62_v19 }
   0xe   :  { %v39_v30 = vadd.f32 %v38_v26, %v23_v21  ;;  %v78_v32 = vadd.f32 %v77_v28, %v63_v23 }
  0x10   :  { %v40_v34 = vadd.f32 %v39_v30, %v24_v25  ;;  %v79_v36 = vadd.f32 %v78_v32, %v64_v27 }
  0x12   :  { %v41_v38 = vadd.f32 %v40_v34, %v25_v29  ;;  %v80_v40 = vadd.f32 %v79_v36, %v65_v31 }
  0x14   :  { %v42_v42 = vadd.f32 %v41_v38, %v26_v33  ;;  %v81_v44 = vadd.f32 %v80_v40, %v66_v35 }
  0x16   :  { %v43_v46 = vadd.f32 %v42_v42, %v27_v37  ;;  %v82_v48 = vadd.f32 %v81_v44, %v67_v39 }
  0x18   :  { %v44_v50 = vadd.f32 %v43_v46, %v28_v41  ;;  %v83_v52 = vadd.f32 %v82_v48, %v68_v43 }
  0x1a   :  { %v45_v54 = vadd.f32 %v44_v50, %v29_v45  ;;  %v84_v56 = vadd.f32 %v83_v52, %v69_v47 }
  0x1c   :  { %v46_v57 = vadd.f32 %v45_v54, %v30_v49  ;;  %v85_v59 = vadd.f32 %v84_v56, %v70_v51 }
  0x1e   :  { %v47_v60 = vadd.f32 %v46_v57, %v31_v53  ;;  %v86_v61 = vadd.f32 %v85_v59, %v71_v55 }
  0x20   :  { %v48_v62 = vrot.slane %v47_v60, 4  ;;  %v87_v63 = vadd.f32 %v86_v61, %v72_v58 }
  0x22   :  { %v49_v0 = vadd.f32 %v48_v62, %v47_v60  ;;  %v88_v1 = vrot.slane %v87_v63, 4 }
  0x24   :  { %v50_v2 = vrot.slane %v49_v0, 2  ;;  %v89_v3 = vadd.f32 %v88_v1, %v87_v63 }
  0x26   :  { %v51_v4 = vadd.f32 %v50_v2, %v49_v0  ;;  %v90_v5 = vrot.slane %v89_v3, 2 }
  0x28   :  { %v52_v6 = vrot.slane %v51_v4, 1  ;;  %v91_v8 = vadd.f32 %v90_v5, %v89_v3 }
  0x2a   :  { %v53_v9 = vadd.f32 %v52_v6, %v51_v4  ;;  %v92_v10 = vrot.slane %v91_v8, 1 }
  0x2c   :  { %v54_v11 = vadd.f32 %v53_v9, %v32_v7  ;;  %v93_v13 = vadd.f32 %v92_v10, %v91_v8 }
  0x2e   :  { %55 = vst [vmem:[%s187_s1] sm:$0x1] %v54_v11  ;;  %v94_v14 = vadd.f32 %v93_v13, %v56_v12 }
  0x30   :  { %95 = vst [vmem:[%s188_s2] sm:$0x1] %v94_v14 }

// kernel: generator_forward.57
= control target key start
LH: loop header
LB: loop body
LE: loop exit
PB: predicated region body
PF: predicated region fallthrough
CT: control target
= control target key end

     0   :  { %s391_s0 = inlined_call_operand.vmem [shape: f32[128,128], index: 0, kind: input, shape index: {}]   ;;  %s392_s1 = inlined_call_operand.vmem [shape: f32[1,128], index: 1, kind: input, shape index: {}]   ;;  %s393_s2 = inlined_call_operand.vmem [shape: f32[1,128], index: 2, kind: input, shape index: {}]   ;;  %s394_s3 = inlined_call_operand.vmem [shape: bf16[128,128], index: 3, kind: output, shape index: {}]  }
   0x1   :  { %v14_v0 = vld [vmem:[%s391_s0] sm:$0xff]  ;;  %v15_v1 = vld [vmem:[%s391_s0 + $0x8] sm:$0xff]  ;;  %v16_v6 = vld [vmem:[%s391_s0 + $0x10] sm:$0xff] }
   0x2   :  { %v286_v2 = vld [vmem:[%s392_s1] ss:$0 sm:$0xff]  ;;  %v17_v7 = vld [vmem:[%s391_s0 + $0x18] sm:$0xff]  ;;  %v19_v11 = vld [vmem:[%s391_s0 + $0x28] sm:$0xff] }
   0x3   :  { %v37_v3 = vmul.f32 %v286_v2, %v14_v0  ;;  %v38_v4 = vmul.f32 %v286_v2, %v15_v1  ;;  %v293_v5 = vld [vmem:[%s393_s2] ss:$0 sm:$0xff]  ;;  %v39_v8 = vmul.f32 %v286_v2, %v16_v6  ;;  %v40_v9 = vmul.f32 %v286_v2, %v17_v7  ;;  %v20_v12 = vld [vmem:[%s391_s0 + $0x30] sm:$0xff]  ;;  %v21_v17 = vld [vmem:[%s391_s0 + $0x38] sm:$0xff] }
   0x4   :  { %v18_v10 = vld [vmem:[%s391_s0 + $0x20] sm:$0xff]  ;;  %v42_v16 = vmul.f32 %v286_v2, %v19_v11  ;;  %v43_v20 = vmul.f32 %v286_v2, %v20_v12  ;;  %v44_v21 = vmul.f32 %v286_v2, %v21_v17  ;;  %v23_v27 = vld [vmem:[%s391_s0 + $0x48] sm:$0xff]  ;;  %v24_v32 = vld [vmem:[%s391_s0 + $0x50] sm:$0xff] }
   0x5   :  { %v60_v13 = vadd.f32 %v293_v5, %v37_v3  ;;  %v61_v14 = vadd.f32 %v293_v5, %v38_v4  ;;  %v41_v15 = vmul.f32 %v286_v2, %v18_v10  ;;  %v62_v18 = vadd.f32 %v293_v5, %v39_v8  ;;  %v22_v22 = vld [vmem:[%s391_s0 + $0x40] sm:$0xff]  ;;  %v25_v33 = vld [vmem:[%s391_s0 + $0x58] sm:$0xff]  ;;  %v27_v39 = vld [vmem:[%s391_s0 + $0x68] sm:$0xff] }
   0x6   :  { %v63_v19 = vadd.f32 %v293_v5, %v40_v9  ;;  %v65_v26 = vadd.f32 %v293_v5, %v42_v16  ;;  %v66_v30 = vadd.f32 %v293_v5, %v43_v20  ;;  %v67_v31 = vadd.f32 %v293_v5, %v44_v21  ;;  %v26_v38 = vld [vmem:[%s391_s0 + $0x60] sm:$0xff]  ;;  %v28_v44 = vld [vmem:[%s391_s0 + $0x70] sm:$0xff]  ;;  %v29_v49 = vld [vmem:[%s391_s0 + $0x78] sm:$0xff] }
   0x7   :  { %v76_v23 = vmax.f32 %v60_v13, 0.0  ;;  %v77_v24 = vmax.f32 %v61_v14, 0.0  ;;  %v64_v25 = vadd.f32 %v293_v5, %v41_v15  ;;  %v78_v28 = vmax.f32 %v62_v18, 0.0 }
   0x8   :  { %v79_v29 = vmax.f32 %v63_v19, 0.0  ;;  %v81_v36 = vmax.f32 %v65_v26, 0.0  ;;  %v45_v37 = vmul.f32 %v286_v2, %v22_v22  ;;  %v82_v41 = vmax.f32 %v66_v30, 0.0 }
   0x9   :  { %v213_v34 = vpack.c.bf16 %v77_v24, %v76_v23  ;;  %v80_v35 = vmax.f32 %v64_v25, 0.0  ;;  %v83_v42 = vmax.f32 %v67_v31, 0.0  ;;  %v46_v43 = vmul.f32 %v286_v2, %v23_v27 }
   0xa   :  { %v218_v40 = vpack.c.bf16 %v79_v29, %v78_v28  ;;  %v68_v46 = vadd.f32 %v293_v5, %v45_v37  ;;  %v47_v47 = vmul.f32 %v286_v2, %v24_v32  ;;  %v48_v48 = vmul.f32 %v286_v2, %v25_v33 }
   0xb   :  { %214 = vst [vmem:[%s394_s3] sm:$0xff] %v213_v34   ;;  %v223_v45 = vpack.c.bf16 %v81_v36, %v80_v35  ;;  %v228_v50 = vpack.c.bf16 %v83_v42, %v82_v41  ;;  %v69_v51 = vadd.f32 %v293_v5, %v46_v43  ;;  %v49_v52 = vmul.f32 %v286_v2, %v26_v38 }
   0xc   :  { %250 = vst [vmem:[%s394_s3 + $0x8] sm:$0xff] %v218_v40   ;;  %v50_v53 = vmul.f32 %v286_v2, %v27_v39  ;;  %v84_v54 = vmax.f32 %v68_v46, 0.0  ;;  %v70_v55 = vadd.f32 %v293_v5, %v47_v47  ;;  %v71_v56 = vadd.f32 %v293_v5, %v48_v48 }
   0xd   :  { %251 = vst [vmem:[%s394_s3 + $0x10] sm:$0xff] %v223_v45   ;;  %v51_v57 = vmul.f32 %v286_v2, %v28_v44  ;;  %252 = vst [vmem:[%s394_s3 + $0x18] sm:$0xff] %v228_v50   ;;  %v85_v58 = vmax.f32 %v69_v51, 0.0  ;;  %v72_v59 = vadd.f32 %v293_v5, %v49_v52  ;;  %v52_v61 = vmul.f32 %v286_v2, %v29_v49 }
   0xe   :  { %v73_v60 = vadd.f32 %v293_v5, %v50_v53  ;;  %v86_v62 = vmax.f32 %v70_v55, 0.0  ;;  %v87_v63 = vmax.f32 %v71_v56, 0.0 }
   0xf   :  { %v74_v0 = vadd.f32 %v293_v5, %v51_v57  ;;  %v233_v1 = vpack.c.bf16 %v85_v58, %v84_v54  ;;  %v88_v3 = vmax.f32 %v72_v59, 0.0  ;;  %v75_v6 = vadd.f32 %v293_v5, %v52_v61 }
  0x10   :  { %v89_v4 = vmax.f32 %v73_v60, 0.0  ;;  %v238_v7 = vpack.c.bf16 %v87_v63, %v86_v62 }
  0x11   :  { %v90_v8 = vmax.f32 %v74_v0, 0.0  ;;  %253 = vst [vmem:[%s394_s3 + $0x20] sm:$0xff] %v233_v1   ;;  %v91_v10 = vmax.f32 %v75_v6, 0.0 }
  0x12   :  { %v243_v9 = vpack.c.bf16 %v89_v4, %v88_v3  ;;  %254 = vst [vmem:[%s394_s3 + $0x28] sm:$0xff] %v238_v7  }
  0x13   :  { %v248_v2 = vpack.c.bf16 %v91_v10, %v90_v8 }
  0x14   :  { %255 = vst [vmem:[%s394_s3 + $0x30] sm:$0xff] %v243_v9  }
  0x15   :  { %256 = vst [vmem:[%s394_s3 + $0x38] sm:$0xff] %v248_v2  }

// kernel: generator_forward.58
= control target key start
LH: loop header
LB: loop body
LE: loop exit
PB: predicated region body
PF: predicated region fallthrough
CT: control target
= control target key end

     0   :  { %s1288_s1 = inlined_call_operand.vmem [shape: bf16[512,128], index: 1, kind: input, shape index: {}]   ;;  %s1289_s0 = inlined_call_operand.vmem [shape: bf16[128,512], index: 0, kind: input, shape index: {}]   ;;  %s1290_s2 = inlined_call_operand.vmem [shape: f32[128,128], index: 2, kind: output, shape index: {}]  }
   0x1   :  { %v953_v0 = vld [vmem:[%s1288_s1 + $0x78] sm:$0xff]   ;;  %v957_v4 = vld [vmem:[%s1288_s1 + $0x70] sm:$0xff]   ;;  %v961_v8 = vld [vmem:[%s1288_s1 + $0x68] sm:$0xff]  }
   0x2   :  { %v954_v1 = vld [vmem:[%s1288_s1 + $0xf8] sm:$0xff]   ;;  %825 = vmatprep.subr.bf16.mxu0 %v953_v0  ;;  %v958_v5 = vld [vmem:[%s1288_s1 + $0xf0] sm:$0xff]   ;;  %v962_v9 = vld [vmem:[%s1288_s1 + $0xe8] sm:$0xff]  }
   0x3   :  { %v955_v2 = vld [vmem:[%s1288_s1 + $0x38] sm:$0xff]   ;;  %889 = vmatprep.subr.bf16.mxu1 %v954_v1  ;;  %v959_v6 = vld [vmem:[%s1288_s1 + $0x30] sm:$0xff]   ;;  %v963_v10 = vld [vmem:[%s1288_s1 + $0x28] sm:$0xff]  }
   0x4   :  { %v956_v3 = vld [vmem:[%s1288_s1 + $0xb8] sm:$0xff]   ;;  %826 = vmatpush3.bf16.msra.mxu0 %v955_v2  ;;  %v960_v7 = vld [vmem:[%s1288_s1 + $0xb0] sm:$0xff]   ;;  %v964_v11 = vld [vmem:[%s1288_s1 + $0xa8] sm:$0xff]  }
   0x5   :  { %890 = vmatpush3.bf16.msra.mxu1 %v956_v3  ;;  %827 = vmatprep.subr.bf16.mxu0 %v957_v4  ;;  %v965_v12 = vld [vmem:[%s1288_s1 + $0x60] sm:$0xff]   ;;  %v969_v16 = vld [vmem:[%s1288_s1 + $0x58] sm:$0xff]   ;;  %v973_v20 = vld [vmem:[%s1288_s1 + $0x50] sm:$0xff]  }
   0x6   :  { %891 = vmatprep.subr.bf16.mxu1 %v958_v5  ;;  %v966_v13 = vld [vmem:[%s1288_s1 + $0xe0] sm:$0xff]   ;;  %v970_v17 = vld [vmem:[%s1288_s1 + $0xd8] sm:$0xff]   ;;  %v974_v21 = vld [vmem:[%s1288_s1 + $0xd0] sm:$0xff]  }
   0x7   :  { %v967_v14 = vld [vmem:[%s1288_s1 + $0x20] sm:$0xff]   ;;  %v971_v18 = vld [vmem:[%s1288_s1 + $0x18] sm:$0xff]   ;;  %v975_v22 = vld [vmem:[%s1288_s1 + $0x10] sm:$0xff]  }
   0x8   :  { %828 = vmatpush3.bf16.msra.mxu0 %v959_v6  ;;  %v968_v15 = vld [vmem:[%s1288_s1 + $0xa0] sm:$0xff]   ;;  %v972_v19 = vld [vmem:[%s1288_s1 + $0x98] sm:$0xff]   ;;  %v976_v23 = vld [vmem:[%s1288_s1 + $0x90] sm:$0xff]  }
   0x9   :  { %892 = vmatpush3.bf16.msra.mxu1 %v960_v7  ;;  %829 = vmatprep.subr.bf16.mxu0 %v961_v8  ;;  %v977_v24 = vld [vmem:[%s1288_s1 + $0x48] sm:$0xff]   ;;  %v981_v28 = vld [vmem:[%s1288_s1 + $0x40] sm:$0xff]  }
   0xa   :  { %893 = vmatprep.subr.bf16.mxu1 %v962_v9  ;;  %v978_v25 = vld [vmem:[%s1288_s1 + $0xc8] sm:$0xff]   ;;  %v982_v29 = vld [vmem:[%s1288_s1 + $0xc0] sm:$0xff]  }
   0xb   :  { %v979_v26 = vld [vmem:[%s1288_s1 + $0x8] sm:$0xff]   ;;  %v983_v30 = vld [vmem:[%s1288_s1] sm:$0xff]  }
   0xc   :  { %830 = vmatpush3.bf16.msra.mxu0 %v963_v10  ;;  %v980_v27 = vld [vmem:[%s1288_s1 + $0x88] sm:$0xff]   ;;  %v984_v31 = vld [vmem:[%s1288_s1 + $0x80] sm:$0xff]  }
   0xd   :  { %894 = vmatpush3.bf16.msra.mxu1 %v964_v11  ;;  %831 = vmatprep.subr.bf16.mxu0 %v965_v12  ;;  %v985_v32 = vld [vmem:[%s1289_s0] ss:$16 sps:$4 sm:$0xff]   ;;  %v987_v33 = vld [vmem:[%s1289_s0 + $0x4] ss:$16 sps:$4 sm:$0xff]   ;;  %v988_v34 = vld [vmem:[%s1289_s0 + $0x8] ss:$16 sps:$4 sm:$0xff]  }
   0xe   :  { %895 = vmatprep.subr.bf16.mxu1 %v966_v13  ;;  %v990_v35 = vld [vmem:[%s1289_s0 + $0xc] ss:$16 sps:$4 sm:$0xff]   ;;  %528 = vmatprep.mubr.bf16.mxu0 %v987_v33  ;;  %v991_v36 = vld [vmem:[%s1289_s0 + $0x24] ss:$16 sps:$4 sm:$0xff]   ;;  %v995_v38 = vld [vmem:[%s1289_s0 + $0x20] ss:$16 sps:$4 sm:$0xff]  }
   0xf   :  { %625 = vmatprep.mubr.bf16.mxu1 %v990_v35  ;;  %v993_v37 = vld [vmem:[%s1289_s0 + $0x2c] ss:$16 sps:$4 sm:$0xff]   ;;  %v996_v39 = vld [vmem:[%s1289_s0 + $0x28] ss:$16 sps:$4 sm:$0xff]   ;;  %v997_v40 = vld [vmem:[%s1289_s0 + $0x44] ss:$16 sps:$4 sm:$0xff]  }
  0x10   :  { %832 = vmatpush3.bf16.msra.mxu0 %v967_v14  ;;  %v999_v41 = vld [vmem:[%s1289_s0 + $0x4c] ss:$16 sps:$4 sm:$0xff]   ;;  %v1001_v42 = vld [vmem:[%s1289_s0 + $0x40] ss:$16 sps:$4 sm:$0xff]   ;;  %v1002_v43 = vld [vmem:[%s1289_s0 + $0x48] ss:$16 sps:$4 sm:$0xff]  }
  0x11   :  { %896 = vmatpush3.bf16.msra.mxu1 %v968_v15  ;;  %833 = vmatprep.subr.bf16.mxu0 %v969_v16  ;;  %v1003_v44 = vld [vmem:[%s1289_s0 + $0x64] ss:$16 sps:$4 sm:$0xff]   ;;  %v1005_v45 = vld [vmem:[%s1289_s0 + $0x6c] ss:$16 sps:$4 sm:$0xff]   ;;  %v1007_v46 = vld [vmem:[%s1289_s0 + $0x60] ss:$16 sps:$4 sm:$0xff]  }
  0x12   :  { %897 = vmatprep.subr.bf16.mxu1 %v970_v17  ;;  %v1008_v47 = vld [vmem:[%s1289_s0 + $0x68] ss:$16 sps:$4 sm:$0xff]   ;;  %v1009_v48 = vld [vmem:[%s1289_s0 + $0x84] ss:$16 sps:$4 sm:$0xff]   ;;  %v1011_v49 = vld [vmem:[%s1289_s0 + $0x8c] ss:$16 sps:$4 sm:$0xff]  }
  0x13   :  { %v1013_v50 = vld [vmem:[%s1289_s0 + $0x80] ss:$16 sps:$4 sm:$0xff]   ;;  %v1014_v51 = vld [vmem:[%s1289_s0 + $0x88] ss:$16 sps:$4 sm:$0xff]   ;;  %v1015_v52 = vld [vmem:[%s1289_s0 + $0xa4] ss:$16 sps:$4 sm:$0xff]  }
  0x14   :  { %834 = vmatpush3.bf16.msra.mxu0 %v971_v18  ;;  %v1017_v53 = vld [vmem:[%s1289_s0 + $0xac] ss:$16 sps:$4 sm:$0xff]   ;;  %v1019_v54 = vld [vmem:[%s1289_s0 + $0xa0] ss:$16 sps:$4 sm:$0xff]   ;;  %v1020_v55 = vld [vmem:[%s1289_s0 + $0xa8] ss:$16 sps:$4 sm:$0xff]  }
  0x15   :  { %898 = vmatpush3.bf16.msra.mxu1 %v972_v19  ;;  %835 = vmatprep.subr.bf16.mxu0 %v973_v20  ;;  %v1021_v56 = vld [vmem:[%s1289_s0 + $0xc4] ss:$16 sps:$4 sm:$0xff]   ;;  %v1023_v57 = vld [vmem:[%s1289_s0 + $0xcc] ss:$16 sps:$4 sm:$0xff]   ;;  %v1025_v58 = vld [vmem:[%s1289_s0 + $0xc0] ss:$16 sps:$4 sm:$0xff]  }
  0x16   :  { %899 = vmatprep.subr.bf16.mxu1 %v974_v21  ;;  %v1026_v59 = vld [vmem:[%s1289_s0 + $0xc8] ss:$16 sps:$4 sm:$0xff]   ;;  %v1027_v60 = vld [vmem:[%s1289_s0 + $0xe4] ss:$16 sps:$4 sm:$0xff]   ;;  %v1029_v61 = vld [vmem:[%s1289_s0 + $0xec] ss:$16 sps:$4 sm:$0xff]  }
  0x17   :  { %v1031_v62 = vld [vmem:[%s1289_s0 + $0xe0] ss:$16 sps:$4 sm:$0xff]   ;;  %v1032_v63 = vld [vmem:[%s1289_s0 + $0xe8] ss:$16 sps:$4 sm:$0xff]  }
  0x18   :  { %836 = vmatpush3.bf16.msra.mxu0 %v975_v22 }
  0x19   :  { %900 = vmatpush3.bf16.msra.mxu1 %v976_v23  ;;  %837 = vmatprep.subr.bf16.mxu0 %v977_v24 }
  0x1a   :  { %901 = vmatprep.subr.bf16.mxu1 %v978_v25 }
  0x1c   :  { %838 = vmatpush3.bf16.msra.mxu0 %v979_v26 }
  0x1d   :  { %902 = vmatpush3.bf16.msra.mxu1 %v980_v27  ;;  %839 = vmatprep.subr.bf16.mxu0 %v981_v28 }
  0x1e   :  { %903 = vmatprep.subr.bf16.mxu1 %v982_v29 }
  0x20   :  { %840 = vmatpush3.bf16.msra.mxu0 %v983_v30 }
  0x21   :  { %904 = vmatpush3.bf16.msra.mxu1 %v984_v31 }
  0x23   :  { %529 = vmatmul.mubr.bf16.vlgmr.msra.gmra.mxu0 %v985_v32 }
  0x24   :  { %626 = vmatmul.mubr.bf16.vlgmr.msra.gmra.mxu1 %v988_v34  ;;  %536 = vmatprep.mubr.bf16.mxu0 %v991_v36 }
  0x25   :  { %633 = vmatprep.mubr.bf16.mxu1 %v993_v37 }
  0x2b   :  { %537 = vmatmul.mubr.bf16.gmra.mxu0 %v995_v38 }
  0x2c   :  { %634 = vmatmul.mubr.bf16.gmra.mxu1 %v996_v39  ;;  %544 = vmatprep.mubr.bf16.mxu0 %v997_v40 }
  0x2d   :  { %641 = vmatprep.mubr.bf16.mxu1 %v999_v41 }
  0x33   :  { %545 = vmatmul.mubr.bf16.gmra.mxu0 %v1001_v42 }
  0x34   :  { %642 = vmatmul.mubr.bf16.gmra.mxu1 %v1002_v43  ;;  %552 = vmatprep.mubr.bf16.mxu0 %v1003_v44 }
  0x35   :  { %649 = vmatprep.mubr.bf16.mxu1 %v1005_v45 }
  0x3b   :  { %553 = vmatmul.mubr.bf16.gmra.mxu0 %v1007_v46 }
  0x3c   :  { %650 = vmatmul.mubr.bf16.gmra.mxu1 %v1008_v47  ;;  %560 = vmatprep.mubr.bf16.mxu0 %v1009_v48 }
  0x3d   :  { %657 = vmatprep.mubr.bf16.mxu1 %v1011_v49 }
  0x43   :  { %561 = vmatmul.mubr.bf16.gmra.mxu0 %v1013_v50 }
  0x44   :  { %658 = vmatmul.mubr.bf16.gmra.mxu1 %v1014_v51  ;;  %568 = vmatprep.mubr.bf16.mxu0 %v1015_v52 }
  0x45   :  { %665 = vmatprep.mubr.bf16.mxu1 %v1017_v53 }
  0x4b   :  { %569 = vmatmul.mubr.bf16.gmra.mxu0 %v1019_v54 }
  0x4c   :  { %666 = vmatmul.mubr.bf16.gmra.mxu1 %v1020_v55  ;;  %576 = vmatprep.mubr.bf16.mxu0 %v1021_v56 }
  0x4d   :  { %673 = vmatprep.mubr.bf16.mxu1 %v1023_v57 }
  0x53   :  { %577 = vmatmul.mubr.bf16.gmra.mxu0 %v1025_v58 }
  0x54   :  { %674 = vmatmul.mubr.bf16.gmra.mxu1 %v1026_v59  ;;  %584 = vmatprep.mubr.bf16.mxu0 %v1027_v60 }
  0x55   :  { %681 = vmatprep.mubr.bf16.mxu1 %v1029_v61 }
  0x5b   :  { %585 = vmatmul.mubr.bf16.gmra.mxu0 %v1031_v62 }
  0x5c   :  { %682 = vmatmul.mubr.bf16.gmra.mxu1 %v1032_v63 }
  0xe3   :  { %v841_v0 = vpop.f32.mrf.mxu0 }
  0xe4   :  { %v905_v1 = vpop.f32.mrf.mxu1 }
  0xe5   :  { %v842_v2 = vpop.f32.mrf.mxu0 }
  0xe6   :  { %v843_v3 = vadd.f32 %v842_v2, %v841_v0  ;;  %v906_v4 = vpop.f32.mrf.mxu1 }
  0xe7   :  { %v907_v5 = vadd.f32 %v906_v4, %v905_v1  ;;  %v844_v6 = vpop.f32.mrf.mxu0 }
  0xe8   :  { %v908_v7 = vpop.f32.mrf.mxu1 }
  0xe9   :  { %v628_v8 = vadd.f32 %v907_v5, %v843_v3  ;;  %v845_v9 = vpop.f32.mrf.mxu0 }
  0xea   :  { %v846_v10 = vadd.f32 %v845_v9, %v844_v6  ;;  %v909_v11 = vpop.f32.mrf.mxu1 }
  0xeb   :  { %741 = vst [vmem:[%s1290_s2] sm:$0xff] %v628_v8  ;;  %v910_v12 = vadd.f32 %v909_v11, %v908_v7  ;;  %v847_v13 = vpop.f32.mrf.mxu0 }
  0xec   :  { %v911_v14 = vpop.f32.mrf.mxu1 }
  0xed   :  { %v631_v15 = vadd.f32 %v910_v12, %v846_v10  ;;  %v848_v16 = vpop.f32.mrf.mxu0 }
  0xee   :  { %v849_v17 = vadd.f32 %v848_v16, %v847_v13  ;;  %v912_v18 = vpop.f32.mrf.mxu1 }
  0xef   :  { %742 = vst [vmem:[%s1290_s2 + $0x8] sm:$0xff] %v631_v15  ;;  %v913_v19 = vadd.f32 %v912_v18, %v911_v14  ;;  %v850_v20 = vpop.f32.mrf.mxu0 }
  0xf0   :  { %v914_v21 = vpop.f32.mrf.mxu1 }
  0xf1   :  { %v636_v22 = vadd.f32 %v913_v19, %v849_v17  ;;  %v851_v23 = vpop.f32.mrf.mxu0 }
  0xf2   :  { %v852_v24 = vadd.f32 %v851_v23, %v850_v20  ;;  %v915_v25 = vpop.f32.mrf.mxu1 }
  0xf3   :  { %743 = vst [vmem:[%s1290_s2 + $0x10] sm:$0xff] %v636_v22  ;;  %v916_v26 = vadd.f32 %v915_v25, %v914_v21  ;;  %v853_v27 = vpop.f32.mrf.mxu0 }
  0xf4   :  { %v917_v28 = vpop.f32.mrf.mxu1 }
  0xf5   :  { %v639_v29 = vadd.f32 %v916_v26, %v852_v24  ;;  %v854_v30 = vpop.f32.mrf.mxu0 }
  0xf6   :  { %v855_v31 = vadd.f32 %v854_v30, %v853_v27  ;;  %v918_v32 = vpop.f32.mrf.mxu1 }
  0xf7   :  { %744 = vst [vmem:[%s1290_s2 + $0x18] sm:$0xff] %v639_v29  ;;  %v919_v33 = vadd.f32 %v918_v32, %v917_v28  ;;  %v856_v34 = vpop.f32.mrf.mxu0 }
  0xf8   :  { %v920_v35 = vpop.f32.mrf.mxu1 }
  0xf9   :  { %v644_v36 = vadd.f32 %v919_v33, %v855_v31  ;;  %v857_v37 = vpop.f32.mrf.mxu0 }
  0xfa   :  { %v858_v38 = vadd.f32 %v857_v37, %v856_v34  ;;  %v921_v39 = vpop.f32.mrf.mxu1 }
  0xfb   :  { %745 = vst [vmem:[%s1290_s2 + $0x20] sm:$0xff] %v644_v36  ;;  %v922_v40 = vadd.f32 %v921_v39, %v920_v35  ;;  %v859_v41 = vpop.f32.mrf.mxu0 }
  0xfc   :  { %v923_v42 = vpop.f32.mrf.mxu1 }
  0xfd   :  { %v647_v43 = vadd.f32 %v922_v40, %v858_v38  ;;  %v860_v44 = vpop.f32.mrf.mxu0 }
  0xfe   :  { %v861_v45 = vadd.f32 %v860_v44, %v859_v41  ;;  %v924_v46 = vpop.f32.mrf.mxu1 }
  0xff   :  { %746 = vst [vmem:[%s1290_s2 + $0x28] sm:$0xff] %v647_v43  ;;  %v925_v47 = vadd.f32 %v924_v46, %v923_v42  ;;  %v862_v48 = vpop.f32.mrf.mxu0 }
 0x100   :  { %v926_v49 = vpop.f32.mrf.mxu1 }
 0x101   :  { %v652_v50 = vadd.f32 %v925_v47, %v861_v45  ;;  %v863_v51 = vpop.f32.mrf.mxu0 }
 0x102   :  { %v864_v52 = vadd.f32 %v863_v51, %v862_v48  ;;  %v927_v53 = vpop.f32.mrf.mxu1 }
 0x103   :  { %747 = vst [vmem:[%s1290_s2 + $0x30] sm:$0xff] %v652_v50  ;;  %v928_v54 = vadd.f32 %v927_v53, %v926_v49  ;;  %v865_v55 = vpop.f32.mrf.mxu0 }
 0x104   :  { %v929_v56 = vpop.f32.mrf.mxu1 }
 0x105   :  { %v655_v57 = vadd.f32 %v928_v54, %v864_v52  ;;  %v866_v58 = vpop.f32.mrf.mxu0 }
 0x106   :  { %v867_v59 = vadd.f32 %v866_v58, %v865_v55  ;;  %v930_v60 = vpop.f32.mrf.mxu1 }
 0x107   :  { %748 = vst [vmem:[%s1290_s2 + $0x38] sm:$0xff] %v655_v57  ;;  %v931_v61 = vadd.f32 %v930_v60, %v929_v56  ;;  %v868_v62 = vpop.f32.mrf.mxu0 }
 0x108   :  { %v932_v63 = vpop.f32.mrf.mxu1 }
 0x109   :  { %v660_v0 = vadd.f32 %v931_v61, %v867_v59  ;;  %v869_v1 = vpop.f32.mrf.mxu0 }
 0x10a   :  { %v870_v2 = vadd.f32 %v869_v1, %v868_v62  ;;  %v933_v3 = vpop.f32.mrf.mxu1 }
 0x10b   :  { %749 = vst [vmem:[%s1290_s2 + $0x40] sm:$0xff] %v660_v0  ;;  %v934_v4 = vadd.f32 %v933_v3, %v932_v63  ;;  %v871_v5 = vpop.f32.mrf.mxu0 }
 0x10c   :  { %v935_v6 = vpop.f32.mrf.mxu1 }
 0x10d   :  { %v663_v7 = vadd.f32 %v934_v4, %v870_v2  ;;  %v872_v8 = vpop.f32.mrf.mxu0 }
 0x10e   :  { %v873_v9 = vadd.f32 %v872_v8, %v871_v5  ;;  %v936_v10 = vpop.f32.mrf.mxu1 }
 0x10f   :  { %750 = vst [vmem:[%s1290_s2 + $0x48] sm:$0xff] %v663_v7  ;;  %v937_v11 = vadd.f32 %v936_v10, %v935_v6  ;;  %v874_v12 = vpop.f32.mrf.mxu0 }
 0x110   :  { %v938_v13 = vpop.f32.mrf.mxu1 }
 0x111   :  { %v668_v14 = vadd.f32 %v937_v11, %v873_v9  ;;  %v875_v15 = vpop.f32.mrf.mxu0 }
 0x112   :  { %v876_v16 = vadd.f32 %v875_v15, %v874_v12  ;;  %v939_v17 = vpop.f32.mrf.mxu1 }
 0x113   :  { %751 = vst [vmem:[%s1290_s2 + $0x50] sm:$0xff] %v668_v14  ;;  %v940_v18 = vadd.f32 %v939_v17, %v938_v13  ;;  %v877_v19 = vpop.f32.mrf.mxu0 }
 0x114   :  { %v941_v20 = vpop.f32.mrf.mxu1 }
 0x115   :  { %v671_v21 = vadd.f32 %v940_v18, %v876_v16  ;;  %v878_v22 = vpop.f32.mrf.mxu0 }
 0x116   :  { %v879_v23 = vadd.f32 %v878_v22, %v877_v19  ;;  %v942_v24 = vpop.f32.mrf.mxu1 }
 0x117   :  { %752 = vst [vmem:[%s1290_s2 + $0x58] sm:$0xff] %v671_v21  ;;  %v943_v25 = vadd.f32 %v942_v24, %v941_v20  ;;  %v880_v26 = vpop.f32.mrf.mxu0 }
 0x118   :  { %v944_v27 = vpop.f32.mrf.mxu1 }
 0x119   :  { %v676_v28 = vadd.f32 %v943_v25, %v879_v23  ;;  %v881_v29 = vpop.f32.mrf.mxu0 }
 0x11a   :  { %v882_v30 = vadd.f32 %v881_v29, %v880_v26  ;;  %v945_v31 = vpop.f32.mrf.mxu1 }
 0x11b   :  { %753 = vst [vmem:[%s1290_s2 + $0x60] sm:$0xff] %v676_v28  ;;  %v946_v32 = vadd.f32 %v945_v31, %v944_v27  ;;  %v883_v33 = vpop.f32.mrf.mxu0 }
 0x11c   :  { %v947_v34 = vpop.f32.mrf.mxu1 }
 0x11d   :  { %v679_v35 = vadd.f32 %v946_v32, %v882_v30  ;;  %v884_v36 = vpop.f32.mrf.mxu0 }
 0x11e   :  { %v885_v37 = vadd.f32 %v884_v36, %v883_v33  ;;  %v948_v38 = vpop.f32.mrf.mxu1 }
 0x11f   :  { %754 = vst [vmem:[%s1290_s2 + $0x68] sm:$0xff] %v679_v35  ;;  %v949_v39 = vadd.f32 %v948_v38, %v947_v34  ;;  %v886_v40 = vpop.f32.mrf.mxu0 }
 0x120   :  { %v950_v41 = vpop.f32.mrf.mxu1 }
 0x121   :  { %v684_v42 = vadd.f32 %v949_v39, %v885_v37  ;;  %v887_v43 = vpop.f32.mrf.mxu0 }
 0x122   :  { %v888_v44 = vadd.f32 %v887_v43, %v886_v40  ;;  %v951_v45 = vpop.f32.mrf.mxu1 }
 0x123   :  { %755 = vst [vmem:[%s1290_s2 + $0x70] sm:$0xff] %v684_v42  ;;  %v952_v46 = vadd.f32 %v951_v45, %v950_v41 }
 0x125   :  { %v687_v47 = vadd.f32 %v952_v46, %v888_v44 }
 0x127   :  { %756 = vst [vmem:[%s1290_s2 + $0x78] sm:$0xff] %v687_v47 }

// kernel: generator_forward.62
= control target key start
LH: loop header
LB: loop body
LE: loop exit
PB: predicated region body
PF: predicated region fallthrough
CT: control target
= control target key end

     0   :  { %vm14_vm0 = vcmask 516096   ;;  %vm82_vm1 = vcmask 523264   ;;  %v428_v0 = vmov 0.0   ;;  %s1318_s0 = inlined_call_operand.vmem [shape: f32[512,64], index: 0, kind: input, shape index: {}]   ;;  %s1319_s1 = inlined_call_operand.vmem [shape: f32[1,64], index: 1, kind: output, shape index: {0}]   ;;  %s1320_s2 = inlined_call_operand.vmem [shape: f32[1,64], index: 2, kind: output, shape index: {1}]  }
   0x1   :  { %15 = vst.msk [vmem:[%s1319_s1] sm:$0x1] %vm14_vm0, %v428_v0  ;;  %16 = vst.msk [vmem:[%s1320_s2] sm:$0x1] %vm14_vm0, %v428_v0  ;;  %v455_v1 = vld [vmem:[%s1318_s0] sm:$0xff]  ;;  %v460_v2 = vld [vmem:[%s1318_s0 + $0x8] sm:$0xff] }
   0x2   :  { %v465_v3 = vld [vmem:[%s1318_s0 + $0x10] sm:$0xff]  ;;  %v83_v4 = vsel %vm82_vm1, %v455_v1, 0.0  ;;  %v84_v5 = vsel %vm82_vm1, %v460_v2, 0.0  ;;  %v476_v7 = vld [vmem:[%s1318_s0 + $0x18] sm:$0xff]  ;;  %v483_v10 = vld [vmem:[%s1318_s0 + $0x20] sm:$0xff] }
   0x3   :  { %v86_v6 = vsel %vm82_vm1, %v465_v3, 0.0  ;;  %v85_v8 = vadd.f32 %v84_v5, %v83_v4  ;;  %v88_v9 = vsel %vm82_vm1, %v476_v7, 0.0  ;;  %v90_v12 = vsel %vm82_vm1, %v483_v10, 0.0  ;;  %v490_v13 = vld [vmem:[%s1318_s0 + $0x28] sm:$0xff]  ;;  %v497_v16 = vld [vmem:[%s1318_s0 + $0x30] sm:$0xff]  ;;  %v502_v18 = vld [vmem:[%s1318_s0 + $0x38] sm:$0xff] }
   0x4   :  { %v92_v15 = vsel %vm82_vm1, %v490_v13, 0.0  ;;  %v507_v19 = vld [vmem:[%s1318_s0 + $0x40] sm:$0xff]  ;;  %v94_v20 = vsel %vm82_vm1, %v497_v16, 0.0  ;;  %v514_v21 = vld [vmem:[%s1318_s0 + $0x48] sm:$0xff]  ;;  %v519_v22 = vld [vmem:[%s1318_s0 + $0x50] sm:$0xff]  ;;  %v96_v25 = vsel %vm82_vm1, %v502_v18, 0.0 }
   0x5   :  { %v87_v11 = vadd.f32 %v86_v6, %v85_v8  ;;  %v524_v23 = vld [vmem:[%s1318_s0 + $0x58] sm:$0xff]  ;;  %v98_v26 = vsel %vm82_vm1, %v507_v19, 0.0  ;;  %v533_v27 = vld [vmem:[%s1318_s0 + $0x108] sm:$0xff]  ;;  %v538_v28 = vld [vmem:[%s1318_s0 + $0x110] sm:$0xff]  ;;  %v100_v30 = vsel %vm82_vm1, %v514_v21, 0.0  ;;  %v102_v31 = vsel %vm82_vm1, %v519_v22, 0.0 }
   0x6   :  { %v543_v29 = vld [vmem:[%s1318_s0 + $0x118] sm:$0xff]  ;;  %v551_v32 = vsel %vm82_vm1, %v524_v23, 0.0  ;;  %v556_v33 = vld [vmem:[%s1318_s0 + $0x120] sm:$0xff]  ;;  %v561_v34 = vld [vmem:[%s1318_s0 + $0x128] sm:$0xff]  ;;  %v570_v37 = vsel %vm82_vm1, %v533_v27, 0.0  ;;  %v574_v38 = vsel %vm82_vm1, %v538_v28, 0.0 }
   0x7   :  { %v89_v14 = vadd.f32 %v88_v9, %v87_v11  ;;  %v566_v35 = vld [vmem:[%s1318_s0 + $0x130] sm:$0xff]  ;;  %1339 = vst [vmem:[#allocation2_spill] sm:$0xff] %v570_v37  ;;  %1340 = vst [vmem:[#allocation3_spill] sm:$0xff] %v574_v38  ;;  %v578_v39 = vsel %vm82_vm1, %v543_v29, 0.0  ;;  %v583_v40 = vld [vmem:[%s1318_s0 + $0x138] sm:$0xff]  ;;  %v597_v43 = vsel %vm82_vm1, %v556_v33, 0.0  ;;  %v222_v37 = vmul.f32 %v465_v3, %v465_v3 }
   0x8   :  { %1341 = vst [vmem:[#allocation4_spill] sm:$0xff] %v578_v39  ;;  %v588_v41 = vld [vmem:[%s1318_s0 + $0x140] sm:$0xff]  ;;  %v593_v42 = vld [vmem:[%s1318_s0 + $0x148] sm:$0xff]  ;;  %1342 = vst [vmem:[#allocation5_spill] sm:$0xff] %v597_v43  ;;  %v601_v44 = vsel %vm82_vm1, %v561_v34, 0.0  ;;  %v605_v45 = vsel %vm82_vm1, %v566_v35, 0.0 }
   0x9   :  { %v91_v17 = vadd.f32 %v90_v12, %v89_v14  ;;  %1343 = vst [vmem:[#allocation6_spill] sm:$0xff] %v601_v44  ;;  %1344 = vst [vmem:[#allocation7_spill] sm:$0xff] %v605_v45  ;;  %v610_v46 = vld [vmem:[%s1318_s0 + $0x150] sm:$0xff]  ;;  %v615_v47 = vld [vmem:[%s1318_s0 + $0x158] sm:$0xff]  ;;  %v624_v50 = vsel %vm82_vm1, %v583_v40, 0.0  ;;  %v628_v51 = vsel %vm82_vm1, %v588_v41, 0.0 }
   0xa   :  { %v620_v48 = vld [vmem:[%s1318_s0 + $0x160] sm:$0xff]  ;;  %1345 = vst [vmem:[#allocation8_spill] sm:$0xff] %v624_v50  ;;  %1346 = vst [vmem:[#allocation9_spill] sm:$0xff] %v628_v51  ;;  %v632_v52 = vsel %vm82_vm1, %v593_v42, 0.0  ;;  %v637_v53 = vld [vmem:[%s1318_s0 + $0x168] sm:$0xff]  ;;  %v651_v56 = vsel %vm82_vm1, %v610_v46, 0.0 }
   0xb   :  { %v93_v24 = vadd.f32 %v92_v15, %v91_v17  ;;  %1347 = vst [vmem:[#allocation10_spill] sm:$0xff] %v632_v52  ;;  %v642_v54 = vld [vmem:[%s1318_s0 + $0x170] sm:$0xff]  ;;  %v647_v55 = vld [vmem:[%s1318_s0 + $0x178] sm:$0xff]  ;;  %1348 = vst [vmem:[#allocation11_spill] sm:$0xff] %v651_v56  ;;  %v655_v57 = vsel %vm82_vm1, %v615_v47, 0.0  ;;  %v659_v58 = vsel %vm82_vm1, %v620_v48, 0.0 }
   0xc   :  { %1349 = vst [vmem:[#allocation12_spill] sm:$0xff] %v655_v57  ;;  %1350 = vst [vmem:[#allocation13_spill] sm:$0xff] %v659_v58  ;;  %v664_v59 = vld [vmem:[%s1318_s0 + $0x180] sm:$0xff]  ;;  %v669_v60 = vld [vmem:[%s1318_s0 + $0x188] sm:$0xff]  ;;  %v678_v63 = vsel %vm82_vm1, %v637_v53, 0.0  ;;  %v682_v0 = vsel %vm82_vm1, %v642_v54, 0.0 }
   0xd   :  { %v95_v36 = vadd.f32 %v94_v20, %v93_v24  ;;  %v674_v61 = vld [vmem:[%s1318_s0 + $0x190] sm:$0xff]  ;;  %1351 = vst [vmem:[#allocation14_spill] sm:$0xff] %v678_v63  ;;  %1352 = vst [vmem:[#allocation15_spill] sm:$0xff] %v682_v0  ;;  %v686_v4 = vsel %vm82_vm1, %v647_v55, 0.0  ;;  %v691_v5 = vld [vmem:[%s1318_s0 + $0x198] sm:$0xff]  ;;  %v705_v9 = vsel %vm82_vm1, %v664_v59, 0.0 }
   0xe   :  { %1353 = vst [vmem:[#allocation16_spill] sm:$0xff] %v686_v4  ;;  %v696_v6 = vld [vmem:[%s1318_s0 + $0x1a0] sm:$0xff]  ;;  %v701_v8 = vld [vmem:[%s1318_s0 + $0x1a8] sm:$0xff]  ;;  %1354 = vst [vmem:[#allocation17_spill] sm:$0xff] %v705_v9  ;;  %v709_v11 = vsel %vm82_vm1, %v669_v60, 0.0  ;;  %v713_v12 = vsel %vm82_vm1, %v674_v61, 0.0 }
   0xf   :  { %v97_v49 = vadd.f32 %v96_v25, %v95_v36  ;;  %1355 = vst [vmem:[#allocation18_spill] sm:$0xff] %v709_v11  ;;  %1356 = vst [vmem:[#allocation19_spill] sm:$0xff] %v713_v12  ;;  %v718_v14 = vld [vmem:[%s1318_s0 + $0x60] sm:$0xff]  ;;  %v723_v15 = vld [vmem:[%s1318_s0 + $0x1b0] sm:$0xff]  ;;  %v737_v25 = vsel %vm82_vm1, %v691_v5, 0.0  ;;  %v745_v36 = vsel %vm82_vm1, %v701_v8, 0.0 }
  0x10   :  { %v728_v17 = vld [vmem:[%s1318_s0 + $0x1b8] sm:$0xff]  ;;  %v733_v20 = vld [vmem:[%s1318_s0 + $0x1c0] sm:$0xff]  ;;  %1357 = vst [vmem:[#allocation20_spill] sm:$0xff] %v737_v25  ;;  %1359 = vst [vmem:[#allocation22_spill] sm:$0xff] %v745_v36 }
  0x11   :  { %v99_v62 = vadd.f32 %v98_v26, %v97_v49  ;;  %v741_v26 = vsel %vm82_vm1, %v696_v6, 0.0  ;;  %v750_v49 = vld [vmem:[%s1318_s0 + $0x1c8] sm:$0xff]  ;;  %v768_v36 = vsel %vm82_vm1, %v728_v17, 0.0  ;;  %v772_v25 = vsel %vm82_vm1, %v733_v20, 0.0  ;;  %v777_v12 = vld [vmem:[%s1318_s0 + $0x1e0] sm:$0xff]  ;;  %v804_v0 = vld [vmem:[%s1318_s0 + $0x1f8] sm:$0xff] }
  0x12   :  { %1358 = vst [vmem:[#allocation21_spill] sm:$0xff] %v741_v26  ;;  %v764_v26 = vsel %vm82_vm1, %v723_v15, 0.0  ;;  %1361 = vst [vmem:[#allocation24_spill] sm:$0xff] %v768_v36  ;;  %v782_v11 = vld [vmem:[%s1318_s0 + $0x1e8] sm:$0xff]  ;;  %v791_v9 = vsel %vm82_vm1, %v750_v49, 0.0  ;;  %v826_v58 = vsel %vm82_vm1, %v804_v0, 0.0 }
  0x13   :  { %v101_v24 = vadd.f32 %v100_v30, %v99_v62  ;;  %v755_v30 = vld [vmem:[%s1318_s0 + $0x1d0] sm:$0xff]  ;;  %v760_v62 = vld [vmem:[%s1318_s0 + $0x1d8] sm:$0xff]  ;;  %1360 = vst [vmem:[#allocation23_spill] sm:$0xff] %v764_v26  ;;  %1362 = vst [vmem:[#allocation25_spill] sm:$0xff] %v772_v25 }
  0x14   :  { %v787_v26 = vld [vmem:[%s1318_s0 + $0x1f0] sm:$0xff]  ;;  %1364 = vst [vmem:[#allocation27_spill] sm:$0xff] %v791_v9  ;;  %v795_v25 = vsel %vm82_vm1, %v755_v30, 0.0  ;;  %v799_v4 = vsel %vm82_vm1, %v760_v62, 0.0  ;;  %1367 = vst [vmem:[#allocation30_spill] sm:$0xff] %v804_v0  ;;  %v814_v9 = vsel %vm82_vm1, %v782_v11, 0.0 }
  0x15   :  { %1363 = vst [vmem:[#allocation26_spill] sm:$0xff] %v787_v26  ;;  %v103_v36 = vadd.f32 %v102_v31, %v101_v24  ;;  %1365 = vst [vmem:[#allocation28_spill] sm:$0xff] %v795_v25  ;;  %v106_v31 = vsel %vm82_vm1, %v718_v14, 0.0  ;;  %v810_v24 = vsel %vm82_vm1, %v777_v12, 0.0  ;;  %v818_v25 = vsel %vm82_vm1, %v787_v26, 0.0  ;;  %v855_v56 = vld [vmem:[%s1318_s0 + $0x90] sm:$0xff] }
  0x16   :  { %1366 = vst [vmem:[#allocation29_spill] sm:$0xff] %v799_v4  ;;  %1368 = vst [vmem:[#allocation31_spill] sm:$0xff] %v810_v24  ;;  %v30_v4 = vld [vmem:[%s1318_s0 + $0x68] sm:$0xff]  ;;  %v860_v52 = vld [vmem:[%s1318_s0 + $0x98] sm:$0xff] }
  0x17   :  { %1369 = vst [vmem:[#allocation32_spill] sm:$0xff] %v814_v9  ;;  %1370 = vst [vmem:[#allocation33_spill] sm:$0xff] %v818_v25  ;;  %v105_v63 = vadd.f32 %v551_v32, %v103_v36  ;;  %v108_v24 = vsel %vm82_vm1, %v30_v4, 0.0  ;;  %v31_v9 = vld [vmem:[%s1318_s0 + $0x70] sm:$0xff]  ;;  %v835_v25 = vld [vmem:[%s1318_s0 + $0x78] sm:$0xff]  ;;  %v120_v39 = vsel %vm82_vm1, %v860_v52, 0.0 }
  0x18   :  { %1371 = vst [vmem:[#allocation34_spill] sm:$0xff] %v826_v58  ;;  %1372 = vst [vmem:[#allocation35_spill] sm:$0xff] %v835_v25  ;;  %v840_v32 = vld [vmem:[%s1318_s0 + $0x80] sm:$0xff]  ;;  %v845_v36 = vld [vmem:[%s1318_s0 + $0x88] sm:$0xff]  ;;  %v110_v58 = vsel %vm82_vm1, %v31_v9, 0.0 }
  0x19   :  { %v107_v57 = vadd.f32 %v106_v31, %v105_v63  ;;  %1373 = vst [vmem:[#allocation36_spill] sm:$0xff] %v840_v32  ;;  %1374 = vst [vmem:[#allocation37_spill] sm:$0xff] %v845_v36  ;;  %v220_v63 = vmul.f32 %v455_v1, %v455_v1  ;;  %v221_v31 = vmul.f32 %v460_v2, %v460_v2  ;;  %v865_v51 = vld [vmem:[%s1318_s0 + $0xa0] sm:$0xff]  ;;  %v112_v1 = vsel %vm82_vm1, %v835_v25, 0.0  ;;  %v876_v44 = vld [vmem:[%s1318_s0 + $0xa8] sm:$0xff] }
  0x1a   :  { %1375 = vst [vmem:[#allocation38_spill] sm:$0xff] %v855_v56  ;;  %1376 = vst [vmem:[#allocation39_spill] sm:$0xff] %v860_v52  ;;  %v114_v2 = vsel %vm82_vm1, %v840_v32, 0.0  ;;  %v116_v45 = vsel %vm82_vm1, %v845_v36, 0.0  ;;  %v881_v43 = vld [vmem:[%s1318_s0 + $0xb0] sm:$0xff]  ;;  %v122_v38 = vsel %vm82_vm1, %v865_v51, 0.0  ;;  %v223_v25 = vmul.f32 %v476_v7, %v476_v7 }
  0x1b   :  { %1377 = vst [vmem:[#allocation40_spill] sm:$0xff] %v865_v51  ;;  %v109_v50 = vadd.f32 %v108_v24, %v107_v57  ;;  %1378 = vst [vmem:[#allocation41_spill] sm:$0xff] %v876_v44  ;;  %v886_v57 = vld [vmem:[%s1318_s0 + $0xb8] sm:$0xff]  ;;  %v118_v24 = vsel %vm82_vm1, %v855_v56, 0.0  ;;  %v899_v36 = vld [vmem:[%s1318_s0 + $0xc0] sm:$0xff]  ;;  %v124_v51 = vsel %vm82_vm1, %v876_v44, 0.0 }
  0x1c   :  { %1379 = vst [vmem:[#allocation42_spill] sm:$0xff] %v881_v43  ;;  %1380 = vst [vmem:[#allocation43_spill] sm:$0xff] %v886_v57  ;;  %v904_v32 = vld [vmem:[%s1318_s0 + $0xc8] sm:$0xff]  ;;  %v909_v52 = vld [vmem:[%s1318_s0 + $0xd0] sm:$0xff]  ;;  %v915_v3 = vsel %vm82_vm1, %v881_v43, 0.0 }
  0x1d   :  { %1381 = vst [vmem:[#allocation44_spill] sm:$0xff] %v899_v36  ;;  %1382 = vst [vmem:[#allocation45_spill] sm:$0xff] %v904_v32  ;;  %v111_v56 = vadd.f32 %v110_v58, %v109_v50  ;;  %v922_v0 = vld [vmem:[%s1318_s0 + $0xd8] sm:$0xff]  ;;  %v927_v26 = vld [vmem:[%s1318_s0 + $0xe0] sm:$0xff]  ;;  %v931_v50 = vsel %vm82_vm1, %v886_v57, 0.0  ;;  %v935_v58 = vsel %vm82_vm1, %v899_v36, 0.0 }
  0x1e   :  { %1383 = vst [vmem:[#allocation46_spill] sm:$0xff] %v909_v52  ;;  %1384 = vst [vmem:[#allocation47_spill] sm:$0xff] %v922_v0  ;;  %v939_v7 = vsel %vm82_vm1, %v904_v32, 0.0  ;;  %v943_v43 = vsel %vm82_vm1, %v909_v52, 0.0  ;;  %v948_v44 = vld [vmem:[%s1318_s0 + $0xe8] sm:$0xff]  ;;  %v953_v57 = vld [vmem:[%s1318_s0 + $0xf0] sm:$0xff]  ;;  %v224_v52 = vmul.f32 %v483_v10, %v483_v10  ;;  %v228_v10 = vmul.f32 %v507_v19, %v507_v19 }
  0x1f   :  { %1385 = vst [vmem:[#allocation48_spill] sm:$0xff] %v927_v26  ;;  %1386 = vst [vmem:[#allocation49_spill] sm:$0xff] %v935_v58  ;;  %v113_v36 = vadd.f32 %v112_v1, %v111_v56  ;;  %v957_v58 = vsel %vm82_vm1, %v922_v0, 0.0  ;;  %v961_v32 = vsel %vm82_vm1, %v927_v26, 0.0  ;;  %v225_v56 = vmul.f32 %v490_v13, %v490_v13 }
  0x20   :  { %1387 = vst [vmem:[#allocation50_spill] sm:$0xff] %v939_v7  ;;  %1388 = vst [vmem:[#allocation51_spill] sm:$0xff] %v943_v43  ;;  %v967_v43 = vsel %vm82_vm1, %v948_v44, 0.0  ;;  %v971_v7 = vsel %vm82_vm1, %v953_v57, 0.0  ;;  %v226_v1 = vmul.f32 %v497_v16, %v497_v16  ;;  %v227_v26 = vmul.f32 %v502_v18, %v502_v18 }
  0x21   :  { %1389 = vst [vmem:[#allocation52_spill] sm:$0xff] %v948_v44  ;;  %1390 = vst [vmem:[#allocation53_spill] sm:$0xff] %v953_v57  ;;  %v115_v0 = vadd.f32 %v114_v2, %v113_v36  ;;  %v229_v44 = vmul.f32 %v514_v21, %v514_v21  ;;  %v230_v57 = vmul.f32 %v519_v22, %v519_v22 }
  0x22   :  { %1391 = vst [vmem:[#allocation54_spill] sm:$0xff] %v971_v7  ;;  %v231_v7 = vmul.f32 %v524_v23, %v524_v23  ;;  %v232_v13 = vmul.f32 %v718_v14, %v718_v14  ;;  %v989_v16 = vmul.f32 %v30_v4, %v30_v4  ;;  %v991_v2 = vmul.f32 %v31_v9, %v31_v9 }
  0x23   :  { %v117_v36 = vadd.f32 %v116_v45, %v115_v0  ;;  %v253_v18 = vmul.f32 %v533_v27, %v533_v27  ;;  %v254_v19 = vmul.f32 %v538_v28, %v538_v28  ;;  %v255_v21 = vmul.f32 %v543_v29, %v543_v29 }
  0x24   :  { %v256_v22 = vmul.f32 %v556_v33, %v556_v33  ;;  %v257_v23 = vmul.f32 %v561_v34, %v561_v34  ;;  %v258_v45 = vmul.f32 %v566_v35, %v566_v35  ;;  %v259_v4 = vmul.f32 %v583_v40, %v583_v40 }
  0x25   :  { %v119_v0 = vadd.f32 %v118_v24, %v117_v36  ;;  %v260_v27 = vmul.f32 %v588_v41, %v588_v41  ;;  %v261_v28 = vmul.f32 %v593_v42, %v593_v42  ;;  %v262_v29 = vmul.f32 %v610_v46, %v610_v46 }
  0x26   :  { %v263_v33 = vmul.f32 %v615_v47, %v615_v47  ;;  %v284_v34 = vsel %vm82_vm1, %v220_v63, 0.0  ;;  %v285_v35 = vsel %vm82_vm1, %v221_v31, 0.0  ;;  %v264_v40 = vmul.f32 %v620_v48, %v620_v48 }
  0x27   :  { %v121_v9 = vadd.f32 %v120_v39, %v119_v0  ;;  %v286_v14 = vadd.f32 %v285_v35, %v284_v34  ;;  %v287_v41 = vsel %vm82_vm1, %v222_v37, 0.0  ;;  %v265_v42 = vmul.f32 %v637_v53, %v637_v53  ;;  %v1392_v0 = vld [vmem:[#allocation26_spill] sm:$0xff] }
  0x28   :  { %v266_v46 = vmul.f32 %v642_v54, %v642_v54  ;;  %v267_v47 = vmul.f32 %v647_v55, %v647_v55  ;;  %v289_v63 = vsel %vm82_vm1, %v223_v25, 0.0  ;;  %v268_v39 = vmul.f32 %v664_v59, %v664_v59  ;;  %v1393_v34 = vld [vmem:[#allocation30_spill] sm:$0xff] }
  0x29   :  { %v123_v24 = vadd.f32 %v122_v38, %v121_v9  ;;  %v269_v48 = vmul.f32 %v669_v60, %v669_v60  ;;  %v288_v31 = vadd.f32 %v287_v41, %v286_v14  ;;  %v270_v37 = vmul.f32 %v674_v61, %v674_v61  ;;  %v1394_v41 = vld [vmem:[#allocation49_spill] sm:$0xff] }
  0x2a   :  { %v271_v53 = vmul.f32 %v691_v5, %v691_v5  ;;  %v272_v54 = vmul.f32 %v696_v6, %v696_v6  ;;  %v291_v55 = vsel %vm82_vm1, %v224_v52, 0.0  ;;  %v273_v38 = vmul.f32 %v701_v8, %v701_v8 }
  0x2b   :  { %v125_v25 = vadd.f32 %v124_v51, %v123_v24  ;;  %v274_v59 = vmul.f32 %v723_v15, %v723_v15  ;;  %v290_v60 = vadd.f32 %v289_v63, %v288_v31  ;;  %v275_v36 = vmul.f32 %v728_v17, %v728_v17 }
  0x2c   :  { %v276_v61 = vmul.f32 %v733_v20, %v733_v20  ;;  %v277_v5 = vmul.f32 %v750_v49, %v750_v49  ;;  %v293_v6 = vsel %vm82_vm1, %v225_v56, 0.0  ;;  %v278_v52 = vmul.f32 %v755_v30, %v755_v30 }
  0x2d   :  { %v127_v51 = vadd.f32 %v915_v3, %v125_v25  ;;  %v279_v8 = vmul.f32 %v760_v62, %v760_v62  ;;  %v292_v15 = vadd.f32 %v291_v55, %v290_v60  ;;  %v280_v17 = vmul.f32 %v777_v12, %v777_v12  ;;  %v1396_v25 = vld [vmem:[#allocation51_spill] sm:$0xff] }
  0x2e   :  { %v281_v20 = vmul.f32 %v782_v11, %v782_v11  ;;  %v282_v49 = vmul.f32 %v1392_v0, %v1392_v0  ;;  %v295_v56 = vsel %vm82_vm1, %v226_v1, 0.0  ;;  %v283_v30 = vmul.f32 %v1393_v34, %v1393_v34  ;;  %v1398_v34 = vld [vmem:[#allocation54_spill] sm:$0xff] }
  0x2f   :  { %v129_v3 = vadd.f32 %v931_v50, %v127_v51  ;;  %v294_v35 = vadd.f32 %v293_v6, %v292_v15  ;;  %v297_v62 = vsel %vm82_vm1, %v227_v26, 0.0  ;;  %v299_v9 = vsel %vm82_vm1, %v228_v10, 0.0 }
  0x30   :  { %v301_v12 = vsel %vm82_vm1, %v229_v44, 0.0  ;;  %v303_v14 = vsel %vm82_vm1, %v230_v57, 0.0  ;;  %v305_v11 = vsel %vm82_vm1, %v231_v7, 0.0  ;;  %v307_v1 = vsel %vm82_vm1, %v232_v13, 0.0  ;;  %v1395_v7 = vld [vmem:[#allocation50_spill] sm:$0xff] }
  0x31   :  { %v131_v63 = vadd.f32 %v1394_v41, %v129_v3  ;;  %v296_v24 = vadd.f32 %v295_v56, %v294_v35  ;;  %v1072_v50 = vsel %vm82_vm1, %v253_v18, 0.0  ;;  %v1075_v31 = vsel %vm82_vm1, %v254_v19, 0.0  ;;  %v1397_v56 = vld [vmem:[#allocation35_spill] sm:$0xff] }
  0x32   :  { %v1078_v26 = vsel %vm82_vm1, %v255_v21, 0.0  ;;  %v1081_v44 = vsel %vm82_vm1, %v256_v22, 0.0  ;;  %v1084_v57 = vsel %vm82_vm1, %v257_v23, 0.0  ;;  %v1088_v13 = vsel %vm82_vm1, %v258_v45, 0.0 }
  0x33   :  { %v133_v10 = vadd.f32 %v1395_v7, %v131_v63  ;;  %v298_v55 = vadd.f32 %v297_v62, %v296_v24  ;;  %v1091_v18 = vsel %vm82_vm1, %v259_v4, 0.0  ;;  %v1094_v19 = vsel %vm82_vm1, %v260_v27, 0.0  ;;  %v1399_v62 = vld [vmem:[#allocation36_spill] sm:$0xff] }
  0x34   :  { %v1097_v21 = vsel %vm82_vm1, %v261_v28, 0.0  ;;  %v1100_v22 = vsel %vm82_vm1, %v262_v29, 0.0  ;;  %v1103_v23 = vsel %vm82_vm1, %v263_v33, 0.0  ;;  %v1107_v45 = vsel %vm82_vm1, %v264_v40, 0.0 }
  0x35   :  { %v135_v60 = vadd.f32 %v1396_v25, %v133_v10  ;;  %v300_v6 = vadd.f32 %v299_v9, %v298_v55  ;;  %v1110_v4 = vsel %vm82_vm1, %v265_v42, 0.0  ;;  %v1113_v27 = vsel %vm82_vm1, %v266_v46, 0.0  ;;  %v1401_v10 = vld [vmem:[#allocation38_spill] sm:$0xff] }
  0x36   :  { %v1116_v28 = vsel %vm82_vm1, %v267_v47, 0.0  ;;  %v1119_v29 = vsel %vm82_vm1, %v268_v39, 0.0  ;;  %v1122_v33 = vsel %vm82_vm1, %v269_v48, 0.0  ;;  %v1126_v40 = vsel %vm82_vm1, %v270_v37, 0.0  ;;  %v1402_v25 = vld [vmem:[#allocation2_spill] sm:$0xff] }
  0x37   :  { %v137_v51 = vadd.f32 %v957_v58, %v135_v60  ;;  %v302_v15 = vadd.f32 %v301_v12, %v300_v6  ;;  %v1129_v42 = vsel %vm82_vm1, %v271_v53, 0.0  ;;  %v1132_v46 = vsel %vm82_vm1, %v272_v54, 0.0 }
  0x38   :  { %v1135_v47 = vsel %vm82_vm1, %v273_v38, 0.0  ;;  %v1138_v39 = vsel %vm82_vm1, %v274_v59, 0.0  ;;  %v1141_v48 = vsel %vm82_vm1, %v275_v36, 0.0  ;;  %v1145_v37 = vsel %vm82_vm1, %v276_v61, 0.0 }
  0x39   :  { %v139_v58 = vadd.f32 %v961_v32, %v137_v51  ;;  %v304_v0 = vadd.f32 %v303_v14, %v302_v15  ;;  %v1148_v53 = vsel %vm82_vm1, %v277_v5, 0.0  ;;  %v1151_v54 = vsel %vm82_vm1, %v278_v52, 0.0  ;;  %v1165_v32 = vld [vmem:[%s1318_s0 + $0xf8] sm:$0xff]  ;;  %v1403_v51 = vld [vmem:[#allocation39_spill] sm:$0xff] }
  0x3a   :  { %v1154_v38 = vsel %vm82_vm1, %v279_v8, 0.0  ;;  %v1157_v59 = vsel %vm82_vm1, %v280_v17, 0.0  ;;  %v1160_v36 = vsel %vm82_vm1, %v281_v20, 0.0  ;;  %v1169_v52 = vsel %vm82_vm1, %v282_v49, 0.0 }
  0x3b   :  { %v141_v61 = vadd.f32 %v967_v43, %v139_v58  ;;  %v306_v5 = vadd.f32 %v305_v11, %v304_v0  ;;  %v1172_v8 = vsel %vm82_vm1, %v283_v30, 0.0  ;;  %v144_v17 = vsel %vm82_vm1, %v1165_v32, 0.0  ;;  %v1183_v43 = vld [vmem:[%s1318_s0 + $0x100] sm:$0xff]  ;;  %v1404_v58 = vld [vmem:[#allocation3_spill] sm:$0xff] }
  0x3c   :  { %v235_v20 = vmul.f32 %v1397_v56, %v1397_v56  ;;  %v309_v3 = vsel %vm82_vm1, %v989_v16, 0.0  ;;  %v146_v30 = vsel %vm82_vm1, %v1183_v43, 0.0  ;;  %v236_v9 = vmul.f32 %v1399_v62, %v1399_v62  ;;  %v1400_v16 = vld [vmem:[#allocation37_spill] sm:$0xff] }
  0x3d   :  { %v143_v49 = vadd.f32 %v1398_v34, %v141_v61  ;;  %v308_v35 = vadd.f32 %v307_v1, %v306_v5  ;;  %v311_v12 = vsel %vm82_vm1, %v991_v2, 0.0  ;;  %v237_v41 = vmul.f32 %v1400_v16, %v1400_v16  ;;  %v1405_v5 = vld [vmem:[#allocation40_spill] sm:$0xff]  ;;  %v1408_v62 = vld [vmem:[#allocation5_spill] sm:$0xff] }
  0x3e   :  { %v313_v63 = vsel %vm82_vm1, %v235_v20, 0.0  ;;  %v238_v1 = vmul.f32 %v1401_v10, %v1401_v10  ;;  %v315_v55 = vsel %vm82_vm1, %v236_v9, 0.0  ;;  %v239_v2 = vmul.f32 %v1403_v51, %v1403_v51  ;;  %v1406_v20 = vld [vmem:[#allocation4_spill] sm:$0xff] }
  0x3f   :  { %v145_v14 = vadd.f32 %v144_v17, %v143_v49  ;;  %v310_v11 = vadd.f32 %v309_v3, %v308_v35  ;;  %v317_v15 = vsel %vm82_vm1, %v237_v41, 0.0  ;;  %v240_v17 = vmul.f32 %v1405_v5, %v1405_v5  ;;  %v1407_v49 = vld [vmem:[#allocation41_spill] sm:$0xff]  ;;  %v1410_v41 = vld [vmem:[#allocation6_spill] sm:$0xff] }
  0x40   :  { %v319_v56 = vsel %vm82_vm1, %v238_v1, 0.0  ;;  %v241_v35 = vmul.f32 %v1407_v49, %v1407_v49 }
  0x41   :  { %v147_v24 = vadd.f32 %v146_v30, %v145_v14  ;;  %v312_v7 = vadd.f32 %v311_v12, %v310_v11  ;;  %v321_v30 = vsel %vm82_vm1, %v239_v2, 0.0  ;;  %v1409_v14 = vld [vmem:[#allocation42_spill] sm:$0xff]  ;;  %v323_v16 = vsel %vm82_vm1, %v240_v17, 0.0 }
  0x42   :  { %v242_v11 = vmul.f32 %v1409_v14, %v1409_v14  ;;  %v325_v1 = vsel %vm82_vm1, %v241_v35, 0.0 }
  0x43   :  { %v149_v60 = vadd.f32 %v1402_v25, %v147_v24  ;;  %v314_v6 = vadd.f32 %v313_v63, %v312_v7  ;;  %v1411_v7 = vld [vmem:[#allocation43_spill] sm:$0xff] }
  0x44   :  { %v243_v10 = vmul.f32 %v1411_v7, %v1411_v7  ;;  %v327_v2 = vsel %vm82_vm1, %v242_v11, 0.0 }
  0x45   :  { %v151_v0 = vadd.f32 %v1404_v58, %v149_v60  ;;  %v316_v61 = vadd.f32 %v315_v55, %v314_v6  ;;  %v1412_v55 = vld [vmem:[#allocation7_spill] sm:$0xff]  ;;  %v1413_v6 = vld [vmem:[#allocation44_spill] sm:$0xff] }
  0x46   :  { %v244_v51 = vmul.f32 %v1413_v6, %v1413_v6  ;;  %v329_v17 = vsel %vm82_vm1, %v243_v10, 0.0 }
  0x47   :  { %v153_v3 = vadd.f32 %v1406_v20, %v151_v0  ;;  %v318_v34 = vadd.f32 %v317_v15, %v316_v61  ;;  %v1414_v15 = vld [vmem:[#allocation8_spill] sm:$0xff]  ;;  %v1415_v61 = vld [vmem:[#allocation45_spill] sm:$0xff] }
  0x48   :  { %v245_v5 = vmul.f32 %v1415_v61, %v1415_v61  ;;  %v331_v35 = vsel %vm82_vm1, %v244_v51, 0.0 }
  0x49   :  { %v155_v9 = vadd.f32 %v1408_v62, %v153_v3  ;;  %v320_v12 = vadd.f32 %v319_v56, %v318_v34  ;;  %v1416_v56 = vld [vmem:[#allocation9_spill] sm:$0xff]  ;;  %v1417_v34 = vld [vmem:[#allocation46_spill] sm:$0xff] }
  0x4a   :  { %v246_v49 = vmul.f32 %v1417_v34, %v1417_v34  ;;  %v333_v11 = vsel %vm82_vm1, %v245_v5, 0.0 }
  0x4b   :  { %v157_v63 = vadd.f32 %v1410_v41, %v155_v9  ;;  %v322_v24 = vadd.f32 %v321_v30, %v320_v12  ;;  %v1418_v30 = vld [vmem:[#allocation10_spill] sm:$0xff]  ;;  %v1419_v12 = vld [vmem:[#allocation47_spill] sm:$0xff] }
  0x4c   :  { %v247_v14 = vmul.f32 %v1419_v12, %v1419_v12  ;;  %v335_v10 = vsel %vm82_vm1, %v246_v49, 0.0  ;;  %v1427_v49 = vld [vmem:[#allocation15_spill] sm:$0xff]  ;;  %v1428_v12 = vld [vmem:[#allocation16_spill] sm:$0xff] }
  0x4d   :  { %v159_v25 = vadd.f32 %v1412_v55, %v157_v63  ;;  %v324_v60 = vadd.f32 %v323_v16, %v322_v24  ;;  %v1420_v16 = vld [vmem:[#allocation11_spill] sm:$0xff]  ;;  %v1421_v24 = vld [vmem:[#allocation48_spill] sm:$0xff] }
  0x4e   :  { %v248_v7 = vmul.f32 %v1421_v24, %v1421_v24  ;;  %v337_v51 = vsel %vm82_vm1, %v247_v14, 0.0 }
  0x4f   :  { %v161_v58 = vadd.f32 %v1414_v15, %v159_v25  ;;  %v326_v0 = vadd.f32 %v325_v1, %v324_v60  ;;  %v1422_v1 = vld [vmem:[#allocation12_spill] sm:$0xff] }
  0x50   :  { %v1423_v60 = vld [vmem:[#allocation52_spill] sm:$0xff]  ;;  %v339_v5 = vsel %vm82_vm1, %v248_v7, 0.0  ;;  %v1430_v7 = vld [vmem:[#allocation18_spill] sm:$0xff] }
  0x51   :  { %v163_v20 = vadd.f32 %v1416_v56, %v161_v58  ;;  %v328_v3 = vadd.f32 %v327_v2, %v326_v0  ;;  %v249_v6 = vmul.f32 %v1423_v60, %v1423_v60  ;;  %v1424_v2 = vld [vmem:[#allocation13_spill] sm:$0xff] }
  0x52   :  { %v1425_v0 = vld [vmem:[#allocation53_spill] sm:$0xff] }
  0x53   :  { %v165_v62 = vadd.f32 %v1418_v30, %v163_v20  ;;  %v330_v9 = vadd.f32 %v329_v17, %v328_v3  ;;  %v250_v61 = vmul.f32 %v1425_v0, %v1425_v0  ;;  %v1426_v17 = vld [vmem:[#allocation14_spill] sm:$0xff]  ;;  %v251_v3 = vmul.f32 %v1165_v32, %v1165_v32 }
  0x54   :  { %v341_v34 = vsel %vm82_vm1, %v249_v6, 0.0  ;;  %v1432_v6 = vld [vmem:[#allocation20_spill] sm:$0xff]  ;;  %v1434_v0 = vld [vmem:[#allocation22_spill] sm:$0xff] }
  0x55   :  { %v167_v41 = vadd.f32 %v1420_v16, %v165_v62  ;;  %v332_v63 = vadd.f32 %v331_v35, %v330_v9  ;;  %v252_v62 = vmul.f32 %v1183_v43, %v1183_v43  ;;  %v343_v9 = vsel %vm82_vm1, %v250_v61, 0.0 }
  0x56   :  { %v345_v16 = vsel %vm82_vm1, %v251_v3, 0.0  ;;  %v1436_v3 = vld [vmem:[#allocation24_spill] sm:$0xff] }
  0x57   :  { %v169_v55 = vadd.f32 %v1422_v1, %v167_v41  ;;  %v334_v25 = vadd.f32 %v333_v11, %v332_v63  ;;  %v1429_v41 = vld [vmem:[#allocation17_spill] sm:$0xff]  ;;  %v347_v32 = vsel %vm82_vm1, %v252_v62, 0.0  ;;  %v1438_v62 = vld [vmem:[#allocation27_spill] sm:$0xff] }
  0x59   :  { %v171_v15 = vadd.f32 %v1424_v2, %v169_v55  ;;  %v336_v58 = vadd.f32 %v335_v10, %v334_v25  ;;  %v1431_v55 = vld [vmem:[#allocation19_spill] sm:$0xff]  ;;  %v1433_v2 = vld [vmem:[#allocation21_spill] sm:$0xff] }
  0x5b   :  { %v173_v56 = vadd.f32 %v1426_v17, %v171_v15  ;;  %v338_v20 = vadd.f32 %v337_v51, %v336_v58  ;;  %v1435_v17 = vld [vmem:[#allocation23_spill] sm:$0xff] }
  0x5d   :  { %v175_v35 = vadd.f32 %v1427_v49, %v173_v56  ;;  %v340_v30 = vadd.f32 %v339_v5, %v338_v20 }
  0x5f   :  { %v177_v14 = vadd.f32 %v1428_v12, %v175_v35  ;;  %v342_v11 = vadd.f32 %v341_v34, %v340_v30  ;;  %v1437_v35 = vld [vmem:[#allocation25_spill] sm:$0xff]  ;;  %v1439_v12 = vld [vmem:[#allocation28_spill] sm:$0xff] }
  0x61   :  { %v179_v63 = vadd.f32 %v1429_v41, %v177_v14  ;;  %v344_v24 = vadd.f32 %v343_v9, %v342_v11  ;;  %v1440_v11 = vld [vmem:[#allocation29_spill] sm:$0xff]  ;;  %v1441_v41 = vld [vmem:[#allocation31_spill] sm:$0xff] }
  0x63   :  { %v181_v10 = vadd.f32 %v1430_v7, %v179_v63  ;;  %v346_v1 = vadd.f32 %v345_v16, %v344_v24  ;;  %v1442_v24 = vld [vmem:[#allocation32_spill] sm:$0xff]  ;;  %v1443_v7 = vld [vmem:[#allocation33_spill] sm:$0xff] }
  0x65   :  { %v183_v25 = vadd.f32 %v1431_v55, %v181_v10  ;;  %v348_v60 = vadd.f32 %v347_v32, %v346_v1  ;;  %v1444_v1 = vld [vmem:[#allocation34_spill] sm:$0xff] }
  0x67   :  { %v185_v43 = vadd.f32 %v1432_v6, %v183_v25  ;;  %v350_v51 = vadd.f32 %v1072_v50, %v348_v60 }
  0x69   :  { %v187_v15 = vadd.f32 %v1433_v2, %v185_v43  ;;  %v352_v58 = vadd.f32 %v1075_v31, %v350_v51 }
  0x6b   :  { %v189_v61 = vadd.f32 %v1434_v0, %v187_v15  ;;  %v354_v5 = vadd.f32 %v1078_v26, %v352_v58 }
  0x6d   :  { %v191_v56 = vadd.f32 %v1435_v17, %v189_v61  ;;  %v356_v20 = vadd.f32 %v1081_v44, %v354_v5 }
  0x6f   :  { %v193_v34 = vadd.f32 %v1436_v3, %v191_v56  ;;  %v358_v49 = vadd.f32 %v1084_v57, %v356_v20 }
  0x71   :  { %v195_v30 = vadd.f32 %v1437_v35, %v193_v34  ;;  %v360_v50 = vadd.f32 %v1088_v13, %v358_v49 }
  0x73   :  { %v197_v9 = vadd.f32 %v1438_v62, %v195_v30  ;;  %v362_v31 = vadd.f32 %v1091_v18, %v360_v50 }
  0x75   :  { %v199_v14 = vadd.f32 %v1439_v12, %v197_v9  ;;  %v364_v26 = vadd.f32 %v1094_v19, %v362_v31 }
  0x77   :  { %v201_v16 = vadd.f32 %v1440_v11, %v199_v14  ;;  %v366_v44 = vadd.f32 %v1097_v21, %v364_v26 }
  0x79   :  { %v203_v63 = vadd.f32 %v1441_v41, %v201_v16  ;;  %v368_v57 = vadd.f32 %v1100_v22, %v366_v44 }
  0x7b   :  { %v205_v32 = vadd.f32 %v1442_v24, %v203_v63  ;;  %v370_v13 = vadd.f32 %v1103_v23, %v368_v57 }
  0x7d   :  { %v207_v10 = vadd.f32 %v1443_v7, %v205_v32  ;;  %v372_v18 = vadd.f32 %v1107_v45, %v370_v13  ;;  %v81_v45 = vld [vmem:[%s1319_s1] sm:$0x1] }
  0x7f   :  { %v209_v55 = vadd.f32 %v1444_v1, %v207_v10  ;;  %v374_v19 = vadd.f32 %v1110_v4, %v372_v18 }
  0x81   :  { %v210_v25 = vrot.slane %v209_v55, 4  ;;  %v376_v60 = vadd.f32 %v1113_v27, %v374_v19 }
  0x83   :  { %v211_v21 = vadd.f32 %v210_v25, %v209_v55  ;;  %v378_v6 = vadd.f32 %v1116_v28, %v376_v60 }
  0x85   :  { %v212_v43 = vrot.slane %v211_v21, 2  ;;  %v380_v22 = vadd.f32 %v1119_v29, %v378_v6 }
  0x87   :  { %v213_v51 = vadd.f32 %v212_v43, %v211_v21  ;;  %v382_v23 = vadd.f32 %v1122_v33, %v380_v22 }
  0x89   :  { %v214_v2 = vrot.slane %v213_v51, 1  ;;  %v384_v15 = vadd.f32 %v1126_v40, %v382_v23 }
  0x8b   :  { %v215_v4 = vadd.f32 %v214_v2, %v213_v51  ;;  %v386_v58 = vadd.f32 %v1129_v42, %v384_v15 }
  0x8d   :  { %v216_v27 = vadd.f32 %v215_v4, %v81_v45  ;;  %v388_v0 = vadd.f32 %v1132_v46, %v386_v58 }
  0x8f   :  { %218 = vst.msk [vmem:[%s1319_s1] sm:$0x1] %vm14_vm0, %v216_v27  ;;  %v390_v28 = vadd.f32 %v1135_v47, %v388_v0 }
  0x91   :  { %v392_v29 = vadd.f32 %v1138_v39, %v390_v28 }
  0x93   :  { %v394_v33 = vadd.f32 %v1141_v48, %v392_v29 }
  0x95   :  { %v396_v40 = vadd.f32 %v1145_v37, %v394_v33  ;;  %v219_v37 = vld [vmem:[%s1320_s2] sm:$0x1] }
  0x97   :  { %v398_v61 = vadd.f32 %v1148_v53, %v396_v40 }
  0x99   :  { %v400_v42 = vadd.f32 %v1151_v54, %v398_v61 }
  0x9b   :  { %v402_v5 = vadd.f32 %v1154_v38, %v400_v42 }
  0x9d   :  { %v404_v46 = vadd.f32 %v1157_v59, %v402_v5 }
  0x9f   :  { %v406_v17 = vadd.f32 %v1160_v36, %v404_v46 }
  0xa1   :  { %v408_v56 = vadd.f32 %v1169_v52, %v406_v17 }
  0xa3   :  { %v410_v47 = vadd.f32 %v1172_v8, %v408_v56 }
  0xa5   :  { %v411_v20 = vrot.slane %v410_v47, 4 }
  0xa7   :  { %v412_v39 = vadd.f32 %v411_v20, %v410_v47 }
  0xa9   :  { %v413_v3 = vrot.slane %v412_v39, 2 }
  0xab   :  { %v414_v48 = vadd.f32 %v413_v3, %v412_v39 }
  0xad   :  { %v415_v34 = vrot.slane %v414_v48, 1 }
  0xaf   :  { %v416_v53 = vadd.f32 %v415_v34, %v414_v48 }
  0xb1   :  { %v417_v54 = vadd.f32 %v416_v53, %v219_v37 }
  0xb3   :  { %418 = vst.msk [vmem:[%s1320_s2] sm:$0x1] %vm14_vm0, %v417_v54 }

// kernel: generator_forward.63
= control target key start
LH: loop header
LB: loop body
LE: loop exit
PB: predicated region body
PF: predicated region fallthrough
CT: control target
= control target key end

     0   :  { %vm540_vm0 = vcmask 519168   ;;  %s1345_s0 = inlined_call_operand.vmem [shape: f32[512,64], index: 0, kind: input, shape index: {}]   ;;  %s1346_s1 = inlined_call_operand.vmem [shape: f32[1,64], index: 1, kind: input, shape index: {}]   ;;  %s1347_s2 = inlined_call_operand.vmem [shape: f32[1,64], index: 2, kind: input, shape index: {}]   ;;  %s1348_s3 = inlined_call_operand.vmem [shape: bf16[512,64], index: 3, kind: output, shape index: {}]  }
   0x1   :  { %v14_v0 = vld [vmem:[%s1345_s0] sm:$0xff]  ;;  %v15_v4 = vld [vmem:[%s1345_s0 + $0x8] sm:$0xff]  ;;  %v16_v5 = vld [vmem:[%s1345_s0 + $0x10] sm:$0xff] }
   0x2   :  { %v765_v1 = vld [vmem:[%s1346_s1] ss:$0 sm:$0xff]  ;;  %v17_v6 = vld [vmem:[%s1345_s0 + $0x18] sm:$0xff]  ;;  %v19_v11 = vld [vmem:[%s1345_s0 + $0x28] sm:$0xff] }
   0x3   :  { %v770_v2 = vld [vmem:[%s1347_s2] ss:$0 sm:$0xff]  ;;  %v85_v3 = vmul.f32 %v765_v1, %v14_v0  ;;  %v86_v7 = vmul.f32 %v765_v1, %v15_v4  ;;  %v87_v8 = vmul.f32 %v765_v1, %v16_v5  ;;  %v88_v9 = vmul.f32 %v765_v1, %v17_v6  ;;  %v20_v12 = vld [vmem:[%s1345_s0 + $0x30] sm:$0xff]  ;;  %v21_v17 = vld [vmem:[%s1345_s0 + $0x38] sm:$0xff] }
   0x4   :  { %v18_v10 = vld [vmem:[%s1345_s0 + $0x20] sm:$0xff]  ;;  %v90_v15 = vmul.f32 %v765_v1, %v19_v11  ;;  %v91_v16 = vmul.f32 %v765_v1, %v20_v12  ;;  %v92_v21 = vmul.f32 %v765_v1, %v21_v17  ;;  %v23_v35 = vld [vmem:[%s1345_s0 + $0x48] sm:$0xff]  ;;  %v24_v36 = vld [vmem:[%s1345_s0 + $0x50] sm:$0xff] }
   0x5   :  { %v156_v13 = vadd.f32 %v770_v2, %v85_v3  ;;  %v89_v14 = vmul.f32 %v765_v1, %v18_v10  ;;  %v157_v18 = vadd.f32 %v770_v2, %v86_v7  ;;  %v158_v19 = vadd.f32 %v770_v2, %v87_v8  ;;  %v22_v30 = vld [vmem:[%s1345_s0 + $0x40] sm:$0xff]  ;;  %v25_v37 = vld [vmem:[%s1345_s0 + $0x58] sm:$0xff]  ;;  %v27_v43 = vld [vmem:[%s1345_s0 + $0x68] sm:$0xff] }
   0x6   :  { %v159_v20 = vadd.f32 %v770_v2, %v88_v9  ;;  %v161_v24 = vadd.f32 %v770_v2, %v90_v15  ;;  %v162_v25 = vadd.f32 %v770_v2, %v91_v16  ;;  %v163_v29 = vadd.f32 %v770_v2, %v92_v21  ;;  %v26_v42 = vld [vmem:[%s1345_s0 + $0x60] sm:$0xff]  ;;  %v28_v44 = vld [vmem:[%s1345_s0 + $0x70] sm:$0xff]  ;;  %v29_v49 = vld [vmem:[%s1345_s0 + $0x78] sm:$0xff] }
   0x7   :  { %v220_v22 = vmax.f32 %v156_v13, 0.0  ;;  %v160_v23 = vadd.f32 %v770_v2, %v89_v14  ;;  %v221_v26 = vmax.f32 %v157_v18, 0.0  ;;  %v222_v27 = vmax.f32 %v158_v19, 0.0  ;;  %v30_v8 = vld [vmem:[%s1345_s0 + $0x80] sm:$0xff]  ;;  %v31_v13 = vld [vmem:[%s1345_s0 + $0x88] sm:$0xff]  ;;  %v32_v14 = vld [vmem:[%s1345_s0 + $0x90] sm:$0xff] }
   0x8   :  { %v223_v28 = vmax.f32 %v159_v20, 0.0  ;;  %v225_v33 = vmax.f32 %v161_v24, 0.0  ;;  %v226_v34 = vmax.f32 %v162_v25, 0.0  ;;  %v227_v41 = vmax.f32 %v163_v29, 0.0  ;;  %v33_v15 = vld [vmem:[%s1345_s0 + $0x98] sm:$0xff]  ;;  %v34_v20 = vld [vmem:[%s1345_s0 + $0xa0] sm:$0xff] }
   0x9   :  { %v675_v31 = vpack.c.bf16 %v220_v22, %v220_v22  ;;  %v224_v32 = vmax.f32 %v160_v23, 0.0  ;;  %v676_v38 = vpack.c.bf16 %v221_v26, %v221_v26  ;;  %v677_v39 = vpack.c.bf16 %v222_v27, %v222_v27  ;;  %v35_v21 = vld [vmem:[%s1345_s0 + $0xa8] sm:$0xff]  ;;  %v36_v22 = vld [vmem:[%s1345_s0 + $0xb0] sm:$0xff]  ;;  %v37_v27 = vld [vmem:[%s1345_s0 + $0xb8] sm:$0xff] }
   0xa   :  { %v678_v40 = vpack.c.bf16 %v223_v28, %v223_v28  ;;  %v680_v46 = vpack.c.bf16 %v225_v33, %v225_v33  ;;  %v681_v47 = vpack.c.bf16 %v226_v34, %v226_v34  ;;  %v93_v48 = vmul.f32 %v765_v1, %v22_v30 }
   0xb   :  { %541 = vst.msk [vmem:[%s1348_s3] sm:$0xf] %vm540_vm0, %v675_v31  ;;  %v679_v45 = vpack.c.bf16 %v224_v32, %v224_v32  ;;  %542 = vst.msk [vmem:[%s1348_s3 + $0x4] sm:$0xf] %vm540_vm0, %v676_v38  ;;  %v682_v50 = vpack.c.bf16 %v227_v41, %v227_v41  ;;  %v94_v51 = vmul.f32 %v765_v1, %v23_v35 }
   0xc   :  { %543 = vst.msk [vmem:[%s1348_s3 + $0x8] sm:$0xf] %vm540_vm0, %v677_v39  ;;  %544 = vst.msk [vmem:[%s1348_s3 + $0xc] sm:$0xf] %vm540_vm0, %v678_v40  ;;  %v95_v52 = vmul.f32 %v765_v1, %v24_v36  ;;  %v96_v53 = vmul.f32 %v765_v1, %v25_v37  ;;  %v164_v54 = vadd.f32 %v770_v2, %v93_v48  ;;  %v38_v48 = vld [vmem:[%s1345_s0 + $0xc0] sm:$0xff] }
   0xd   :  { %545 = vst.msk [vmem:[%s1348_s3 + $0x10] sm:$0xf] %vm540_vm0, %v679_v45  ;;  %546 = vst.msk [vmem:[%s1348_s3 + $0x14] sm:$0xf] %vm540_vm0, %v680_v46  ;;  %v97_v55 = vmul.f32 %v765_v1, %v26_v42  ;;  %v98_v56 = vmul.f32 %v765_v1, %v27_v43  ;;  %v99_v57 = vmul.f32 %v765_v1, %v28_v44 }
   0xe   :  { %547 = vst.msk [vmem:[%s1348_s3 + $0x18] sm:$0xf] %vm540_vm0, %v681_v47  ;;  %548 = vst.msk [vmem:[%s1348_s3 + $0x1c] sm:$0xf] %vm540_vm0, %v682_v50  ;;  %v165_v58 = vadd.f32 %v770_v2, %v94_v51  ;;  %v166_v59 = vadd.f32 %v770_v2, %v95_v52  ;;  %v167_v60 = vadd.f32 %v770_v2, %v96_v53  ;;  %v228_v62 = vmax.f32 %v164_v54, 0.0  ;;  %v39_v53 = vld [vmem:[%s1345_s0 + $0xc8] sm:$0xff] }
   0xf   :  { %v100_v61 = vmul.f32 %v765_v1, %v29_v49  ;;  %v168_v63 = vadd.f32 %v770_v2, %v97_v55  ;;  %v169_v0 = vadd.f32 %v770_v2, %v98_v56  ;;  %v170_v3 = vadd.f32 %v770_v2, %v99_v57  ;;  %v40_v54 = vld [vmem:[%s1345_s0 + $0xd0] sm:$0xff]  ;;  %v41_v55 = vld [vmem:[%s1345_s0 + $0xd8] sm:$0xff] }
  0x10   :  { %v229_v4 = vmax.f32 %v165_v58, 0.0  ;;  %v230_v5 = vmax.f32 %v166_v59, 0.0  ;;  %v231_v6 = vmax.f32 %v167_v60, 0.0  ;;  %v683_v9 = vpack.c.bf16 %v228_v62, %v228_v62  ;;  %v42_v60 = vld [vmem:[%s1345_s0 + $0xe0] sm:$0xff]  ;;  %v44_v62 = vld [vmem:[%s1345_s0 + $0xf0] sm:$0xff] }
  0x11   :  { %v171_v7 = vadd.f32 %v770_v2, %v100_v61  ;;  %v232_v10 = vmax.f32 %v168_v63, 0.0  ;;  %v233_v11 = vmax.f32 %v169_v0, 0.0  ;;  %v234_v12 = vmax.f32 %v170_v3, 0.0  ;;  %v43_v61 = vld [vmem:[%s1345_s0 + $0xe8] sm:$0xff] }
  0x12   :  { %v684_v16 = vpack.c.bf16 %v229_v4, %v229_v4  ;;  %v685_v17 = vpack.c.bf16 %v230_v5, %v230_v5  ;;  %v686_v18 = vpack.c.bf16 %v231_v6, %v231_v6  ;;  %549 = vst.msk [vmem:[%s1348_s3 + $0x20] sm:$0xf] %vm540_vm0, %v683_v9  ;;  %v101_v26 = vmul.f32 %v765_v1, %v30_v8  ;;  %v45_v5 = vld [vmem:[%s1345_s0 + $0xf8] sm:$0xff] }
  0x13   :  { %v235_v19 = vmax.f32 %v171_v7, 0.0  ;;  %v687_v23 = vpack.c.bf16 %v232_v10, %v232_v10  ;;  %v688_v24 = vpack.c.bf16 %v233_v11, %v233_v11  ;;  %v689_v25 = vpack.c.bf16 %v234_v12, %v234_v12 }
  0x14   :  { %550 = vst.msk [vmem:[%s1348_s3 + $0x24] sm:$0xf] %vm540_vm0, %v684_v16  ;;  %551 = vst.msk [vmem:[%s1348_s3 + $0x28] sm:$0xf] %vm540_vm0, %v685_v17  ;;  %v102_v29 = vmul.f32 %v765_v1, %v31_v13  ;;  %v103_v30 = vmul.f32 %v765_v1, %v32_v14  ;;  %v104_v31 = vmul.f32 %v765_v1, %v33_v15 }
  0x15   :  { %552 = vst.msk [vmem:[%s1348_s3 + $0x2c] sm:$0xf] %vm540_vm0, %v686_v18  ;;  %v690_v28 = vpack.c.bf16 %v235_v19, %v235_v19  ;;  %553 = vst.msk [vmem:[%s1348_s3 + $0x30] sm:$0xf] %vm540_vm0, %v687_v23  ;;  %v172_v32 = vadd.f32 %v770_v2, %v101_v26  ;;  %v105_v33 = vmul.f32 %v765_v1, %v34_v20  ;;  %v46_v26 = vld [vmem:[%s1345_s0 + $0x100] sm:$0xff] }
  0x16   :  { %554 = vst.msk [vmem:[%s1348_s3 + $0x34] sm:$0xf] %vm540_vm0, %v688_v24  ;;  %555 = vst.msk [vmem:[%s1348_s3 + $0x38] sm:$0xf] %vm540_vm0, %v689_v25  ;;  %v106_v34 = vmul.f32 %v765_v1, %v35_v21  ;;  %v107_v35 = vmul.f32 %v765_v1, %v36_v22  ;;  %v173_v36 = vadd.f32 %v770_v2, %v102_v29 }
  0x17   :  { %556 = vst.msk [vmem:[%s1348_s3 + $0x3c] sm:$0xf] %vm540_vm0, %v690_v28  ;;  %v174_v37 = vadd.f32 %v770_v2, %v103_v30  ;;  %v175_v38 = vadd.f32 %v770_v2, %v104_v31  ;;  %v108_v39 = vmul.f32 %v765_v1, %v37_v27  ;;  %v236_v40 = vmax.f32 %v172_v32, 0.0  ;;  %v47_v31 = vld [vmem:[%s1345_s0 + $0x108] sm:$0xff]  ;;  %v48_v32 = vld [vmem:[%s1345_s0 + $0x110] sm:$0xff] }
  0x18   :  { %v176_v41 = vadd.f32 %v770_v2, %v105_v33  ;;  %v177_v42 = vadd.f32 %v770_v2, %v106_v34  ;;  %v178_v43 = vadd.f32 %v770_v2, %v107_v35  ;;  %v237_v44 = vmax.f32 %v173_v36, 0.0  ;;  %v49_v33 = vld [vmem:[%s1345_s0 + $0x118] sm:$0xff] }
  0x19   :  { %v238_v45 = vmax.f32 %v174_v37, 0.0  ;;  %v239_v46 = vmax.f32 %v175_v38, 0.0  ;;  %v179_v47 = vadd.f32 %v770_v2, %v108_v39  ;;  %v691_v49 = vpack.c.bf16 %v236_v40, %v236_v40  ;;  %v50_v38 = vld [vmem:[%s1345_s0 + $0x120] sm:$0xff]  ;;  %v51_v39 = vld [vmem:[%s1345_s0 + $0x128] sm:$0xff]  ;;  %v52_v40 = vld [vmem:[%s1345_s0 + $0x130] sm:$0xff] }
  0x1a   :  { %v240_v50 = vmax.f32 %v176_v41, 0.0  ;;  %v241_v51 = vmax.f32 %v177_v42, 0.0  ;;  %v242_v52 = vmax.f32 %v178_v43, 0.0  ;;  %v692_v56 = vpack.c.bf16 %v237_v44, %v237_v44 }
  0x1b   :  { %v693_v57 = vpack.c.bf16 %v238_v45, %v238_v45  ;;  %v694_v58 = vpack.c.bf16 %v239_v46, %v239_v46  ;;  %v243_v59 = vmax.f32 %v179_v47, 0.0  ;;  %557 = vst.msk [vmem:[%s1348_s3 + $0x40] sm:$0xf] %vm540_vm0, %v691_v49  ;;  %v109_v4 = vmul.f32 %v765_v1, %v38_v48  ;;  %v53_v45 = vld [vmem:[%s1345_s0 + $0x138] sm:$0xff] }
  0x1c   :  { %v695_v63 = vpack.c.bf16 %v240_v50, %v240_v50  ;;  %v696_v0 = vpack.c.bf16 %v241_v51, %v241_v51  ;;  %v697_v3 = vpack.c.bf16 %v242_v52, %v242_v52  ;;  %558 = vst.msk [vmem:[%s1348_s3 + $0x44] sm:$0xf] %vm540_vm0, %v692_v56  ;;  %v110_v7 = vmul.f32 %v765_v1, %v39_v53 }
  0x1d   :  { %559 = vst.msk [vmem:[%s1348_s3 + $0x48] sm:$0xf] %vm540_vm0, %v693_v57  ;;  %560 = vst.msk [vmem:[%s1348_s3 + $0x4c] sm:$0xf] %vm540_vm0, %v694_v58  ;;  %v698_v6 = vpack.c.bf16 %v243_v59, %v243_v59  ;;  %v111_v8 = vmul.f32 %v765_v1, %v40_v54  ;;  %v112_v9 = vmul.f32 %v765_v1, %v41_v55 }
  0x1e   :  { %561 = vst.msk [vmem:[%s1348_s3 + $0x50] sm:$0xf] %vm540_vm0, %v695_v63  ;;  %562 = vst.msk [vmem:[%s1348_s3 + $0x54] sm:$0xf] %vm540_vm0, %v696_v0  ;;  %v180_v10 = vadd.f32 %v770_v2, %v109_v4  ;;  %v113_v11 = vmul.f32 %v765_v1, %v42_v60  ;;  %v114_v12 = vmul.f32 %v765_v1, %v43_v61  ;;  %v54_v4 = vld [vmem:[%s1345_s0 + $0x140] sm:$0xff] }
  0x1f   :  { %563 = vst.msk [vmem:[%s1348_s3 + $0x58] sm:$0xf] %vm540_vm0, %v697_v3  ;;  %v115_v13 = vmul.f32 %v765_v1, %v44_v62  ;;  %564 = vst.msk [vmem:[%s1348_s3 + $0x5c] sm:$0xf] %vm540_vm0, %v698_v6  ;;  %v181_v14 = vadd.f32 %v770_v2, %v110_v7  ;;  %v182_v15 = vadd.f32 %v770_v2, %v111_v8 }
  0x20   :  { %v183_v16 = vadd.f32 %v770_v2, %v112_v9  ;;  %v116_v17 = vmul.f32 %v765_v1, %v45_v5  ;;  %v244_v18 = vmax.f32 %v180_v10, 0.0  ;;  %v184_v19 = vadd.f32 %v770_v2, %v113_v11  ;;  %v55_v9 = vld [vmem:[%s1345_s0 + $0x148] sm:$0xff]  ;;  %v56_v10 = vld [vmem:[%s1345_s0 + $0x150] sm:$0xff]  ;;  %v57_v11 = vld [vmem:[%s1345_s0 + $0x158] sm:$0xff] }
  0x21   :  { %v185_v20 = vadd.f32 %v770_v2, %v114_v12  ;;  %v186_v21 = vadd.f32 %v770_v2, %v115_v13  ;;  %v245_v22 = vmax.f32 %v181_v14, 0.0  ;;  %v246_v23 = vmax.f32 %v182_v15, 0.0 }
  0x22   :  { %v247_v24 = vmax.f32 %v183_v16, 0.0  ;;  %v187_v25 = vadd.f32 %v770_v2, %v116_v17  ;;  %v699_v27 = vpack.c.bf16 %v244_v18, %v244_v18  ;;  %v248_v28 = vmax.f32 %v184_v19, 0.0  ;;  %v58_v16 = vld [vmem:[%s1345_s0 + $0x160] sm:$0xff]  ;;  %v59_v17 = vld [vmem:[%s1345_s0 + $0x168] sm:$0xff]  ;;  %v60_v18 = vld [vmem:[%s1345_s0 + $0x170] sm:$0xff] }
  0x23   :  { %v249_v29 = vmax.f32 %v185_v20, 0.0  ;;  %v250_v30 = vmax.f32 %v186_v21, 0.0  ;;  %v700_v34 = vpack.c.bf16 %v245_v22, %v245_v22  ;;  %v701_v35 = vpack.c.bf16 %v246_v23, %v246_v23  ;;  %v61_v23 = vld [vmem:[%s1345_s0 + $0x178] sm:$0xff] }
  0x24   :  { %v702_v36 = vpack.c.bf16 %v247_v24, %v247_v24  ;;  %v251_v37 = vmax.f32 %v187_v25, 0.0  ;;  %565 = vst.msk [vmem:[%s1348_s3 + $0x60] sm:$0xf] %vm540_vm0, %v699_v27  ;;  %v703_v41 = vpack.c.bf16 %v248_v28, %v248_v28  ;;  %v117_v44 = vmul.f32 %v765_v1, %v46_v26 }
  0x25   :  { %v704_v42 = vpack.c.bf16 %v249_v29, %v249_v29  ;;  %v705_v43 = vpack.c.bf16 %v250_v30, %v250_v30  ;;  %566 = vst.msk [vmem:[%s1348_s3 + $0x64] sm:$0xf] %vm540_vm0, %v700_v34  ;;  %567 = vst.msk [vmem:[%s1348_s3 + $0x68] sm:$0xf] %vm540_vm0, %v701_v35  ;;  %v118_v47 = vmul.f32 %v765_v1, %v47_v31 }
  0x26   :  { %568 = vst.msk [vmem:[%s1348_s3 + $0x6c] sm:$0xf] %vm540_vm0, %v702_v36  ;;  %v706_v46 = vpack.c.bf16 %v251_v37, %v251_v37  ;;  %v119_v48 = vmul.f32 %v765_v1, %v48_v32  ;;  %v120_v49 = vmul.f32 %v765_v1, %v49_v33  ;;  %569 = vst.msk [vmem:[%s1348_s3 + $0x70] sm:$0xf] %vm540_vm0, %v703_v41 }
  0x27   :  { %570 = vst.msk [vmem:[%s1348_s3 + $0x74] sm:$0xf] %vm540_vm0, %v704_v42  ;;  %571 = vst.msk [vmem:[%s1348_s3 + $0x78] sm:$0xf] %vm540_vm0, %v705_v43  ;;  %v188_v50 = vadd.f32 %v770_v2, %v117_v44  ;;  %v121_v51 = vmul.f32 %v765_v1, %v50_v38  ;;  %v122_v52 = vmul.f32 %v765_v1, %v51_v39  ;;  %v62_v44 = vld [vmem:[%s1345_s0 + $0x180] sm:$0xff] }
  0x28   :  { %v123_v53 = vmul.f32 %v765_v1, %v52_v40  ;;  %572 = vst.msk [vmem:[%s1348_s3 + $0x7c] sm:$0xf] %vm540_vm0, %v706_v46  ;;  %v189_v54 = vadd.f32 %v770_v2, %v118_v47  ;;  %v190_v55 = vadd.f32 %v770_v2, %v119_v48  ;;  %v191_v56 = vadd.f32 %v770_v2, %v120_v49  ;;  %v63_v49 = vld [vmem:[%s1345_s0 + $0x188] sm:$0xff] }
  0x29   :  { %v124_v57 = vmul.f32 %v765_v1, %v53_v45  ;;  %v252_v58 = vmax.f32 %v188_v50, 0.0  ;;  %v192_v59 = vadd.f32 %v770_v2, %v121_v51  ;;  %v193_v60 = vadd.f32 %v770_v2, %v122_v52  ;;  %v64_v50 = vld [vmem:[%s1345_s0 + $0x190] sm:$0xff]  ;;  %v65_v51 = vld [vmem:[%s1345_s0 + $0x198] sm:$0xff] }
  0x2a   :  { %v194_v61 = vadd.f32 %v770_v2, %v123_v53  ;;  %v253_v62 = vmax.f32 %v189_v54, 0.0  ;;  %v254_v63 = vmax.f32 %v190_v55, 0.0  ;;  %v255_v0 = vmax.f32 %v191_v56, 0.0  ;;  %v66_v56 = vld [vmem:[%s1345_s0 + $0x1a0] sm:$0xff] }
  0x2b   :  { %v195_v3 = vadd.f32 %v770_v2, %v124_v57  ;;  %v707_v5 = vpack.c.bf16 %v252_v58, %v252_v58  ;;  %v256_v6 = vmax.f32 %v192_v59, 0.0  ;;  %v257_v7 = vmax.f32 %v193_v60, 0.0  ;;  %v67_v57 = vld [vmem:[%s1345_s0 + $0x1a8] sm:$0xff]  ;;  %v68_v58 = vld [vmem:[%s1345_s0 + $0x1b0] sm:$0xff] }
  0x2c   :  { %v258_v8 = vmax.f32 %v194_v61, 0.0  ;;  %v708_v12 = vpack.c.bf16 %v253_v62, %v253_v62  ;;  %v709_v13 = vpack.c.bf16 %v254_v63, %v254_v63  ;;  %v710_v14 = vpack.c.bf16 %v255_v0, %v255_v0  ;;  %v69_v63 = vld [vmem:[%s1345_s0 + $0x1b8] sm:$0xff] }
  0x2d   :  { %v259_v15 = vmax.f32 %v195_v3, 0.0  ;;  %573 = vst.msk [vmem:[%s1348_s3 + $0x80] sm:$0xf] %vm540_vm0, %v707_v5  ;;  %v711_v19 = vpack.c.bf16 %v256_v6, %v256_v6  ;;  %v712_v20 = vpack.c.bf16 %v257_v7, %v257_v7  ;;  %v125_v22 = vmul.f32 %v765_v1, %v54_v4 }
  0x2e   :  { %v713_v21 = vpack.c.bf16 %v258_v8, %v258_v8  ;;  %574 = vst.msk [vmem:[%s1348_s3 + $0x84] sm:$0xf] %vm540_vm0, %v708_v12  ;;  %575 = vst.msk [vmem:[%s1348_s3 + $0x88] sm:$0xf] %vm540_vm0, %v709_v13  ;;  %v126_v25 = vmul.f32 %v765_v1, %v55_v9  ;;  %v127_v26 = vmul.f32 %v765_v1, %v56_v10 }
  0x2f   :  { %576 = vst.msk [vmem:[%s1348_s3 + $0x8c] sm:$0xf] %vm540_vm0, %v710_v14  ;;  %v714_v24 = vpack.c.bf16 %v259_v15, %v259_v15  ;;  %v128_v27 = vmul.f32 %v765_v1, %v57_v11  ;;  %577 = vst.msk [vmem:[%s1348_s3 + $0x90] sm:$0xf] %vm540_vm0, %v711_v19  ;;  %v196_v28 = vadd.f32 %v770_v2, %v125_v22  ;;  %v70_v22 = vld [vmem:[%s1345_s0 + $0x1c0] sm:$0xff] }
  0x30   :  { %578 = vst.msk [vmem:[%s1348_s3 + $0x94] sm:$0xf] %vm540_vm0, %v712_v20  ;;  %579 = vst.msk [vmem:[%s1348_s3 + $0x98] sm:$0xf] %vm540_vm0, %v713_v21  ;;  %v129_v29 = vmul.f32 %v765_v1, %v58_v16  ;;  %v130_v30 = vmul.f32 %v765_v1, %v59_v17  ;;  %v131_v31 = vmul.f32 %v765_v1, %v60_v18 }
  0x31   :  { %580 = vst.msk [vmem:[%s1348_s3 + $0x9c] sm:$0xf] %vm540_vm0, %v714_v24  ;;  %v197_v32 = vadd.f32 %v770_v2, %v126_v25  ;;  %v198_v33 = vadd.f32 %v770_v2, %v127_v26  ;;  %v199_v34 = vadd.f32 %v770_v2, %v128_v27  ;;  %v132_v35 = vmul.f32 %v765_v1, %v61_v23  ;;  %v71_v27 = vld [vmem:[%s1345_s0 + $0x1c8] sm:$0xff] }
  0x32   :  { %v260_v36 = vmax.f32 %v196_v28, 0.0  ;;  %v200_v37 = vadd.f32 %v770_v2, %v129_v29  ;;  %v201_v38 = vadd.f32 %v770_v2, %v130_v30  ;;  %v202_v39 = vadd.f32 %v770_v2, %v131_v31  ;;  %v72_v28 = vld [vmem:[%s1345_s0 + $0x1d0] sm:$0xff]  ;;  %v73_v29 = vld [vmem:[%s1345_s0 + $0x1d8] sm:$0xff] }
  0x33   :  { %v261_v40 = vmax.f32 %v197_v32, 0.0  ;;  %v262_v41 = vmax.f32 %v198_v33, 0.0  ;;  %v263_v42 = vmax.f32 %v199_v34, 0.0  ;;  %v203_v43 = vadd.f32 %v770_v2, %v132_v35  ;;  %v74_v34 = vld [vmem:[%s1345_s0 + $0x1e0] sm:$0xff]  ;;  %v75_v35 = vld [vmem:[%s1345_s0 + $0x1e8] sm:$0xff] }
  0x34   :  { %v715_v45 = vpack.c.bf16 %v260_v36, %v260_v36  ;;  %v264_v46 = vmax.f32 %v200_v37, 0.0  ;;  %v265_v47 = vmax.f32 %v201_v38, 0.0  ;;  %v266_v48 = vmax.f32 %v202_v39, 0.0  ;;  %v76_v36 = vld [vmem:[%s1345_s0 + $0x1f0] sm:$0xff] }
  0x35   :  { %v716_v52 = vpack.c.bf16 %v261_v40, %v261_v40  ;;  %v717_v53 = vpack.c.bf16 %v262_v41, %v262_v41  ;;  %v718_v54 = vpack.c.bf16 %v263_v42, %v263_v42  ;;  %v267_v55 = vmax.f32 %v203_v43, 0.0  ;;  %v77_v41 = vld [vmem:[%s1345_s0 + $0x1f8] sm:$0xff] }
  0x36   :  { %581 = vst.msk [vmem:[%s1348_s3 + $0xa0] sm:$0xf] %vm540_vm0, %v715_v45  ;;  %v719_v59 = vpack.c.bf16 %v264_v46, %v264_v46  ;;  %v720_v60 = vpack.c.bf16 %v265_v47, %v265_v47  ;;  %v721_v61 = vpack.c.bf16 %v266_v48, %v266_v48  ;;  %v133_v62 = vmul.f32 %v765_v1, %v62_v44 }
  0x37   :  { %582 = vst.msk [vmem:[%s1348_s3 + $0xa4] sm:$0xf] %vm540_vm0, %v716_v52  ;;  %583 = vst.msk [vmem:[%s1348_s3 + $0xa8] sm:$0xf] %vm540_vm0, %v717_v53  ;;  %v722_v0 = vpack.c.bf16 %v267_v55, %v267_v55  ;;  %v134_v3 = vmul.f32 %v765_v1, %v63_v49  ;;  %v135_v4 = vmul.f32 %v765_v1, %v64_v50 }
  0x38   :  { %584 = vst.msk [vmem:[%s1348_s3 + $0xac] sm:$0xf] %vm540_vm0, %v718_v54  ;;  %v136_v5 = vmul.f32 %v765_v1, %v65_v51  ;;  %585 = vst.msk [vmem:[%s1348_s3 + $0xb0] sm:$0xf] %vm540_vm0, %v719_v59  ;;  %v204_v6 = vadd.f32 %v770_v2, %v133_v62  ;;  %v137_v7 = vmul.f32 %v765_v1, %v66_v56 }
  0x39   :  { %586 = vst.msk [vmem:[%s1348_s3 + $0xb4] sm:$0xf] %vm540_vm0, %v720_v60  ;;  %587 = vst.msk [vmem:[%s1348_s3 + $0xb8] sm:$0xf] %vm540_vm0, %v721_v61  ;;  %v138_v8 = vmul.f32 %v765_v1, %v67_v57  ;;  %v139_v9 = vmul.f32 %v765_v1, %v68_v58  ;;  %v205_v10 = vadd.f32 %v770_v2, %v134_v3 }
  0x3a   :  { %588 = vst.msk [vmem:[%s1348_s3 + $0xbc] sm:$0xf] %vm540_vm0, %v722_v0  ;;  %v206_v11 = vadd.f32 %v770_v2, %v135_v4  ;;  %v207_v12 = vadd.f32 %v770_v2, %v136_v5  ;;  %v140_v13 = vmul.f32 %v765_v1, %v69_v63  ;;  %v268_v14 = vmax.f32 %v204_v6, 0.0 }
  0x3b   :  { %v208_v15 = vadd.f32 %v770_v2, %v137_v7  ;;  %v209_v16 = vadd.f32 %v770_v2, %v138_v8  ;;  %v210_v17 = vadd.f32 %v770_v2, %v139_v9  ;;  %v269_v18 = vmax.f32 %v205_v10, 0.0 }
  0x3c   :  { %v270_v19 = vmax.f32 %v206_v11, 0.0  ;;  %v271_v20 = vmax.f32 %v207_v12, 0.0  ;;  %v211_v21 = vadd.f32 %v770_v2, %v140_v13  ;;  %v723_v23 = vpack.c.bf16 %v268_v14, %v268_v14 }
  0x3d   :  { %v272_v24 = vmax.f32 %v208_v15, 0.0  ;;  %v273_v25 = vmax.f32 %v209_v16, 0.0  ;;  %v274_v26 = vmax.f32 %v210_v17, 0.0  ;;  %v724_v30 = vpack.c.bf16 %v269_v18, %v269_v18 }
  0x3e   :  { %v725_v31 = vpack.c.bf16 %v270_v19, %v270_v19  ;;  %v726_v32 = vpack.c.bf16 %v271_v20, %v271_v20  ;;  %v275_v33 = vmax.f32 %v211_v21, 0.0  ;;  %589 = vst.msk [vmem:[%s1348_s3 + $0xc0] sm:$0xf] %vm540_vm0, %v723_v23  ;;  %v141_v40 = vmul.f32 %v765_v1, %v70_v22 }
  0x3f   :  { %v727_v37 = vpack.c.bf16 %v272_v24, %v272_v24  ;;  %v728_v38 = vpack.c.bf16 %v273_v25, %v273_v25  ;;  %v729_v39 = vpack.c.bf16 %v274_v26, %v274_v26  ;;  %590 = vst.msk [vmem:[%s1348_s3 + $0xc4] sm:$0xf] %vm540_vm0, %v724_v30  ;;  %v142_v43 = vmul.f32 %v765_v1, %v71_v27 }
  0x40   :  { %591 = vst.msk [vmem:[%s1348_s3 + $0xc8] sm:$0xf] %vm540_vm0, %v725_v31  ;;  %592 = vst.msk [vmem:[%s1348_s3 + $0xcc] sm:$0xf] %vm540_vm0, %v726_v32  ;;  %v730_v42 = vpack.c.bf16 %v275_v33, %v275_v33  ;;  %v143_v44 = vmul.f32 %v765_v1, %v72_v28  ;;  %v144_v45 = vmul.f32 %v765_v1, %v73_v29 }
  0x41   :  { %593 = vst.msk [vmem:[%s1348_s3 + $0xd0] sm:$0xf] %vm540_vm0, %v727_v37  ;;  %594 = vst.msk [vmem:[%s1348_s3 + $0xd4] sm:$0xf] %vm540_vm0, %v728_v38  ;;  %v212_v46 = vadd.f32 %v770_v2, %v141_v40  ;;  %v145_v47 = vmul.f32 %v765_v1, %v74_v34  ;;  %v146_v48 = vmul.f32 %v765_v1, %v75_v35 }
  0x42   :  { %595 = vst.msk [vmem:[%s1348_s3 + $0xd8] sm:$0xf] %vm540_vm0, %v729_v39  ;;  %v147_v49 = vmul.f32 %v765_v1, %v76_v36  ;;  %596 = vst.msk [vmem:[%s1348_s3 + $0xdc] sm:$0xf] %vm540_vm0, %v730_v42  ;;  %v213_v50 = vadd.f32 %v770_v2, %v142_v43  ;;  %v214_v51 = vadd.f32 %v770_v2, %v143_v44 }
  0x43   :  { %v215_v52 = vadd.f32 %v770_v2, %v144_v45  ;;  %v148_v53 = vmul.f32 %v765_v1, %v77_v41  ;;  %v276_v54 = vmax.f32 %v212_v46, 0.0  ;;  %v216_v55 = vadd.f32 %v770_v2, %v145_v47 }
  0x44   :  { %v217_v56 = vadd.f32 %v770_v2, %v146_v48  ;;  %v218_v57 = vadd.f32 %v770_v2, %v147_v49  ;;  %v277_v58 = vmax.f32 %v213_v50, 0.0  ;;  %v278_v59 = vmax.f32 %v214_v51, 0.0 }
  0x45   :  { %v279_v60 = vmax.f32 %v215_v52, 0.0  ;;  %v219_v61 = vadd.f32 %v770_v2, %v148_v53  ;;  %v731_v62 = vpack.c.bf16 %v276_v54, %v276_v54  ;;  %v280_v63 = vmax.f32 %v216_v55, 0.0 }
  0x46   :  { %v281_v0 = vmax.f32 %v217_v56, 0.0  ;;  %v282_v3 = vmax.f32 %v218_v57, 0.0  ;;  %v732_v4 = vpack.c.bf16 %v277_v58, %v277_v58  ;;  %v733_v5 = vpack.c.bf16 %v278_v59, %v278_v59 }
  0x47   :  { %v734_v6 = vpack.c.bf16 %v279_v60, %v279_v60  ;;  %v283_v1 = vmax.f32 %v219_v61, 0.0  ;;  %597 = vst.msk [vmem:[%s1348_s3 + $0xe0] sm:$0xf] %vm540_vm0, %v731_v62  ;;  %v735_v7 = vpack.c.bf16 %v280_v63, %v280_v63 }
  0x48   :  { %v736_v8 = vpack.c.bf16 %v281_v0, %v281_v0  ;;  %v737_v9 = vpack.c.bf16 %v282_v3, %v282_v3  ;;  %598 = vst.msk [vmem:[%s1348_s3 + $0xe4] sm:$0xf] %vm540_vm0, %v732_v4  ;;  %599 = vst.msk [vmem:[%s1348_s3 + $0xe8] sm:$0xf] %vm540_vm0, %v733_v5 }
  0x49   :  { %600 = vst.msk [vmem:[%s1348_s3 + $0xec] sm:$0xf] %vm540_vm0, %v734_v6  ;;  %v738_v2 = vpack.c.bf16 %v283_v1, %v283_v1  ;;  %601 = vst.msk [vmem:[%s1348_s3 + $0xf0] sm:$0xf] %vm540_vm0, %v735_v7 }
  0x4a   :  { %602 = vst.msk [vmem:[%s1348_s3 + $0xf4] sm:$0xf] %vm540_vm0, %v736_v8  ;;  %603 = vst.msk [vmem:[%s1348_s3 + $0xf8] sm:$0xf] %vm540_vm0, %v737_v9 }
  0x4b   :  { %604 = vst.msk [vmem:[%s1348_s3 + $0xfc] sm:$0xf] %vm540_vm0, %v738_v2 }

// kernel: generator_forward.64
= control target key start
LH: loop header
LB: loop body
LE: loop exit
PB: predicated region body
PF: predicated region fallthrough
CT: control target
= control target key end

     0   :  { %s1422_s9 = smov 0   ;;  %s1424_s10 = smov 0   ;;  %s1578_s0 = inlined_call_operand.vmem [shape: bf16[512,256], index: 0, kind: input, shape index: {}]   ;;  %s1579_s1 = inlined_call_operand.vmem [shape: bf16[256,128], index: 1, kind: input, shape index: {}]   ;;  %s1580_s2 = inlined_call_operand.vmem [shape: f32[512,128], index: 2, kind: output, shape index: {}]  }
   0x1   :  { %s1426_s11 = smov 0  }
   0x2 LB: > { %s31_s12 = sadd.s32 1, %s1401_s10  ;;  %p1046_p0 = scmp.ge.s32.totalorder %s1405_s11, 1  ;;  %s1405_s11 = sphi %s1426_s11, %s12_s11   ;;  %s1401_s10 = sphi %s1424_s10, %s1582_s10   ;;  %s1397_s9 = sphi %s1422_s9, %s1581_s9  }
   0x3   : > { %p33_p1 = scmp.ge.s32.totalorder %s31_s12, 2  ;;  %p158_p2 = scmp.lt.s32.totalorder %s1405_s11, 3 }
   0x5   : > { %s1584_s12 = smov (%p33_p1, %s31_s12), 0  ;;  %p159_p3 = pnand %p1046_p0, %p158_p2 }
   0x6   : > { %s1047_s15 = sshll.u32 (!%p159_p3), %s1397_s9, 5 }
   0x7   : > { %162 = sbr.rel (%p159_p3) target bundleno = 318 (0x13e), region = 28  ;;  %p198_p4 = scmp.lt.s32.totalorder (!%p159_p3), %s1047_s15, 63 }
   0xc   : > { %v1255_v0 = vld [vmem:[%s1579_s1 + $0x78] sm:$0xff]   ;;  %v1257_v2 = vld [vmem:[%s1579_s1 + $0x70] sm:$0xff]   ;;  %v1259_v4 = vld [vmem:[%s1579_s1 + $0x68] sm:$0xff]   ;;  %s1586_s15 = smov (!%p198_p4, %s1047_s15), 63 }
   0xd   : > { %v1256_v1 = vld [vmem:[%s1579_s1 + $0x38] sm:$0xff]   ;;  %1103 = vmatprep.subr.bf16.mxu0 %v1255_v0  ;;  %1215 = vmatprep.subr.bf16.mxu1 %v1255_v0  ;;  %v1258_v3 = vld [vmem:[%s1579_s1 + $0x30] sm:$0xff]   ;;  %v1260_v5 = vld [vmem:[%s1579_s1 + $0x28] sm:$0xff]   ;;  %s1102_s30 = sshll.u32 %s1586_s15, 3 }
   0xe   : > { %1104 = vmatpush3.bf16.msra.mxu0 %v1256_v1  ;;  %1223 = vmatpush3.bf16.msra.mxu1 %v1256_v1  ;;  %v1261_v6 = vld [vmem:[%s1579_s1 + $0x60] sm:$0xff]   ;;  %v1263_v8 = vld [vmem:[%s1579_s1 + $0x58] sm:$0xff]   ;;  %s1475_s7 = scalar_lea.vmem %s1578_s0, %s1102_s30  ;;  %v1265_v10 = vld [vmem:[%s1579_s1 + $0x50] sm:$0xff]   ;;  %s1535_s28 = scalar_lea.vmem %s1580_s2, %s1102_s30 }
   0xf   : > { %1105 = vmatprep.subr.bf16.mxu0 %v1257_v2  ;;  %1216 = vmatprep.subr.bf16.mxu1 %v1257_v2  ;;  %v1262_v7 = vld [vmem:[%s1579_s1 + $0x20] sm:$0xff]   ;;  %v1264_v9 = vld [vmem:[%s1579_s1 + $0x18] sm:$0xff]   ;;  %v1266_v13 = vld [vmem:[%s1579_s1 + $0x10] sm:$0xff]  }
  0x10   : > { %v1273_v11 = vld [vmem:[%s1475_s7 + $0x4] ss:$8 sps:$4 sm:$0xff]   ;;  %v1271_v18 = vld [vmem:[%s1475_s7] ss:$8 sps:$4 sm:$0xff]   ;;  %v1277_v20 = vld [vmem:[%s1475_s7 + $0x14] ss:$8 sps:$4 sm:$0xff]  }
  0x11   : > { %v1276_v12 = vld [vmem:[%s1475_s7 + $0x84] ss:$8 sps:$4 sm:$0xff]   ;;  %647 = vmatprep.mubr.bf16.mxu0 %v1273_v11  ;;  %v1274_v19 = vld [vmem:[%s1475_s7 + $0x80] ss:$8 sps:$4 sm:$0xff]   ;;  %v1279_v21 = vld [vmem:[%s1475_s7 + $0x94] ss:$8 sps:$4 sm:$0xff]  }
  0x12   : > { %1106 = vmatpush3.bf16.msra.mxu0 %v1258_v3  ;;  %1224 = vmatpush3.bf16.msra.mxu1 %v1258_v3  ;;  %v1267_v14 = vld [vmem:[%s1579_s1 + $0x48] sm:$0xff]   ;;  %v1269_v16 = vld [vmem:[%s1579_s1 + $0x40] sm:$0xff]   ;;  %v1281_v22 = vld [vmem:[%s1475_s7 + $0x10] ss:$8 sps:$4 sm:$0xff]  }
  0x13   : > { %1107 = vmatprep.subr.bf16.mxu0 %v1259_v4  ;;  %1217 = vmatprep.subr.bf16.mxu1 %v1259_v4  ;;  %v1268_v15 = vld [vmem:[%s1579_s1 + $0x8] sm:$0xff]   ;;  %v1270_v17 = vld [vmem:[%s1579_s1] sm:$0xff]   ;;  %v1282_v23 = vld [vmem:[%s1475_s7 + $0x90] ss:$8 sps:$4 sm:$0xff]  }
  0x14   : > { %711 = vmatprep.mubr.bf16.mxu1 %v1276_v12  ;;  %v1283_v24 = vld [vmem:[%s1475_s7 + $0x24] ss:$8 sps:$4 sm:$0xff]   ;;  %v1287_v26 = vld [vmem:[%s1475_s7 + $0x20] ss:$8 sps:$4 sm:$0xff]   ;;  %v1289_v28 = vld [vmem:[%s1475_s7 + $0x34] ss:$8 sps:$4 sm:$0xff]  }
  0x15   : > { %v1285_v25 = vld [vmem:[%s1475_s7 + $0xa4] ss:$8 sps:$4 sm:$0xff]   ;;  %v1288_v27 = vld [vmem:[%s1475_s7 + $0xa0] ss:$8 sps:$4 sm:$0xff]   ;;  %v1291_v29 = vld [vmem:[%s1475_s7 + $0xb4] ss:$8 sps:$4 sm:$0xff]  }
  0x16   : > { %1108 = vmatpush3.bf16.msra.mxu0 %v1260_v5  ;;  %1225 = vmatpush3.bf16.msra.mxu1 %v1260_v5  ;;  %v1293_v30 = vld [vmem:[%s1475_s7 + $0x30] ss:$8 sps:$4 sm:$0xff]   ;;  %v1295_v32 = vld [vmem:[%s1475_s7 + $0x44] ss:$8 sps:$4 sm:$0xff]   ;;  %v1299_v34 = vld [vmem:[%s1475_s7 + $0x40] ss:$8 sps:$4 sm:$0xff]  }
  0x17   : > { %1109 = vmatprep.subr.bf16.mxu0 %v1261_v6  ;;  %1218 = vmatprep.subr.bf16.mxu1 %v1261_v6  ;;  %v1294_v31 = vld [vmem:[%s1475_s7 + $0xb0] ss:$8 sps:$4 sm:$0xff]   ;;  %v1297_v33 = vld [vmem:[%s1475_s7 + $0xc4] ss:$8 sps:$4 sm:$0xff]   ;;  %v1300_v35 = vld [vmem:[%s1475_s7 + $0xc0] ss:$8 sps:$4 sm:$0xff]  }
  0x18   : > { %v1301_v36 = vld [vmem:[%s1475_s7 + $0x54] ss:$8 sps:$4 sm:$0xff]   ;;  %v1305_v38 = vld [vmem:[%s1475_s7 + $0x50] ss:$8 sps:$4 sm:$0xff]   ;;  %v1307_v40 = vld [vmem:[%s1475_s7 + $0x64] ss:$8 sps:$4 sm:$0xff]  }
  0x19   : > { %v1303_v37 = vld [vmem:[%s1475_s7 + $0xd4] ss:$8 sps:$4 sm:$0xff]   ;;  %v1306_v39 = vld [vmem:[%s1475_s7 + $0xd0] ss:$8 sps:$4 sm:$0xff]   ;;  %v1309_v41 = vld [vmem:[%s1475_s7 + $0xe4] ss:$8 sps:$4 sm:$0xff]  }
  0x1a   : > { %1110 = vmatpush3.bf16.msra.mxu0 %v1262_v7  ;;  %1226 = vmatpush3.bf16.msra.mxu1 %v1262_v7  ;;  %v1311_v42 = vld [vmem:[%s1475_s7 + $0x60] ss:$8 sps:$4 sm:$0xff]   ;;  %v1313_v44 = vld [vmem:[%s1475_s7 + $0x74] ss:$8 sps:$4 sm:$0xff]   ;;  %v1317_v46 = vld [vmem:[%s1475_s7 + $0x70] ss:$8 sps:$4 sm:$0xff]  }
  0x1b   : > { %1111 = vmatprep.subr.bf16.mxu0 %v1263_v8  ;;  %1219 = vmatprep.subr.bf16.mxu1 %v1263_v8  ;;  %v1312_v43 = vld [vmem:[%s1475_s7 + $0xe0] ss:$8 sps:$4 sm:$0xff]   ;;  %v1315_v45 = vld [vmem:[%s1475_s7 + $0xf4] ss:$8 sps:$4 sm:$0xff]   ;;  %v1318_v47 = vld [vmem:[%s1475_s7 + $0xf0] ss:$8 sps:$4 sm:$0xff]  }
  0x1e   : > { %1112 = vmatpush3.bf16.msra.mxu0 %v1264_v9  ;;  %1227 = vmatpush3.bf16.msra.mxu1 %v1264_v9 }
  0x1f   : > { %1113 = vmatprep.subr.bf16.mxu0 %v1265_v10  ;;  %1220 = vmatprep.subr.bf16.mxu1 %v1265_v10 }
  0x22   : > { %1114 = vmatpush3.bf16.msra.mxu0 %v1266_v13  ;;  %1228 = vmatpush3.bf16.msra.mxu1 %v1266_v13 }
  0x23   : > { %1115 = vmatprep.subr.bf16.mxu0 %v1267_v14  ;;  %1221 = vmatprep.subr.bf16.mxu1 %v1267_v14 }
  0x26   : > { %1116 = vmatpush3.bf16.msra.mxu0 %v1268_v15  ;;  %1229 = vmatpush3.bf16.msra.mxu1 %v1268_v15 }
  0x27   : > { %1117 = vmatprep.subr.bf16.mxu0 %v1269_v16  ;;  %1222 = vmatprep.subr.bf16.mxu1 %v1269_v16 }
  0x2a   : > { %1118 = vmatpush3.bf16.msra.mxu0 %v1270_v17  ;;  %1230 = vmatpush3.bf16.msra.mxu1 %v1270_v17 }
  0x2d   : > { %648 = vmatmul.mubr.bf16.vlgmr.msra.gmra.mxu0 %v1271_v18  ;;  %712 = vmatmul.mubr.bf16.vlgmr.msra.gmra.mxu1 %v1274_v19 }
  0x2e   : > { %655 = vmatprep.mubr.bf16.mxu0 %v1277_v20  ;;  %719 = vmatprep.mubr.bf16.mxu1 %v1279_v21 }
  0x35   : > { %656 = vmatmul.mubr.bf16.gmra.mxu0 %v1281_v22  ;;  %720 = vmatmul.mubr.bf16.gmra.mxu1 %v1282_v23 }
  0x36   : > { %663 = vmatprep.mubr.bf16.mxu0 %v1283_v24  ;;  %727 = vmatprep.mubr.bf16.mxu1 %v1285_v25 }
  0x3d   : > { %664 = vmatmul.mubr.bf16.gmra.mxu0 %v1287_v26  ;;  %728 = vmatmul.mubr.bf16.gmra.mxu1 %v1288_v27 }
  0x3e   : > { %671 = vmatprep.mubr.bf16.mxu0 %v1289_v28  ;;  %735 = vmatprep.mubr.bf16.mxu1 %v1291_v29 }
  0x45   : > { %672 = vmatmul.mubr.bf16.gmra.mxu0 %v1293_v30  ;;  %736 = vmatmul.mubr.bf16.gmra.mxu1 %v1294_v31 }
  0x46   : > { %679 = vmatprep.mubr.bf16.mxu0 %v1295_v32  ;;  %743 = vmatprep.mubr.bf16.mxu1 %v1297_v33 }
  0x4d   : > { %680 = vmatmul.mubr.bf16.gmra.mxu0 %v1299_v34  ;;  %744 = vmatmul.mubr.bf16.gmra.mxu1 %v1300_v35 }
  0x4e   : > { %687 = vmatprep.mubr.bf16.mxu0 %v1301_v36  ;;  %751 = vmatprep.mubr.bf16.mxu1 %v1303_v37 }
  0x55   : > { %688 = vmatmul.mubr.bf16.gmra.mxu0 %v1305_v38  ;;  %752 = vmatmul.mubr.bf16.gmra.mxu1 %v1306_v39 }
  0x56   : > { %695 = vmatprep.mubr.bf16.mxu0 %v1307_v40  ;;  %759 = vmatprep.mubr.bf16.mxu1 %v1309_v41 }
  0x5d   : > { %696 = vmatmul.mubr.bf16.gmra.mxu0 %v1311_v42  ;;  %760 = vmatmul.mubr.bf16.gmra.mxu1 %v1312_v43 }
  0x5e   : > { %703 = vmatprep.mubr.bf16.mxu0 %v1313_v44  ;;  %767 = vmatprep.mubr.bf16.mxu1 %v1315_v45 }
  0x65   : > { %704 = vmatmul.mubr.bf16.gmra.mxu0 %v1317_v46  ;;  %768 = vmatmul.mubr.bf16.gmra.mxu1 %v1318_v47 }
  0xed   : > { %v1119_v48 = vpop.f32.mrf.mxu0  ;;  %v1167_v49 = vpop.f32.mrf.mxu1 }
  0xef   : > { %v1120_v50 = vpop.f32.mrf.mxu0  ;;  %v1168_v51 = vpop.f32.mrf.mxu1 }
  0xf0   : > { %v1121_v52 = vadd.f32 %v1120_v50, %v1119_v48  ;;  %v1169_v53 = vadd.f32 %v1168_v51, %v1167_v49 }
  0xf1   : > { %v1122_v54 = vpop.f32.mrf.mxu0  ;;  %v1170_v55 = vpop.f32.mrf.mxu1 }
  0xf2   : > { %1319 = vtanh.f32 %v1121_v52 }
  0xf3   : > { %1321 = vtanh.f32 %v1169_v53  ;;  %v1123_v56 = vpop.f32.mrf.mxu0  ;;  %v1171_v57 = vpop.f32.mrf.mxu1 }
  0xf4   : > { %v1124_v58 = vadd.f32 %v1123_v56, %v1122_v54  ;;  %v1172_v59 = vadd.f32 %v1171_v57, %v1170_v55 }
  0xf5   : > { %v1125_v60 = vpop.f32.mrf.mxu0  ;;  %v1173_v61 = vpop.f32.mrf.mxu1 }
  0xf6   : > { %1323 = vtanh.f32 %v1124_v58 }
  0xf7   : > { %1325 = vtanh.f32 %v1172_v59  ;;  %v1126_v62 = vpop.f32.mrf.mxu0  ;;  %v1174_v63 = vpop.f32.mrf.mxu1 }
  0xf8   : > { %v1127_v0 = vadd.f32 %v1126_v62, %v1125_v60  ;;  %v1175_v1 = vadd.f32 %v1174_v63, %v1173_v61 }
  0xf9   : > { %v1128_v2 = vpop.f32.mrf.mxu0  ;;  %v1176_v3 = vpop.f32.mrf.mxu1 }
  0xfa   : > { %1327 = vtanh.f32 %v1127_v0 }
  0xfb   : > { %1329 = vtanh.f32 %v1175_v1  ;;  %v1129_v4 = vpop.f32.mrf.mxu0  ;;  %v1177_v5 = vpop.f32.mrf.mxu1 }
  0xfc   : > { %v1130_v6 = vadd.f32 %v1129_v4, %v1128_v2  ;;  %v1178_v7 = vadd.f32 %v1177_v5, %v1176_v3 }
  0xfd   : > { %v1131_v8 = vpop.f32.mrf.mxu0  ;;  %v1179_v9 = vpop.f32.mrf.mxu1 }
  0xfe   : > { %1331 = vtanh.f32 %v1130_v6 }
  0xff   : > { %v1320_v10 = vpop.eup %1319  ;;  %1333 = vtanh.f32 %v1178_v7  ;;  %v1132_v11 = vpop.f32.mrf.mxu0 }
 0x100   : > { %v1180_v12 = vpop.f32.mrf.mxu1  ;;  %v1322_v13 = vpop.eup %1321  ;;  %907 = vst [vmem:[%s1535_s28] sm:$0xff] %v1320_v10  ;;  %v1133_v14 = vadd.f32 %v1132_v11, %v1131_v8 }
 0x101   : > { %v1181_v15 = vadd.f32 %v1180_v12, %v1179_v9  ;;  %923 = vst [vmem:[%s1535_s28 + $0x80] sm:$0xff] %v1322_v13  ;;  %v1134_v16 = vpop.f32.mrf.mxu0 }
 0x102   : > { %v1182_v17 = vpop.f32.mrf.mxu1  ;;  %1335 = vtanh.f32 %v1133_v14 }
 0x103   : > { %v1324_v18 = vpop.eup %1323  ;;  %1337 = vtanh.f32 %v1181_v15  ;;  %v1135_v19 = vpop.f32.mrf.mxu0 }
 0x104   : > { %v1183_v20 = vpop.f32.mrf.mxu1  ;;  %v1326_v21 = vpop.eup %1325  ;;  %908 = vst [vmem:[%s1535_s28 + $0x8] sm:$0xff] %v1324_v18  ;;  %v1136_v22 = vadd.f32 %v1135_v19, %v1134_v16 }
 0x105   : > { %v1184_v23 = vadd.f32 %v1183_v20, %v1182_v17  ;;  %924 = vst [vmem:[%s1535_s28 + $0x88] sm:$0xff] %v1326_v21  ;;  %v1137_v24 = vpop.f32.mrf.mxu0 }
 0x106   : > { %v1185_v25 = vpop.f32.mrf.mxu1  ;;  %1339 = vtanh.f32 %v1136_v22 }
 0x107   : > { %v1328_v26 = vpop.eup %1327  ;;  %1341 = vtanh.f32 %v1184_v23  ;;  %v1138_v27 = vpop.f32.mrf.mxu0 }
 0x108   : > { %v1186_v28 = vpop.f32.mrf.mxu1  ;;  %v1330_v29 = vpop.eup %1329  ;;  %909 = vst [vmem:[%s1535_s28 + $0x10] sm:$0xff] %v1328_v26  ;;  %v1139_v30 = vadd.f32 %v1138_v27, %v1137_v24 }
 0x109   : > { %v1187_v31 = vadd.f32 %v1186_v28, %v1185_v25  ;;  %925 = vst [vmem:[%s1535_s28 + $0x90] sm:$0xff] %v1330_v29  ;;  %v1140_v32 = vpop.f32.mrf.mxu0 }
 0x10a   : > { %v1188_v33 = vpop.f32.mrf.mxu1  ;;  %1343 = vtanh.f32 %v1139_v30 }
 0x10b   : > { %v1332_v34 = vpop.eup %1331  ;;  %1345 = vtanh.f32 %v1187_v31  ;;  %v1141_v35 = vpop.f32.mrf.mxu0 }
 0x10c   : > { %v1189_v36 = vpop.f32.mrf.mxu1  ;;  %v1334_v37 = vpop.eup %1333  ;;  %910 = vst [vmem:[%s1535_s28 + $0x18] sm:$0xff] %v1332_v34  ;;  %v1142_v38 = vadd.f32 %v1141_v35, %v1140_v32 }
 0x10d   : > { %v1190_v39 = vadd.f32 %v1189_v36, %v1188_v33  ;;  %926 = vst [vmem:[%s1535_s28 + $0x98] sm:$0xff] %v1334_v37  ;;  %v1143_v40 = vpop.f32.mrf.mxu0 }
 0x10e   : > { %v1191_v41 = vpop.f32.mrf.mxu1  ;;  %1347 = vtanh.f32 %v1142_v38 }
 0x10f   : > { %v1336_v42 = vpop.eup %1335  ;;  %1349 = vtanh.f32 %v1190_v39  ;;  %v1144_v43 = vpop.f32.mrf.mxu0 }
 0x110   : > { %v1192_v44 = vpop.f32.mrf.mxu1  ;;  %v1338_v45 = vpop.eup %1337  ;;  %911 = vst [vmem:[%s1535_s28 + $0x20] sm:$0xff] %v1336_v42  ;;  %v1145_v46 = vadd.f32 %v1144_v43, %v1143_v40 }
 0x111   : > { %v1193_v47 = vadd.f32 %v1192_v44, %v1191_v41  ;;  %927 = vst [vmem:[%s1535_s28 + $0xa0] sm:$0xff] %v1338_v45  ;;  %v1146_v48 = vpop.f32.mrf.mxu0 }
 0x112   : > { %v1194_v49 = vpop.f32.mrf.mxu1  ;;  %1351 = vtanh.f32 %v1145_v46 }
 0x113   : > { %v1340_v50 = vpop.eup %1339  ;;  %1353 = vtanh.f32 %v1193_v47  ;;  %v1147_v51 = vpop.f32.mrf.mxu0 }
 0x114   : > { %v1195_v52 = vpop.f32.mrf.mxu1  ;;  %v1342_v53 = vpop.eup %1341  ;;  %912 = vst [vmem:[%s1535_s28 + $0x28] sm:$0xff] %v1340_v50  ;;  %v1148_v54 = vadd.f32 %v1147_v51, %v1146_v48 }
 0x115   : > { %v1196_v55 = vadd.f32 %v1195_v52, %v1194_v49  ;;  %928 = vst [vmem:[%s1535_s28 + $0xa8] sm:$0xff] %v1342_v53  ;;  %v1149_v56 = vpop.f32.mrf.mxu0 }
 0x116   : > { %v1197_v57 = vpop.f32.mrf.mxu1  ;;  %1355 = vtanh.f32 %v1148_v54 }
 0x117   : > { %v1344_v58 = vpop.eup %1343  ;;  %1357 = vtanh.f32 %v1196_v55  ;;  %v1150_v59 = vpop.f32.mrf.mxu0 }
 0x118   : > { %v1198_v60 = vpop.f32.mrf.mxu1  ;;  %v1346_v61 = vpop.eup %1345  ;;  %913 = vst [vmem:[%s1535_s28 + $0x30] sm:$0xff] %v1344_v58  ;;  %v1151_v62 = vadd.f32 %v1150_v59, %v1149_v56 }
 0x119   : > { %v1199_v63 = vadd.f32 %v1198_v60, %v1197_v57  ;;  %929 = vst [vmem:[%s1535_s28 + $0xb0] sm:$0xff] %v1346_v61  ;;  %v1152_v0 = vpop.f32.mrf.mxu0 }
 0x11a   : > { %v1200_v1 = vpop.f32.mrf.mxu1  ;;  %1359 = vtanh.f32 %v1151_v62 }
 0x11b   : > { %v1348_v2 = vpop.eup %1347  ;;  %1361 = vtanh.f32 %v1199_v63  ;;  %v1153_v3 = vpop.f32.mrf.mxu0 }
 0x11c   : > { %v1201_v4 = vpop.f32.mrf.mxu1  ;;  %v1350_v5 = vpop.eup %1349  ;;  %914 = vst [vmem:[%s1535_s28 + $0x38] sm:$0xff] %v1348_v2  ;;  %v1154_v6 = vadd.f32 %v1153_v3, %v1152_v0 }
 0x11d   : > { %v1202_v7 = vadd.f32 %v1201_v4, %v1200_v1  ;;  %930 = vst [vmem:[%s1535_s28 + $0xb8] sm:$0xff] %v1350_v5  ;;  %v1155_v8 = vpop.f32.mrf.mxu0 }
 0x11e   : > { %v1203_v9 = vpop.f32.mrf.mxu1  ;;  %1363 = vtanh.f32 %v1154_v6 }
 0x11f   : > { %v1352_v10 = vpop.eup %1351  ;;  %1365 = vtanh.f32 %v1202_v7  ;;  %v1156_v11 = vpop.f32.mrf.mxu0 }
 0x120   : > { %v1204_v12 = vpop.f32.mrf.mxu1  ;;  %v1354_v13 = vpop.eup %1353  ;;  %915 = vst [vmem:[%s1535_s28 + $0x40] sm:$0xff] %v1352_v10  ;;  %v1157_v14 = vadd.f32 %v1156_v11, %v1155_v8 }
 0x121   : > { %v1205_v15 = vadd.f32 %v1204_v12, %v1203_v9  ;;  %931 = vst [vmem:[%s1535_s28 + $0xc0] sm:$0xff] %v1354_v13  ;;  %v1158_v16 = vpop.f32.mrf.mxu0 }
 0x122   : > { %v1206_v17 = vpop.f32.mrf.mxu1  ;;  %1367 = vtanh.f32 %v1157_v14 }
 0x123   : > { %v1356_v18 = vpop.eup %1355  ;;  %1369 = vtanh.f32 %v1205_v15  ;;  %v1159_v19 = vpop.f32.mrf.mxu0 }
 0x124   : > { %v1207_v20 = vpop.f32.mrf.mxu1  ;;  %v1358_v21 = vpop.eup %1357  ;;  %916 = vst [vmem:[%s1535_s28 + $0x48] sm:$0xff] %v1356_v18  ;;  %v1160_v22 = vadd.f32 %v1159_v19, %v1158_v16 }
 0x125   : > { %v1208_v23 = vadd.f32 %v1207_v20, %v1206_v17  ;;  %932 = vst [vmem:[%s1535_s28 + $0xc8] sm:$0xff] %v1358_v21  ;;  %v1161_v24 = vpop.f32.mrf.mxu0 }
 0x126   : > { %v1209_v25 = vpop.f32.mrf.mxu1  ;;  %1371 = vtanh.f32 %v1160_v22 }
 0x127   : > { %v1360_v26 = vpop.eup %1359  ;;  %1373 = vtanh.f32 %v1208_v23  ;;  %v1162_v27 = vpop.f32.mrf.mxu0 }
 0x128   : > { %v1210_v28 = vpop.f32.mrf.mxu1  ;;  %v1362_v29 = vpop.eup %1361  ;;  %917 = vst [vmem:[%s1535_s28 + $0x50] sm:$0xff] %v1360_v26  ;;  %v1163_v30 = vadd.f32 %v1162_v27, %v1161_v24 }
 0x129   : > { %v1211_v31 = vadd.f32 %v1210_v28, %v1209_v25  ;;  %933 = vst [vmem:[%s1535_s28 + $0xd0] sm:$0xff] %v1362_v29  ;;  %v1164_v32 = vpop.f32.mrf.mxu0 }
 0x12a   : > { %v1212_v33 = vpop.f32.mrf.mxu1  ;;  %1375 = vtanh.f32 %v1163_v30 }
 0x12b   : > { %v1364_v34 = vpop.eup %1363  ;;  %1377 = vtanh.f32 %v1211_v31  ;;  %v1165_v35 = vpop.f32.mrf.mxu0 }
 0x12c   : > { %v1213_v36 = vpop.f32.mrf.mxu1  ;;  %v1366_v37 = vpop.eup %1365  ;;  %918 = vst [vmem:[%s1535_s28 + $0x58] sm:$0xff] %v1364_v34  ;;  %v1166_v38 = vadd.f32 %v1165_v35, %v1164_v32 }
 0x12d   : > { %v1214_v39 = vadd.f32 %v1213_v36, %v1212_v33  ;;  %934 = vst [vmem:[%s1535_s28 + $0xd8] sm:$0xff] %v1366_v37 }
 0x12e   : > { %1379 = vtanh.f32 %v1166_v38 }
 0x12f   : > { %v1368_v40 = vpop.eup %1367  ;;  %1381 = vtanh.f32 %v1214_v39 }
 0x130   : > { %v1370_v41 = vpop.eup %1369  ;;  %919 = vst [vmem:[%s1535_s28 + $0x60] sm:$0xff] %v1368_v40 }
 0x131   : > { %935 = vst [vmem:[%s1535_s28 + $0xe0] sm:$0xff] %v1370_v41 }
 0x133   : > { %v1372_v42 = vpop.eup %1371 }
 0x134   : > { %v1374_v43 = vpop.eup %1373  ;;  %920 = vst [vmem:[%s1535_s28 + $0x68] sm:$0xff] %v1372_v42 }
 0x135   : > { %936 = vst [vmem:[%s1535_s28 + $0xe8] sm:$0xff] %v1374_v43 }
 0x137   : > { %v1376_v44 = vpop.eup %1375 }
 0x138   : > { %v1378_v45 = vpop.eup %1377  ;;  %921 = vst [vmem:[%s1535_s28 + $0x70] sm:$0xff] %v1376_v44 }
 0x139   : > { %937 = vst [vmem:[%s1535_s28 + $0xf0] sm:$0xff] %v1378_v45 }
 0x13b   : > { %v1380_v46 = vpop.eup %1379 }
 0x13c   : > { %v1382_v47 = vpop.eup %1381  ;;  %922 = vst [vmem:[%s1535_s28 + $0x78] sm:$0xff] %v1380_v46 }
 0x13d   : > { %938 = vst [vmem:[%s1535_s28 + $0xf8] sm:$0xff] %v1382_v47 }
 0x13e PF: > { %s12_s11 = sadd.s32 1, %s1405_s11   ;;  %s1581_s9 = smov %s1401_s10 }
 0x13f   : > { %p9_p5 = scmp.ge.s32.totalorder %s12_s11, 4   ;;  %s1582_s10 = smov %s1584_s12 }
 0x141   :  { %11 = sbr.rel (!%p9_p5) target bundleno = 2 (0x2), region = 69 }

</bundles_post_ra>
